<compile_context>
chip_gen: v7x
topology: tpu7x:2x2x1
jax: 0.10.0
libtpu: 0.0.40
codegen_flags: <defaults>
</compile_context>

<pallas_src>
import numpy as np

import jax
import jax.numpy as jnp
from jax import lax
from jax.experimental import pallas as pl
from jax.experimental.pallas import tpu as pltpu


B_TILE = 8      # samples per grid step (M dimension of the batched FC matmuls); 8-32 good
OUT_PAD = 128   # lane-dense output width; real logits live in [:num_classes]


# ------------------------------- Pallas kernel -------------------------------

def _sigmoid(v):
    # sigmoid(v) = (1 + tanh(v/2)) / 2  -> one EUP op, VALU-cheap.
    return 0.5 * jnp.tanh(0.5 * v) + 0.5


def _lenet_kernel(x_ref, t1_ref, b1_ref, pr1_ref, pc1_ref, t2_ref, b2_ref,
                  pr2_ref, g_ref, fb1_ref, w2_ref, fb2_ref, w3_ref, fb3_ref,
                  o_ref,
                  xpad_ref, slab1_ref, slab2_ref, r2_ref):
    """One grid step = B_TILE samples; conv path per-sample, FC stack batched."""
    f32 = jnp.float32
    bf16 = jnp.bfloat16

    # Zero the padded-input scratch once per step: its 2-pixel border stays zero,
    # the interior is overwritten for every sample.
    xpad_ref[...] = jnp.zeros_like(xpad_ref)

    # ------------------------- per-sample conv path (unrolled) -------------------------
    for s in range(B_TILE):
        # In-kernel zero padding (conv1 padding=2): write raw 28x28 plane into interior.
        xpad_ref[2:30, 2:30] = x_ref[s, 0]

        # conv1 (1->6, 5x5) as ONE matmul: stage 5 row-shifted slices -> (28, 5*32).
        for i in range(5):
            slab1_ref[:, i * 32:(i + 1) * 32] = xpad_ref[i:i + 28, :]
        c1 = jnp.dot(slab1_ref[...].astype(bf16), t1_ref[...],
                     preferred_element_type=f32) + b1_ref[...]
        c1 = _sigmoid(c1)                                   # (28, 168), packed [oh, ow*6+c]

        # 2x2 avg-pool via tiny pooling-matrix matmuls (rows, then cols with 0.25 folded).
        p1 = jnp.dot(pr1_ref[...], c1.astype(bf16), preferred_element_type=f32)   # (14,168)
        p1 = jnp.dot(p1.astype(bf16), pc1_ref[...], preferred_element_type=f32)   # (14, 84)

        # conv2 (6->16, 5x5) as ONE matmul: stage 5 shifted slices -> (10, 5*84).
        for i in range(5):
            slab2_ref[:, i * 84:(i + 1) * 84] = p1[i:i + 10, :]
        c2 = jnp.dot(slab2_ref[...].astype(bf16), t2_ref[...],
                     preferred_element_type=f32) + b2_ref[...]
        c2 = _sigmoid(c2)                                   # (10, 160), packed [oh, ow*16+d]

        # pool2 over rows; column-pool + NCHW flatten + fc1 weight are folded into G.
        r2 = jnp.dot(pr2_ref[...], c2.astype(bf16), preferred_element_type=f32)   # (5, 160)

        # Flatten into the batched fc1-input slab: row s, 5*160 = 800 lanes.
        for a in range(5):
            r2_ref[s:s + 1, a * 160:(a + 1) * 160] = r2[a:a + 1, :]

    # --------------------------- batched FC stack (M = B_TILE) ---------------------------
    y = _sigmoid(jnp.dot(r2_ref[...].astype(bf16), g_ref[...],
                         preferred_element_type=f32) + fb1_ref[...])               # (B, 120)
    y = _sigmoid(jnp.dot(y.astype(bf16), w2_ref[...],
                         preferred_element_type=f32) + fb2_ref[...])               # (B, 84)
    o_ref[...] = jnp.dot(y.astype(bf16), w3_ref[...],
                         preferred_element_type=f32) + fb3_ref[...]                # (B, 128)


def lenet_forward(x, ops, num_classes):
    """x: (N, 1, 28, 28) float32 -> (N, num_classes) float32."""
    n = x.shape[0]
    n_pad = pl.cdiv(n, B_TILE) * B_TILE
    if n_pad != n:
        x = jnp.pad(x, ((0, n_pad - n), (0, 0), (0, 0), (0, 0)))   # batch pad only

    out = pl.pallas_call(
        _lenet_kernel,
        out_shape=jax.ShapeDtypeStruct((n_pad, OUT_PAD), jnp.float32),
        grid=(n_pad // B_TILE,),
        in_specs=[
            pl.BlockSpec((B_TILE, 1, 28, 28), lambda b: (b, 0, 0, 0)),   # raw input tile
            # Weight-like operands: constant index_map => VMEM-resident across grid steps.
            pl.BlockSpec((160, 168), lambda b: (0, 0)),       # T1 flat (conv1 Toeplitz, bf16)
            pl.BlockSpec((1, 168), lambda b: (0, 0)),         # conv1 bias row (f32)
            pl.BlockSpec((14, 28), lambda b: (0, 0)),         # pool1 row matrix (bf16)
            pl.BlockSpec((168, 84), lambda b: (0, 0)),        # pool1 col matrix (bf16)
            pl.BlockSpec((420, 160), lambda b: (0, 0)),       # T2 flat (conv2 Toeplitz, bf16)
            pl.BlockSpec((1, 160), lambda b: (0, 0)),         # conv2 bias row (f32)
            pl.BlockSpec((5, 10), lambda b: (0, 0)),          # pool2 row matrix (bf16)
            pl.BlockSpec((800, 120), lambda b: (0, 0)),       # G flat = pool2cols+flatten+fc1
            pl.BlockSpec((1, 120), lambda b: (0, 0)),         # fc1 bias (f32)
            pl.BlockSpec((120, 84), lambda b: (0, 0)),        # fc2 weight (in, out, bf16)
            pl.BlockSpec((1, 84), lambda b: (0, 0)),          # fc2 bias (f32)
            pl.BlockSpec((84, OUT_PAD), lambda b: (0, 0)),    # fc3 weight padded to 128 lanes
            pl.BlockSpec((1, OUT_PAD), lambda b: (0, 0)),     # fc3 bias padded to 128 lanes
        ],
        out_specs=pl.BlockSpec((B_TILE, OUT_PAD), lambda b: (b, 0)),     # lane-dense output
        scratch_shapes=[
            pltpu.VMEM((32, 32), jnp.float32),                # zero-padded input plane
            pltpu.VMEM((28, 5 * 32), jnp.float32),            # conv1 K-fused activation slab
            pltpu.VMEM((10, 5 * 84), jnp.float32),            # conv2 K-fused activation slab
            pltpu.VMEM((B_TILE, 5 * 160), jnp.float32),       # batched fc1-input slab
        ],
        compiler_params=pltpu.CompilerParams(dimension_semantics=("parallel",)),
    )(x, ops["T1"], ops["b1row"], ops["Pr1T"], ops["Pc1"], ops["T2"], ops["b2row"],
      ops["Pr2T"], ops["G"], ops["fb1row"], ops["W2"], ops["fb2row"], ops["W3"],
      ops["fb3row"])
    return out[:n, :num_classes]


# --------------------- one-time parameter preparation (host) ---------------------

def prepare_operands(params, num_classes):
    """Fold PyTorch-layout weights into kernel-friendly operands (done once, off hot path)."""
    w1 = np.asarray(params["cw1"], np.float32)    # (6, 1, 5, 5)
    b1 = np.asarray(params["cb1"], np.float32)    # (6,)
    w2 = np.asarray(params["cw2"], np.float32)    # (16, 6, 5, 5)
    b2 = np.asarray(params["cb2"], np.float32)    # (16,)
    fw1 = np.asarray(params["fw1"], np.float32)   # (120, 400)
    fb1 = np.asarray(params["fb1"], np.float32)
    fw2 = np.asarray(params["fw2"], np.float32)   # (84, 120)
    fb2 = np.asarray(params["fb2"], np.float32)
    fw3 = np.asarray(params["fw3"], np.float32)   # (C, 84)
    fb3 = np.asarray(params["fb3"], np.float32)

    # conv1 Toeplitz, K-fused: C1[oh, ow*6+c] = sum_{i,w} xpad[oh+i, w] * T1flat[i*32+w, ow*6+c]
    T1 = np.zeros((5, 32, 28 * 6), np.float32)
    for i in range(5):
        for ow in range(28):
            for j in range(5):
                T1[i, ow + j, ow * 6:(ow + 1) * 6] = w1[:, 0, i, j]
    T1flat = T1.reshape(5 * 32, 28 * 6)                    # (160, 168)
    b1row = np.tile(b1, 28)[None, :]                       # (1, 168)

    # pool1: rows summed by Pr1T (ones), cols + 0.25 scale by Pc1
    Pr1T = np.zeros((14, 28), np.float32)
    for a in range(14):
        Pr1T[a, 2 * a] = 1.0
        Pr1T[a, 2 * a + 1] = 1.0
    Pc1 = np.zeros((28 * 6, 14 * 6), np.float32)
    for w in range(28):
        for c in range(6):
            Pc1[w * 6 + c, (w // 2) * 6 + c] = 0.25

    # conv2 Toeplitz, K-fused over the packed (h, w*6+c) layout
    T2 = np.zeros((5, 14 * 6, 10 * 16), np.float32)
    for i in range(5):
        for ow in range(10):
            for j in range(5):
                T2[i, (ow + j) * 6:(ow + j + 1) * 6, ow * 16:(ow + 1) * 16] = w2[:, :, i, j].T
    T2flat = T2.reshape(5 * 84, 10 * 16)                   # (420, 160)
    b2row = np.tile(b2, 10)[None, :]                       # (1, 160)

    Pr2T = np.zeros((5, 10), np.float32)
    for a in range(5):
        Pr2T[a, 2 * a] = 1.0
        Pr2T[a, 2 * a + 1] = 1.0

    # G folds: pool2 column-average (0.25), PyTorch NCHW flatten order (d*25 + a*5 + b),
    # and the fc1 weight.  y1 = fb1 + r2slab @ Gflat, r2slab[s, a*160 + ow*16 + d].
    G = np.zeros((5, 10 * 16, 120), np.float32)
    for a in range(5):
        for ow in range(10):
            b_ = ow // 2
            for d in range(16):
                G[a, ow * 16 + d, :] = 0.25 * fw1[:, d * 25 + a * 5 + b_]
    Gflat = G.reshape(5 * 160, 120)                        # (800, 120)

    # fc3 padded to a lane-dense 128-wide output slab (zero columns are sliced off later).
    W3p = np.zeros((84, OUT_PAD), np.float32)
    W3p[:, :num_classes] = fw3.T
    fb3p = np.zeros((1, OUT_PAD), np.float32)
    fb3p[0, :num_classes] = fb3

    bf = jnp.bfloat16
    ops = dict(
        # MXU operands in bf16 (f32 accumulation inside the kernel)
        T1=jnp.asarray(T1flat, bf), Pr1T=jnp.asarray(Pr1T, bf), Pc1=jnp.asarray(Pc1, bf),
        T2=jnp.asarray(T2flat, bf), Pr2T=jnp.asarray(Pr2T, bf), G=jnp.asarray(Gflat, bf),
        W2=jnp.asarray(np.ascontiguousarray(fw2.T), bf), W3=jnp.asarray(W3p, bf),
        # biases stay f32
        b1row=jnp.asarray(b1row), b2row=jnp.asarray(b2row),
        fb1row=jnp.asarray(fb1[None, :]), fb2row=jnp.asarray(fb2[None, :]),
        fb3row=jnp.asarray(fb3p),
    )
    return ops


def init_params(key, num_classes):
    """Deterministic synthetic parameters with PyTorch weight layouts."""
    ks = jax.random.split(key, 10)

    def u(k, shape, fan_in):
        bound = 1.0 / jnp.sqrt(jnp.float32(fan_in))
        return jax.random.uniform(k, shape, jnp.float32, -bound, bound)

    return {
        "cw1": u(ks[0], (6, 1, 5, 5), 1 * 5 * 5),
        "cb1": u(ks[1], (6,), 1 * 5 * 5),
        "cw2": u(ks[2], (16, 6, 5, 5), 6 * 5 * 5),
        "cb2": u(ks[3], (16,), 6 * 5 * 5),
        "fw1": u(ks[4], (120, 400), 400),
        "fb1": u(ks[5], (120,), 400),
        "fw2": u(ks[6], (84, 120), 120),
        "fb2": u(ks[7], (84,), 120),
        "fw3": u(ks[8], (num_classes, 84), 84),
        "fb3": u(ks[9], (num_classes,), 84),
    }


# ------------------------------ pure-JAX reference ------------------------------

def _avgpool2x2_ref(y):
    n, c, h, w = y.shape
    return y.reshape(n, c, h // 2, 2, w // 2, 2).mean(axis=(3, 5))


def lenet_reference(x, params):
    dn = ("NCHW", "OIHW", "NCHW")
    y = lax.conv_general_dilated(x, params["cw1"], (1, 1), ((2, 2), (2, 2)),
                                 dimension_numbers=dn, precision=lax.Precision.HIGHEST)
    y = jax.nn.sigmoid(y + params["cb1"][None, :, None, None])
    y = _avgpool2x2_ref(y)
    y = lax.conv_general_dilated(y, params["cw2"], (1, 1), ((0, 0), (0, 0)),
                                 dimension_numbers=dn, precision=lax.Precision.HIGHEST)
    y = jax.nn.sigmoid(y + params["cb2"][None, :, None, None])
    y = _avgpool2x2_ref(y)
    y = y.reshape(y.shape[0], -1)
    y = jax.nn.sigmoid(y @ params["fw1"].T + params["fb1"])
    y = jax.nn.sigmoid(y @ params["fw2"].T + params["fb2"])
    return y @ params["fw3"].T + params["fb3"]


if __name__ == "__main__":
    num_classes = 10
    batch = 2
    key = jax.random.PRNGKey(0)
    k_x, k_p = jax.random.split(key)

    # Architecture hard-codes the 16*5*5 fc input => spatial must be 28x28, Cin=1.
    x = jax.random.normal(k_x, (batch, 1, 28, 28), dtype=jnp.float32)
    params = init_params(k_p, num_classes)
    ops = prepare_operands(params, num_classes)

    fwd = jax.jit(lenet_forward, static_argnames=("num_classes",))
    logits = jax.block_until_ready(fwd(x, ops, num_classes=num_classes))
    assert logits.shape == (batch, num_classes), logits.shape
    assert logits.dtype == jnp.float32

    # Sanity check vs. a pure-f32 JAX reference of the PyTorch module.
    # Tolerance is 2e-2 (not 2e-3) because MXU operands are stored/fed in bfloat16
    # (f32 accumulation); observed/expected logit error is well below 1e-2.
    ref = lenet_reference(x, params)
    np.testing.assert_allclose(np.asarray(logits), np.asarray(ref), rtol=2e-2, atol=2e-2)

    print("KERNEL_OK")
</pallas_src>

<mosaic_0001>
module attributes {stable_mosaic.version = 11 : i64} {
  func.func @_lenet_kernel(%arg0: i32, %arg1: memref<8x1x28x28xf32, #tpu.memory_space<vmem>>, %arg2: memref<160x168xbf16, #tpu.memory_space<vmem>>, %arg3: memref<1x168xf32, #tpu.memory_space<vmem>>, %arg4: memref<14x28xbf16, #tpu.memory_space<vmem>>, %arg5: memref<168x84xbf16, #tpu.memory_space<vmem>>, %arg6: memref<420x160xbf16, #tpu.memory_space<vmem>>, %arg7: memref<1x160xf32, #tpu.memory_space<vmem>>, %arg8: memref<5x10xbf16, #tpu.memory_space<vmem>>, %arg9: memref<800x120xbf16, #tpu.memory_space<vmem>>, %arg10: memref<1x120xf32, #tpu.memory_space<vmem>>, %arg11: memref<120x84xbf16, #tpu.memory_space<vmem>>, %arg12: memref<1x84xf32, #tpu.memory_space<vmem>>, %arg13: memref<84x128xbf16, #tpu.memory_space<vmem>>, %arg14: memref<1x128xf32, #tpu.memory_space<vmem>>, %arg15: memref<8x128xf32, #tpu.memory_space<vmem>>, %arg16: memref<32x32xf32, #tpu.memory_space<vmem>>, %arg17: memref<28x160xf32, #tpu.memory_space<vmem>>, %arg18: memref<10x420xf32, #tpu.memory_space<vmem>>, %arg19: memref<8x800xf32, #tpu.memory_space<vmem>>) attributes {dimension_semantics = [#tpu.dimension_semantics<parallel>], iteration_bounds = array<i64: 1>, scalar_prefetch = 0 : i64, scratch_operands = 4 : i64, tpu.core_type = #tpu.core_type<tc>, window_params = [{transform_indices = @transform_0, window_bounds = array<i64: 8, 1, 28, 28>}, {pipeline_mode = #tpu.pipeline_mode<synchronous>, transform_indices = @transform_1, window_bounds = array<i64: 160, 168>}, {pipeline_mode = #tpu.pipeline_mode<synchronous>, transform_indices = @transform_2, window_bounds = array<i64: 1, 168>}, {pipeline_mode = #tpu.pipeline_mode<synchronous>, transform_indices = @transform_3, window_bounds = array<i64: 14, 28>}, {pipeline_mode = #tpu.pipeline_mode<synchronous>, transform_indices = @transform_4, window_bounds = array<i64: 168, 84>}, {pipeline_mode = #tpu.pipeline_mode<synchronous>, transform_indices = @transform_5, window_bounds = array<i64: 420, 160>}, {pipeline_mode = #tpu.pipeline_mode<synchronous>, transform_indices = @transform_6, window_bounds = array<i64: 1, 160>}, {pipeline_mode = #tpu.pipeline_mode<synchronous>, transform_indices = @transform_7, window_bounds = array<i64: 5, 10>}, {pipeline_mode = #tpu.pipeline_mode<synchronous>, transform_indices = @transform_8, window_bounds = array<i64: 800, 120>}, {pipeline_mode = #tpu.pipeline_mode<synchronous>, transform_indices = @transform_9, window_bounds = array<i64: 1, 120>}, {pipeline_mode = #tpu.pipeline_mode<synchronous>, transform_indices = @transform_10, window_bounds = array<i64: 120, 84>}, {pipeline_mode = #tpu.pipeline_mode<synchronous>, transform_indices = @transform_11, window_bounds = array<i64: 1, 84>}, {pipeline_mode = #tpu.pipeline_mode<synchronous>, transform_indices = @transform_12, window_bounds = array<i64: 84, 128>}, {pipeline_mode = #tpu.pipeline_mode<synchronous>, transform_indices = @transform_13, window_bounds = array<i64: 1, 128>}, {transform_indices = @transform_14, window_bounds = array<i64: 8, 128>}]} {
    %cst = arith.constant 0.000000e+00 : f32
    %0 = vector.broadcast %cst : f32 to vector<32x32xf32>
    %c0 = arith.constant 0 : index
    %c0_0 = arith.constant 0 : index
    %1 = vector.load %arg16[%c0, %c0_0] : memref<32x32xf32, #tpu.memory_space<vmem>>, vector<32x32xf32>
    tpu.vector_store %arg16[%c0, %c0_0], %0 {strides = array<i32>} : memref<32x32xf32, #tpu.memory_space<vmem>>, vector<32x32xf32>,
    %c0_1 = arith.constant 0 : index
    %c0_2 = arith.constant 0 : index
    %c0_3 = arith.constant 0 : index
    %c0_4 = arith.constant 0 : index
    %2 = vector.load %arg1[%c0_1, %c0_2, %c0_3, %c0_4] : memref<8x1x28x28xf32, #tpu.memory_space<vmem>>, vector<1x1x28x28xf32>
    %3 = vector.shape_cast %2 : vector<1x1x28x28xf32> to vector<28x28xf32>
    %c2 = arith.constant 2 : index
    %c2_5 = arith.constant 2 : index
    %4 = vector.load %arg16[%c2, %c2_5] : memref<32x32xf32, #tpu.memory_space<vmem>>, vector<28x28xf32>
    tpu.vector_store %arg16[%c2, %c2_5], %3 {strides = array<i32>} : memref<32x32xf32, #tpu.memory_space<vmem>>, vector<28x28xf32>,
    %c0_6 = arith.constant 0 : index
    %c0_7 = arith.constant 0 : index
    %5 = vector.load %arg16[%c0_6, %c0_7] : memref<32x32xf32, #tpu.memory_space<vmem>>, vector<28x32xf32>
    %c0_8 = arith.constant 0 : index
    %c0_9 = arith.constant 0 : index
    %6 = vector.load %arg17[%c0_8, %c0_9] : memref<28x160xf32, #tpu.memory_space<vmem>>, vector<28x32xf32>
    tpu.vector_store %arg17[%c0_8, %c0_9], %5 {strides = array<i32>} : memref<28x160xf32, #tpu.memory_space<vmem>>, vector<28x32xf32>,
    %c1 = arith.constant 1 : index
    %c0_10 = arith.constant 0 : index
    %7 = vector.load %arg16[%c1, %c0_10] : memref<32x32xf32, #tpu.memory_space<vmem>>, vector<28x32xf32>
    %c0_11 = arith.constant 0 : index
    %c32 = arith.constant 32 : index
    %8 = vector.load %arg17[%c0_11, %c32] : memref<28x160xf32, #tpu.memory_space<vmem>>, vector<28x32xf32>
    tpu.vector_store %arg17[%c0_11, %c32], %7 {strides = array<i32>} : memref<28x160xf32, #tpu.memory_space<vmem>>, vector<28x32xf32>,
    %c2_12 = arith.constant 2 : index
    %c0_13 = arith.constant 0 : index
    %9 = vector.load %arg16[%c2_12, %c0_13] : memref<32x32xf32, #tpu.memory_space<vmem>>, vector<28x32xf32>
    %c0_14 = arith.constant 0 : index
    %c64 = arith.constant 64 : index
    %10 = vector.load %arg17[%c0_14, %c64] : memref<28x160xf32, #tpu.memory_space<vmem>>, vector<28x32xf32>
    tpu.vector_store %arg17[%c0_14, %c64], %9 {strides = array<i32>} : memref<28x160xf32, #tpu.memory_space<vmem>>, vector<28x32xf32>,
    %c3 = arith.constant 3 : index
    %c0_15 = arith.constant 0 : index
    %11 = vector.load %arg16[%c3, %c0_15] : memref<32x32xf32, #tpu.memory_space<vmem>>, vector<28x32xf32>
    %c0_16 = arith.constant 0 : index
    %c96 = arith.constant 96 : index
    %12 = vector.load %arg17[%c0_16, %c96] : memref<28x160xf32, #tpu.memory_space<vmem>>, vector<28x32xf32>
    tpu.vector_store %arg17[%c0_16, %c96], %11 {strides = array<i32>} : memref<28x160xf32, #tpu.memory_space<vmem>>, vector<28x32xf32>,
    %c4 = arith.constant 4 : index
    %c0_17 = arith.constant 0 : index
    %13 = vector.load %arg16[%c4, %c0_17] : memref<32x32xf32, #tpu.memory_space<vmem>>, vector<28x32xf32>
    %c0_18 = arith.constant 0 : index
    %c128 = arith.constant 128 : index
    %14 = vector.load %arg17[%c0_18, %c128] : memref<28x160xf32, #tpu.memory_space<vmem>>, vector<28x32xf32>
    tpu.vector_store %arg17[%c0_18, %c128], %13 {strides = array<i32>} : memref<28x160xf32, #tpu.memory_space<vmem>>, vector<28x32xf32>,
    %c0_19 = arith.constant 0 : index
    %c0_20 = arith.constant 0 : index
    %15 = vector.load %arg17[%c0_19, %c0_20] : memref<28x160xf32, #tpu.memory_space<vmem>>, vector<28x160xf32>
    %16 = arith.truncf %15 : vector<28x160xf32> to vector<28x160xbf16>
    %c0_21 = arith.constant 0 : index
    %c0_22 = arith.constant 0 : index
    %17 = vector.load %arg2[%c0_21, %c0_22] : memref<160x168xbf16, #tpu.memory_space<vmem>>, vector<160x168xbf16>
    %cst_23 = arith.constant dense<0.000000e+00> : vector<28x168xf32>
    %18 = tpu.matmul %16, %17, %cst_23 {dimension_numbers = #tpu.dot_dimension_numbers<[1], [0], [0], [1], [0, 0, 1, 1], [], []>} : vector<28x160xbf16>, vector<160x168xbf16>, vector<28x168xf32> -> vector<28x168xf32>
    %c0_24 = arith.constant 0 : index
    %c0_25 = arith.constant 0 : index
    %19 = vector.load %arg3[%c0_24, %c0_25] : memref<1x168xf32, #tpu.memory_space<vmem>>, vector<1x168xf32>
    %20 = vector.broadcast %19 : vector<1x168xf32> to vector<28x168xf32>
    %21 = arith.addf %18, %20 : vector<28x168xf32>
    %cst_26 = arith.constant 5.000000e-01 : f32
    %22 = vector.broadcast %cst_26 : f32 to vector<28x168xf32>
    %23 = arith.mulf %22, %21 : vector<28x168xf32>
    %24 = math.tanh %23 : vector<28x168xf32>
    %cst_27 = arith.constant 5.000000e-01 : f32
    %25 = vector.broadcast %cst_27 : f32 to vector<28x168xf32>
    %26 = arith.mulf %25, %24 : vector<28x168xf32>
    %cst_28 = arith.constant 5.000000e-01 : f32
    %27 = vector.broadcast %cst_28 : f32 to vector<28x168xf32>
    %28 = arith.addf %26, %27 : vector<28x168xf32>
    %c0_29 = arith.constant 0 : index
    %c0_30 = arith.constant 0 : index
    %29 = vector.load %arg4[%c0_29, %c0_30] : memref<14x28xbf16, #tpu.memory_space<vmem>>, vector<14x28xbf16>
    %30 = arith.truncf %28 : vector<28x168xf32> to vector<28x168xbf16>
    %cst_31 = arith.constant dense<0.000000e+00> : vector<14x168xf32>
    %31 = tpu.matmul %29, %30, %cst_31 {dimension_numbers = #tpu.dot_dimension_numbers<[1], [0], [0], [1], [0, 0, 1, 1], [], []>} : vector<14x28xbf16>, vector<28x168xbf16>, vector<14x168xf32> -> vector<14x168xf32>
    %32 = arith.truncf %31 : vector<14x168xf32> to vector<14x168xbf16>
    %c0_32 = arith.constant 0 : index
    %c0_33 = arith.constant 0 : index
    %33 = vector.load %arg5[%c0_32, %c0_33] : memref<168x84xbf16, #tpu.memory_space<vmem>>, vector<168x84xbf16>
    %cst_34 = arith.constant dense<0.000000e+00> : vector<14x84xf32>
    %34 = tpu.matmul %32, %33, %cst_34 {dimension_numbers = #tpu.dot_dimension_numbers<[1], [0], [0], [1], [0, 0, 1, 1], [], []>} : vector<14x168xbf16>, vector<168x84xbf16>, vector<14x84xf32> -> vector<14x84xf32>
    %35 = vector.extract_strided_slice %34 {offsets = [0, 0], sizes = [10, 84], strides = [1, 1]} : vector<14x84xf32> to vector<10x84xf32>
    %c0_35 = arith.constant 0 : index
    %c0_36 = arith.constant 0 : index
    %36 = vector.load %arg18[%c0_35, %c0_36] : memref<10x420xf32, #tpu.memory_space<vmem>>, vector<10x84xf32>
    tpu.vector_store %arg18[%c0_35, %c0_36], %35 {strides = array<i32>} : memref<10x420xf32, #tpu.memory_space<vmem>>, vector<10x84xf32>,
    %37 = vector.extract_strided_slice %34 {offsets = [1, 0], sizes = [10, 84], strides = [1, 1]} : vector<14x84xf32> to vector<10x84xf32>
    %c0_37 = arith.constant 0 : index
    %c84 = arith.constant 84 : index
    %38 = vector.load %arg18[%c0_37, %c84] : memref<10x420xf32, #tpu.memory_space<vmem>>, vector<10x84xf32>
    tpu.vector_store %arg18[%c0_37, %c84], %37 {strides = array<i32>} : memref<10x420xf32, #tpu.memory_space<vmem>>, vector<10x84xf32>,
    %39 = vector.extract_strided_slice %34 {offsets = [2, 0], sizes = [10, 84], strides = [1, 1]} : vector<14x84xf32> to vector<10x84xf32>
    %c0_38 = arith.constant 0 : index
    %c168 = arith.constant 168 : index
    %40 = vector.load %arg18[%c0_38, %c168] : memref<10x420xf32, #tpu.memory_space<vmem>>, vector<10x84xf32>
    tpu.vector_store %arg18[%c0_38, %c168], %39 {strides = array<i32>} : memref<10x420xf32, #tpu.memory_space<vmem>>, vector<10x84xf32>,
    %41 = vector.extract_strided_slice %34 {offsets = [3, 0], sizes = [10, 84], strides = [1, 1]} : vector<14x84xf32> to vector<10x84xf32>
    %c0_39 = arith.constant 0 : index
    %c252 = arith.constant 252 : index
    %42 = vector.load %arg18[%c0_39, %c252] : memref<10x420xf32, #tpu.memory_space<vmem>>, vector<10x84xf32>
    tpu.vector_store %arg18[%c0_39, %c252], %41 {strides = array<i32>} : memref<10x420xf32, #tpu.memory_space<vmem>>, vector<10x84xf32>,
    %43 = vector.extract_strided_slice %34 {offsets = [4, 0], sizes = [10, 84], strides = [1, 1]} : vector<14x84xf32> to vector<10x84xf32>
    %c0_40 = arith.constant 0 : index
    %c336 = arith.constant 336 : index
    %44 = vector.load %arg18[%c0_40, %c336] : memref<10x420xf32, #tpu.memory_space<vmem>>, vector<10x84xf32>
    tpu.vector_store %arg18[%c0_40, %c336], %43 {strides = array<i32>} : memref<10x420xf32, #tpu.memory_space<vmem>>, vector<10x84xf32>,
    %c0_41 = arith.constant 0 : index
    %c0_42 = arith.constant 0 : index
    %45 = vector.load %arg18[%c0_41, %c0_42] : memref<10x420xf32, #tpu.memory_space<vmem>>, vector<10x420xf32>
    %46 = arith.truncf %45 : vector<10x420xf32> to vector<10x420xbf16>
    %c0_43 = arith.constant 0 : index
    %c0_44 = arith.constant 0 : index
    %47 = vector.load %arg6[%c0_43, %c0_44] : memref<420x160xbf16, #tpu.memory_space<vmem>>, vector<420x160xbf16>
    %cst_45 = arith.constant dense<0.000000e+00> : vector<10x160xf32>
    %48 = tpu.matmul %46, %47, %cst_45 {dimension_numbers = #tpu.dot_dimension_numbers<[1], [0], [0], [1], [0, 0, 1, 1], [], []>} : vector<10x420xbf16>, vector<420x160xbf16>, vector<10x160xf32> -> vector<10x160xf32>
    %c0_46 = arith.constant 0 : index
    %c0_47 = arith.constant 0 : index
    %49 = vector.load %arg7[%c0_46, %c0_47] : memref<1x160xf32, #tpu.memory_space<vmem>>, vector<1x160xf32>
    %50 = vector.broadcast %49 : vector<1x160xf32> to vector<10x160xf32>
    %51 = arith.addf %48, %50 : vector<10x160xf32>
    %cst_48 = arith.constant 5.000000e-01 : f32
    %52 = vector.broadcast %cst_48 : f32 to vector<10x160xf32>
    %53 = arith.mulf %52, %51 : vector<10x160xf32>
    %54 = math.tanh %53 : vector<10x160xf32>
    %cst_49 = arith.constant 5.000000e-01 : f32
    %55 = vector.broadcast %cst_49 : f32 to vector<10x160xf32>
    %56 = arith.mulf %55, %54 : vector<10x160xf32>
    %cst_50 = arith.constant 5.000000e-01 : f32
    %57 = vector.broadcast %cst_50 : f32 to vector<10x160xf32>
    %58 = arith.addf %56, %57 : vector<10x160xf32>
    %c0_51 = arith.constant 0 : index
    %c0_52 = arith.constant 0 : index
    %59 = vector.load %arg8[%c0_51, %c0_52] : memref<5x10xbf16, #tpu.memory_space<vmem>>, vector<5x10xbf16>
    %60 = arith.truncf %58 : vector<10x160xf32> to vector<10x160xbf16>
    %cst_53 = arith.constant dense<0.000000e+00> : vector<5x160xf32>
    %61 = tpu.matmul %59, %60, %cst_53 {dimension_numbers = #tpu.dot_dimension_numbers<[1], [0], [0], [1], [0, 0, 1, 1], [], []>} : vector<5x10xbf16>, vector<10x160xbf16>, vector<5x160xf32> -> vector<5x160xf32>
    %62 = vector.extract_strided_slice %61 {offsets = [0, 0], sizes = [1, 160], strides = [1, 1]} : vector<5x160xf32> to vector<1x160xf32>
    %c0_54 = arith.constant 0 : index
    %c0_55 = arith.constant 0 : index
    %63 = vector.load %arg19[%c0_54, %c0_55] : memref<8x800xf32, #tpu.memory_space<vmem>>, vector<1x160xf32>
    tpu.vector_store %arg19[%c0_54, %c0_55], %62 {strides = array<i32>} : memref<8x800xf32, #tpu.memory_space<vmem>>, vector<1x160xf32>,
    %64 = vector.extract_strided_slice %61 {offsets = [1, 0], sizes = [1, 160], strides = [1, 1]} : vector<5x160xf32> to vector<1x160xf32>
    %c0_56 = arith.constant 0 : index
    %c160 = arith.constant 160 : index
    %65 = vector.load %arg19[%c0_56, %c160] : memref<8x800xf32, #tpu.memory_space<vmem>>, vector<1x160xf32>
    tpu.vector_store %arg19[%c0_56, %c160], %64 {strides = array<i32>} : memref<8x800xf32, #tpu.memory_space<vmem>>, vector<1x160xf32>,
    %66 = vector.extract_strided_slice %61 {offsets = [2, 0], sizes = [1, 160], strides = [1, 1]} : vector<5x160xf32> to vector<1x160xf32>
    %c0_57 = arith.constant 0 : index
    %c320 = arith.constant 320 : index
    %67 = vector.load %arg19[%c0_57, %c320] : memref<8x800xf32, #tpu.memory_space<vmem>>, vector<1x160xf32>
    tpu.vector_store %arg19[%c0_57, %c320], %66 {strides = array<i32>} : memref<8x800xf32, #tpu.memory_space<vmem>>, vector<1x160xf32>,
    %68 = vector.extract_strided_slice %61 {offsets = [3, 0], sizes = [1, 160], strides = [1, 1]} : vector<5x160xf32> to vector<1x160xf32>
    %c0_58 = arith.constant 0 : index
    %c480 = arith.constant 480 : index
    %69 = vector.load %arg19[%c0_58, %c480] : memref<8x800xf32, #tpu.memory_space<vmem>>, vector<1x160xf32>
    tpu.vector_store %arg19[%c0_58, %c480], %68 {strides = array<i32>} : memref<8x800xf32, #tpu.memory_space<vmem>>, vector<1x160xf32>,
    %70 = vector.extract_strided_slice %61 {offsets = [4, 0], sizes = [1, 160], strides = [1, 1]} : vector<5x160xf32> to vector<1x160xf32>
    %c0_59 = arith.constant 0 : index
    %c640 = arith.constant 640 : index
    %71 = vector.load %arg19[%c0_59, %c640] : memref<8x800xf32, #tpu.memory_space<vmem>>, vector<1x160xf32>
    tpu.vector_store %arg19[%c0_59, %c640], %70 {strides = array<i32>} : memref<8x800xf32, #tpu.memory_space<vmem>>, vector<1x160xf32>,
    %c1_60 = arith.constant 1 : index
    %c0_61 = arith.constant 0 : index
    %c0_62 = arith.constant 0 : index
    %c0_63 = arith.constant 0 : index
    %72 = vector.load %arg1[%c1_60, %c0_61, %c0_62, %c0_63] : memref<8x1x28x28xf32, #tpu.memory_space<vmem>>, vector<1x1x28x28xf32>
    %73 = vector.shape_cast %72 : vector<1x1x28x28xf32> to vector<28x28xf32>
    %c2_64 = arith.constant 2 : index
    %c2_65 = arith.constant 2 : index
    %74 = vector.load %arg16[%c2_64, %c2_65] : memref<32x32xf32, #tpu.memory_space<vmem>>, vector<28x28xf32>
    tpu.vector_store %arg16[%c2_64, %c2_65], %73 {strides = array<i32>} : memref<32x32xf32, #tpu.memory_space<vmem>>, vector<28x28xf32>,
    %c0_66 = arith.constant 0 : index
    %c0_67 = arith.constant 0 : index
    %75 = vector.load %arg16[%c0_66, %c0_67] : memref<32x32xf32, #tpu.memory_space<vmem>>, vector<28x32xf32>
    %c0_68 = arith.constant 0 : index
    %c0_69 = arith.constant 0 : index
    %76 = vector.load %arg17[%c0_68, %c0_69] : memref<28x160xf32, #tpu.memory_space<vmem>>, vector<28x32xf32>
    tpu.vector_store %arg17[%c0_68, %c0_69], %75 {strides = array<i32>} : memref<28x160xf32, #tpu.memory_space<vmem>>, vector<28x32xf32>,
    %c1_70 = arith.constant 1 : index
    %c0_71 = arith.constant 0 : index
    %77 = vector.load %arg16[%c1_70, %c0_71] : memref<32x32xf32, #tpu.memory_space<vmem>>, vector<28x32xf32>
    %c0_72 = arith.constant 0 : index
    %c32_73 = arith.constant 32 : index
    %78 = vector.load %arg17[%c0_72, %c32_73] : memref<28x160xf32, #tpu.memory_space<vmem>>, vector<28x32xf32>
    tpu.vector_store %arg17[%c0_72, %c32_73], %77 {strides = array<i32>} : memref<28x160xf32, #tpu.memory_space<vmem>>, vector<28x32xf32>,
    %c2_74 = arith.constant 2 : index
    %c0_75 = arith.constant 0 : index
    %79 = vector.load %arg16[%c2_74, %c0_75] : memref<32x32xf32, #tpu.memory_space<vmem>>, vector<28x32xf32>
    %c0_76 = arith.constant 0 : index
    %c64_77 = arith.constant 64 : index
    %80 = vector.load %arg17[%c0_76, %c64_77] : memref<28x160xf32, #tpu.memory_space<vmem>>, vector<28x32xf32>
    tpu.vector_store %arg17[%c0_76, %c64_77], %79 {strides = array<i32>} : memref<28x160xf32, #tpu.memory_space<vmem>>, vector<28x32xf32>,
    %c3_78 = arith.constant 3 : index
    %c0_79 = arith.constant 0 : index
    %81 = vector.load %arg16[%c3_78, %c0_79] : memref<32x32xf32, #tpu.memory_space<vmem>>, vector<28x32xf32>
    %c0_80 = arith.constant 0 : index
    %c96_81 = arith.constant 96 : index
    %82 = vector.load %arg17[%c0_80, %c96_81] : memref<28x160xf32, #tpu.memory_space<vmem>>, vector<28x32xf32>
    tpu.vector_store %arg17[%c0_80, %c96_81], %81 {strides = array<i32>} : memref<28x160xf32, #tpu.memory_space<vmem>>, vector<28x32xf32>,
    %c4_82 = arith.constant 4 : index
    %c0_83 = arith.constant 0 : index
    %83 = vector.load %arg16[%c4_82, %c0_83] : memref<32x32xf32, #tpu.memory_space<vmem>>, vector<28x32xf32>
    %c0_84 = arith.constant 0 : index
    %c128_85 = arith.constant 128 : index
    %84 = vector.load %arg17[%c0_84, %c128_85] : memref<28x160xf32, #tpu.memory_space<vmem>>, vector<28x32xf32>
    tpu.vector_store %arg17[%c0_84, %c128_85], %83 {strides = array<i32>} : memref<28x160xf32, #tpu.memory_space<vmem>>, vector<28x32xf32>,
    %c0_86 = arith.constant 0 : index
    %c0_87 = arith.constant 0 : index
    %85 = vector.load %arg17[%c0_86, %c0_87] : memref<28x160xf32, #tpu.memory_space<vmem>>, vector<28x160xf32>
    %86 = arith.truncf %85 : vector<28x160xf32> to vector<28x160xbf16>
    %c0_88 = arith.constant 0 : index
    %c0_89 = arith.constant 0 : index
    %87 = vector.load %arg2[%c0_88, %c0_89] : memref<160x168xbf16, #tpu.memory_space<vmem>>, vector<160x168xbf16>
    %cst_90 = arith.constant dense<0.000000e+00> : vector<28x168xf32>
    %88 = tpu.matmul %86, %87, %cst_90 {dimension_numbers = #tpu.dot_dimension_numbers<[1], [0], [0], [1], [0, 0, 1, 1], [], []>} : vector<28x160xbf16>, vector<160x168xbf16>, vector<28x168xf32> -> vector<28x168xf32>
    %c0_91 = arith.constant 0 : index
    %c0_92 = arith.constant 0 : index
    %89 = vector.load %arg3[%c0_91, %c0_92] : memref<1x168xf32, #tpu.memory_space<vmem>>, vector<1x168xf32>
    %90 = vector.broadcast %89 : vector<1x168xf32> to vector<28x168xf32>
    %91 = arith.addf %88, %90 : vector<28x168xf32>
    %cst_93 = arith.constant 5.000000e-01 : f32
    %92 = vector.broadcast %cst_93 : f32 to vector<28x168xf32>
    %93 = arith.mulf %92, %91 : vector<28x168xf32>
    %94 = math.tanh %93 : vector<28x168xf32>
    %cst_94 = arith.constant 5.000000e-01 : f32
    %95 = vector.broadcast %cst_94 : f32 to vector<28x168xf32>
    %96 = arith.mulf %95, %94 : vector<28x168xf32>
    %cst_95 = arith.constant 5.000000e-01 : f32
    %97 = vector.broadcast %cst_95 : f32 to vector<28x168xf32>
    %98 = arith.addf %96, %97 : vector<28x168xf32>
    %c0_96 = arith.constant 0 : index
    %c0_97 = arith.constant 0 : index
    %99 = vector.load %arg4[%c0_96, %c0_97] : memref<14x28xbf16, #tpu.memory_space<vmem>>, vector<14x28xbf16>
    %100 = arith.truncf %98 : vector<28x168xf32> to vector<28x168xbf16>
    %cst_98 = arith.constant dense<0.000000e+00> : vector<14x168xf32>
    %101 = tpu.matmul %99, %100, %cst_98 {dimension_numbers = #tpu.dot_dimension_numbers<[1], [0], [0], [1], [0, 0, 1, 1], [], []>} : vector<14x28xbf16>, vector<28x168xbf16>, vector<14x168xf32> -> vector<14x168xf32>
    %102 = arith.truncf %101 : vector<14x168xf32> to vector<14x168xbf16>
    %c0_99 = arith.constant 0 : index
    %c0_100 = arith.constant 0 : index
    %103 = vector.load %arg5[%c0_99, %c0_100] : memref<168x84xbf16, #tpu.memory_space<vmem>>, vector<168x84xbf16>
    %cst_101 = arith.constant dense<0.000000e+00> : vector<14x84xf32>
    %104 = tpu.matmul %102, %103, %cst_101 {dimension_numbers = #tpu.dot_dimension_numbers<[1], [0], [0], [1], [0, 0, 1, 1], [], []>} : vector<14x168xbf16>, vector<168x84xbf16>, vector<14x84xf32> -> vector<14x84xf32>
    %105 = vector.extract_strided_slice %104 {offsets = [0, 0], sizes = [10, 84], strides = [1, 1]} : vector<14x84xf32> to vector<10x84xf32>
    %c0_102 = arith.constant 0 : index
    %c0_103 = arith.constant 0 : index
    %106 = vector.load %arg18[%c0_102, %c0_103] : memref<10x420xf32, #tpu.memory_space<vmem>>, vector<10x84xf32>
    tpu.vector_store %arg18[%c0_102, %c0_103], %105 {strides = array<i32>} : memref<10x420xf32, #tpu.memory_space<vmem>>, vector<10x84xf32>,
    %107 = vector.extract_strided_slice %104 {offsets = [1, 0], sizes = [10, 84], strides = [1, 1]} : vector<14x84xf32> to vector<10x84xf32>
    %c0_104 = arith.constant 0 : index
    %c84_105 = arith.constant 84 : index
    %108 = vector.load %arg18[%c0_104, %c84_105] : memref<10x420xf32, #tpu.memory_space<vmem>>, vector<10x84xf32>
    tpu.vector_store %arg18[%c0_104, %c84_105], %107 {strides = array<i32>} : memref<10x420xf32, #tpu.memory_space<vmem>>, vector<10x84xf32>,
    %109 = vector.extract_strided_slice %104 {offsets = [2, 0], sizes = [10, 84], strides = [1, 1]} : vector<14x84xf32> to vector<10x84xf32>
    %c0_106 = arith.constant 0 : index
    %c168_107 = arith.constant 168 : index
    %110 = vector.load %arg18[%c0_106, %c168_107] : memref<10x420xf32, #tpu.memory_space<vmem>>, vector<10x84xf32>
    tpu.vector_store %arg18[%c0_106, %c168_107], %109 {strides = array<i32>} : memref<10x420xf32, #tpu.memory_space<vmem>>, vector<10x84xf32>,
    %111 = vector.extract_strided_slice %104 {offsets = [3, 0], sizes = [10, 84], strides = [1, 1]} : vector<14x84xf32> to vector<10x84xf32>
    %c0_108 = arith.constant 0 : index
    %c252_109 = arith.constant 252 : index
    %112 = vector.load %arg18[%c0_108, %c252_109] : memref<10x420xf32, #tpu.memory_space<vmem>>, vector<10x84xf32>
    tpu.vector_store %arg18[%c0_108, %c252_109], %111 {strides = array<i32>} : memref<10x420xf32, #tpu.memory_space<vmem>>, vector<10x84xf32>,
    %113 = vector.extract_strided_slice %104 {offsets = [4, 0], sizes = [10, 84], strides = [1, 1]} : vector<14x84xf32> to vector<10x84xf32>
    %c0_110 = arith.constant 0 : index
    %c336_111 = arith.constant 336 : index
    %114 = vector.load %arg18[%c0_110, %c336_111] : memref<10x420xf32, #tpu.memory_space<vmem>>, vector<10x84xf32>
    tpu.vector_store %arg18[%c0_110, %c336_111], %113 {strides = array<i32>} : memref<10x420xf32, #tpu.memory_space<vmem>>, vector<10x84xf32>,
    %c0_112 = arith.constant 0 : index
    %c0_113 = arith.constant 0 : index
    %115 = vector.load %arg18[%c0_112, %c0_113] : memref<10x420xf32, #tpu.memory_space<vmem>>, vector<10x420xf32>
    %116 = arith.truncf %115 : vector<10x420xf32> to vector<10x420xbf16>
    %c0_114 = arith.constant 0 : index
    %c0_115 = arith.constant 0 : index
    %117 = vector.load %arg6[%c0_114, %c0_115] : memref<420x160xbf16, #tpu.memory_space<vmem>>, vector<420x160xbf16>
    %cst_116 = arith.constant dense<0.000000e+00> : vector<10x160xf32>
    %118 = tpu.matmul %116, %117, %cst_116 {dimension_numbers = #tpu.dot_dimension_numbers<[1], [0], [0], [1], [0, 0, 1, 1], [], []>} : vector<10x420xbf16>, vector<420x160xbf16>, vector<10x160xf32> -> vector<10x160xf32>
    %c0_117 = arith.constant 0 : index
    %c0_118 = arith.constant 0 : index
    %119 = vector.load %arg7[%c0_117, %c0_118] : memref<1x160xf32, #tpu.memory_space<vmem>>, vector<1x160xf32>
    %120 = vector.broadcast %119 : vector<1x160xf32> to vector<10x160xf32>
    %121 = arith.addf %118, %120 : vector<10x160xf32>
    %cst_119 = arith.constant 5.000000e-01 : f32
    %122 = vector.broadcast %cst_119 : f32 to vector<10x160xf32>
    %123 = arith.mulf %122, %121 : vector<10x160xf32>
    %124 = math.tanh %123 : vector<10x160xf32>
    %cst_120 = arith.constant 5.000000e-01 : f32
    %125 = vector.broadcast %cst_120 : f32 to vector<10x160xf32>
    %126 = arith.mulf %125, %124 : vector<10x160xf32>
    %cst_121 = arith.constant 5.000000e-01 : f32
    %127 = vector.broadcast %cst_121 : f32 to vector<10x160xf32>
    %128 = arith.addf %126, %127 : vector<10x160xf32>
    %c0_122 = arith.constant 0 : index
    %c0_123 = arith.constant 0 : index
    %129 = vector.load %arg8[%c0_122, %c0_123] : memref<5x10xbf16, #tpu.memory_space<vmem>>, vector<5x10xbf16>
    %130 = arith.truncf %128 : vector<10x160xf32> to vector<10x160xbf16>
    %cst_124 = arith.constant dense<0.000000e+00> : vector<5x160xf32>
    %131 = tpu.matmul %129, %130, %cst_124 {dimension_numbers = #tpu.dot_dimension_numbers<[1], [0], [0], [1], [0, 0, 1, 1], [], []>} : vector<5x10xbf16>, vector<10x160xbf16>, vector<5x160xf32> -> vector<5x160xf32>
    %132 = vector.extract_strided_slice %131 {offsets = [0, 0], sizes = [1, 160], strides = [1, 1]} : vector<5x160xf32> to vector<1x160xf32>
    %c1_125 = arith.constant 1 : index
    %c0_126 = arith.constant 0 : index
    %133 = vector.load %arg19[%c1_125, %c0_126] : memref<8x800xf32, #tpu.memory_space<vmem>>, vector<1x160xf32>
    tpu.vector_store %arg19[%c1_125, %c0_126], %132 {strides = array<i32>} : memref<8x800xf32, #tpu.memory_space<vmem>>, vector<1x160xf32>,
    %134 = vector.extract_strided_slice %131 {offsets = [1, 0], sizes = [1, 160], strides = [1, 1]} : vector<5x160xf32> to vector<1x160xf32>
    %c1_127 = arith.constant 1 : index
    %c160_128 = arith.constant 160 : index
    %135 = vector.load %arg19[%c1_127, %c160_128] : memref<8x800xf32, #tpu.memory_space<vmem>>, vector<1x160xf32>
    tpu.vector_store %arg19[%c1_127, %c160_128], %134 {strides = array<i32>} : memref<8x800xf32, #tpu.memory_space<vmem>>, vector<1x160xf32>,
    %136 = vector.extract_strided_slice %131 {offsets = [2, 0], sizes = [1, 160], strides = [1, 1]} : vector<5x160xf32> to vector<1x160xf32>
    %c1_129 = arith.constant 1 : index
    %c320_130 = arith.constant 320 : index
    %137 = vector.load %arg19[%c1_129, %c320_130] : memref<8x800xf32, #tpu.memory_space<vmem>>, vector<1x160xf32>
    tpu.vector_store %arg19[%c1_129, %c320_130], %136 {strides = array<i32>} : memref<8x800xf32, #tpu.memory_space<vmem>>, vector<1x160xf32>,
    %138 = vector.extract_strided_slice %131 {offsets = [3, 0], sizes = [1, 160], strides = [1, 1]} : vector<5x160xf32> to vector<1x160xf32>
    %c1_131 = arith.constant 1 : index
    %c480_132 = arith.constant 480 : index
    %139 = vector.load %arg19[%c1_131, %c480_132] : memref<8x800xf32, #tpu.memory_space<vmem>>, vector<1x160xf32>
    tpu.vector_store %arg19[%c1_131, %c480_132], %138 {strides = array<i32>} : memref<8x800xf32, #tpu.memory_space<vmem>>, vector<1x160xf32>,
    %140 = vector.extract_strided_slice %131 {offsets = [4, 0], sizes = [1, 160], strides = [1, 1]} : vector<5x160xf32> to vector<1x160xf32>
    %c1_133 = arith.constant 1 : index
    %c640_134 = arith.constant 640 : index
    %141 = vector.load %arg19[%c1_133, %c640_134] : memref<8x800xf32, #tpu.memory_space<vmem>>, vector<1x160xf32>
    tpu.vector_store %arg19[%c1_133, %c640_134], %140 {strides = array<i32>} : memref<8x800xf32, #tpu.memory_space<vmem>>, vector<1x160xf32>,
    %c2_135 = arith.constant 2 : index
    %c0_136 = arith.constant 0 : index
    %c0_137 = arith.constant 0 : index
    %c0_138 = arith.constant 0 : index
    %142 = vector.load %arg1[%c2_135, %c0_136, %c0_137, %c0_138] : memref<8x1x28x28xf32, #tpu.memory_space<vmem>>, vector<1x1x28x28xf32>
    %143 = vector.shape_cast %142 : vector<1x1x28x28xf32> to vector<28x28xf32>
    %c2_139 = arith.constant 2 : index
    %c2_140 = arith.constant 2 : index
    %144 = vector.load %arg16[%c2_139, %c2_140] : memref<32x32xf32, #tpu.memory_space<vmem>>, vector<28x28xf32>
    tpu.vector_store %arg16[%c2_139, %c2_140], %143 {strides = array<i32>} : memref<32x32xf32, #tpu.memory_space<vmem>>, vector<28x28xf32>,
    %c0_141 = arith.constant 0 : index
    %c0_142 = arith.constant 0 : index
    %145 = vector.load %arg16[%c0_141, %c0_142] : memref<32x32xf32, #tpu.memory_space<vmem>>, vector<28x32xf32>
    %c0_143 = arith.constant 0 : index
    %c0_144 = arith.constant 0 : index
    %146 = vector.load %arg17[%c0_143, %c0_144] : memref<28x160xf32, #tpu.memory_space<vmem>>, vector<28x32xf32>
    tpu.vector_store %arg17[%c0_143, %c0_144], %145 {strides = array<i32>} : memref<28x160xf32, #tpu.memory_space<vmem>>, vector<28x32xf32>,
    %c1_145 = arith.constant 1 : index
    %c0_146 = arith.constant 0 : index
    %147 = vector.load %arg16[%c1_145, %c0_146] : memref<32x32xf32, #tpu.memory_space<vmem>>, vector<28x32xf32>
    %c0_147 = arith.constant 0 : index
    %c32_148 = arith.constant 32 : index
    %148 = vector.load %arg17[%c0_147, %c32_148] : memref<28x160xf32, #tpu.memory_space<vmem>>, vector<28x32xf32>
    tpu.vector_store %arg17[%c0_147, %c32_148], %147 {strides = array<i32>} : memref<28x160xf32, #tpu.memory_space<vmem>>, vector<28x32xf32>,
    %c2_149 = arith.constant 2 : index
    %c0_150 = arith.constant 0 : index
    %149 = vector.load %arg16[%c2_149, %c0_150] : memref<32x32xf32, #tpu.memory_space<vmem>>, vector<28x32xf32>
    %c0_151 = arith.constant 0 : index
    %c64_152 = arith.constant 64 : index
    %150 = vector.load %arg17[%c0_151, %c64_152] : memref<28x160xf32, #tpu.memory_space<vmem>>, vector<28x32xf32>
    tpu.vector_store %arg17[%c0_151, %c64_152], %149 {strides = array<i32>} : memref<28x160xf32, #tpu.memory_space<vmem>>, vector<28x32xf32>,
    %c3_153 = arith.constant 3 : index
    %c0_154 = arith.constant 0 : index
    %151 = vector.load %arg16[%c3_153, %c0_154] : memref<32x32xf32, #tpu.memory_space<vmem>>, vector<28x32xf32>
    %c0_155 = arith.constant 0 : index
    %c96_156 = arith.constant 96 : index
    %152 = vector.load %arg17[%c0_155, %c96_156] : memref<28x160xf32, #tpu.memory_space<vmem>>, vector<28x32xf32>
    tpu.vector_store %arg17[%c0_155, %c96_156], %151 {strides = array<i32>} : memref<28x160xf32, #tpu.memory_space<vmem>>, vector<28x32xf32>,
    %c4_157 = arith.constant 4 : index
    %c0_158 = arith.constant 0 : index
    %153 = vector.load %arg16[%c4_157, %c0_158] : memref<32x32xf32, #tpu.memory_space<vmem>>, vector<28x32xf32>
    %c0_159 = arith.constant 0 : index
    %c128_160 = arith.constant 128 : index
    %154 = vector.load %arg17[%c0_159, %c128_160] : memref<28x160xf32, #tpu.memory_space<vmem>>, vector<28x32xf32>
    tpu.vector_store %arg17[%c0_159, %c128_160], %153 {strides = array<i32>} : memref<28x160xf32, #tpu.memory_space<vmem>>, vector<28x32xf32>,
    %c0_161 = arith.constant 0 : index
    %c0_162 = arith.constant 0 : index
    %155 = vector.load %arg17[%c0_161, %c0_162] : memref<28x160xf32, #tpu.memory_space<vmem>>, vector<28x160xf32>
    %156 = arith.truncf %155 : vector<28x160xf32> to vector<28x160xbf16>
    %c0_163 = arith.constant 0 : index
    %c0_164 = arith.constant 0 : index
    %157 = vector.load %arg2[%c0_163, %c0_164] : memref<160x168xbf16, #tpu.memory_space<vmem>>, vector<160x168xbf16>
    %cst_165 = arith.constant dense<0.000000e+00> : vector<28x168xf32>
    %158 = tpu.matmul %156, %157, %cst_165 {dimension_numbers = #tpu.dot_dimension_numbers<[1], [0], [0], [1], [0, 0, 1, 1], [], []>} : vector<28x160xbf16>, vector<160x168xbf16>, vector<28x168xf32> -> vector<28x168xf32>
    %c0_166 = arith.constant 0 : index
    %c0_167 = arith.constant 0 : index
    %159 = vector.load %arg3[%c0_166, %c0_167] : memref<1x168xf32, #tpu.memory_space<vmem>>, vector<1x168xf32>
    %160 = vector.broadcast %159 : vector<1x168xf32> to vector<28x168xf32>
    %161 = arith.addf %158, %160 : vector<28x168xf32>
    %cst_168 = arith.constant 5.000000e-01 : f32
    %162 = vector.broadcast %cst_168 : f32 to vector<28x168xf32>
    %163 = arith.mulf %162, %161 : vector<28x168xf32>
    %164 = math.tanh %163 : vector<28x168xf32>
    %cst_169 = arith.constant 5.000000e-01 : f32
    %165 = vector.broadcast %cst_169 : f32 to vector<28x168xf32>
    %166 = arith.mulf %165, %164 : vector<28x168xf32>
    %cst_170 = arith.constant 5.000000e-01 : f32
    %167 = vector.broadcast %cst_170 : f32 to vector<28x168xf32>
    %168 = arith.addf %166, %167 : vector<28x168xf32>
    %c0_171 = arith.constant 0 : index
    %c0_172 = arith.constant 0 : index
    %169 = vector.load %arg4[%c0_171, %c0_172] : memref<14x28xbf16, #tpu.memory_space<vmem>>, vector<14x28xbf16>
    %170 = arith.truncf %168 : vector<28x168xf32> to vector<28x168xbf16>
    %cst_173 = arith.constant dense<0.000000e+00> : vector<14x168xf32>
    %171 = tpu.matmul %169, %170, %cst_173 {dimension_numbers = #tpu.dot_dimension_numbers<[1], [0], [0], [1], [0, 0, 1, 1], [], []>} : vector<14x28xbf16>, vector<28x168xbf16>, vector<14x168xf32> -> vector<14x168xf32>
    %172 = arith.truncf %171 : vector<14x168xf32> to vector<14x168xbf16>
    %c0_174 = arith.constant 0 : index
    %c0_175 = arith.constant 0 : index
    %173 = vector.load %arg5[%c0_174, %c0_175] : memref<168x84xbf16, #tpu.memory_space<vmem>>, vector<168x84xbf16>
    %cst_176 = arith.constant dense<0.000000e+00> : vector<14x84xf32>
    %174 = tpu.matmul %172, %173, %cst_176 {dimension_numbers = #tpu.dot_dimension_numbers<[1], [0], [0], [1], [0, 0, 1, 1], [], []>} : vector<14x168xbf16>, vector<168x84xbf16>, vector<14x84xf32> -> vector<14x84xf32>
    %175 = vector.extract_strided_slice %174 {offsets = [0, 0], sizes = [10, 84], strides = [1, 1]} : vector<14x84xf32> to vector<10x84xf32>
    %c0_177 = arith.constant 0 : index
    %c0_178 = arith.constant 0 : index
    %176 = vector.load %arg18[%c0_177, %c0_178] : memref<10x420xf32, #tpu.memory_space<vmem>>, vector<10x84xf32>
    tpu.vector_store %arg18[%c0_177, %c0_178], %175 {strides = array<i32>} : memref<10x420xf32, #tpu.memory_space<vmem>>, vector<10x84xf32>,
    %177 = vector.extract_strided_slice %174 {offsets = [1, 0], sizes = [10, 84], strides = [1, 1]} : vector<14x84xf32> to vector<10x84xf32>
    %c0_179 = arith.constant 0 : index
    %c84_180 = arith.constant 84 : index
    %178 = vector.load %arg18[%c0_179, %c84_180] : memref<10x420xf32, #tpu.memory_space<vmem>>, vector<10x84xf32>
    tpu.vector_store %arg18[%c0_179, %c84_180], %177 {strides = array<i32>} : memref<10x420xf32, #tpu.memory_space<vmem>>, vector<10x84xf32>,
    %179 = vector.extract_strided_slice %174 {offsets = [2, 0], sizes = [10, 84], strides = [1, 1]} : vector<14x84xf32> to vector<10x84xf32>
    %c0_181 = arith.constant 0 : index
    %c168_182 = arith.constant 168 : index
    %180 = vector.load %arg18[%c0_181, %c168_182] : memref<10x420xf32, #tpu.memory_space<vmem>>, vector<10x84xf32>
    tpu.vector_store %arg18[%c0_181, %c168_182], %179 {strides = array<i32>} : memref<10x420xf32, #tpu.memory_space<vmem>>, vector<10x84xf32>,
    %181 = vector.extract_strided_slice %174 {offsets = [3, 0], sizes = [10, 84], strides = [1, 1]} : vector<14x84xf32> to vector<10x84xf32>
    %c0_183 = arith.constant 0 : index
    %c252_184 = arith.constant 252 : index
    %182 = vector.load %arg18[%c0_183, %c252_184] : memref<10x420xf32, #tpu.memory_space<vmem>>, vector<10x84xf32>
    tpu.vector_store %arg18[%c0_183, %c252_184], %181 {strides = array<i32>} : memref<10x420xf32, #tpu.memory_space<vmem>>, vector<10x84xf32>,
    %183 = vector.extract_strided_slice %174 {offsets = [4, 0], sizes = [10, 84], strides = [1, 1]} : vector<14x84xf32> to vector<10x84xf32>
    %c0_185 = arith.constant 0 : index
    %c336_186 = arith.constant 336 : index
    %184 = vector.load %arg18[%c0_185, %c336_186] : memref<10x420xf32, #tpu.memory_space<vmem>>, vector<10x84xf32>
    tpu.vector_store %arg18[%c0_185, %c336_186], %183 {strides = array<i32>} : memref<10x420xf32, #tpu.memory_space<vmem>>, vector<10x84xf32>,
    %c0_187 = arith.constant 0 : index
    %c0_188 = arith.constant 0 : index
    %185 = vector.load %arg18[%c0_187, %c0_188] : memref<10x420xf32, #tpu.memory_space<vmem>>, vector<10x420xf32>
    %186 = arith.truncf %185 : vector<10x420xf32> to vector<10x420xbf16>
    %c0_189 = arith.constant 0 : index
    %c0_190 = arith.constant 0 : index
    %187 = vector.load %arg6[%c0_189, %c0_190] : memref<420x160xbf16, #tpu.memory_space<vmem>>, vector<420x160xbf16>
    %cst_191 = arith.constant dense<0.000000e+00> : vector<10x160xf32>
    %188 = tpu.matmul %186, %187, %cst_191 {dimension_numbers = #tpu.dot_dimension_numbers<[1], [0], [0], [1], [0, 0, 1, 1], [], []>} : vector<10x420xbf16>, vector<420x160xbf16>, vector<10x160xf32> -> vector<10x160xf32>
    %c0_192 = arith.constant 0 : index
    %c0_193 = arith.constant 0 : index
    %189 = vector.load %arg7[%c0_192, %c0_193] : memref<1x160xf32, #tpu.memory_space<vmem>>, vector<1x160xf32>
    %190 = vector.broadcast %189 : vector<1x160xf32> to vector<10x160xf32>
    %191 = arith.addf %188, %190 : vector<10x160xf32>
    %cst_194 = arith.constant 5.000000e-01 : f32
    %192 = vector.broadcast %cst_194 : f32 to vector<10x160xf32>
    %193 = arith.mulf %192, %191 : vector<10x160xf32>
    %194 = math.tanh %193 : vector<10x160xf32>
    %cst_195 = arith.constant 5.000000e-01 : f32
    %195 = vector.broadcast %cst_195 : f32 to vector<10x160xf32>
    %196 = arith.mulf %195, %194 : vector<10x160xf32>
    %cst_196 = arith.constant 5.000000e-01 : f32
    %197 = vector.broadcast %cst_196 : f32 to vector<10x160xf32>
    %198 = arith.addf %196, %197 : vector<10x160xf32>
    %c0_197 = arith.constant 0 : index
    %c0_198 = arith.constant 0 : index
    %199 = vector.load %arg8[%c0_197, %c0_198] : memref<5x10xbf16, #tpu.memory_space<vmem>>, vector<5x10xbf16>
    %200 = arith.truncf %198 : vector<10x160xf32> to vector<10x160xbf16>
    %cst_199 = arith.constant dense<0.000000e+00> : vector<5x160xf32>
    %201 = tpu.matmul %199, %200, %cst_199 {dimension_numbers = #tpu.dot_dimension_numbers<[1], [0], [0], [1], [0, 0, 1, 1], [], []>} : vector<5x10xbf16>, vector<10x160xbf16>, vector<5x160xf32> -> vector<5x160xf32>
    %202 = vector.extract_strided_slice %201 {offsets = [0, 0], sizes = [1, 160], strides = [1, 1]} : vector<5x160xf32> to vector<1x160xf32>
    %c2_200 = arith.constant 2 : index
    %c0_201 = arith.constant 0 : index
    %203 = vector.load %arg19[%c2_200, %c0_201] : memref<8x800xf32, #tpu.memory_space<vmem>>, vector<1x160xf32>
    tpu.vector_store %arg19[%c2_200, %c0_201], %202 {strides = array<i32>} : memref<8x800xf32, #tpu.memory_space<vmem>>, vector<1x160xf32>,
    %204 = vector.extract_strided_slice %201 {offsets = [1, 0], sizes = [1, 160], strides = [1, 1]} : vector<5x160xf32> to vector<1x160xf32>
    %c2_202 = arith.constant 2 : index
    %c160_203 = arith.constant 160 : index
    %205 = vector.load %arg19[%c2_202, %c160_203] : memref<8x800xf32, #tpu.memory_space<vmem>>, vector<1x160xf32>
    tpu.vector_store %arg19[%c2_202, %c160_203], %204 {strides = array<i32>} : memref<8x800xf32, #tpu.memory_space<vmem>>, vector<1x160xf32>,
    %206 = vector.extract_strided_slice %201 {offsets = [2, 0], sizes = [1, 160], strides = [1, 1]} : vector<5x160xf32> to vector<1x160xf32>
    %c2_204 = arith.constant 2 : index
    %c320_205 = arith.constant 320 : index
    %207 = vector.load %arg19[%c2_204, %c320_205] : memref<8x800xf32, #tpu.memory_space<vmem>>, vector<1x160xf32>
    tpu.vector_store %arg19[%c2_204, %c320_205], %206 {strides = array<i32>} : memref<8x800xf32, #tpu.memory_space<vmem>>, vector<1x160xf32>,
    %208 = vector.extract_strided_slice %201 {offsets = [3, 0], sizes = [1, 160], strides = [1, 1]} : vector<5x160xf32> to vector<1x160xf32>
    %c2_206 = arith.constant 2 : index
    %c480_207 = arith.constant 480 : index
    %209 = vector.load %arg19[%c2_206, %c480_207] : memref<8x800xf32, #tpu.memory_space<vmem>>, vector<1x160xf32>
    tpu.vector_store %arg19[%c2_206, %c480_207], %208 {strides = array<i32>} : memref<8x800xf32, #tpu.memory_space<vmem>>, vector<1x160xf32>,
    %210 = vector.extract_strided_slice %201 {offsets = [4, 0], sizes = [1, 160], strides = [1, 1]} : vector<5x160xf32> to vector<1x160xf32>
    %c2_208 = arith.constant 2 : index
    %c640_209 = arith.constant 640 : index
    %211 = vector.load %arg19[%c2_208, %c640_209] : memref<8x800xf32, #tpu.memory_space<vmem>>, vector<1x160xf32>
    tpu.vector_store %arg19[%c2_208, %c640_209], %210 {strides = array<i32>} : memref<8x800xf32, #tpu.memory_space<vmem>>, vector<1x160xf32>,
    %c3_210 = arith.constant 3 : index
    %c0_211 = arith.constant 0 : index
    %c0_212 = arith.constant 0 : index
    %c0_213 = arith.constant 0 : index
    %212 = vector.load %arg1[%c3_210, %c0_211, %c0_212, %c0_213] : memref<8x1x28x28xf32, #tpu.memory_space<vmem>>, vector<1x1x28x28xf32>
    %213 = vector.shape_cast %212 : vector<1x1x28x28xf32> to vector<28x28xf32>
    %c2_214 = arith.constant 2 : index
    %c2_215 = arith.constant 2 : index
    %214 = vector.load %arg16[%c2_214, %c2_215] : memref<32x32xf32, #tpu.memory_space<vmem>>, vector<28x28xf32>
    tpu.vector_store %arg16[%c2_214, %c2_215], %213 {strides = array<i32>} : memref<32x32xf32, #tpu.memory_space<vmem>>, vector<28x28xf32>,
    %c0_216 = arith.constant 0 : index
    %c0_217 = arith.constant 0 : index
    %215 = vector.load %arg16[%c0_216, %c0_217] : memref<32x32xf32, #tpu.memory_space<vmem>>, vector<28x32xf32>
    %c0_218 = arith.constant 0 : index
    %c0_219 = arith.constant 0 : index
    %216 = vector.load %arg17[%c0_218, %c0_219] : memref<28x160xf32, #tpu.memory_space<vmem>>, vector<28x32xf32>
    tpu.vector_store %arg17[%c0_218, %c0_219], %215 {strides = array<i32>} : memref<28x160xf32, #tpu.memory_space<vmem>>, vector<28x32xf32>,
    %c1_220 = arith.constant 1 : index
    %c0_221 = arith.constant 0 : index
    %217 = vector.load %arg16[%c1_220, %c0_221] : memref<32x32xf32, #tpu.memory_space<vmem>>, vector<28x32xf32>
    %c0_222 = arith.constant 0 : index
    %c32_223 = arith.constant 32 : index
    %218 = vector.load %arg17[%c0_222, %c32_223] : memref<28x160xf32, #tpu.memory_space<vmem>>, vector<28x32xf32>
    tpu.vector_store %arg17[%c0_222, %c32_223], %217 {strides = array<i32>} : memref<28x160xf32, #tpu.memory_space<vmem>>, vector<28x32xf32>,
    %c2_224 = arith.constant 2 : index
    %c0_225 = arith.constant 0 : index
    %219 = vector.load %arg16[%c2_224, %c0_225] : memref<32x32xf32, #tpu.memory_space<vmem>>, vector<28x32xf32>
    %c0_226 = arith.constant 0 : index
    %c64_227 = arith.constant 64 : index
    %220 = vector.load %arg17[%c0_226, %c64_227] : memref<28x160xf32, #tpu.memory_space<vmem>>, vector<28x32xf32>
    tpu.vector_store %arg17[%c0_226, %c64_227], %219 {strides = array<i32>} : memref<28x160xf32, #tpu.memory_space<vmem>>, vector<28x32xf32>,
    %c3_228 = arith.constant 3 : index
    %c0_229 = arith.constant 0 : index
    %221 = vector.load %arg16[%c3_228, %c0_229] : memref<32x32xf32, #tpu.memory_space<vmem>>, vector<28x32xf32>
    %c0_230 = arith.constant 0 : index
    %c96_231 = arith.constant 96 : index
    %222 = vector.load %arg17[%c0_230, %c96_231] : memref<28x160xf32, #tpu.memory_space<vmem>>, vector<28x32xf32>
    tpu.vector_store %arg17[%c0_230, %c96_231], %221 {strides = array<i32>} : memref<28x160xf32, #tpu.memory_space<vmem>>, vector<28x32xf32>,
    %c4_232 = arith.constant 4 : index
    %c0_233 = arith.constant 0 : index
    %223 = vector.load %arg16[%c4_232, %c0_233] : memref<32x32xf32, #tpu.memory_space<vmem>>, vector<28x32xf32>
    %c0_234 = arith.constant 0 : index
    %c128_235 = arith.constant 128 : index
    %224 = vector.load %arg17[%c0_234, %c128_235] : memref<28x160xf32, #tpu.memory_space<vmem>>, vector<28x32xf32>
    tpu.vector_store %arg17[%c0_234, %c128_235], %223 {strides = array<i32>} : memref<28x160xf32, #tpu.memory_space<vmem>>, vector<28x32xf32>,
    %c0_236 = arith.constant 0 : index
    %c0_237 = arith.constant 0 : index
    %225 = vector.load %arg17[%c0_236, %c0_237] : memref<28x160xf32, #tpu.memory_space<vmem>>, vector<28x160xf32>
    %226 = arith.truncf %225 : vector<28x160xf32> to vector<28x160xbf16>
    %c0_238 = arith.constant 0 : index
    %c0_239 = arith.constant 0 : index
    %227 = vector.load %arg2[%c0_238, %c0_239] : memref<160x168xbf16, #tpu.memory_space<vmem>>, vector<160x168xbf16>
    %cst_240 = arith.constant dense<0.000000e+00> : vector<28x168xf32>
    %228 = tpu.matmul %226, %227, %cst_240 {dimension_numbers = #tpu.dot_dimension_numbers<[1], [0], [0], [1], [0, 0, 1, 1], [], []>} : vector<28x160xbf16>, vector<160x168xbf16>, vector<28x168xf32> -> vector<28x168xf32>
    %c0_241 = arith.constant 0 : index
    %c0_242 = arith.constant 0 : index
    %229 = vector.load %arg3[%c0_241, %c0_242] : memref<1x168xf32, #tpu.memory_space<vmem>>, vector<1x168xf32>
    %230 = vector.broadcast %229 : vector<1x168xf32> to vector<28x168xf32>
    %231 = arith.addf %228, %230 : vector<28x168xf32>
    %cst_243 = arith.constant 5.000000e-01 : f32
    %232 = vector.broadcast %cst_243 : f32 to vector<28x168xf32>
    %233 = arith.mulf %232, %231 : vector<28x168xf32>
    %234 = math.tanh %233 : vector<28x168xf32>
    %cst_244 = arith.constant 5.000000e-01 : f32
    %235 = vector.broadcast %cst_244 : f32 to vector<28x168xf32>
    %236 = arith.mulf %235, %234 : vector<28x168xf32>
    %cst_245 = arith.constant 5.000000e-01 : f32
    %237 = vector.broadcast %cst_245 : f32 to vector<28x168xf32>
    %238 = arith.addf %236, %237 : vector<28x168xf32>
    %c0_246 = arith.constant 0 : index
    %c0_247 = arith.constant 0 : index
    %239 = vector.load %arg4[%c0_246, %c0_247] : memref<14x28xbf16, #tpu.memory_space<vmem>>, vector<14x28xbf16>
    %240 = arith.truncf %238 : vector<28x168xf32> to vector<28x168xbf16>
    %cst_248 = arith.constant dense<0.000000e+00> : vector<14x168xf32>
    %241 = tpu.matmul %239, %240, %cst_248 {dimension_numbers = #tpu.dot_dimension_numbers<[1], [0], [0], [1], [0, 0, 1, 1], [], []>} : vector<14x28xbf16>, vector<28x168xbf16>, vector<14x168xf32> -> vector<14x168xf32>
    %242 = arith.truncf %241 : vector<14x168xf32> to vector<14x168xbf16>
    %c0_249 = arith.constant 0 : index
    %c0_250 = arith.constant 0 : index
    %243 = vector.load %arg5[%c0_249, %c0_250] : memref<168x84xbf16, #tpu.memory_space<vmem>>, vector<168x84xbf16>
    %cst_251 = arith.constant dense<0.000000e+00> : vector<14x84xf32>
    %244 = tpu.matmul %242, %243, %cst_251 {dimension_numbers = #tpu.dot_dimension_numbers<[1], [0], [0], [1], [0, 0, 1, 1], [], []>} : vector<14x168xbf16>, vector<168x84xbf16>, vector<14x84xf32> -> vector<14x84xf32>
    %245 = vector.extract_strided_slice %244 {offsets = [0, 0], sizes = [10, 84], strides = [1, 1]} : vector<14x84xf32> to vector<10x84xf32>
    %c0_252 = arith.constant 0 : index
    %c0_253 = arith.constant 0 : index
    %246 = vector.load %arg18[%c0_252, %c0_253] : memref<10x420xf32, #tpu.memory_space<vmem>>, vector<10x84xf32>
    tpu.vector_store %arg18[%c0_252, %c0_253], %245 {strides = array<i32>} : memref<10x420xf32, #tpu.memory_space<vmem>>, vector<10x84xf32>,
    %247 = vector.extract_strided_slice %244 {offsets = [1, 0], sizes = [10, 84], strides = [1, 1]} : vector<14x84xf32> to vector<10x84xf32>
    %c0_254 = arith.constant 0 : index
    %c84_255 = arith.constant 84 : index
    %248 = vector.load %arg18[%c0_254, %c84_255] : memref<10x420xf32, #tpu.memory_space<vmem>>, vector<10x84xf32>
    tpu.vector_store %arg18[%c0_254, %c84_255], %247 {strides = array<i32>} : memref<10x420xf32, #tpu.memory_space<vmem>>, vector<10x84xf32>,
    %249 = vector.extract_strided_slice %244 {offsets = [2, 0], sizes = [10, 84], strides = [1, 1]} : vector<14x84xf32> to vector<10x84xf32>
    %c0_256 = arith.constant 0 : index
    %c168_257 = arith.constant 168 : index
    %250 = vector.load %arg18[%c0_256, %c168_257] : memref<10x420xf32, #tpu.memory_space<vmem>>, vector<10x84xf32>
    tpu.vector_store %arg18[%c0_256, %c168_257], %249 {strides = array<i32>} : memref<10x420xf32, #tpu.memory_space<vmem>>, vector<10x84xf32>,
    %251 = vector.extract_strided_slice %244 {offsets = [3, 0], sizes = [10, 84], strides = [1, 1]} : vector<14x84xf32> to vector<10x84xf32>
    %c0_258 = arith.constant 0 : index
    %c252_259 = arith.constant 252 : index
    %252 = vector.load %arg18[%c0_258, %c252_259] : memref<10x420xf32, #tpu.memory_space<vmem>>, vector<10x84xf32>
    tpu.vector_store %arg18[%c0_258, %c252_259], %251 {strides = array<i32>} : memref<10x420xf32, #tpu.memory_space<vmem>>, vector<10x84xf32>,
    %253 = vector.extract_strided_slice %244 {offsets = [4, 0], sizes = [10, 84], strides = [1, 1]} : vector<14x84xf32> to vector<10x84xf32>
    %c0_260 = arith.constant 0 : index
    %c336_261 = arith.constant 336 : index
    %254 = vector.load %arg18[%c0_260, %c336_261] : memref<10x420xf32, #tpu.memory_space<vmem>>, vector<10x84xf32>
    tpu.vector_store %arg18[%c0_260, %c336_261], %253 {strides = array<i32>} : memref<10x420xf32, #tpu.memory_space<vmem>>, vector<10x84xf32>,
    %c0_262 = arith.constant 0 : index
    %c0_263 = arith.constant 0 : index
    %255 = vector.load %arg18[%c0_262, %c0_263] : memref<10x420xf32, #tpu.memory_space<vmem>>, vector<10x420xf32>
    %256 = arith.truncf %255 : vector<10x420xf32> to vector<10x420xbf16>
    %c0_264 = arith.constant 0 : index
    %c0_265 = arith.constant 0 : index
    %257 = vector.load %arg6[%c0_264, %c0_265] : memref<420x160xbf16, #tpu.memory_space<vmem>>, vector<420x160xbf16>
    %cst_266 = arith.constant dense<0.000000e+00> : vector<10x160xf32>
    %258 = tpu.matmul %256, %257, %cst_266 {dimension_numbers = #tpu.dot_dimension_numbers<[1], [0], [0], [1], [0, 0, 1, 1], [], []>} : vector<10x420xbf16>, vector<420x160xbf16>, vector<10x160xf32> -> vector<10x160xf32>
    %c0_267 = arith.constant 0 : index
    %c0_268 = arith.constant 0 : index
    %259 = vector.load %arg7[%c0_267, %c0_268] : memref<1x160xf32, #tpu.memory_space<vmem>>, vector<1x160xf32>
    %260 = vector.broadcast %259 : vector<1x160xf32> to vector<10x160xf32>
    %261 = arith.addf %258, %260 : vector<10x160xf32>
    %cst_269 = arith.constant 5.000000e-01 : f32
    %262 = vector.broadcast %cst_269 : f32 to vector<10x160xf32>
    %263 = arith.mulf %262, %261 : vector<10x160xf32>
    %264 = math.tanh %263 : vector<10x160xf32>
    %cst_270 = arith.constant 5.000000e-01 : f32
    %265 = vector.broadcast %cst_270 : f32 to vector<10x160xf32>
    %266 = arith.mulf %265, %264 : vector<10x160xf32>
    %cst_271 = arith.constant 5.000000e-01 : f32
    %267 = vector.broadcast %cst_271 : f32 to vector<10x160xf32>
    %268 = arith.addf %266, %267 : vector<10x160xf32>
    %c0_272 = arith.constant 0 : index
    %c0_273 = arith.constant 0 : index
    %269 = vector.load %arg8[%c0_272, %c0_273] : memref<5x10xbf16, #tpu.memory_space<vmem>>, vector<5x10xbf16>
    %270 = arith.truncf %268 : vector<10x160xf32> to vector<10x160xbf16>
    %cst_274 = arith.constant dense<0.000000e+00> : vector<5x160xf32>
    %271 = tpu.matmul %269, %270, %cst_274 {dimension_numbers = #tpu.dot_dimension_numbers<[1], [0], [0], [1], [0, 0, 1, 1], [], []>} : vector<5x10xbf16>, vector<10x160xbf16>, vector<5x160xf32> -> vector<5x160xf32>
    %272 = vector.extract_strided_slice %271 {offsets = [0, 0], sizes = [1, 160], strides = [1, 1]} : vector<5x160xf32> to vector<1x160xf32>
    %c3_275 = arith.constant 3 : index
    %c0_276 = arith.constant 0 : index
    %273 = vector.load %arg19[%c3_275, %c0_276] : memref<8x800xf32, #tpu.memory_space<vmem>>, vector<1x160xf32>
    tpu.vector_store %arg19[%c3_275, %c0_276], %272 {strides = array<i32>} : memref<8x800xf32, #tpu.memory_space<vmem>>, vector<1x160xf32>,
    %274 = vector.extract_strided_slice %271 {offsets = [1, 0], sizes = [1, 160], strides = [1, 1]} : vector<5x160xf32> to vector<1x160xf32>
    %c3_277 = arith.constant 3 : index
    %c160_278 = arith.constant 160 : index
    %275 = vector.load %arg19[%c3_277, %c160_278] : memref<8x800xf32, #tpu.memory_space<vmem>>, vector<1x160xf32>
    tpu.vector_store %arg19[%c3_277, %c160_278], %274 {strides = array<i32>} : memref<8x800xf32, #tpu.memory_space<vmem>>, vector<1x160xf32>,
    %276 = vector.extract_strided_slice %271 {offsets = [2, 0], sizes = [1, 160], strides = [1, 1]} : vector<5x160xf32> to vector<1x160xf32>
    %c3_279 = arith.constant 3 : index
    %c320_280 = arith.constant 320 : index
    %277 = vector.load %arg19[%c3_279, %c320_280] : memref<8x800xf32, #tpu.memory_space<vmem>>, vector<1x160xf32>
    tpu.vector_store %arg19[%c3_279, %c320_280], %276 {strides = array<i32>} : memref<8x800xf32, #tpu.memory_space<vmem>>, vector<1x160xf32>,
    %278 = vector.extract_strided_slice %271 {offsets = [3, 0], sizes = [1, 160], strides = [1, 1]} : vector<5x160xf32> to vector<1x160xf32>
    %c3_281 = arith.constant 3 : index
    %c480_282 = arith.constant 480 : index
    %279 = vector.load %arg19[%c3_281, %c480_282] : memref<8x800xf32, #tpu.memory_space<vmem>>, vector<1x160xf32>
    tpu.vector_store %arg19[%c3_281, %c480_282], %278 {strides = array<i32>} : memref<8x800xf32, #tpu.memory_space<vmem>>, vector<1x160xf32>,
    %280 = vector.extract_strided_slice %271 {offsets = [4, 0], sizes = [1, 160], strides = [1, 1]} : vector<5x160xf32> to vector<1x160xf32>
    %c3_283 = arith.constant 3 : index
    %c640_284 = arith.constant 640 : index
    %281 = vector.load %arg19[%c3_283, %c640_284] : memref<8x800xf32, #tpu.memory_space<vmem>>, vector<1x160xf32>
    tpu.vector_store %arg19[%c3_283, %c640_284], %280 {strides = array<i32>} : memref<8x800xf32, #tpu.memory_space<vmem>>, vector<1x160xf32>,
    %c4_285 = arith.constant 4 : index
    %c0_286 = arith.constant 0 : index
    %c0_287 = arith.constant 0 : index
    %c0_288 = arith.constant 0 : index
    %282 = vector.load %arg1[%c4_285, %c0_286, %c0_287, %c0_288] : memref<8x1x28x28xf32, #tpu.memory_space<vmem>>, vector<1x1x28x28xf32>
    %283 = vector.shape_cast %282 : vector<1x1x28x28xf32> to vector<28x28xf32>
    %c2_289 = arith.constant 2 : index
    %c2_290 = arith.constant 2 : index
    %284 = vector.load %arg16[%c2_289, %c2_290] : memref<32x32xf32, #tpu.memory_space<vmem>>, vector<28x28xf32>
    tpu.vector_store %arg16[%c2_289, %c2_290], %283 {strides = array<i32>} : memref<32x32xf32, #tpu.memory_space<vmem>>, vector<28x28xf32>,
    %c0_291 = arith.constant 0 : index
    %c0_292 = arith.constant 0 : index
    %285 = vector.load %arg16[%c0_291, %c0_292] : memref<32x32xf32, #tpu.memory_space<vmem>>, vector<28x32xf32>
    %c0_293 = arith.constant 0 : index
    %c0_294 = arith.constant 0 : index
    %286 = vector.load %arg17[%c0_293, %c0_294] : memref<28x160xf32, #tpu.memory_space<vmem>>, vector<28x32xf32>
    tpu.vector_store %arg17[%c0_293, %c0_294], %285 {strides = array<i32>} : memref<28x160xf32, #tpu.memory_space<vmem>>, vector<28x32xf32>,
    %c1_295 = arith.constant 1 : index
    %c0_296 = arith.constant 0 : index
    %287 = vector.load %arg16[%c1_295, %c0_296] : memref<32x32xf32, #tpu.memory_space<vmem>>, vector<28x32xf32>
    %c0_297 = arith.constant 0 : index
    %c32_298 = arith.constant 32 : index
    %288 = vector.load %arg17[%c0_297, %c32_298] : memref<28x160xf32, #tpu.memory_space<vmem>>, vector<28x32xf32>
    tpu.vector_store %arg17[%c0_297, %c32_298], %287 {strides = array<i32>} : memref<28x160xf32, #tpu.memory_space<vmem>>, vector<28x32xf32>,
    %c2_299 = arith.constant 2 : index
    %c0_300 = arith.constant 0 : index
    %289 = vector.load %arg16[%c2_299, %c0_300] : memref<32x32xf32, #tpu.memory_space<vmem>>, vector<28x32xf32>
    %c0_301 = arith.constant 0 : index
    %c64_302 = arith.constant 64 : index
    %290 = vector.load %arg17[%c0_301, %c64_302] : memref<28x160xf32, #tpu.memory_space<vmem>>, vector<28x32xf32>
    tpu.vector_store %arg17[%c0_301, %c64_302], %289 {strides = array<i32>} : memref<28x160xf32, #tpu.memory_space<vmem>>, vector<28x32xf32>,
    %c3_303 = arith.constant 3 : index
    %c0_304 = arith.constant 0 : index
    %291 = vector.load %arg16[%c3_303, %c0_304] : memref<32x32xf32, #tpu.memory_space<vmem>>, vector<28x32xf32>
    %c0_305 = arith.constant 0 : index
    %c96_306 = arith.constant 96 : index
    %292 = vector.load %arg17[%c0_305, %c96_306] : memref<28x160xf32, #tpu.memory_space<vmem>>, vector<28x32xf32>
    tpu.vector_store %arg17[%c0_305, %c96_306], %291 {strides = array<i32>} : memref<28x160xf32, #tpu.memory_space<vmem>>, vector<28x32xf32>,
    %c4_307 = arith.constant 4 : index
    %c0_308 = arith.constant 0 : index
    %293 = vector.load %arg16[%c4_307, %c0_308] : memref<32x32xf32, #tpu.memory_space<vmem>>, vector<28x32xf32>
    %c0_309 = arith.constant 0 : index
    %c128_310 = arith.constant 128 : index
    %294 = vector.load %arg17[%c0_309, %c128_310] : memref<28x160xf32, #tpu.memory_space<vmem>>, vector<28x32xf32>
    tpu.vector_store %arg17[%c0_309, %c128_310], %293 {strides = array<i32>} : memref<28x160xf32, #tpu.memory_space<vmem>>, vector<28x32xf32>,
    %c0_311 = arith.constant 0 : index
    %c0_312 = arith.constant 0 : index
    %295 = vector.load %arg17[%c0_311, %c0_312] : memref<28x160xf32, #tpu.memory_space<vmem>>, vector<28x160xf32>
    %296 = arith.truncf %295 : vector<28x160xf32> to vector<28x160xbf16>
    %c0_313 = arith.constant 0 : index
    %c0_314 = arith.constant 0 : index
    %297 = vector.load %arg2[%c0_313, %c0_314] : memref<160x168xbf16, #tpu.memory_space<vmem>>, vector<160x168xbf16>
    %cst_315 = arith.constant dense<0.000000e+00> : vector<28x168xf32>
    %298 = tpu.matmul %296, %297, %cst_315 {dimension_numbers = #tpu.dot_dimension_numbers<[1], [0], [0], [1], [0, 0, 1, 1], [], []>} : vector<28x160xbf16>, vector<160x168xbf16>, vector<28x168xf32> -> vector<28x168xf32>
    %c0_316 = arith.constant 0 : index
    %c0_317 = arith.constant 0 : index
    %299 = vector.load %arg3[%c0_316, %c0_317] : memref<1x168xf32, #tpu.memory_space<vmem>>, vector<1x168xf32>
    %300 = vector.broadcast %299 : vector<1x168xf32> to vector<28x168xf32>
    %301 = arith.addf %298, %300 : vector<28x168xf32>
    %cst_318 = arith.constant 5.000000e-01 : f32
    %302 = vector.broadcast %cst_318 : f32 to vector<28x168xf32>
    %303 = arith.mulf %302, %301 : vector<28x168xf32>
    %304 = math.tanh %303 : vector<28x168xf32>
    %cst_319 = arith.constant 5.000000e-01 : f32
    %305 = vector.broadcast %cst_319 : f32 to vector<28x168xf32>
    %306 = arith.mulf %305, %304 : vector<28x168xf32>
    %cst_320 = arith.constant 5.000000e-01 : f32
    %307 = vector.broadcast %cst_320 : f32 to vector<28x168xf32>
    %308 = arith.addf %306, %307 : vector<28x168xf32>
    %c0_321 = arith.constant 0 : index
    %c0_322 = arith.constant 0 : index
    %309 = vector.load %arg4[%c0_321, %c0_322] : memref<14x28xbf16, #tpu.memory_space<vmem>>, vector<14x28xbf16>
    %310 = arith.truncf %308 : vector<28x168xf32> to vector<28x168xbf16>
    %cst_323 = arith.constant dense<0.000000e+00> : vector<14x168xf32>
    %311 = tpu.matmul %309, %310, %cst_323 {dimension_numbers = #tpu.dot_dimension_numbers<[1], [0], [0], [1], [0, 0, 1, 1], [], []>} : vector<14x28xbf16>, vector<28x168xbf16>, vector<14x168xf32> -> vector<14x168xf32>
    %312 = arith.truncf %311 : vector<14x168xf32> to vector<14x168xbf16>
    %c0_324 = arith.constant 0 : index
    %c0_325 = arith.constant 0 : index
    %313 = vector.load %arg5[%c0_324, %c0_325] : memref<168x84xbf16, #tpu.memory_space<vmem>>, vector<168x84xbf16>
    %cst_326 = arith.constant dense<0.000000e+00> : vector<14x84xf32>
    %314 = tpu.matmul %312, %313, %cst_326 {dimension_numbers = #tpu.dot_dimension_numbers<[1], [0], [0], [1], [0, 0, 1, 1], [], []>} : vector<14x168xbf16>, vector<168x84xbf16>, vector<14x84xf32> -> vector<14x84xf32>
    %315 = vector.extract_strided_slice %314 {offsets = [0, 0], sizes = [10, 84], strides = [1, 1]} : vector<14x84xf32> to vector<10x84xf32>
    %c0_327 = arith.constant 0 : index
    %c0_328 = arith.constant 0 : index
    %316 = vector.load %arg18[%c0_327, %c0_328] : memref<10x420xf32, #tpu.memory_space<vmem>>, vector<10x84xf32>
    tpu.vector_store %arg18[%c0_327, %c0_328], %315 {strides = array<i32>} : memref<10x420xf32, #tpu.memory_space<vmem>>, vector<10x84xf32>,
    %317 = vector.extract_strided_slice %314 {offsets = [1, 0], sizes = [10, 84], strides = [1, 1]} : vector<14x84xf32> to vector<10x84xf32>
    %c0_329 = arith.constant 0 : index
    %c84_330 = arith.constant 84 : index
    %318 = vector.load %arg18[%c0_329, %c84_330] : memref<10x420xf32, #tpu.memory_space<vmem>>, vector<10x84xf32>
    tpu.vector_store %arg18[%c0_329, %c84_330], %317 {strides = array<i32>} : memref<10x420xf32, #tpu.memory_space<vmem>>, vector<10x84xf32>,
    %319 = vector.extract_strided_slice %314 {offsets = [2, 0], sizes = [10, 84], strides = [1, 1]} : vector<14x84xf32> to vector<10x84xf32>
    %c0_331 = arith.constant 0 : index
    %c168_332 = arith.constant 168 : index
    %320 = vector.load %arg18[%c0_331, %c168_332] : memref<10x420xf32, #tpu.memory_space<vmem>>, vector<10x84xf32>
    tpu.vector_store %arg18[%c0_331, %c168_332], %319 {strides = array<i32>} : memref<10x420xf32, #tpu.memory_space<vmem>>, vector<10x84xf32>,
    %321 = vector.extract_strided_slice %314 {offsets = [3, 0], sizes = [10, 84], strides = [1, 1]} : vector<14x84xf32> to vector<10x84xf32>
    %c0_333 = arith.constant 0 : index
    %c252_334 = arith.constant 252 : index
    %322 = vector.load %arg18[%c0_333, %c252_334] : memref<10x420xf32, #tpu.memory_space<vmem>>, vector<10x84xf32>
    tpu.vector_store %arg18[%c0_333, %c252_334], %321 {strides = array<i32>} : memref<10x420xf32, #tpu.memory_space<vmem>>, vector<10x84xf32>,
    %323 = vector.extract_strided_slice %314 {offsets = [4, 0], sizes = [10, 84], strides = [1, 1]} : vector<14x84xf32> to vector<10x84xf32>
    %c0_335 = arith.constant 0 : index
    %c336_336 = arith.constant 336 : index
    %324 = vector.load %arg18[%c0_335, %c336_336] : memref<10x420xf32, #tpu.memory_space<vmem>>, vector<10x84xf32>
    tpu.vector_store %arg18[%c0_335, %c336_336], %323 {strides = array<i32>} : memref<10x420xf32, #tpu.memory_space<vmem>>, vector<10x84xf32>,
    %c0_337 = arith.constant 0 : index
    %c0_338 = arith.constant 0 : index
    %325 = vector.load %arg18[%c0_337, %c0_338] : memref<10x420xf32, #tpu.memory_space<vmem>>, vector<10x420xf32>
    %326 = arith.truncf %325 : vector<10x420xf32> to vector<10x420xbf16>
    %c0_339 = arith.constant 0 : index
    %c0_340 = arith.constant 0 : index
    %327 = vector.load %arg6[%c0_339, %c0_340] : memref<420x160xbf16, #tpu.memory_space<vmem>>, vector<420x160xbf16>
    %cst_341 = arith.constant dense<0.000000e+00> : vector<10x160xf32>
    %328 = tpu.matmul %326, %327, %cst_341 {dimension_numbers = #tpu.dot_dimension_numbers<[1], [0], [0], [1], [0, 0, 1, 1], [], []>} : vector<10x420xbf16>, vector<420x160xbf16>, vector<10x160xf32> -> vector<10x160xf32>
    %c0_342 = arith.constant 0 : index
    %c0_343 = arith.constant 0 : index
    %329 = vector.load %arg7[%c0_342, %c0_343] : memref<1x160xf32, #tpu.memory_space<vmem>>, vector<1x160xf32>
    %330 = vector.broadcast %329 : vector<1x160xf32> to vector<10x160xf32>
    %331 = arith.addf %328, %330 : vector<10x160xf32>
    %cst_344 = arith.constant 5.000000e-01 : f32
    %332 = vector.broadcast %cst_344 : f32 to vector<10x160xf32>
    %333 = arith.mulf %332, %331 : vector<10x160xf32>
    %334 = math.tanh %333 : vector<10x160xf32>
    %cst_345 = arith.constant 5.000000e-01 : f32
    %335 = vector.broadcast %cst_345 : f32 to vector<10x160xf32>
    %336 = arith.mulf %335, %334 : vector<10x160xf32>
    %cst_346 = arith.constant 5.000000e-01 : f32
    %337 = vector.broadcast %cst_346 : f32 to vector<10x160xf32>
    %338 = arith.addf %336, %337 : vector<10x160xf32>
    %c0_347 = arith.constant 0 : index
    %c0_348 = arith.constant 0 : index
    %339 = vector.load %arg8[%c0_347, %c0_348] : memref<5x10xbf16, #tpu.memory_space<vmem>>, vector<5x10xbf16>
    %340 = arith.truncf %338 : vector<10x160xf32> to vector<10x160xbf16>
    %cst_349 = arith.constant dense<0.000000e+00> : vector<5x160xf32>
    %341 = tpu.matmul %339, %340, %cst_349 {dimension_numbers = #tpu.dot_dimension_numbers<[1], [0], [0], [1], [0, 0, 1, 1], [], []>} : vector<5x10xbf16>, vector<10x160xbf16>, vector<5x160xf32> -> vector<5x160xf32>
    %342 = vector.extract_strided_slice %341 {offsets = [0, 0], sizes = [1, 160], strides = [1, 1]} : vector<5x160xf32> to vector<1x160xf32>
    %c4_350 = arith.constant 4 : index
    %c0_351 = arith.constant 0 : index
    %343 = vector.load %arg19[%c4_350, %c0_351] : memref<8x800xf32, #tpu.memory_space<vmem>>, vector<1x160xf32>
    tpu.vector_store %arg19[%c4_350, %c0_351], %342 {strides = array<i32>} : memref<8x800xf32, #tpu.memory_space<vmem>>, vector<1x160xf32>,
    %344 = vector.extract_strided_slice %341 {offsets = [1, 0], sizes = [1, 160], strides = [1, 1]} : vector<5x160xf32> to vector<1x160xf32>
    %c4_352 = arith.constant 4 : index
    %c160_353 = arith.constant 160 : index
    %345 = vector.load %arg19[%c4_352, %c160_353] : memref<8x800xf32, #tpu.memory_space<vmem>>, vector<1x160xf32>
    tpu.vector_store %arg19[%c4_352, %c160_353], %344 {strides = array<i32>} : memref<8x800xf32, #tpu.memory_space<vmem>>, vector<1x160xf32>,
    %346 = vector.extract_strided_slice %341 {offsets = [2, 0], sizes = [1, 160], strides = [1, 1]} : vector<5x160xf32> to vector<1x160xf32>
    %c4_354 = arith.constant 4 : index
    %c320_355 = arith.constant 320 : index
    %347 = vector.load %arg19[%c4_354, %c320_355] : memref<8x800xf32, #tpu.memory_space<vmem>>, vector<1x160xf32>
    tpu.vector_store %arg19[%c4_354, %c320_355], %346 {strides = array<i32>} : memref<8x800xf32, #tpu.memory_space<vmem>>, vector<1x160xf32>,
    %348 = vector.extract_strided_slice %341 {offsets = [3, 0], sizes = [1, 160], strides = [1, 1]} : vector<5x160xf32> to vector<1x160xf32>
    %c4_356 = arith.constant 4 : index
    %c480_357 = arith.constant 480 : index
    %349 = vector.load %arg19[%c4_356, %c480_357] : memref<8x800xf32, #tpu.memory_space<vmem>>, vector<1x160xf32>
    tpu.vector_store %arg19[%c4_356, %c480_357], %348 {strides = array<i32>} : memref<8x800xf32, #tpu.memory_space<vmem>>, vector<1x160xf32>,
    %350 = vector.extract_strided_slice %341 {offsets = [4, 0], sizes = [1, 160], strides = [1, 1]} : vector<5x160xf32> to vector<1x160xf32>
    %c4_358 = arith.constant 4 : index
    %c640_359 = arith.constant 640 : index
    %351 = vector.load %arg19[%c4_358, %c640_359] : memref<8x800xf32, #tpu.memory_space<vmem>>, vector<1x160xf32>
    tpu.vector_store %arg19[%c4_358, %c640_359], %350 {strides = array<i32>} : memref<8x800xf32, #tpu.memory_space<vmem>>, vector<1x160xf32>,
    %c5 = arith.constant 5 : index
    %c0_360 = arith.constant 0 : index
    %c0_361 = arith.constant 0 : index
    %c0_362 = arith.constant 0 : index
    %352 = vector.load %arg1[%c5, %c0_360, %c0_361, %c0_362] : memref<8x1x28x28xf32, #tpu.memory_space<vmem>>, vector<1x1x28x28xf32>
    %353 = vector.shape_cast %352 : vector<1x1x28x28xf32> to vector<28x28xf32>
    %c2_363 = arith.constant 2 : index
    %c2_364 = arith.constant 2 : index
    %354 = vector.load %arg16[%c2_363, %c2_364] : memref<32x32xf32, #tpu.memory_space<vmem>>, vector<28x28xf32>
    tpu.vector_store %arg16[%c2_363, %c2_364], %353 {strides = array<i32>} : memref<32x32xf32, #tpu.memory_space<vmem>>, vector<28x28xf32>,
    %c0_365 = arith.constant 0 : index
    %c0_366 = arith.constant 0 : index
    %355 = vector.load %arg16[%c0_365, %c0_366] : memref<32x32xf32, #tpu.memory_space<vmem>>, vector<28x32xf32>
    %c0_367 = arith.constant 0 : index
    %c0_368 = arith.constant 0 : index
    %356 = vector.load %arg17[%c0_367, %c0_368] : memref<28x160xf32, #tpu.memory_space<vmem>>, vector<28x32xf32>
    tpu.vector_store %arg17[%c0_367, %c0_368], %355 {strides = array<i32>} : memref<28x160xf32, #tpu.memory_space<vmem>>, vector<28x32xf32>,
    %c1_369 = arith.constant 1 : index
    %c0_370 = arith.constant 0 : index
    %357 = vector.load %arg16[%c1_369, %c0_370] : memref<32x32xf32, #tpu.memory_space<vmem>>, vector<28x32xf32>
    %c0_371 = arith.constant 0 : index
    %c32_372 = arith.constant 32 : index
    %358 = vector.load %arg17[%c0_371, %c32_372] : memref<28x160xf32, #tpu.memory_space<vmem>>, vector<28x32xf32>
    tpu.vector_store %arg17[%c0_371, %c32_372], %357 {strides = array<i32>} : memref<28x160xf32, #tpu.memory_space<vmem>>, vector<28x32xf32>,
    %c2_373 = arith.constant 2 : index
    %c0_374 = arith.constant 0 : index
    %359 = vector.load %arg16[%c2_373, %c0_374] : memref<32x32xf32, #tpu.memory_space<vmem>>, vector<28x32xf32>
    %c0_375 = arith.constant 0 : index
    %c64_376 = arith.constant 64 : index
    %360 = vector.load %arg17[%c0_375, %c64_376] : memref<28x160xf32, #tpu.memory_space<vmem>>, vector<28x32xf32>
    tpu.vector_store %arg17[%c0_375, %c64_376], %359 {strides = array<i32>} : memref<28x160xf32, #tpu.memory_space<vmem>>, vector<28x32xf32>,
    %c3_377 = arith.constant 3 : index
    %c0_378 = arith.constant 0 : index
    %361 = vector.load %arg16[%c3_377, %c0_378] : memref<32x32xf32, #tpu.memory_space<vmem>>, vector<28x32xf32>
    %c0_379 = arith.constant 0 : index
    %c96_380 = arith.constant 96 : index
    %362 = vector.load %arg17[%c0_379, %c96_380] : memref<28x160xf32, #tpu.memory_space<vmem>>, vector<28x32xf32>
    tpu.vector_store %arg17[%c0_379, %c96_380], %361 {strides = array<i32>} : memref<28x160xf32, #tpu.memory_space<vmem>>, vector<28x32xf32>,
    %c4_381 = arith.constant 4 : index
    %c0_382 = arith.constant 0 : index
    %363 = vector.load %arg16[%c4_381, %c0_382] : memref<32x32xf32, #tpu.memory_space<vmem>>, vector<28x32xf32>
    %c0_383 = arith.constant 0 : index
    %c128_384 = arith.constant 128 : index
    %364 = vector.load %arg17[%c0_383, %c128_384] : memref<28x160xf32, #tpu.memory_space<vmem>>, vector<28x32xf32>
    tpu.vector_store %arg17[%c0_383, %c128_384], %363 {strides = array<i32>} : memref<28x160xf32, #tpu.memory_space<vmem>>, vector<28x32xf32>,
    %c0_385 = arith.constant 0 : index
    %c0_386 = arith.constant 0 : index
    %365 = vector.load %arg17[%c0_385, %c0_386] : memref<28x160xf32, #tpu.memory_space<vmem>>, vector<28x160xf32>
    %366 = arith.truncf %365 : vector<28x160xf32> to vector<28x160xbf16>
    %c0_387 = arith.constant 0 : index
    %c0_388 = arith.constant 0 : index
    %367 = vector.load %arg2[%c0_387, %c0_388] : memref<160x168xbf16, #tpu.memory_space<vmem>>, vector<160x168xbf16>
    %cst_389 = arith.constant dense<0.000000e+00> : vector<28x168xf32>
    %368 = tpu.matmul %366, %367, %cst_389 {dimension_numbers = #tpu.dot_dimension_numbers<[1], [0], [0], [1], [0, 0, 1, 1], [], []>} : vector<28x160xbf16>, vector<160x168xbf16>, vector<28x168xf32> -> vector<28x168xf32>
    %c0_390 = arith.constant 0 : index
    %c0_391 = arith.constant 0 : index
    %369 = vector.load %arg3[%c0_390, %c0_391] : memref<1x168xf32, #tpu.memory_space<vmem>>, vector<1x168xf32>
    %370 = vector.broadcast %369 : vector<1x168xf32> to vector<28x168xf32>
    %371 = arith.addf %368, %370 : vector<28x168xf32>
    %cst_392 = arith.constant 5.000000e-01 : f32
    %372 = vector.broadcast %cst_392 : f32 to vector<28x168xf32>
    %373 = arith.mulf %372, %371 : vector<28x168xf32>
    %374 = math.tanh %373 : vector<28x168xf32>
    %cst_393 = arith.constant 5.000000e-01 : f32
    %375 = vector.broadcast %cst_393 : f32 to vector<28x168xf32>
    %376 = arith.mulf %375, %374 : vector<28x168xf32>
    %cst_394 = arith.constant 5.000000e-01 : f32
    %377 = vector.broadcast %cst_394 : f32 to vector<28x168xf32>
    %378 = arith.addf %376, %377 : vector<28x168xf32>
    %c0_395 = arith.constant 0 : index
    %c0_396 = arith.constant 0 : index
    %379 = vector.load %arg4[%c0_395, %c0_396] : memref<14x28xbf16, #tpu.memory_space<vmem>>, vector<14x28xbf16>
    %380 = arith.truncf %378 : vector<28x168xf32> to vector<28x168xbf16>
    %cst_397 = arith.constant dense<0.000000e+00> : vector<14x168xf32>
    %381 = tpu.matmul %379, %380, %cst_397 {dimension_numbers = #tpu.dot_dimension_numbers<[1], [0], [0], [1], [0, 0, 1, 1], [], []>} : vector<14x28xbf16>, vector<28x168xbf16>, vector<14x168xf32> -> vector<14x168xf32>
    %382 = arith.truncf %381 : vector<14x168xf32> to vector<14x168xbf16>
    %c0_398 = arith.constant 0 : index
    %c0_399 = arith.constant 0 : index
    %383 = vector.load %arg5[%c0_398, %c0_399] : memref<168x84xbf16, #tpu.memory_space<vmem>>, vector<168x84xbf16>
    %cst_400 = arith.constant dense<0.000000e+00> : vector<14x84xf32>
    %384 = tpu.matmul %382, %383, %cst_400 {dimension_numbers = #tpu.dot_dimension_numbers<[1], [0], [0], [1], [0, 0, 1, 1], [], []>} : vector<14x168xbf16>, vector<168x84xbf16>, vector<14x84xf32> -> vector<14x84xf32>
    %385 = vector.extract_strided_slice %384 {offsets = [0, 0], sizes = [10, 84], strides = [1, 1]} : vector<14x84xf32> to vector<10x84xf32>
    %c0_401 = arith.constant 0 : index
    %c0_402 = arith.constant 0 : index
    %386 = vector.load %arg18[%c0_401, %c0_402] : memref<10x420xf32, #tpu.memory_space<vmem>>, vector<10x84xf32>
    tpu.vector_store %arg18[%c0_401, %c0_402], %385 {strides = array<i32>} : memref<10x420xf32, #tpu.memory_space<vmem>>, vector<10x84xf32>,
    %387 = vector.extract_strided_slice %384 {offsets = [1, 0], sizes = [10, 84], strides = [1, 1]} : vector<14x84xf32> to vector<10x84xf32>
    %c0_403 = arith.constant 0 : index
    %c84_404 = arith.constant 84 : index
    %388 = vector.load %arg18[%c0_403, %c84_404] : memref<10x420xf32, #tpu.memory_space<vmem>>, vector<10x84xf32>
    tpu.vector_store %arg18[%c0_403, %c84_404], %387 {strides = array<i32>} : memref<10x420xf32, #tpu.memory_space<vmem>>, vector<10x84xf32>,
    %389 = vector.extract_strided_slice %384 {offsets = [2, 0], sizes = [10, 84], strides = [1, 1]} : vector<14x84xf32> to vector<10x84xf32>
    %c0_405 = arith.constant 0 : index
    %c168_406 = arith.constant 168 : index
    %390 = vector.load %arg18[%c0_405, %c168_406] : memref<10x420xf32, #tpu.memory_space<vmem>>, vector<10x84xf32>
    tpu.vector_store %arg18[%c0_405, %c168_406], %389 {strides = array<i32>} : memref<10x420xf32, #tpu.memory_space<vmem>>, vector<10x84xf32>,
    %391 = vector.extract_strided_slice %384 {offsets = [3, 0], sizes = [10, 84], strides = [1, 1]} : vector<14x84xf32> to vector<10x84xf32>
    %c0_407 = arith.constant 0 : index
    %c252_408 = arith.constant 252 : index
    %392 = vector.load %arg18[%c0_407, %c252_408] : memref<10x420xf32, #tpu.memory_space<vmem>>, vector<10x84xf32>
    tpu.vector_store %arg18[%c0_407, %c252_408], %391 {strides = array<i32>} : memref<10x420xf32, #tpu.memory_space<vmem>>, vector<10x84xf32>,
    %393 = vector.extract_strided_slice %384 {offsets = [4, 0], sizes = [10, 84], strides = [1, 1]} : vector<14x84xf32> to vector<10x84xf32>
    %c0_409 = arith.constant 0 : index
    %c336_410 = arith.constant 336 : index
    %394 = vector.load %arg18[%c0_409, %c336_410] : memref<10x420xf32, #tpu.memory_space<vmem>>, vector<10x84xf32>
    tpu.vector_store %arg18[%c0_409, %c336_410], %393 {strides = array<i32>} : memref<10x420xf32, #tpu.memory_space<vmem>>, vector<10x84xf32>,
    %c0_411 = arith.constant 0 : index
    %c0_412 = arith.constant 0 : index
    %395 = vector.load %arg18[%c0_411, %c0_412] : memref<10x420xf32, #tpu.memory_space<vmem>>, vector<10x420xf32>
    %396 = arith.truncf %395 : vector<10x420xf32> to vector<10x420xbf16>
    %c0_413 = arith.constant 0 : index
    %c0_414 = arith.constant 0 : index
    %397 = vector.load %arg6[%c0_413, %c0_414] : memref<420x160xbf16, #tpu.memory_space<vmem>>, vector<420x160xbf16>
    %cst_415 = arith.constant dense<0.000000e+00> : vector<10x160xf32>
    %398 = tpu.matmul %396, %397, %cst_415 {dimension_numbers = #tpu.dot_dimension_numbers<[1], [0], [0], [1], [0, 0, 1, 1], [], []>} : vector<10x420xbf16>, vector<420x160xbf16>, vector<10x160xf32> -> vector<10x160xf32>
    %c0_416 = arith.constant 0 : index
    %c0_417 = arith.constant 0 : index
    %399 = vector.load %arg7[%c0_416, %c0_417] : memref<1x160xf32, #tpu.memory_space<vmem>>, vector<1x160xf32>
    %400 = vector.broadcast %399 : vector<1x160xf32> to vector<10x160xf32>
    %401 = arith.addf %398, %400 : vector<10x160xf32>
    %cst_418 = arith.constant 5.000000e-01 : f32
    %402 = vector.broadcast %cst_418 : f32 to vector<10x160xf32>
    %403 = arith.mulf %402, %401 : vector<10x160xf32>
    %404 = math.tanh %403 : vector<10x160xf32>
    %cst_419 = arith.constant 5.000000e-01 : f32
    %405 = vector.broadcast %cst_419 : f32 to vector<10x160xf32>
    %406 = arith.mulf %405, %404 : vector<10x160xf32>
    %cst_420 = arith.constant 5.000000e-01 : f32
    %407 = vector.broadcast %cst_420 : f32 to vector<10x160xf32>
    %408 = arith.addf %406, %407 : vector<10x160xf32>
    %c0_421 = arith.constant 0 : index
    %c0_422 = arith.constant 0 : index
    %409 = vector.load %arg8[%c0_421, %c0_422] : memref<5x10xbf16, #tpu.memory_space<vmem>>, vector<5x10xbf16>
    %410 = arith.truncf %408 : vector<10x160xf32> to vector<10x160xbf16>
    %cst_423 = arith.constant dense<0.000000e+00> : vector<5x160xf32>
    %411 = tpu.matmul %409, %410, %cst_423 {dimension_numbers = #tpu.dot_dimension_numbers<[1], [0], [0], [1], [0, 0, 1, 1], [], []>} : vector<5x10xbf16>, vector<10x160xbf16>, vector<5x160xf32> -> vector<5x160xf32>
    %412 = vector.extract_strided_slice %411 {offsets = [0, 0], sizes = [1, 160], strides = [1, 1]} : vector<5x160xf32> to vector<1x160xf32>
    %c5_424 = arith.constant 5 : index
    %c0_425 = arith.constant 0 : index
    %413 = vector.load %arg19[%c5_424, %c0_425] : memref<8x800xf32, #tpu.memory_space<vmem>>, vector<1x160xf32>
    tpu.vector_store %arg19[%c5_424, %c0_425], %412 {strides = array<i32>} : memref<8x800xf32, #tpu.memory_space<vmem>>, vector<1x160xf32>,
    %414 = vector.extract_strided_slice %411 {offsets = [1, 0], sizes = [1, 160], strides = [1, 1]} : vector<5x160xf32> to vector<1x160xf32>
    %c5_426 = arith.constant 5 : index
    %c160_427 = arith.constant 160 : index
    %415 = vector.load %arg19[%c5_426, %c160_427] : memref<8x800xf32, #tpu.memory_space<vmem>>, vector<1x160xf32>
    tpu.vector_store %arg19[%c5_426, %c160_427], %414 {strides = array<i32>} : memref<8x800xf32, #tpu.memory_space<vmem>>, vector<1x160xf32>,
    %416 = vector.extract_strided_slice %411 {offsets = [2, 0], sizes = [1, 160], strides = [1, 1]} : vector<5x160xf32> to vector<1x160xf32>
    %c5_428 = arith.constant 5 : index
    %c320_429 = arith.constant 320 : index
    %417 = vector.load %arg19[%c5_428, %c320_429] : memref<8x800xf32, #tpu.memory_space<vmem>>, vector<1x160xf32>
    tpu.vector_store %arg19[%c5_428, %c320_429], %416 {strides = array<i32>} : memref<8x800xf32, #tpu.memory_space<vmem>>, vector<1x160xf32>,
    %418 = vector.extract_strided_slice %411 {offsets = [3, 0], sizes = [1, 160], strides = [1, 1]} : vector<5x160xf32> to vector<1x160xf32>
    %c5_430 = arith.constant 5 : index
    %c480_431 = arith.constant 480 : index
    %419 = vector.load %arg19[%c5_430, %c480_431] : memref<8x800xf32, #tpu.memory_space<vmem>>, vector<1x160xf32>
    tpu.vector_store %arg19[%c5_430, %c480_431], %418 {strides = array<i32>} : memref<8x800xf32, #tpu.memory_space<vmem>>, vector<1x160xf32>,
    %420 = vector.extract_strided_slice %411 {offsets = [4, 0], sizes = [1, 160], strides = [1, 1]} : vector<5x160xf32> to vector<1x160xf32>
    %c5_432 = arith.constant 5 : index
    %c640_433 = arith.constant 640 : index
    %421 = vector.load %arg19[%c5_432, %c640_433] : memref<8x800xf32, #tpu.memory_space<vmem>>, vector<1x160xf32>
    tpu.vector_store %arg19[%c5_432, %c640_433], %420 {strides = array<i32>} : memref<8x800xf32, #tpu.memory_space<vmem>>, vector<1x160xf32>,
    %c6 = arith.constant 6 : index
    %c0_434 = arith.constant 0 : index
    %c0_435 = arith.constant 0 : index
    %c0_436 = arith.constant 0 : index
    %422 = vector.load %arg1[%c6, %c0_434, %c0_435, %c0_436] : memref<8x1x28x28xf32, #tpu.memory_space<vmem>>, vector<1x1x28x28xf32>
    %423 = vector.shape_cast %422 : vector<1x1x28x28xf32> to vector<28x28xf32>
    %c2_437 = arith.constant 2 : index
    %c2_438 = arith.constant 2 : index
    %424 = vector.load %arg16[%c2_437, %c2_438] : memref<32x32xf32, #tpu.memory_space<vmem>>, vector<28x28xf32>
    tpu.vector_store %arg16[%c2_437, %c2_438], %423 {strides = array<i32>} : memref<32x32xf32, #tpu.memory_space<vmem>>, vector<28x28xf32>,
    %c0_439 = arith.constant 0 : index
    %c0_440 = arith.constant 0 : index
    %425 = vector.load %arg16[%c0_439, %c0_440] : memref<32x32xf32, #tpu.memory_space<vmem>>, vector<28x32xf32>
    %c0_441 = arith.constant 0 : index
    %c0_442 = arith.constant 0 : index
    %426 = vector.load %arg17[%c0_441, %c0_442] : memref<28x160xf32, #tpu.memory_space<vmem>>, vector<28x32xf32>
    tpu.vector_store %arg17[%c0_441, %c0_442], %425 {strides = array<i32>} : memref<28x160xf32, #tpu.memory_space<vmem>>, vector<28x32xf32>,
    %c1_443 = arith.constant 1 : index
    %c0_444 = arith.constant 0 : index
    %427 = vector.load %arg16[%c1_443, %c0_444] : memref<32x32xf32, #tpu.memory_space<vmem>>, vector<28x32xf32>
    %c0_445 = arith.constant 0 : index
    %c32_446 = arith.constant 32 : index
    %428 = vector.load %arg17[%c0_445, %c32_446] : memref<28x160xf32, #tpu.memory_space<vmem>>, vector<28x32xf32>
    tpu.vector_store %arg17[%c0_445, %c32_446], %427 {strides = array<i32>} : memref<28x160xf32, #tpu.memory_space<vmem>>, vector<28x32xf32>,
    %c2_447 = arith.constant 2 : index
    %c0_448 = arith.constant 0 : index
    %429 = vector.load %arg16[%c2_447, %c0_448] : memref<32x32xf32, #tpu.memory_space<vmem>>, vector<28x32xf32>
    %c0_449 = arith.constant 0 : index
    %c64_450 = arith.constant 64 : index
    %430 = vector.load %arg17[%c0_449, %c64_450] : memref<28x160xf32, #tpu.memory_space<vmem>>, vector<28x32xf32>
    tpu.vector_store %arg17[%c0_449, %c64_450], %429 {strides = array<i32>} : memref<28x160xf32, #tpu.memory_space<vmem>>, vector<28x32xf32>,
    %c3_451 = arith.constant 3 : index
    %c0_452 = arith.constant 0 : index
    %431 = vector.load %arg16[%c3_451, %c0_452] : memref<32x32xf32, #tpu.memory_space<vmem>>, vector<28x32xf32>
    %c0_453 = arith.constant 0 : index
    %c96_454 = arith.constant 96 : index
    %432 = vector.load %arg17[%c0_453, %c96_454] : memref<28x160xf32, #tpu.memory_space<vmem>>, vector<28x32xf32>
    tpu.vector_store %arg17[%c0_453, %c96_454], %431 {strides = array<i32>} : memref<28x160xf32, #tpu.memory_space<vmem>>, vector<28x32xf32>,
    %c4_455 = arith.constant 4 : index
    %c0_456 = arith.constant 0 : index
    %433 = vector.load %arg16[%c4_455, %c0_456] : memref<32x32xf32, #tpu.memory_space<vmem>>, vector<28x32xf32>
    %c0_457 = arith.constant 0 : index
    %c128_458 = arith.constant 128 : index
    %434 = vector.load %arg17[%c0_457, %c128_458] : memref<28x160xf32, #tpu.memory_space<vmem>>, vector<28x32xf32>
    tpu.vector_store %arg17[%c0_457, %c128_458], %433 {strides = array<i32>} : memref<28x160xf32, #tpu.memory_space<vmem>>, vector<28x32xf32>,
    %c0_459 = arith.constant 0 : index
    %c0_460 = arith.constant 0 : index
    %435 = vector.load %arg17[%c0_459, %c0_460] : memref<28x160xf32, #tpu.memory_space<vmem>>, vector<28x160xf32>
    %436 = arith.truncf %435 : vector<28x160xf32> to vector<28x160xbf16>
    %c0_461 = arith.constant 0 : index
    %c0_462 = arith.constant 0 : index
    %437 = vector.load %arg2[%c0_461, %c0_462] : memref<160x168xbf16, #tpu.memory_space<vmem>>, vector<160x168xbf16>
    %cst_463 = arith.constant dense<0.000000e+00> : vector<28x168xf32>
    %438 = tpu.matmul %436, %437, %cst_463 {dimension_numbers = #tpu.dot_dimension_numbers<[1], [0], [0], [1], [0, 0, 1, 1], [], []>} : vector<28x160xbf16>, vector<160x168xbf16>, vector<28x168xf32> -> vector<28x168xf32>
    %c0_464 = arith.constant 0 : index
    %c0_465 = arith.constant 0 : index
    %439 = vector.load %arg3[%c0_464, %c0_465] : memref<1x168xf32, #tpu.memory_space<vmem>>, vector<1x168xf32>
    %440 = vector.broadcast %439 : vector<1x168xf32> to vector<28x168xf32>
    %441 = arith.addf %438, %440 : vector<28x168xf32>
    %cst_466 = arith.constant 5.000000e-01 : f32
    %442 = vector.broadcast %cst_466 : f32 to vector<28x168xf32>
    %443 = arith.mulf %442, %441 : vector<28x168xf32>
    %444 = math.tanh %443 : vector<28x168xf32>
    %cst_467 = arith.constant 5.000000e-01 : f32
    %445 = vector.broadcast %cst_467 : f32 to vector<28x168xf32>
    %446 = arith.mulf %445, %444 : vector<28x168xf32>
    %cst_468 = arith.constant 5.000000e-01 : f32
    %447 = vector.broadcast %cst_468 : f32 to vector<28x168xf32>
    %448 = arith.addf %446, %447 : vector<28x168xf32>
    %c0_469 = arith.constant 0 : index
    %c0_470 = arith.constant 0 : index
    %449 = vector.load %arg4[%c0_469, %c0_470] : memref<14x28xbf16, #tpu.memory_space<vmem>>, vector<14x28xbf16>
    %450 = arith.truncf %448 : vector<28x168xf32> to vector<28x168xbf16>
    %cst_471 = arith.constant dense<0.000000e+00> : vector<14x168xf32>
    %451 = tpu.matmul %449, %450, %cst_471 {dimension_numbers = #tpu.dot_dimension_numbers<[1], [0], [0], [1], [0, 0, 1, 1], [], []>} : vector<14x28xbf16>, vector<28x168xbf16>, vector<14x168xf32> -> vector<14x168xf32>
    %452 = arith.truncf %451 : vector<14x168xf32> to vector<14x168xbf16>
    %c0_472 = arith.constant 0 : index
    %c0_473 = arith.constant 0 : index
    %453 = vector.load %arg5[%c0_472, %c0_473] : memref<168x84xbf16, #tpu.memory_space<vmem>>, vector<168x84xbf16>
    %cst_474 = arith.constant dense<0.000000e+00> : vector<14x84xf32>
    %454 = tpu.matmul %452, %453, %cst_474 {dimension_numbers = #tpu.dot_dimension_numbers<[1], [0], [0], [1], [0, 0, 1, 1], [], []>} : vector<14x168xbf16>, vector<168x84xbf16>, vector<14x84xf32> -> vector<14x84xf32>
    %455 = vector.extract_strided_slice %454 {offsets = [0, 0], sizes = [10, 84], strides = [1, 1]} : vector<14x84xf32> to vector<10x84xf32>
    %c0_475 = arith.constant 0 : index
    %c0_476 = arith.constant 0 : index
    %456 = vector.load %arg18[%c0_475, %c0_476] : memref<10x420xf32, #tpu.memory_space<vmem>>, vector<10x84xf32>
    tpu.vector_store %arg18[%c0_475, %c0_476], %455 {strides = array<i32>} : memref<10x420xf32, #tpu.memory_space<vmem>>, vector<10x84xf32>,
    %457 = vector.extract_strided_slice %454 {offsets = [1, 0], sizes = [10, 84], strides = [1, 1]} : vector<14x84xf32> to vector<10x84xf32>
    %c0_477 = arith.constant 0 : index
    %c84_478 = arith.constant 84 : index
    %458 = vector.load %arg18[%c0_477, %c84_478] : memref<10x420xf32, #tpu.memory_space<vmem>>, vector<10x84xf32>
    tpu.vector_store %arg18[%c0_477, %c84_478], %457 {strides = array<i32>} : memref<10x420xf32, #tpu.memory_space<vmem>>, vector<10x84xf32>,
    %459 = vector.extract_strided_slice %454 {offsets = [2, 0], sizes = [10, 84], strides = [1, 1]} : vector<14x84xf32> to vector<10x84xf32>
    %c0_479 = arith.constant 0 : index
    %c168_480 = arith.constant 168 : index
    %460 = vector.load %arg18[%c0_479, %c168_480] : memref<10x420xf32, #tpu.memory_space<vmem>>, vector<10x84xf32>
    tpu.vector_store %arg18[%c0_479, %c168_480], %459 {strides = array<i32>} : memref<10x420xf32, #tpu.memory_space<vmem>>, vector<10x84xf32>,
    %461 = vector.extract_strided_slice %454 {offsets = [3, 0], sizes = [10, 84], strides = [1, 1]} : vector<14x84xf32> to vector<10x84xf32>
    %c0_481 = arith.constant 0 : index
    %c252_482 = arith.constant 252 : index
    %462 = vector.load %arg18[%c0_481, %c252_482] : memref<10x420xf32, #tpu.memory_space<vmem>>, vector<10x84xf32>
    tpu.vector_store %arg18[%c0_481, %c252_482], %461 {strides = array<i32>} : memref<10x420xf32, #tpu.memory_space<vmem>>, vector<10x84xf32>,
    %463 = vector.extract_strided_slice %454 {offsets = [4, 0], sizes = [10, 84], strides = [1, 1]} : vector<14x84xf32> to vector<10x84xf32>
    %c0_483 = arith.constant 0 : index
    %c336_484 = arith.constant 336 : index
    %464 = vector.load %arg18[%c0_483, %c336_484] : memref<10x420xf32, #tpu.memory_space<vmem>>, vector<10x84xf32>
    tpu.vector_store %arg18[%c0_483, %c336_484], %463 {strides = array<i32>} : memref<10x420xf32, #tpu.memory_space<vmem>>, vector<10x84xf32>,
    %c0_485 = arith.constant 0 : index
    %c0_486 = arith.constant 0 : index
    %465 = vector.load %arg18[%c0_485, %c0_486] : memref<10x420xf32, #tpu.memory_space<vmem>>, vector<10x420xf32>
    %466 = arith.truncf %465 : vector<10x420xf32> to vector<10x420xbf16>
    %c0_487 = arith.constant 0 : index
    %c0_488 = arith.constant 0 : index
    %467 = vector.load %arg6[%c0_487, %c0_488] : memref<420x160xbf16, #tpu.memory_space<vmem>>, vector<420x160xbf16>
    %cst_489 = arith.constant dense<0.000000e+00> : vector<10x160xf32>
    %468 = tpu.matmul %466, %467, %cst_489 {dimension_numbers = #tpu.dot_dimension_numbers<[1], [0], [0], [1], [0, 0, 1, 1], [], []>} : vector<10x420xbf16>, vector<420x160xbf16>, vector<10x160xf32> -> vector<10x160xf32>
    %c0_490 = arith.constant 0 : index
    %c0_491 = arith.constant 0 : index
    %469 = vector.load %arg7[%c0_490, %c0_491] : memref<1x160xf32, #tpu.memory_space<vmem>>, vector<1x160xf32>
    %470 = vector.broadcast %469 : vector<1x160xf32> to vector<10x160xf32>
    %471 = arith.addf %468, %470 : vector<10x160xf32>
    %cst_492 = arith.constant 5.000000e-01 : f32
    %472 = vector.broadcast %cst_492 : f32 to vector<10x160xf32>
    %473 = arith.mulf %472, %471 : vector<10x160xf32>
    %474 = math.tanh %473 : vector<10x160xf32>
    %cst_493 = arith.constant 5.000000e-01 : f32
    %475 = vector.broadcast %cst_493 : f32 to vector<10x160xf32>
    %476 = arith.mulf %475, %474 : vector<10x160xf32>
    %cst_494 = arith.constant 5.000000e-01 : f32
    %477 = vector.broadcast %cst_494 : f32 to vector<10x160xf32>
    %478 = arith.addf %476, %477 : vector<10x160xf32>
    %c0_495 = arith.constant 0 : index
    %c0_496 = arith.constant 0 : index
    %479 = vector.load %arg8[%c0_495, %c0_496] : memref<5x10xbf16, #tpu.memory_space<vmem>>, vector<5x10xbf16>
    %480 = arith.truncf %478 : vector<10x160xf32> to vector<10x160xbf16>
    %cst_497 = arith.constant dense<0.000000e+00> : vector<5x160xf32>
    %481 = tpu.matmul %479, %480, %cst_497 {dimension_numbers = #tpu.dot_dimension_numbers<[1], [0], [0], [1], [0, 0, 1, 1], [], []>} : vector<5x10xbf16>, vector<10x160xbf16>, vector<5x160xf32> -> vector<5x160xf32>
    %482 = vector.extract_strided_slice %481 {offsets = [0, 0], sizes = [1, 160], strides = [1, 1]} : vector<5x160xf32> to vector<1x160xf32>
    %c6_498 = arith.constant 6 : index
    %c0_499 = arith.constant 0 : index
    %483 = vector.load %arg19[%c6_498, %c0_499] : memref<8x800xf32, #tpu.memory_space<vmem>>, vector<1x160xf32>
    tpu.vector_store %arg19[%c6_498, %c0_499], %482 {strides = array<i32>} : memref<8x800xf32, #tpu.memory_space<vmem>>, vector<1x160xf32>,
    %484 = vector.extract_strided_slice %481 {offsets = [1, 0], sizes = [1, 160], strides = [1, 1]} : vector<5x160xf32> to vector<1x160xf32>
    %c6_500 = arith.constant 6 : index
    %c160_501 = arith.constant 160 : index
    %485 = vector.load %arg19[%c6_500, %c160_501] : memref<8x800xf32, #tpu.memory_space<vmem>>, vector<1x160xf32>
    tpu.vector_store %arg19[%c6_500, %c160_501], %484 {strides = array<i32>} : memref<8x800xf32, #tpu.memory_space<vmem>>, vector<1x160xf32>,
    %486 = vector.extract_strided_slice %481 {offsets = [2, 0], sizes = [1, 160], strides = [1, 1]} : vector<5x160xf32> to vector<1x160xf32>
    %c6_502 = arith.constant 6 : index
    %c320_503 = arith.constant 320 : index
    %487 = vector.load %arg19[%c6_502, %c320_503] : memref<8x800xf32, #tpu.memory_space<vmem>>, vector<1x160xf32>
    tpu.vector_store %arg19[%c6_502, %c320_503], %486 {strides = array<i32>} : memref<8x800xf32, #tpu.memory_space<vmem>>, vector<1x160xf32>,
    %488 = vector.extract_strided_slice %481 {offsets = [3, 0], sizes = [1, 160], strides = [1, 1]} : vector<5x160xf32> to vector<1x160xf32>
    %c6_504 = arith.constant 6 : index
    %c480_505 = arith.constant 480 : index
    %489 = vector.load %arg19[%c6_504, %c480_505] : memref<8x800xf32, #tpu.memory_space<vmem>>, vector<1x160xf32>
    tpu.vector_store %arg19[%c6_504, %c480_505], %488 {strides = array<i32>} : memref<8x800xf32, #tpu.memory_space<vmem>>, vector<1x160xf32>,
    %490 = vector.extract_strided_slice %481 {offsets = [4, 0], sizes = [1, 160], strides = [1, 1]} : vector<5x160xf32> to vector<1x160xf32>
    %c6_506 = arith.constant 6 : index
    %c640_507 = arith.constant 640 : index
    %491 = vector.load %arg19[%c6_506, %c640_507] : memref<8x800xf32, #tpu.memory_space<vmem>>, vector<1x160xf32>
    tpu.vector_store %arg19[%c6_506, %c640_507], %490 {strides = array<i32>} : memref<8x800xf32, #tpu.memory_space<vmem>>, vector<1x160xf32>,
    %c7 = arith.constant 7 : index
    %c0_508 = arith.constant 0 : index
    %c0_509 = arith.constant 0 : index
    %c0_510 = arith.constant 0 : index
    %492 = vector.load %arg1[%c7, %c0_508, %c0_509, %c0_510] : memref<8x1x28x28xf32, #tpu.memory_space<vmem>>, vector<1x1x28x28xf32>
    %493 = vector.shape_cast %492 : vector<1x1x28x28xf32> to vector<28x28xf32>
    %c2_511 = arith.constant 2 : index
    %c2_512 = arith.constant 2 : index
    %494 = vector.load %arg16[%c2_511, %c2_512] : memref<32x32xf32, #tpu.memory_space<vmem>>, vector<28x28xf32>
    tpu.vector_store %arg16[%c2_511, %c2_512], %493 {strides = array<i32>} : memref<32x32xf32, #tpu.memory_space<vmem>>, vector<28x28xf32>,
    %c0_513 = arith.constant 0 : index
    %c0_514 = arith.constant 0 : index
    %495 = vector.load %arg16[%c0_513, %c0_514] : memref<32x32xf32, #tpu.memory_space<vmem>>, vector<28x32xf32>
    %c0_515 = arith.constant 0 : index
    %c0_516 = arith.constant 0 : index
    %496 = vector.load %arg17[%c0_515, %c0_516] : memref<28x160xf32, #tpu.memory_space<vmem>>, vector<28x32xf32>
    tpu.vector_store %arg17[%c0_515, %c0_516], %495 {strides = array<i32>} : memref<28x160xf32, #tpu.memory_space<vmem>>, vector<28x32xf32>,
    %c1_517 = arith.constant 1 : index
    %c0_518 = arith.constant 0 : index
    %497 = vector.load %arg16[%c1_517, %c0_518] : memref<32x32xf32, #tpu.memory_space<vmem>>, vector<28x32xf32>
    %c0_519 = arith.constant 0 : index
    %c32_520 = arith.constant 32 : index
    %498 = vector.load %arg17[%c0_519, %c32_520] : memref<28x160xf32, #tpu.memory_space<vmem>>, vector<28x32xf32>
    tpu.vector_store %arg17[%c0_519, %c32_520], %497 {strides = array<i32>} : memref<28x160xf32, #tpu.memory_space<vmem>>, vector<28x32xf32>,
    %c2_521 = arith.constant 2 : index
    %c0_522 = arith.constant 0 : index
    %499 = vector.load %arg16[%c2_521, %c0_522] : memref<32x32xf32, #tpu.memory_space<vmem>>, vector<28x32xf32>
    %c0_523 = arith.constant 0 : index
    %c64_524 = arith.constant 64 : index
    %500 = vector.load %arg17[%c0_523, %c64_524] : memref<28x160xf32, #tpu.memory_space<vmem>>, vector<28x32xf32>
    tpu.vector_store %arg17[%c0_523, %c64_524], %499 {strides = array<i32>} : memref<28x160xf32, #tpu.memory_space<vmem>>, vector<28x32xf32>,
    %c3_525 = arith.constant 3 : index
    %c0_526 = arith.constant 0 : index
    %501 = vector.load %arg16[%c3_525, %c0_526] : memref<32x32xf32, #tpu.memory_space<vmem>>, vector<28x32xf32>
    %c0_527 = arith.constant 0 : index
    %c96_528 = arith.constant 96 : index
    %502 = vector.load %arg17[%c0_527, %c96_528] : memref<28x160xf32, #tpu.memory_space<vmem>>, vector<28x32xf32>
    tpu.vector_store %arg17[%c0_527, %c96_528], %501 {strides = array<i32>} : memref<28x160xf32, #tpu.memory_space<vmem>>, vector<28x32xf32>,
    %c4_529 = arith.constant 4 : index
    %c0_530 = arith.constant 0 : index
    %503 = vector.load %arg16[%c4_529, %c0_530] : memref<32x32xf32, #tpu.memory_space<vmem>>, vector<28x32xf32>
    %c0_531 = arith.constant 0 : index
    %c128_532 = arith.constant 128 : index
    %504 = vector.load %arg17[%c0_531, %c128_532] : memref<28x160xf32, #tpu.memory_space<vmem>>, vector<28x32xf32>
    tpu.vector_store %arg17[%c0_531, %c128_532], %503 {strides = array<i32>} : memref<28x160xf32, #tpu.memory_space<vmem>>, vector<28x32xf32>,
    %c0_533 = arith.constant 0 : index
    %c0_534 = arith.constant 0 : index
    %505 = vector.load %arg17[%c0_533, %c0_534] : memref<28x160xf32, #tpu.memory_space<vmem>>, vector<28x160xf32>
    %506 = arith.truncf %505 : vector<28x160xf32> to vector<28x160xbf16>
    %c0_535 = arith.constant 0 : index
    %c0_536 = arith.constant 0 : index
    %507 = vector.load %arg2[%c0_535, %c0_536] : memref<160x168xbf16, #tpu.memory_space<vmem>>, vector<160x168xbf16>
    %cst_537 = arith.constant dense<0.000000e+00> : vector<28x168xf32>
    %508 = tpu.matmul %506, %507, %cst_537 {dimension_numbers = #tpu.dot_dimension_numbers<[1], [0], [0], [1], [0, 0, 1, 1], [], []>} : vector<28x160xbf16>, vector<160x168xbf16>, vector<28x168xf32> -> vector<28x168xf32>
    %c0_538 = arith.constant 0 : index
    %c0_539 = arith.constant 0 : index
    %509 = vector.load %arg3[%c0_538, %c0_539] : memref<1x168xf32, #tpu.memory_space<vmem>>, vector<1x168xf32>
    %510 = vector.broadcast %509 : vector<1x168xf32> to vector<28x168xf32>
    %511 = arith.addf %508, %510 : vector<28x168xf32>
    %cst_540 = arith.constant 5.000000e-01 : f32
    %512 = vector.broadcast %cst_540 : f32 to vector<28x168xf32>
    %513 = arith.mulf %512, %511 : vector<28x168xf32>
    %514 = math.tanh %513 : vector<28x168xf32>
    %cst_541 = arith.constant 5.000000e-01 : f32
    %515 = vector.broadcast %cst_541 : f32 to vector<28x168xf32>
    %516 = arith.mulf %515, %514 : vector<28x168xf32>
    %cst_542 = arith.constant 5.000000e-01 : f32
    %517 = vector.broadcast %cst_542 : f32 to vector<28x168xf32>
    %518 = arith.addf %516, %517 : vector<28x168xf32>
    %c0_543 = arith.constant 0 : index
    %c0_544 = arith.constant 0 : index
    %519 = vector.load %arg4[%c0_543, %c0_544] : memref<14x28xbf16, #tpu.memory_space<vmem>>, vector<14x28xbf16>
    %520 = arith.truncf %518 : vector<28x168xf32> to vector<28x168xbf16>
    %cst_545 = arith.constant dense<0.000000e+00> : vector<14x168xf32>
    %521 = tpu.matmul %519, %520, %cst_545 {dimension_numbers = #tpu.dot_dimension_numbers<[1], [0], [0], [1], [0, 0, 1, 1], [], []>} : vector<14x28xbf16>, vector<28x168xbf16>, vector<14x168xf32> -> vector<14x168xf32>
    %522 = arith.truncf %521 : vector<14x168xf32> to vector<14x168xbf16>
    %c0_546 = arith.constant 0 : index
    %c0_547 = arith.constant 0 : index
    %523 = vector.load %arg5[%c0_546, %c0_547] : memref<168x84xbf16, #tpu.memory_space<vmem>>, vector<168x84xbf16>
    %cst_548 = arith.constant dense<0.000000e+00> : vector<14x84xf32>
    %524 = tpu.matmul %522, %523, %cst_548 {dimension_numbers = #tpu.dot_dimension_numbers<[1], [0], [0], [1], [0, 0, 1, 1], [], []>} : vector<14x168xbf16>, vector<168x84xbf16>, vector<14x84xf32> -> vector<14x84xf32>
    %525 = vector.extract_strided_slice %524 {offsets = [0, 0], sizes = [10, 84], strides = [1, 1]} : vector<14x84xf32> to vector<10x84xf32>
    %c0_549 = arith.constant 0 : index
    %c0_550 = arith.constant 0 : index
    %526 = vector.load %arg18[%c0_549, %c0_550] : memref<10x420xf32, #tpu.memory_space<vmem>>, vector<10x84xf32>
    tpu.vector_store %arg18[%c0_549, %c0_550], %525 {strides = array<i32>} : memref<10x420xf32, #tpu.memory_space<vmem>>, vector<10x84xf32>,
    %527 = vector.extract_strided_slice %524 {offsets = [1, 0], sizes = [10, 84], strides = [1, 1]} : vector<14x84xf32> to vector<10x84xf32>
    %c0_551 = arith.constant 0 : index
    %c84_552 = arith.constant 84 : index
    %528 = vector.load %arg18[%c0_551, %c84_552] : memref<10x420xf32, #tpu.memory_space<vmem>>, vector<10x84xf32>
    tpu.vector_store %arg18[%c0_551, %c84_552], %527 {strides = array<i32>} : memref<10x420xf32, #tpu.memory_space<vmem>>, vector<10x84xf32>,
    %529 = vector.extract_strided_slice %524 {offsets = [2, 0], sizes = [10, 84], strides = [1, 1]} : vector<14x84xf32> to vector<10x84xf32>
    %c0_553 = arith.constant 0 : index
    %c168_554 = arith.constant 168 : index
    %530 = vector.load %arg18[%c0_553, %c168_554] : memref<10x420xf32, #tpu.memory_space<vmem>>, vector<10x84xf32>
    tpu.vector_store %arg18[%c0_553, %c168_554], %529 {strides = array<i32>} : memref<10x420xf32, #tpu.memory_space<vmem>>, vector<10x84xf32>,
    %531 = vector.extract_strided_slice %524 {offsets = [3, 0], sizes = [10, 84], strides = [1, 1]} : vector<14x84xf32> to vector<10x84xf32>
    %c0_555 = arith.constant 0 : index
    %c252_556 = arith.constant 252 : index
    %532 = vector.load %arg18[%c0_555, %c252_556] : memref<10x420xf32, #tpu.memory_space<vmem>>, vector<10x84xf32>
    tpu.vector_store %arg18[%c0_555, %c252_556], %531 {strides = array<i32>} : memref<10x420xf32, #tpu.memory_space<vmem>>, vector<10x84xf32>,
    %533 = vector.extract_strided_slice %524 {offsets = [4, 0], sizes = [10, 84], strides = [1, 1]} : vector<14x84xf32> to vector<10x84xf32>
    %c0_557 = arith.constant 0 : index
    %c336_558 = arith.constant 336 : index
    %534 = vector.load %arg18[%c0_557, %c336_558] : memref<10x420xf32, #tpu.memory_space<vmem>>, vector<10x84xf32>
    tpu.vector_store %arg18[%c0_557, %c336_558], %533 {strides = array<i32>} : memref<10x420xf32, #tpu.memory_space<vmem>>, vector<10x84xf32>,
    %c0_559 = arith.constant 0 : index
    %c0_560 = arith.constant 0 : index
    %535 = vector.load %arg18[%c0_559, %c0_560] : memref<10x420xf32, #tpu.memory_space<vmem>>, vector<10x420xf32>
    %536 = arith.truncf %535 : vector<10x420xf32> to vector<10x420xbf16>
    %c0_561 = arith.constant 0 : index
    %c0_562 = arith.constant 0 : index
    %537 = vector.load %arg6[%c0_561, %c0_562] : memref<420x160xbf16, #tpu.memory_space<vmem>>, vector<420x160xbf16>
    %cst_563 = arith.constant dense<0.000000e+00> : vector<10x160xf32>
    %538 = tpu.matmul %536, %537, %cst_563 {dimension_numbers = #tpu.dot_dimension_numbers<[1], [0], [0], [1], [0, 0, 1, 1], [], []>} : vector<10x420xbf16>, vector<420x160xbf16>, vector<10x160xf32> -> vector<10x160xf32>
    %c0_564 = arith.constant 0 : index
    %c0_565 = arith.constant 0 : index
    %539 = vector.load %arg7[%c0_564, %c0_565] : memref<1x160xf32, #tpu.memory_space<vmem>>, vector<1x160xf32>
    %540 = vector.broadcast %539 : vector<1x160xf32> to vector<10x160xf32>
    %541 = arith.addf %538, %540 : vector<10x160xf32>
    %cst_566 = arith.constant 5.000000e-01 : f32
    %542 = vector.broadcast %cst_566 : f32 to vector<10x160xf32>
    %543 = arith.mulf %542, %541 : vector<10x160xf32>
    %544 = math.tanh %543 : vector<10x160xf32>
    %cst_567 = arith.constant 5.000000e-01 : f32
    %545 = vector.broadcast %cst_567 : f32 to vector<10x160xf32>
    %546 = arith.mulf %545, %544 : vector<10x160xf32>
    %cst_568 = arith.constant 5.000000e-01 : f32
    %547 = vector.broadcast %cst_568 : f32 to vector<10x160xf32>
    %548 = arith.addf %546, %547 : vector<10x160xf32>
    %c0_569 = arith.constant 0 : index
    %c0_570 = arith.constant 0 : index
    %549 = vector.load %arg8[%c0_569, %c0_570] : memref<5x10xbf16, #tpu.memory_space<vmem>>, vector<5x10xbf16>
    %550 = arith.truncf %548 : vector<10x160xf32> to vector<10x160xbf16>
    %cst_571 = arith.constant dense<0.000000e+00> : vector<5x160xf32>
    %551 = tpu.matmul %549, %550, %cst_571 {dimension_numbers = #tpu.dot_dimension_numbers<[1], [0], [0], [1], [0, 0, 1, 1], [], []>} : vector<5x10xbf16>, vector<10x160xbf16>, vector<5x160xf32> -> vector<5x160xf32>
    %552 = vector.extract_strided_slice %551 {offsets = [0, 0], sizes = [1, 160], strides = [1, 1]} : vector<5x160xf32> to vector<1x160xf32>
    %c7_572 = arith.constant 7 : index
    %c0_573 = arith.constant 0 : index
    %553 = vector.load %arg19[%c7_572, %c0_573] : memref<8x800xf32, #tpu.memory_space<vmem>>, vector<1x160xf32>
    tpu.vector_store %arg19[%c7_572, %c0_573], %552 {strides = array<i32>} : memref<8x800xf32, #tpu.memory_space<vmem>>, vector<1x160xf32>,
    %554 = vector.extract_strided_slice %551 {offsets = [1, 0], sizes = [1, 160], strides = [1, 1]} : vector<5x160xf32> to vector<1x160xf32>
    %c7_574 = arith.constant 7 : index
    %c160_575 = arith.constant 160 : index
    %555 = vector.load %arg19[%c7_574, %c160_575] : memref<8x800xf32, #tpu.memory_space<vmem>>, vector<1x160xf32>
    tpu.vector_store %arg19[%c7_574, %c160_575], %554 {strides = array<i32>} : memref<8x800xf32, #tpu.memory_space<vmem>>, vector<1x160xf32>,
    %556 = vector.extract_strided_slice %551 {offsets = [2, 0], sizes = [1, 160], strides = [1, 1]} : vector<5x160xf32> to vector<1x160xf32>
    %c7_576 = arith.constant 7 : index
    %c320_577 = arith.constant 320 : index
    %557 = vector.load %arg19[%c7_576, %c320_577] : memref<8x800xf32, #tpu.memory_space<vmem>>, vector<1x160xf32>
    tpu.vector_store %arg19[%c7_576, %c320_577], %556 {strides = array<i32>} : memref<8x800xf32, #tpu.memory_space<vmem>>, vector<1x160xf32>,
    %558 = vector.extract_strided_slice %551 {offsets = [3, 0], sizes = [1, 160], strides = [1, 1]} : vector<5x160xf32> to vector<1x160xf32>
    %c7_578 = arith.constant 7 : index
    %c480_579 = arith.constant 480 : index
    %559 = vector.load %arg19[%c7_578, %c480_579] : memref<8x800xf32, #tpu.memory_space<vmem>>, vector<1x160xf32>
    tpu.vector_store %arg19[%c7_578, %c480_579], %558 {strides = array<i32>} : memref<8x800xf32, #tpu.memory_space<vmem>>, vector<1x160xf32>,
    %560 = vector.extract_strided_slice %551 {offsets = [4, 0], sizes = [1, 160], strides = [1, 1]} : vector<5x160xf32> to vector<1x160xf32>
    %c7_580 = arith.constant 7 : index
    %c640_581 = arith.constant 640 : index
    %561 = vector.load %arg19[%c7_580, %c640_581] : memref<8x800xf32, #tpu.memory_space<vmem>>, vector<1x160xf32>
    tpu.vector_store %arg19[%c7_580, %c640_581], %560 {strides = array<i32>} : memref<8x800xf32, #tpu.memory_space<vmem>>, vector<1x160xf32>,
    %c0_582 = arith.constant 0 : index
    %c0_583 = arith.constant 0 : index
    %562 = vector.load %arg19[%c0_582, %c0_583] : memref<8x800xf32, #tpu.memory_space<vmem>>, vector<8x800xf32>
    %563 = arith.truncf %562 : vector<8x800xf32> to vector<8x800xbf16>
    %c0_584 = arith.constant 0 : index
    %c0_585 = arith.constant 0 : index
    %564 = vector.load %arg9[%c0_584, %c0_585] : memref<800x120xbf16, #tpu.memory_space<vmem>>, vector<800x120xbf16>
    %cst_586 = arith.constant dense<0.000000e+00> : vector<8x120xf32>
    %565 = tpu.matmul %563, %564, %cst_586 {dimension_numbers = #tpu.dot_dimension_numbers<[1], [0], [0], [1], [0, 0, 1, 1], [], []>} : vector<8x800xbf16>, vector<800x120xbf16>, vector<8x120xf32> -> vector<8x120xf32>
    %c0_587 = arith.constant 0 : index
    %c0_588 = arith.constant 0 : index
    %566 = vector.load %arg10[%c0_587, %c0_588] : memref<1x120xf32, #tpu.memory_space<vmem>>, vector<1x120xf32>
    %567 = vector.broadcast %566 : vector<1x120xf32> to vector<8x120xf32>
    %568 = arith.addf %565, %567 : vector<8x120xf32>
    %cst_589 = arith.constant 5.000000e-01 : f32
    %569 = vector.broadcast %cst_589 : f32 to vector<8x120xf32>
    %570 = arith.mulf %569, %568 : vector<8x120xf32>
    %571 = math.tanh %570 : vector<8x120xf32>
    %cst_590 = arith.constant 5.000000e-01 : f32
    %572 = vector.broadcast %cst_590 : f32 to vector<8x120xf32>
    %573 = arith.mulf %572, %571 : vector<8x120xf32>
    %cst_591 = arith.constant 5.000000e-01 : f32
    %574 = vector.broadcast %cst_591 : f32 to vector<8x120xf32>
    %575 = arith.addf %573, %574 : vector<8x120xf32>
    %576 = arith.truncf %575 : vector<8x120xf32> to vector<8x120xbf16>
    %c0_592 = arith.constant 0 : index
    %c0_593 = arith.constant 0 : index
    %577 = vector.load %arg11[%c0_592, %c0_593] : memref<120x84xbf16, #tpu.memory_space<vmem>>, vector<120x84xbf16>
    %cst_594 = arith.constant dense<0.000000e+00> : vector<8x84xf32>
    %578 = tpu.matmul %576, %577, %cst_594 {dimension_numbers = #tpu.dot_dimension_numbers<[1], [0], [0], [1], [0, 0, 1, 1], [], []>} : vector<8x120xbf16>, vector<120x84xbf16>, vector<8x84xf32> -> vector<8x84xf32>
    %c0_595 = arith.constant 0 : index
    %c0_596 = arith.constant 0 : index
    %579 = vector.load %arg12[%c0_595, %c0_596] : memref<1x84xf32, #tpu.memory_space<vmem>>, vector<1x84xf32>
    %580 = vector.broadcast %579 : vector<1x84xf32> to vector<8x84xf32>
    %581 = arith.addf %578, %580 : vector<8x84xf32>
    %cst_597 = arith.constant 5.000000e-01 : f32
    %582 = vector.broadcast %cst_597 : f32 to vector<8x84xf32>
    %583 = arith.mulf %582, %581 : vector<8x84xf32>
    %584 = math.tanh %583 : vector<8x84xf32>
    %cst_598 = arith.constant 5.000000e-01 : f32
    %585 = vector.broadcast %cst_598 : f32 to vector<8x84xf32>
    %586 = arith.mulf %585, %584 : vector<8x84xf32>
    %cst_599 = arith.constant 5.000000e-01 : f32
    %587 = vector.broadcast %cst_599 : f32 to vector<8x84xf32>
    %588 = arith.addf %586, %587 : vector<8x84xf32>
    %589 = arith.truncf %588 : vector<8x84xf32> to vector<8x84xbf16>
    %c0_600 = arith.constant 0 : index
    %c0_601 = arith.constant 0 : index
    %590 = vector.load %arg13[%c0_600, %c0_601] : memref<84x128xbf16, #tpu.memory_space<vmem>>, vector<84x128xbf16>
    %cst_602 = arith.constant dense<0.000000e+00> : vector<8x128xf32>
    %591 = tpu.matmul %589, %590, %cst_602 {dimension_numbers = #tpu.dot_dimension_numbers<[1], [0], [0], [1], [0, 0, 1, 1], [], []>} : vector<8x84xbf16>, vector<84x128xbf16>, vector<8x128xf32> -> vector<8x128xf32>
    %c0_603 = arith.constant 0 : index
    %c0_604 = arith.constant 0 : index
    %592 = vector.load %arg14[%c0_603, %c0_604] : memref<1x128xf32, #tpu.memory_space<vmem>>, vector<1x128xf32>
    %593 = vector.broadcast %592 : vector<1x128xf32> to vector<8x128xf32>
    %594 = arith.addf %591, %593 : vector<8x128xf32>
    %c0_605 = arith.constant 0 : index
    %c0_606 = arith.constant 0 : index
    %595 = vector.load %arg15[%c0_605, %c0_606] : memref<8x128xf32, #tpu.memory_space<vmem>>, vector<8x128xf32>
    tpu.vector_store %arg15[%c0_605, %c0_606], %594 {strides = array<i32>} : memref<8x128xf32, #tpu.memory_space<vmem>>, vector<8x128xf32>,
    return
  }
  func.func @transform_0(%arg0: i32) -> (i32, i32, i32, i32) {
    %c0_i32 = arith.constant 0 : i32
    %c0_i32_0 = arith.constant 0 : i32
    %c0_i32_1 = arith.constant 0 : i32
    %c0_i32_2 = arith.constant 0 : i32
    return %arg0, %c0_i32, %c0_i32_0, %c0_i32_1 : i32, i32, i32, i32
  }
  func.func @transform_1(%arg0: i32) -> (i32, i32) {
    %c0_i32 = arith.constant 0 : i32
    %c0_i32_0 = arith.constant 0 : i32
    %c0_i32_1 = arith.constant 0 : i32
    return %c0_i32, %c0_i32_0 : i32, i32
  }
  func.func @transform_2(%arg0: i32) -> (i32, i32) {
    %c0_i32 = arith.constant 0 : i32
    %c0_i32_0 = arith.constant 0 : i32
    %c0_i32_1 = arith.constant 0 : i32
    return %c0_i32, %c0_i32_0 : i32, i32
  }
  func.func @transform_3(%arg0: i32) -> (i32, i32) {
    %c0_i32 = arith.constant 0 : i32
    %c0_i32_0 = arith.constant 0 : i32
    %c0_i32_1 = arith.constant 0 : i32
    return %c0_i32, %c0_i32_0 : i32, i32
  }
  func.func @transform_4(%arg0: i32) -> (i32, i32) {
    %c0_i32 = arith.constant 0 : i32
    %c0_i32_0 = arith.constant 0 : i32
    %c0_i32_1 = arith.constant 0 : i32
    return %c0_i32, %c0_i32_0 : i32, i32
  }
  func.func @transform_5(%arg0: i32) -> (i32, i32) {
    %c0_i32 = arith.constant 0 : i32
    %c0_i32_0 = arith.constant 0 : i32
    %c0_i32_1 = arith.constant 0 : i32
    return %c0_i32, %c0_i32_0 : i32, i32
  }
  func.func @transform_6(%arg0: i32) -> (i32, i32) {
    %c0_i32 = arith.constant 0 : i32
    %c0_i32_0 = arith.constant 0 : i32
    %c0_i32_1 = arith.constant 0 : i32
    return %c0_i32, %c0_i32_0 : i32, i32
  }
  func.func @transform_7(%arg0: i32) -> (i32, i32) {
    %c0_i32 = arith.constant 0 : i32
    %c0_i32_0 = arith.constant 0 : i32
    %c0_i32_1 = arith.constant 0 : i32
    return %c0_i32, %c0_i32_0 : i32, i32
  }
  func.func @transform_8(%arg0: i32) -> (i32, i32) {
    %c0_i32 = arith.constant 0 : i32
    %c0_i32_0 = arith.constant 0 : i32
    %c0_i32_1 = arith.constant 0 : i32
    return %c0_i32, %c0_i32_0 : i32, i32
  }
  func.func @transform_9(%arg0: i32) -> (i32, i32) {
    %c0_i32 = arith.constant 0 : i32
    %c0_i32_0 = arith.constant 0 : i32
    %c0_i32_1 = arith.constant 0 : i32
    return %c0_i32, %c0_i32_0 : i32, i32
  }
  func.func @transform_10(%arg0: i32) -> (i32, i32) {
    %c0_i32 = arith.constant 0 : i32
    %c0_i32_0 = arith.constant 0 : i32
    %c0_i32_1 = arith.constant 0 : i32
    return %c0_i32, %c0_i32_0 : i32, i32
  }
  func.func @transform_11(%arg0: i32) -> (i32, i32) {
    %c0_i32 = arith.constant 0 : i32
    %c0_i32_0 = arith.constant 0 : i32
    %c0_i32_1 = arith.constant 0 : i32
    return %c0_i32, %c0_i32_0 : i32, i32
  }
  func.func @transform_12(%arg0: i32) -> (i32, i32) {
    %c0_i32 = arith.constant 0 : i32
    %c0_i32_0 = arith.constant 0 : i32
    %c0_i32_1 = arith.constant 0 : i32
    return %c0_i32, %c0_i32_0 : i32, i32
  }
  func.func @transform_13(%arg0: i32) -> (i32, i32) {
    %c0_i32 = arith.constant 0 : i32
    %c0_i32_0 = arith.constant 0 : i32
    %c0_i32_1 = arith.constant 0 : i32
    return %c0_i32, %c0_i32_0 : i32, i32
  }
  func.func @transform_14(%arg0: i32) -> (i32, i32) {
    %c0_i32 = arith.constant 0 : i32
    %c0_i32_0 = arith.constant 0 : i32
    return %arg0, %c0_i32 : i32, i32
  }
}

</mosaic_0001>

<bundles_post_ra>
// kernel: lenet_forward.1
= control target key start
LH: loop header
LB: loop body
LE: loop exit
PB: predicated region body
PF: predicated region fallthrough
CT: control target
= control target key end

     0   :  { %vm48_vm0 = vcmask 261120   ;;  %v12630_v2 = vmov 0.0   ;;  %s16265_s17 = smov 2   ;;  %vm16273_vm1 = vcmask 244752   ;;  %vm16271_vm2 = vcmask 240656   ;;  %s16288_s24 = smov 32   ;;  %s16235_s0 = inlined_call_operand.vmem [shape: f32[8,1,28,28], index: 0, kind: input, shape index: {}]   ;;  %s16236_s1 = inlined_call_operand.vmem [shape: bf16[160,168], index: 1, kind: input, shape index: {}]   ;;  %s16237_s3 = inlined_call_operand.vmem [shape: bf16[14,28], index: 3, kind: input, shape index: {}]   ;;  %s16238_s4 = inlined_call_operand.vmem [shape: bf16[168,84], index: 4, kind: input, shape index: {}]   ;;  %s16239_s2 = inlined_call_operand.vmem [shape: f32[1,168], index: 2, kind: input, shape index: {}]   ;;  %s16240_s5 = inlined_call_operand.vmem [shape: bf16[420,160], index: 5, kind: input, shape index: {}]   ;;  %s16241_s6 = inlined_call_operand.vmem [shape: f32[1,160], index: 6, kind: input, shape index: {}]   ;;  %s16242_s7 = inlined_call_operand.vmem [shape: bf16[5,10], index: 7, kind: input, shape index: {}]   ;;  %s16243_s8 = inlined_call_operand.vmem [shape: bf16[800,120], index: 8, kind: input, shape index: {}]   ;;  %s16244_s10 = inlined_call_operand.vmem [shape: bf16[120,84], index: 10, kind: input, shape index: {}]   ;;  %s16245_s12 = inlined_call_operand.vmem [shape: bf16[84,128], index: 12, kind: input, shape index: {}]   ;;  %s16246_s9 = inlined_call_operand.vmem [shape: f32[1,120], index: 9, kind: input, shape index: {}]   ;;  %s16247_s11 = inlined_call_operand.vmem [shape: f32[1,84], index: 11, kind: input, shape index: {}]   ;;  %s16248_s13 = inlined_call_operand.vmem [shape: f32[1,128], index: 13, kind: input, shape index: {}]   ;;  %s16249_s14 = inlined_call_operand.vmem [shape: f32[8,128], index: 14, kind: output, shape index: {}]  }
   0x1   :  { %16290 = sst [smem:[#allocation6_spill]] %s16248_s13  ;;  %v53_v0 = vld [vmem:[%s16235_s0] sm:$0xff]  ;;  %v55_v1 = vld [vmem:[%s16235_s0 + $0x10] sm:$0xff]  ;;  %49 = vst.msk [vmem:[#allocation2] sm:$0xff] %vm48_vm0, %v12630_v2  ;;  %50 = vst.msk [vmem:[#allocation2 + $0x8] sm:$0xff] %vm48_vm0, %v12630_v2  ;;  %vm16272_vm3 = vcmask 257024  }
   0x2   :  { %16291 = sst [smem:[#allocation7_spill]] %s16249_s14  ;;  %51 = vst.msk [vmem:[#allocation2 + $0x10] sm:$0xff] %vm48_vm0, %v12630_v2  ;;  %52 = vst.msk [vmem:[#allocation2 + $0x18] sm:$0xff] %vm48_vm0, %v12630_v2  ;;  %61 = vrot.lane.b32.xlu0 %v53_v0, %s16265_s17  ;;  %65 = vrot.lane.b32.xlu1 %v55_v1, %s16265_s17  ;;  %v54_v3 = vld [vmem:[%s16235_s0 + $0x8] sm:$0xff]  ;;  %v56_v4 = vld [vmem:[%s16235_s0 + $0x18] sm:$0xf] }
   0x3   :  { %v11395_v5 = vld [vmem:[%s16236_s1 + $0x4] ss:$8 sps:$4 sm:$0xff]   ;;  %v11397_v6 = vld [vmem:[%s16236_s1] ss:$8 sps:$4 sm:$0xff]   ;;  %v11398_v7 = vld [vmem:[%s16236_s1 + $0x14] ss:$8 sps:$4 sm:$0xff]  }
   0x4   :  { %324 = vmatprep.subr.bf16.mxu0 %v11395_v5  ;;  %v11400_v8 = vld [vmem:[%s16236_s1 + $0x10] ss:$8 sps:$4 sm:$0xff]   ;;  %v11401_v9 = vld [vmem:[%s16236_s1 + $0x24] ss:$8 sps:$4 sm:$0xff]   ;;  %v11403_v10 = vld [vmem:[%s16236_s1 + $0x20] ss:$8 sps:$4 sm:$0xff]  }
   0x5   :  { %325 = vmatpush1.bf16.msra.mxu0 %v11397_v6  ;;  %v11404_v11 = vld [vmem:[%s16236_s1 + $0x34] ss:$8 sps:$4 sm:$0xff]   ;;  %v11406_v12 = vld [vmem:[%s16236_s1 + $0x30] ss:$8 sps:$4 sm:$0xff]   ;;  %v11407_v13 = vld [vmem:[%s16236_s1 + $0x44] ss:$8 sps:$4 sm:$0xff]  }
   0x6   :  { %63 = vrot.lane.b32.xlu0 %v54_v3, %s16265_s17  ;;  %67 = vrot.lane.b32.xlu1 %v56_v4, %s16265_s17  ;;  %v11409_v14 = vld [vmem:[%s16236_s1 + $0x40] ss:$8 sps:$4 sm:$0xff]   ;;  %v11410_v15 = vld [vmem:[%s16236_s1 + $0x54] ss:$8 sps:$4 sm:$0xff]   ;;  %s16286_s29 = smov 64   ;;  %s16284_s30 = smov 96  }
   0x7   :  { %326 = vmatprep.subr.bf16.mxu0 %v11398_v7  ;;  %v11412_v16 = vld [vmem:[%s16236_s1 + $0x50] ss:$8 sps:$4 sm:$0xff]   ;;  %v11413_v19 = vld [vmem:[%s16236_s1 + $0x64] ss:$8 sps:$4 sm:$0xff]   ;;  %v11415_v20 = vld [vmem:[%s16236_s1 + $0x60] ss:$8 sps:$4 sm:$0xff]  }
   0x8   :  { %v11416_v23 = vld [vmem:[%s16236_s1 + $0x74] ss:$8 sps:$4 sm:$0xff]   ;;  %v11418_v24 = vld [vmem:[%s16236_s1 + $0x70] ss:$8 sps:$4 sm:$0xff]   ;;  %v11419_v27 = vld [vmem:[%s16236_s1 + $0x84] ss:$8 sps:$4 sm:$0xff]  }
   0x9   :  { %327 = vmatpush1.bf16.msra.mxu0 %v11400_v8  ;;  %v11421_v28 = vld [vmem:[%s16236_s1 + $0x80] ss:$8 sps:$4 sm:$0xff]   ;;  %v11422_v40 = vld [vmem:[%s16236_s1 + $0x94] ss:$8 sps:$4 sm:$0xff]   ;;  %v11424_v41 = vld [vmem:[%s16236_s1 + $0x90] ss:$8 sps:$4 sm:$0xff]  }
   0xa   :  { %328 = vmatprep.subr.bf16.mxu0 %v11401_v9  ;;  %vm108_vm4 = vcmask 523520   ;;  %vm134_vm5 = vcmask 785920   ;;  %vm16260_vm6 = vcmask 1048320   ;;  %vm16259_vm7 = vcmask 519424   ;;  %s16282_s20 = smov 84   ;;  %s16278_s26 = smov 40  }
   0xb   :  { %vm16258_vm8 = vcmask 781824   ;;  %vm16251_vm9 = vcmask 1044224   ;;  %vm16256_vm10 = vcmask 1045504   ;;  %vm16250_vm11 = vcmask 228352   ;;  %s16276_s18 = smov 124   ;;  %s16267_s19 = smov 80  }
   0xc   :  { %vm16255_vm12 = vcmask 1043456   ;;  %vm560_vm13 = vcmask 326656   ;;  %vm16254_vm14 = vcmask 687104   ;;  %vm16253_vm15 = vcmask 680960   ;;  %s16313_s25 = smov 2   ;;  %s16346_s15 = smov 40  }
   0xd   :  { %329 = vmatpush1.bf16.msra.mxu0 %v11403_v10  ;;  %v12635_v10 = vmov 0   ;;  %s16364_s22 = smov 96   ;;  %s16381_s27 = smov 84  }
   0xe   :  { %330 = vmatprep.subr.bf16.mxu0 %v11404_v11  ;;  %463 = vmatprep.mubr.bf16.mxu1 %v12635_v10  ;;  %v208_v11 = vlaneseq  ;;  %s16400_s21 = smov 32   ;;  %s16547_s16 = sld [smem:[#allocation6_spill]] }
  0x11   :  { %331 = vmatpush1.bf16.msra.mxu0 %v11406_v12  ;;  %v12841_v12 = vshrl.u32 %v208_v11, 7 }
  0x12   :  { %332 = vmatprep.subr.bf16.mxu0 %v11407_v13 }
  0x13   :  { %v12844_v13 = vsub.s32 0, %v12841_v12 }
  0x15   :  { %333 = vmatpush1.bf16.msra.mxu0 %v11409_v14  ;;  %v206_v14 = vld [vmem:[%s16239_s2] sm:$0x3] }
  0x16   :  { %334 = vmatprep.subr.bf16.mxu0 %v11410_v15  ;;  %v12850_v15 = vsub.s32 1, %v12841_v12 }
  0x19   :  { %335 = vmatpush1.bf16.msra.mxu0 %v11412_v16  ;;  %v211_v16 = vrot.slane %v206_v14, %v12844_v13 }
  0x1a   :  { %336 = vmatprep.subr.bf16.mxu0 %v11413_v19 }
  0x1d   :  { %337 = vmatpush1.bf16.msra.mxu0 %v11415_v20 }
  0x1e   :  { %338 = vmatprep.subr.bf16.mxu0 %v11416_v23 }
  0x21   :  { %339 = vmatpush1.bf16.msra.mxu0 %v11418_v24 }
  0x22   :  { %340 = vmatprep.subr.bf16.mxu0 %v11419_v27 }
  0x25   :  { %341 = vmatpush1.bf16.msra.mxu0 %v11421_v28 }
  0x26   :  { %342 = vmatprep.subr.bf16.mxu0 %v11422_v40 }
  0x29   :  { %343 = vmatpush1.bf16.msra.mxu0 %v11424_v41 }
  0x74   :  { %v62_v17 = vpop.permute.xlu0 %61  ;;  %v66_v18 = vpop.permute.xlu1 %65 }
  0x75   :  { %74 = vst.msk [vmem:[#allocation2 + $0x2] sm:$0xff] %vm16273_vm1, %v62_v17  ;;  %76 = vst.msk [vmem:[#allocation2 + $0x12] sm:$0xff] %vm16273_vm1, %v66_v18  ;;  %v215_v17 = vrot.slane %v206_v14, %v12850_v15  ;;  %v11427_v14 = vld [vmem:[%s16238_s4 + $0x8] sm:$0xff]  }
  0x78   :  { %v64_v21 = vpop.permute.xlu0 %63  ;;  %v68_v22 = vpop.permute.xlu1 %67 }
  0x79   :  { %75 = vst.msk [vmem:[#allocation2 + $0xa] sm:$0xff] %vm16273_vm1, %v64_v21 }
  0x7a   :  { %78 = vst.msk [vmem:[#allocation2 + $0x1a] sm:$0xf] %vm16271_vm2, %v68_v22 }
  0x7c   :  { %v88_v25 = vld [vmem:[#allocation2 + $0x1] sm:$0xff]  ;;  %v116_v47 = vld [vmem:[#allocation2 + $0x12] sm:$0xff] }
  0x7d   :  { %96 = vrot.lane.b32.xlu0 %v88_v25, %s16288_s24  ;;  %v79_v26 = vld [vmem:[#allocation2] sm:$0xff] }
  0x7e   :  { %83 = vst.msk [vmem:[#allocation3] sm:$0xff] %vm48_vm0, %v79_v26  ;;  %v114_v29 = vld [vmem:[#allocation2 + $0x2] sm:$0xff] }
  0x80   :  { %v80_v30 = vld [vmem:[#allocation2 + $0x8] sm:$0xff]  ;;  %v81_v31 = vld [vmem:[#allocation2 + $0x10] sm:$0xff] }
  0x81   :  { %v89_v32 = vld [vmem:[#allocation2 + $0x9] sm:$0xff]  ;;  %84 = vst.msk [vmem:[#allocation3 + $0x10] sm:$0xff] %vm48_vm0, %v80_v30  ;;  %85 = vst.msk [vmem:[#allocation3 + $0x20] sm:$0xff] %vm48_vm0, %v81_v31  ;;  %122 = vrot.lane.b32.xlu0 %v114_v29, %s16286_s29  ;;  %v82_v35 = vld [vmem:[#allocation2 + $0x18] sm:$0xf] }
  0x82   :  { %98 = vrot.lane.b32.xlu1 %v89_v32, %s16288_s24  ;;  %v166_v33 = vld [vmem:[#allocation2 + $0x4] sm:$0xff]  ;;  %v167_v34 = vld [vmem:[#allocation2 + $0xc] sm:$0xff]  ;;  %v168_v36 = vld [vmem:[#allocation2 + $0x14] sm:$0xff]  ;;  %87 = vst.msk [vmem:[#allocation3 + $0x30] sm:$0xf] %vm16272_vm3, %v82_v35 }
  0x83   :  { %170 = vst.msk [vmem:[#allocation3 + $0x8] sm:$0xff] %vm48_vm0, %v166_v33  ;;  %171 = vst.msk [vmem:[#allocation3 + $0x18] sm:$0xff] %vm48_vm0, %v167_v34  ;;  %v140_v37 = vld [vmem:[#allocation2 + $0x3] sm:$0xff]  ;;  %v169_v38 = vld [vmem:[#allocation2 + $0x1c] sm:$0xf] }
  0x84   :  { %172 = vst.msk [vmem:[#allocation3 + $0x28] sm:$0xff] %vm48_vm0, %v168_v36  ;;  %v115_v39 = vld [vmem:[#allocation2 + $0xa] sm:$0xff]  ;;  %v91_v48 = vld [vmem:[#allocation2 + $0x19] sm:$0xf] }
  0x85   :  { %173 = vst.msk [vmem:[#allocation3 + $0x38] sm:$0xf] %vm16272_vm3, %v169_v38  ;;  %148 = vrot.lane.b32.xlu0 %v140_v37, %s16284_s30  ;;  %v90_v42 = vld [vmem:[#allocation2 + $0x11] sm:$0xff]  ;;  %v117_v50 = vld [vmem:[#allocation2 + $0x1a] sm:$0xf] }
  0x86   :  { %124 = vrot.lane.b32.xlu1 %v115_v39, %s16286_s29  ;;  %v141_v43 = vld [vmem:[#allocation2 + $0xb] sm:$0xff]  ;;  %v142_v49 = vld [vmem:[#allocation2 + $0x13] sm:$0xff]  ;;  %v143_v51 = vld [vmem:[#allocation2 + $0x1b] sm:$0xf] }
  0x89   :  { %100 = vrot.lane.b32.xlu0 %v90_v42, %s16288_s24 }
  0x8a   :  { %150 = vrot.lane.b32.xlu1 %v141_v43, %s16284_s30  ;;  %v175_v44 = vld [vmem:[#allocation3 + $0x8] sm:$0xff]  ;;  %v177_v45 = vld [vmem:[#allocation3 + $0x18] sm:$0xff] }
  0x8b   :  { %v183_v46 = vpack.c.bf16 %v177_v45, %v175_v44  ;;  %v179_v61 = vld [vmem:[#allocation3 + $0x28] sm:$0xff] }
  0x8c   :  { %v181_v62 = vld [vmem:[#allocation3 + $0x38] sm:$0xf] }
  0x8d   :  { %10352 = vmatprep.mubr.msk.bf16.mxu0 %vm48_vm0, %v183_v46  ;;  %126 = vrot.lane.b32.xlu0 %v116_v47, %s16286_s29  ;;  %v185_v5 = vpack.c.bf16 %v181_v62, %v179_v61 }
  0x8e   :  { %102 = vrot.lane.b32.xlu1 %v91_v48, %s16288_s24 }
  0x91   :  { %152 = vrot.lane.b32.xlu0 %v142_v49, %s16284_s30 }
  0x92   :  { %128 = vrot.lane.b32.xlu1 %v117_v50, %s16286_s29 }
  0x96   :  { %154 = vrot.lane.b32.xlu1 %v143_v51, %s16284_s30 }
  0xef   :  { %v97_v52 = vpop.permute.xlu0 %96 }
  0xf0   :  { %109 = vst.msk [vmem:[#allocation3] sm:$0xff] %vm108_vm4, %v97_v52 }
  0xf3   :  { %v123_v54 = vpop.permute.xlu0 %122 }
  0xf4   :  { %v99_v53 = vpop.permute.xlu1 %98  ;;  %135 = vst.msk [vmem:[#allocation3] sm:$0xff] %vm134_vm5, %v123_v54 }
  0xf5   :  { %110 = vst.msk [vmem:[#allocation3 + $0x10] sm:$0xff] %vm108_vm4, %v99_v53 }
  0xf7   :  { %v149_v56 = vpop.permute.xlu0 %148 }
  0xf8   :  { %v125_v55 = vpop.permute.xlu1 %124  ;;  %161 = vst.msk [vmem:[#allocation3] sm:$0xff] %vm16260_vm6, %v149_v56 }
  0xf9   :  { %136 = vst.msk [vmem:[#allocation3 + $0x10] sm:$0xff] %vm134_vm5, %v125_v55 }
  0xfb   :  { %v101_v58 = vpop.permute.xlu0 %100 }
  0xfc   :  { %v151_v57 = vpop.permute.xlu1 %150  ;;  %111 = vst.msk [vmem:[#allocation3 + $0x20] sm:$0xff] %vm108_vm4, %v101_v58 }
  0xfd   :  { %162 = vst.msk [vmem:[#allocation3 + $0x10] sm:$0xff] %vm16260_vm6, %v151_v57 }
  0xff   :  { %v127_v59 = vpop.permute.xlu0 %126  ;;  %v174_v0 = vld [vmem:[#allocation3] sm:$0xff] }
 0x100   :  { %v103_v60 = vpop.permute.xlu1 %102  ;;  %137 = vst.msk [vmem:[#allocation3 + $0x20] sm:$0xff] %vm134_vm5, %v127_v59 }
 0x101   :  { %113 = vst.msk [vmem:[#allocation3 + $0x30] sm:$0xf] %vm16259_vm7, %v103_v60  ;;  %vm655_vm7 = vcmask 1048544  }
 0x103   :  { %v153_v63 = vpop.permute.xlu0 %152 }
 0x104   :  { %v176_v1 = vld [vmem:[#allocation3 + $0x10] sm:$0xff]  ;;  %v129_v3 = vpop.permute.xlu1 %128  ;;  %163 = vst.msk [vmem:[#allocation3 + $0x20] sm:$0xff] %vm16260_vm6, %v153_v63  ;;  %vm16281_vm6 = vcmask 654336  }
 0x105   :  { %v182_v4 = vpack.c.bf16 %v176_v1, %v174_v0  ;;  %139 = vst.msk [vmem:[#allocation3 + $0x30] sm:$0xf] %vm16258_vm8, %v129_v3  ;;  %vm661_vm8 = vcmask 648192  }
 0x107   :  { %357 = vmatmul.mubr.bf16.vlgmr.msra.gmra.mrb[0].mxu0 %v182_v4 }
 0x108   :  { %10353 = vmatprep.mubr.msk.bf16.mxu0 %vm48_vm0, %v185_v5  ;;  %v155_v6 = vpop.permute.xlu1 %154 }
 0x109   :  { %165 = vst.msk [vmem:[#allocation3 + $0x30] sm:$0xf] %vm16251_vm9, %v155_v6  ;;  %vm16257_vm9 = vcmask 1044480  }
 0x10b   :  { %v178_v8 = vld [vmem:[#allocation3 + $0x20] sm:$0xff] }
 0x110   :  { %v180_v7 = vld [vmem:[#allocation3 + $0x30] sm:$0xf] }
 0x111   :  { %v184_v9 = vpack.c.bf16 %v180_v7, %v178_v8  ;;  %v11425_v8 = vld [vmem:[%s16237_s3] sm:$0x7f]  }
 0x113   :  { %367 = vmatmul.mubr.bf16.gmra.mrb[4].mxu0 %v184_v9  ;;  %v11426_v9 = vld [vmem:[%s16238_s4] sm:$0xff]  }
 0x1da   :  { %v358_v18 = vpop.f32.mrb[0].mxu0 }
 0x1db   :  { %v359_v19 = vadd.f32 %v358_v18, %v211_v16  ;;  %v360_v20 = vpop.f32.mrb[1].mxu0  ;;  %v11430_v18 = vld [vmem:[%s16238_s4 + $0x20] sm:$0xff]  }
 0x1dc   :  { %v361_v21 = vadd.f32 %v360_v20, %v215_v17  ;;  %v362_v22 = vpop.f32.mrb[2].mxu0  ;;  %v11432_v20 = vld [vmem:[%s16238_s4 + $0x30] sm:$0xff]  }
 0x1dd   :  { %v377_v23 = vmul.f32 0.5, %v359_v19  ;;  %v363_v24 = vadd.f32 %v362_v22, %v211_v16  ;;  %v364_v25 = vpop.f32.mrb[3].mxu0  ;;  %v11431_v19 = vld [vmem:[%s16238_s4 + $0x28] sm:$0xff]   ;;  %v11434_v22 = vld [vmem:[%s16238_s4 + $0x40] sm:$0xff]  }
 0x1de   :  { %v378_v26 = vmul.f32 0.5, %v361_v21  ;;  %v365_v27 = vadd.f32 %v364_v25, %v215_v17  ;;  %v11433_v21 = vld [vmem:[%s16238_s4 + $0x38] sm:$0xff]  }
 0x1df   :  { %12434 = vtanh.f32 %v377_v23  ;;  %v379_v28 = vmul.f32 0.5, %v363_v24  ;;  %v11435_v23 = vld [vmem:[%s16238_s4 + $0x48] sm:$0xff]   ;;  %v11436_v24 = vld [vmem:[%s16238_s4 + $0x50] ss:$0 sps:$4 sm:$0xff]  }
 0x1e0   :  { %12436 = vtanh.f32 %v378_v26  ;;  %v380_v29 = vmul.f32 0.5, %v365_v27  ;;  %v566_v25 = vsel %vm16255_vm12, %v11436_v24, 0  ;;  %v10427_v24 = vld [vmem:[%s16235_s0 + $0x20] sm:$0xff] }
 0x1e1   :  { %12438 = vtanh.f32 %v379_v28 }
 0x1e2   :  { %12440 = vtanh.f32 %v380_v29 }
 0x1e6   :  { %v368_v30 = vpop.f32.mrb[4].mxu0 }
 0x1e7   :  { %v369_v31 = vadd.f32 %v368_v30, %v211_v16  ;;  %v370_v32 = vpop.f32.mrb[5].mxu0 }
 0x1e8   :  { %v371_v34 = vadd.f32 %v370_v32, %v215_v17  ;;  %v372_v35 = vpop.f32.mrb[6].mxu0  ;;  %v11437_v32 = vld [vmem:[%s16240_s5] ss:$8 sps:$4 sm:$0xff]  }
 0x1e9   :  { %v12435_v33 = vpop.eup %12434  ;;  %v381_v37 = vmul.f32 0.5, %v369_v31  ;;  %v373_v38 = vadd.f32 %v372_v35, %v211_v16  ;;  %v374_v39 = vpop.f32.mrb[7].mxu0  ;;  %v11428_v16 = vld [vmem:[%s16238_s4 + $0x10] sm:$0xff]  }
 0x1ea   :  { %v12437_v36 = vpop.eup %12436  ;;  %v393_v40 = vmul.f32 0.5, %v12435_v33  ;;  %v382_v42 = vmul.f32 0.5, %v371_v34  ;;  %v375_v43 = vadd.f32 %v374_v39, %v215_v17  ;;  %v11429_v17 = vld [vmem:[%s16238_s4 + $0x18] sm:$0xff]   ;;  %v11439_v33 = vld [vmem:[%s16240_s5 + $0x4] ss:$8 sps:$4 sm:$0xff]  }
 0x1eb   :  { %v12439_v41 = vpop.eup %12438  ;;  %v394_v44 = vmul.f32 0.5, %v12437_v36  ;;  %12442 = vtanh.f32 %v381_v37  ;;  %v383_v46 = vmul.f32 0.5, %v373_v38  ;;  %v11442_v34 = vld [vmem:[%s16240_s5 + $0x14] ss:$8 sps:$4 sm:$0xff]   ;;  %1032 = vmatprep.subr.bf16.mxu0 %v11439_v33  ;;  %v11440_v35 = vld [vmem:[%s16240_s5 + $0x10] ss:$8 sps:$4 sm:$0xff]  }
 0x1ec   :  { %v12441_v45 = vpop.eup %12440  ;;  %v395_v47 = vmul.f32 0.5, %v12439_v41  ;;  %12444 = vtanh.f32 %v382_v42  ;;  %v384_v48 = vmul.f32 0.5, %v375_v43  ;;  %v401_v50 = vadd.f32 0.5, %v393_v40  ;;  %1033 = vmatpush1.bf16.msra.mxu0 %v11437_v32  ;;  %v11445_v36 = vld [vmem:[%s16240_s5 + $0x24] ss:$8 sps:$4 sm:$0xff]  }
 0x1ed   :  { %v396_v49 = vmul.f32 0.5, %v12441_v45  ;;  %12446 = vtanh.f32 %v383_v46  ;;  %v402_v52 = vadd.f32 0.5, %v394_v44  ;;  %1034 = vmatprep.subr.bf16.mxu0 %v11442_v34  ;;  %v11443_v37 = vld [vmem:[%s16240_s5 + $0x20] ss:$8 sps:$4 sm:$0xff]   ;;  %v11448_v38 = vld [vmem:[%s16240_s5 + $0x34] ss:$8 sps:$4 sm:$0xff]  }
 0x1ee   :  { %v403_v51 = vadd.f32 0.5, %v395_v47  ;;  %12448 = vtanh.f32 %v384_v48  ;;  %v11446_v39 = vld [vmem:[%s16240_s5 + $0x30] ss:$8 sps:$4 sm:$0xff]   ;;  %v11451_v40 = vld [vmem:[%s16240_s5 + $0x44] ss:$8 sps:$4 sm:$0xff]  }
 0x1ef   :  { %v404_v53 = vadd.f32 0.5, %v396_v49  ;;  %v11449_v41 = vld [vmem:[%s16240_s5 + $0x40] ss:$8 sps:$4 sm:$0xff]   ;;  %v11454_v42 = vld [vmem:[%s16240_s5 + $0x54] ss:$8 sps:$4 sm:$0xff]  }
 0x1f0   :  { %v411_v54 = vpack.c.bf16 %v403_v51, %v401_v50  ;;  %1035 = vmatpush1.bf16.msra.mxu0 %v11440_v35  ;;  %v11452_v43 = vld [vmem:[%s16240_s5 + $0x50] ss:$8 sps:$4 sm:$0xff]   ;;  %v11457_v44 = vld [vmem:[%s16240_s5 + $0x64] ss:$8 sps:$4 sm:$0xff]   ;;  %v11455_v45 = vld [vmem:[%s16240_s5 + $0x60] ss:$8 sps:$4 sm:$0xff]  }
 0x1f1   :  { %v412_v55 = vpack.c.bf16 %v404_v53, %v402_v52  ;;  %1036 = vmatprep.subr.bf16.mxu0 %v11445_v36  ;;  %v11460_v46 = vld [vmem:[%s16240_s5 + $0x74] ss:$8 sps:$4 sm:$0xff]   ;;  %v11458_v47 = vld [vmem:[%s16240_s5 + $0x70] ss:$8 sps:$4 sm:$0xff]   ;;  %v11463_v48 = vld [vmem:[%s16240_s5 + $0x84] ss:$8 sps:$4 sm:$0xff]  }
 0x1f2   :  { %v11461_v49 = vld [vmem:[%s16240_s5 + $0x80] ss:$8 sps:$4 sm:$0xff]   ;;  %v11466_v50 = vld [vmem:[%s16240_s5 + $0x94] ss:$8 sps:$4 sm:$0xff]   ;;  %v11464_v51 = vld [vmem:[%s16240_s5 + $0x90] ss:$8 sps:$4 sm:$0xff]  }
 0x1f3   :  { %431 = vmatprep.subr.bf16.mxu1 %v412_v55  ;;  %v11469_v52 = vld [vmem:[%s16240_s5 + $0xa4] ss:$8 sps:$4 sm:$0xff]   ;;  %v11467_v53 = vld [vmem:[%s16240_s5 + $0xa0] ss:$8 sps:$4 sm:$0xff]   ;;  %v11470_v55 = vld [vmem:[%s16240_s5 + $0xb0] ss:$8 sps:$4 sm:$0xff]  }
 0x1f4   :  { %432 = vmatpush1.bf16.msra.mxu1 %v411_v54  ;;  %1037 = vmatpush1.bf16.msra.mxu0 %v11443_v37  ;;  %v11472_v54 = vld [vmem:[%s16240_s5 + $0xb4] ss:$8 sps:$4 sm:$0xff]  }
 0x1f5   :  { %v12443_v56 = vpop.eup %12442  ;;  %1038 = vmatprep.subr.bf16.mxu0 %v11448_v38 }
 0x1f6   :  { %v12445_v57 = vpop.eup %12444  ;;  %v397_v58 = vmul.f32 0.5, %v12443_v56  ;;  %v11475_v56 = vld [vmem:[%s16240_s5 + $0xc4] ss:$8 sps:$4 sm:$0xff]  }
 0x1f7   :  { %v12447_v59 = vpop.eup %12446  ;;  %v398_v60 = vmul.f32 0.5, %v12445_v57  ;;  %v11473_v57 = vld [vmem:[%s16240_s5 + $0xc0] ss:$8 sps:$4 sm:$0xff]  }
 0x1f8   :  { %v12449_v61 = vpop.eup %12448  ;;  %v399_v62 = vmul.f32 0.5, %v12447_v59  ;;  %v405_v0 = vadd.f32 0.5, %v397_v58  ;;  %1039 = vmatpush1.bf16.msra.mxu0 %v11446_v39  ;;  %v11476_v58 = vld [vmem:[%s16240_s5 + $0xd0] ss:$8 sps:$4 sm:$0xff]   ;;  %v11478_v59 = vld [vmem:[%s16240_s5 + $0xd4] ss:$8 sps:$4 sm:$0xff]  }
 0x1f9   :  { %v400_v63 = vmul.f32 0.5, %v12449_v61  ;;  %v406_v3 = vadd.f32 0.5, %v398_v60  ;;  %1040 = vmatprep.subr.bf16.mxu0 %v11451_v40  ;;  %v11485_v40 = vld [vmem:[%s16240_s5 + $0x100] ss:$8 sps:$4 sm:$0xff]  }
 0x1fa   :  { %v407_v1 = vadd.f32 0.5, %v399_v62 }
 0x1fb   :  { %v408_v4 = vadd.f32 0.5, %v400_v63 }
 0x1fc   :  { %v413_v5 = vpack.c.bf16 %v407_v1, %v405_v0  ;;  %1041 = vmatpush1.bf16.msra.mxu0 %v11449_v41 }
 0x1fd   :  { %v414_v6 = vpack.c.bf16 %v408_v4, %v406_v3  ;;  %1042 = vmatprep.subr.bf16.mxu0 %v11454_v42  ;;  %v11490_v42 = vld [vmem:[%s16240_s5 + $0x114] ss:$8 sps:$4 sm:$0xff]  }
 0x1fe   :  { %v426_v7 = vsel %vm16256_vm10, %v413_v5, 0 }
 0x1ff   :  { %10355 = vmatprep.subr.msk.bf16.mxu1 %vm16256_vm10, %v414_v6 }
 0x200   :  { %434 = vmatpush1.bf16.msra.mxu1 %v426_v7  ;;  %1043 = vmatpush1.bf16.msra.mxu0 %v11452_v43 }
 0x201   :  { %568 = vmatprep.subr.bf16.mxu1 %v12635_v10  ;;  %1044 = vmatprep.subr.bf16.mxu0 %v11457_v44 }
 0x203   :  { %10356 = vmatmul.mubr.msk.bf16.vlgmr.msra.gmra.mrb[0].mxu1 %vm16250_vm11, %v11425_v8  ;;  %vm16252_vm11 = vcmask 1046528  }
 0x204   :  { %569 = vmatpush1.bf16.msra.mxu1 %v11426_v9  ;;  %1045 = vmatpush1.bf16.msra.mxu0 %v11455_v45  ;;  %v11481_v9 = vld [vmem:[%s16240_s5 + $0xe4] ss:$8 sps:$4 sm:$0xff]   ;;  %v11488_v45 = vld [vmem:[%s16240_s5 + $0x110] ss:$8 sps:$4 sm:$0xff]  }
 0x205   :  { %570 = vmatprep.subr.bf16.mxu1 %v12635_v10  ;;  %1046 = vmatprep.subr.bf16.mxu0 %v11460_v46 }
 0x208   :  { %571 = vmatpush1.bf16.msra.mxu1 %v11427_v14  ;;  %1047 = vmatpush1.bf16.msra.mxu0 %v11458_v47  ;;  %v11493_v47 = vld [vmem:[%s16240_s5 + $0x124] ss:$8 sps:$4 sm:$0xff]  }
 0x209   :  { %572 = vmatprep.subr.bf16.mxu1 %v12635_v10  ;;  %1048 = vmatprep.subr.bf16.mxu0 %v11463_v48  ;;  %v11491_v48 = vld [vmem:[%s16240_s5 + $0x120] ss:$8 sps:$4 sm:$0xff]  }
 0x20c   :  { %573 = vmatpush1.bf16.msra.mxu1 %v11428_v16  ;;  %1049 = vmatpush1.bf16.msra.mxu0 %v11461_v49  ;;  %v11496_v49 = vld [vmem:[%s16240_s5 + $0x134] ss:$8 sps:$4 sm:$0xff]  }
 0x20d   :  { %574 = vmatprep.subr.bf16.mxu1 %v12635_v10  ;;  %1050 = vmatprep.subr.bf16.mxu0 %v11466_v50  ;;  %v11494_v50 = vld [vmem:[%s16240_s5 + $0x130] ss:$8 sps:$4 sm:$0xff]  }
 0x210   :  { %575 = vmatpush1.bf16.msra.mxu1 %v11429_v17  ;;  %1051 = vmatpush1.bf16.msra.mxu0 %v11464_v51  ;;  %v11499_v51 = vld [vmem:[%s16240_s5 + $0x144] ss:$8 sps:$4 sm:$0xff]  }
 0x211   :  { %576 = vmatprep.subr.bf16.mxu1 %v12635_v10  ;;  %1052 = vmatprep.subr.bf16.mxu0 %v11469_v52  ;;  %v11497_v52 = vld [vmem:[%s16240_s5 + $0x140] ss:$8 sps:$4 sm:$0xff]  }
 0x214   :  { %577 = vmatpush1.bf16.msra.mxu1 %v11430_v18  ;;  %1053 = vmatpush1.bf16.msra.mxu0 %v11467_v53  ;;  %v11502_v53 = vld [vmem:[%s16240_s5 + $0x154] ss:$8 sps:$4 sm:$0xff]  }
 0x215   :  { %578 = vmatprep.subr.bf16.mxu1 %v12635_v10  ;;  %1054 = vmatprep.subr.bf16.mxu0 %v11472_v54  ;;  %v11500_v54 = vld [vmem:[%s16240_s5 + $0x150] ss:$8 sps:$4 sm:$0xff]  }
 0x218   :  { %579 = vmatpush1.bf16.msra.mxu1 %v11431_v19  ;;  %1055 = vmatpush1.bf16.msra.mxu0 %v11470_v55  ;;  %v11479_v19 = vld [vmem:[%s16240_s5 + $0xe0] ss:$8 sps:$4 sm:$0xff]   ;;  %v11505_v55 = vld [vmem:[%s16240_s5 + $0x164] ss:$8 sps:$4 sm:$0xff]  }
 0x219   :  { %580 = vmatprep.subr.bf16.mxu1 %v12635_v10  ;;  %1056 = vmatprep.subr.bf16.mxu0 %v11475_v56  ;;  %v11503_v56 = vld [vmem:[%s16240_s5 + $0x160] ss:$8 sps:$4 sm:$0xff]  }
 0x21c   :  { %581 = vmatpush1.bf16.msra.mxu1 %v11432_v20  ;;  %1057 = vmatpush1.bf16.msra.mxu0 %v11473_v57  ;;  %v11484_v20 = vld [vmem:[%s16240_s5 + $0xf4] ss:$8 sps:$4 sm:$0xff]  }
 0x21d   :  { %582 = vmatprep.subr.bf16.mxu1 %v12635_v10  ;;  %1058 = vmatprep.subr.bf16.mxu0 %v11478_v59  ;;  %v11508_v57 = vld [vmem:[%s16240_s5 + $0x174] ss:$8 sps:$4 sm:$0xff]   ;;  %v11511_v59 = vld [vmem:[%s16240_s5 + $0x184] ss:$8 sps:$4 sm:$0xff]  }
 0x220   :  { %583 = vmatpush1.bf16.msra.mxu1 %v11433_v21  ;;  %1059 = vmatpush1.bf16.msra.mxu0 %v11476_v58  ;;  %v11482_v21 = vld [vmem:[%s16240_s5 + $0xf0] ss:$8 sps:$4 sm:$0xff]  }
 0x221   :  { %584 = vmatprep.subr.bf16.mxu1 %v12635_v10  ;;  %1060 = vmatprep.subr.bf16.mxu0 %v11481_v9  ;;  %v11506_v58 = vld [vmem:[%s16240_s5 + $0x170] ss:$8 sps:$4 sm:$0xff]  }
 0x224   :  { %585 = vmatpush1.bf16.msra.mxu1 %v11434_v22  ;;  %1061 = vmatpush1.bf16.msra.mxu0 %v11479_v19  ;;  %v11487_v22 = vld [vmem:[%s16240_s5 + $0x104] ss:$8 sps:$4 sm:$0xff]  }
 0x225   :  { %586 = vmatprep.subr.bf16.mxu1 %v12635_v10  ;;  %1062 = vmatprep.subr.bf16.mxu0 %v11484_v20 }
 0x228   :  { %587 = vmatpush1.bf16.msra.mxu1 %v11435_v23  ;;  %1063 = vmatpush1.bf16.msra.mxu0 %v11482_v21  ;;  %v10428_v23 = vld [vmem:[%s16235_s0 + $0x28] sm:$0xff] }
 0x229   :  { %588 = vmatprep.subr.bf16.mxu1 %v12635_v10  ;;  %1075 = vmatprep.subr.bf16.mxu0 %v11487_v22 }
 0x22c   :  { %589 = vmatpush1.bf16.msra.mxu1 %v566_v25  ;;  %v10429_v25 = vld [vmem:[%s16235_s0 + $0x30] sm:$0xff] }
 0x2d6   :  { %v465_v26 = vpop.f32.mrb[0].mxu1 }
 0x2d7   :  { %v467_v27 = vpop.f32.mrb[1].mxu1 }
 0x2d8   :  { %v469_v28 = vpop.f32.mrb[2].mxu1 }
 0x2d9   :  { %v474_v29 = vpack.c.bf16 %v469_v28, %v465_v26  ;;  %v471_v30 = vpop.f32.mrb[3].mxu1  ;;  %v10430_v26 = vld [vmem:[%s16235_s0 + $0x38] sm:$0xf] }
 0x2da   :  { %v475_v31 = vpack.c.bf16 %v471_v30, %v467_v27 }
 0x2dc   :  { %10368 = vmatprep.mubr.msk.bf16.mxu1 %vm560_vm13, %v475_v31 }
 0x2dd   :  { %601 = vmatmul.mubr.bf16.vlgmr.msra.gmra.mrb[4].mxu1 %v474_v29 }
 0x2de   :  { %1179 = vmatprep.mubr.bf16.mxu1 %v12635_v10 }
 0x3b0   :  { %v602_v60 = vpop.f32.mrb[4].mxu1 }
 0x3b1   :  { %v604_v61 = vpop.f32.mrb[5].mxu1  ;;  %v616_v62 = vrot.slane %v602_v60, 1  ;;  %v632_v63 = vrot.slane %v602_v60, 2  ;;  %610 = vst.msk [vmem:[#allocation4] sm:$0xff] %vm16254_vm14, %v602_v60  ;;  %v646_v1 = vrot.slane %v602_v60, 3  ;;  %v663_v3 = vrot.slane %v602_v60, 4 }
 0x3b2   :  { %v605_v0 = vpop.f32.mrb[6].mxu1  ;;  %vm16261_vm14 = vcmask 1048224   ;;  %v11509_v60 = vld [vmem:[%s16240_s5 + $0x180] ss:$8 sps:$4 sm:$0xff]   ;;  %v11514_v61 = vld [vmem:[%s16240_s5 + $0x194] ss:$8 sps:$4 sm:$0xff]  }
 0x3b3   :  { %v607_v4 = vpop.f32.mrb[7].mxu1  ;;  %v617_v5 = vrot.slane %v605_v0, 1  ;;  %v633_v6 = vrot.slane %v605_v0, 2  ;;  %v647_v7 = vrot.slane %v605_v0, 3  ;;  %v664_v8 = vrot.slane %v605_v0, 4 }
 0x3b4   :  { %612 = vst.msk [vmem:[#allocation4 + $0x20] sm:$0x3] %vm16253_vm15, %v605_v0  ;;  %vm16262_vm15 = vcmask 320512  }
 0x3b5   :  { %621 = vrot.lane.b32.xlu1 %v617_v5, %s16282_s20  ;;  %v618_v14 = vsel %vm16252_vm11, %v616_v62, %v617_v5  ;;  %v634_v16 = vsel %vm16256_vm10, %v632_v63, %v633_v6  ;;  %v648_v17 = vsel %vm16257_vm9, %v646_v1, %v647_v7  ;;  %v665_v18 = vsel %vm16255_vm12, %v663_v3, %v664_v8  ;;  %v744_v62 = vld [vmem:[%s16240_s5 + $0x1a0] sm:$0x33]  ;;  %v11512_v1 = vld [vmem:[%s16240_s5 + $0x190] ss:$8 sps:$4 sm:$0xff]  }
 0x3b6   :  { %619 = vrot.lane.b32.xlu0 %v618_v14, %s16282_s20  ;;  %vm16264_vm11 = vcmask 1042080   ;;  %vm16263_vm12 = vcmask 1008960   ;;  %vm641_vm10 = vcmask 1015104   ;;  %vm659_vm9 = vcmask 1042400  }
 0x3b7   :  { %v10422_v3 = vcombine.high %v744_v62, %v744_v62  ;;  %v10421_v4 = vcombine.low %v744_v62, %v744_v62 }
 0x3b9   :  { %637 = vrot.lane.b32.xlu1 %v633_v6, %s16278_s26 }
 0x3ba   :  { %635 = vrot.lane.b32.xlu0 %v634_v16, %s16278_s26 }
 0x3bd   :  { %651 = vrot.lane.b32.xlu1 %v647_v7, %s16276_s18 }
 0x3be   :  { %649 = vrot.lane.b32.xlu0 %v648_v17, %s16276_s18 }
 0x3c1   :  { %668 = vrot.lane.b32.xlu1 %v664_v8, %s16267_s19 }
 0x3c2   :  { %666 = vrot.lane.b32.xlu0 %v665_v18, %s16267_s19 }
 0x3c5   :  { %1287 = vrot.lane.b32.xlu1 %v10428_v23, %s16265_s17 }
 0x3c6   :  { %1285 = vrot.lane.b32.xlu0 %v10427_v24, %s16265_s17 }
 0x3c9   :  { %1291 = vrot.lane.b32.xlu1 %v10430_v26, %s16265_s17 }
 0x3ca   :  { %1289 = vrot.lane.b32.xlu0 %v10429_v25, %s16265_s17  ;;  %s16312_s17 = smov 80  }
 0x427   :  { %v622_v27 = vpop.permute.xlu1 %621 }
 0x428   :  { %629 = vst.msk [vmem:[#allocation4 + $0x20] sm:$0x3] %vm16264_vm11, %v622_v27  ;;  %v620_v28 = vpop.permute.xlu0 %619  ;;  %vm16269_vm11 = vcmask 293888  }
 0x429   :  { %631 = vst.msk [vmem:[#allocation4 + $0x28] sm:$0x3] %vm16262_vm15, %v622_v27  ;;  %vm16275_vm15 = vcmask 287744  }
 0x42a   :  { %626 = vst.msk [vmem:[#allocation4] sm:$0xff] %vm16261_vm14, %v620_v28  ;;  %vm16280_vm14 = vcmask 1042048  }
 0x42b   :  { %627 = vst.msk [vmem:[#allocation4 + $0x8] sm:$0xff] %vm560_vm13, %v620_v28  ;;  %v638_v29 = vpop.permute.xlu1 %637 }
 0x42c   :  { %644 = vst.msk [vmem:[#allocation4 + $0x28] sm:$0x3] %vm16263_vm12, %v638_v29  ;;  %v636_v30 = vpop.permute.xlu0 %635  ;;  %vm16274_vm12 = vcmask 1048192  }
 0x42d   :  { %642 = vst.msk [vmem:[#allocation4 + $0x8] sm:$0xff] %vm641_vm10, %v636_v30 }
 0x42f   :  { %v652_v31 = vpop.permute.xlu1 %651  ;;  %v684_v35 = vld [vmem:[#allocation4 + $0x20] sm:$0x3] }
 0x430   :  { %660 = vst.msk [vmem:[#allocation4 + $0x28] sm:$0x3] %vm659_vm9, %v652_v31  ;;  %v650_v32 = vpop.permute.xlu0 %649 }
 0x431   :  { %662 = vst.msk [vmem:[#allocation4 + $0x30] sm:$0x3] %vm661_vm8, %v652_v31  ;;  %v680_v37 = vld [vmem:[#allocation4] sm:$0xff] }
 0x432   :  { %656 = vst.msk [vmem:[#allocation4 + $0x8] sm:$0xff] %vm655_vm7, %v650_v32  ;;  %v688_v41 = vpack.c.bf16 %v684_v35, %v680_v37 }
 0x433   :  { %658 = vst.msk [vmem:[#allocation4 + $0x10] sm:$0xff] %vm16281_vm6, %v650_v32  ;;  %v669_v33 = vpop.permute.xlu1 %668 }
 0x434   :  { %677 = vst.msk [vmem:[#allocation4 + $0x30] sm:$0x3] %vm16280_vm14, %v669_v33  ;;  %v667_v34 = vpop.permute.xlu0 %666 }
 0x435   :  { %679 = vst.msk [vmem:[#allocation4 + $0x38] sm:$0x3] %vm16275_vm15, %v669_v33 }
 0x436   :  { %673 = vst.msk [vmem:[#allocation4 + $0x10] sm:$0xff] %vm16274_vm12, %v667_v34  ;;  %vm16296_vm12 = vcmask 1044224  }
 0x437   :  { %675 = vst.msk [vmem:[#allocation4 + $0x18] sm:$0xff] %vm16269_vm11, %v667_v34  ;;  %v685_v36 = vld [vmem:[#allocation4 + $0x28] sm:$0x3]  ;;  %v1288_v63 = vpop.permute.xlu1 %1287 }
 0x438   :  { %v1286_v0 = vpop.permute.xlu0 %1285  ;;  %1298 = vst.msk [vmem:[#allocation2 + $0xa] sm:$0xff] %vm16273_vm1, %v1288_v63 }
 0x439   :  { %v681_v38 = vld [vmem:[#allocation4 + $0x8] sm:$0xff]  ;;  %1297 = vst.msk [vmem:[#allocation2 + $0x2] sm:$0xff] %vm16273_vm1, %v1286_v0 }
 0x43a   :  { %v689_v39 = vpack.c.bf16 %v685_v36, %v681_v38 }
 0x43b   :  { %v1292_v6 = vpop.permute.xlu1 %1291  ;;  %v686_v7 = vld [vmem:[#allocation4 + $0x30] sm:$0x3] }
 0x43c   :  { %1064 = vmatprep.mubr.bf16.mxu0 %v689_v39  ;;  %v687_v43 = vld [vmem:[#allocation4 + $0x38] sm:$0x3]  ;;  %v1290_v5 = vpop.permute.xlu0 %1289  ;;  %1300 = vst.msk [vmem:[#allocation2 + $0x1a] sm:$0xf] %vm16271_vm2, %v1292_v6 }
 0x43d   :  { %1065 = vmatmul.mubr.bf16.vlgmr.msra.gmra.mrb[8].mxu0 %v688_v41  ;;  %1299 = vst.msk [vmem:[#allocation2 + $0x12] sm:$0xff] %vm16273_vm1, %v1290_v5  ;;  %v682_v9 = vld [vmem:[#allocation4 + $0x10] sm:$0xff]  ;;  %vm16295_vm1 = vcmask 781824  }
 0x43e   :  { %v683_v44 = vld [vmem:[#allocation4 + $0x18] sm:$0xff]  ;;  %1076 = vmatpush1.bf16.msra.mxu0 %v11485_v40  ;;  %v690_v19 = vpack.c.bf16 %v686_v7, %v682_v9 }
 0x43f   :  { %v691_v46 = vpack.c.bf16 %v687_v43, %v683_v44  ;;  %1077 = vmatprep.subr.bf16.mxu0 %v11490_v42  ;;  %v1334_v18 = vld [vmem:[#allocation2 + $0xa] sm:$0xff] }
 0x440   :  { %v1381_v14 = vld [vmem:[#allocation2 + $0x4] sm:$0xff] }
 0x441   :  { %10424 = vmatprep.mubr.msk.bf16.mxu0 %vm16269_vm11, %v691_v46  ;;  %vm16270_vm11 = vcmask 1041408   ;;  %v1310_v16 = vld [vmem:[#allocation2 + $0x9] sm:$0xff]  ;;  %v1309_v17 = vld [vmem:[#allocation2 + $0x1] sm:$0xff]  ;;  %1385 = vst.msk [vmem:[#allocation3 + $0x8] sm:$0xff] %vm48_vm0, %v1381_v14 }
 0x442   :  { %1078 = vmatpush1.bf16.msra.mxu0 %v11488_v45  ;;  %v1027_v8 = vsel %vm16270_vm11, %v10421_v4, 0  ;;  %1319 = vrot.lane.b32.xlu1 %v1310_v16, %s16288_s24  ;;  %v1333_v20 = vld [vmem:[#allocation2 + $0x2] sm:$0xff] }
 0x443   :  { %1079 = vmatprep.subr.bf16.mxu0 %v11493_v47  ;;  %1317 = vrot.lane.b32.xlu0 %v1309_v17, %s16288_s24  ;;  %v1384_v23 = vld [vmem:[#allocation2 + $0x1c] sm:$0xf]  ;;  %v1357_v25 = vld [vmem:[#allocation2 + $0x3] sm:$0xff] }
 0x444   :  { %v1382_v21 = vld [vmem:[#allocation2 + $0xc] sm:$0xff]  ;;  %v1383_v22 = vld [vmem:[#allocation2 + $0x14] sm:$0xff]  ;;  %1388 = vst.msk [vmem:[#allocation3 + $0x38] sm:$0xf] %vm16272_vm3, %v1384_v23  ;;  %v1301_v33 = vld [vmem:[#allocation2] sm:$0xff] }
 0x445   :  { %1386 = vst.msk [vmem:[#allocation3 + $0x18] sm:$0xff] %vm48_vm0, %v1382_v21  ;;  %1387 = vst.msk [vmem:[#allocation3 + $0x28] sm:$0xff] %vm48_vm0, %v1383_v22  ;;  %v1358_v24 = vld [vmem:[#allocation2 + $0xb] sm:$0xff]  ;;  %v1312_v26 = vld [vmem:[#allocation2 + $0x19] sm:$0xf] }
 0x446   :  { %1080 = vmatpush1.bf16.msra.mxu0 %v11491_v48  ;;  %1343 = vrot.lane.b32.xlu1 %v1334_v18, %s16286_s29  ;;  %v1311_v27 = vld [vmem:[#allocation2 + $0x11] sm:$0xff]  ;;  %v1336_v28 = vld [vmem:[#allocation2 + $0x1a] sm:$0xf]  ;;  %v1302_v32 = vld [vmem:[#allocation2 + $0x8] sm:$0xff]  ;;  %1305 = vst.msk [vmem:[#allocation3] sm:$0xff] %vm48_vm0, %v1301_v33 }
 0x447   :  { %1081 = vmatprep.subr.bf16.mxu0 %v11496_v49  ;;  %1341 = vrot.lane.b32.xlu0 %v1333_v20, %s16286_s29  ;;  %v1335_v29 = vld [vmem:[#allocation2 + $0x12] sm:$0xff]  ;;  %v1360_v30 = vld [vmem:[#allocation2 + $0x1b] sm:$0xf]  ;;  %1306 = vst.msk [vmem:[#allocation3 + $0x10] sm:$0xff] %vm48_vm0, %v1302_v32  ;;  %v745_v48 = vld [vmem:[%s16241_s6] sm:$0x3] }
 0x448   :  { %v1359_v31 = vld [vmem:[#allocation2 + $0x13] sm:$0xff]  ;;  %v750_v49 = vrot.slane %v745_v48, %v12844_v13  ;;  %v1390_v21 = vld [vmem:[#allocation3 + $0x8] sm:$0xff]  ;;  %v1134_v23 = vld [vmem:[%s16242_s7] sm:$0x7] }
 0x449   :  { %v1303_v34 = vld [vmem:[#allocation2 + $0x10] sm:$0xff]  ;;  %v1304_v35 = vld [vmem:[#allocation2 + $0x18] sm:$0xf]  ;;  %v11531_v32 = vld [vmem:[%s16236_s1 + $0x44] ss:$8 sps:$4 sm:$0xff]  }
 0x44a   :  { %1082 = vmatpush1.bf16.msra.mxu0 %v11494_v50  ;;  %1367 = vrot.lane.b32.xlu1 %v1358_v24, %s16284_s30  ;;  %1307 = vst.msk [vmem:[#allocation3 + $0x20] sm:$0xff] %vm48_vm0, %v1303_v34  ;;  %v754_v50 = vrot.slane %v745_v48, %v12850_v15  ;;  %v11517_v24 = vld [vmem:[%s16236_s1] ss:$8 sps:$4 sm:$0xff]   ;;  %v11534_v34 = vld [vmem:[%s16236_s1 + $0x54] ss:$8 sps:$4 sm:$0xff]  }
 0x44b   :  { %1083 = vmatprep.subr.bf16.mxu0 %v11499_v51  ;;  %1365 = vrot.lane.b32.xlu0 %v1357_v25, %s16284_s30  ;;  %1308 = vst.msk [vmem:[#allocation3 + $0x30] sm:$0xf] %vm16272_vm3, %v1304_v35  ;;  %vm16294_vm3 = vcmask 519424   ;;  %v11522_v25 = vld [vmem:[%s16236_s1 + $0x14] ss:$8 sps:$4 sm:$0xff]  }
 0x44c   :  { %v1392_v22 = vld [vmem:[#allocation3 + $0x18] sm:$0xff]  ;;  %v11529_v33 = vld [vmem:[%s16236_s1 + $0x40] ss:$8 sps:$4 sm:$0xff]  }
 0x44d   :  { %v11532_v35 = vld [vmem:[%s16236_s1 + $0x50] ss:$8 sps:$4 sm:$0xff]  }
 0x44e   :  { %1084 = vmatpush1.bf16.msra.mxu0 %v11497_v52  ;;  %1323 = vrot.lane.b32.xlu1 %v1312_v26, %s16288_s24  ;;  %v1398_v26 = vpack.c.bf16 %v1392_v22, %v1390_v21 }
 0x44f   :  { %1085 = vmatprep.subr.bf16.mxu0 %v11502_v53  ;;  %1321 = vrot.lane.b32.xlu0 %v1311_v27, %s16288_s24  ;;  %v11520_v27 = vld [vmem:[%s16236_s1 + $0x10] ss:$8 sps:$4 sm:$0xff]  }
 0x452   :  { %1086 = vmatpush1.bf16.msra.mxu0 %v11500_v54  ;;  %1347 = vrot.lane.b32.xlu1 %v1336_v28, %s16286_s29  ;;  %v11525_v28 = vld [vmem:[%s16236_s1 + $0x24] ss:$8 sps:$4 sm:$0xff]  }
 0x453   :  { %1087 = vmatprep.subr.bf16.mxu0 %v11505_v55  ;;  %1345 = vrot.lane.b32.xlu0 %v1335_v29, %s16286_s29  ;;  %v11523_v29 = vld [vmem:[%s16236_s1 + $0x20] ss:$8 sps:$4 sm:$0xff]  }
 0x456   :  { %1088 = vmatpush1.bf16.msra.mxu0 %v11503_v56  ;;  %1371 = vrot.lane.b32.xlu1 %v1360_v30, %s16284_s30  ;;  %v11528_v30 = vld [vmem:[%s16236_s1 + $0x34] ss:$8 sps:$4 sm:$0xff]  }
 0x457   :  { %1089 = vmatprep.subr.bf16.mxu0 %v11508_v57  ;;  %1369 = vrot.lane.b32.xlu0 %v1359_v31, %s16284_s30  ;;  %v11526_v31 = vld [vmem:[%s16236_s1 + $0x30] ss:$8 sps:$4 sm:$0xff]  }
 0x45a   :  { %1090 = vmatpush1.bf16.msra.mxu0 %v11506_v58 }
 0x45b   :  { %1091 = vmatprep.subr.bf16.mxu0 %v11511_v59 }
 0x45e   :  { %1092 = vmatpush1.bf16.msra.mxu0 %v11509_v60 }
 0x45f   :  { %1093 = vmatprep.subr.bf16.mxu0 %v11514_v61 }
 0x462   :  { %1094 = vmatpush1.bf16.msra.mxu0 %v11512_v1 }
 0x463   :  { %10423 = vmatprep.subr.msk.bf16.mxu0 %vm16270_vm11, %v10422_v3  ;;  %vm16292_vm11 = vcmask 1048320  }
 0x464   :  { %vm16293_vm2 = vmmov %vm16292_vm11 }
 0x465   :  { %vm16297_vm15 = vmmov %vm16293_vm2 }
 0x466   :  { %1096 = vmatpush1.bf16.msra.mxu0 %v1027_v8 }
 0x469   :  { %1108 = vmatmul.mubr.bf16.vlgmr.msra.gmra.mrb[8].mxu0 %v690_v19  ;;  %v11519_v19 = vld [vmem:[%s16236_s1 + $0x4] ss:$8 sps:$4 sm:$0xff]  }
 0x4b4   :  { %v1320_v36 = vpop.permute.xlu1 %1319 }
 0x4b5   :  { %v1318_v37 = vpop.permute.xlu0 %1317  ;;  %1330 = vst.msk [vmem:[#allocation3 + $0x10] sm:$0xff] %vm108_vm4, %v1320_v36  ;;  %v11537_v36 = vld [vmem:[%s16236_s1 + $0x64] ss:$8 sps:$4 sm:$0xff]  }
 0x4b6   :  { %1329 = vst.msk [vmem:[#allocation3] sm:$0xff] %vm108_vm4, %v1318_v37  ;;  %v11535_v37 = vld [vmem:[%s16236_s1 + $0x60] ss:$8 sps:$4 sm:$0xff]  }
 0x4b8   :  { %v1344_v38 = vpop.permute.xlu1 %1343 }
 0x4b9   :  { %v1342_v39 = vpop.permute.xlu0 %1341  ;;  %1354 = vst.msk [vmem:[#allocation3 + $0x10] sm:$0xff] %vm134_vm5, %v1344_v38  ;;  %v11540_v38 = vld [vmem:[%s16236_s1 + $0x74] ss:$8 sps:$4 sm:$0xff]  }
 0x4ba   :  { %1353 = vst.msk [vmem:[#allocation3] sm:$0xff] %vm134_vm5, %v1342_v39  ;;  %v11538_v39 = vld [vmem:[%s16236_s1 + $0x70] ss:$8 sps:$4 sm:$0xff]  }
 0x4bc   :  { %v1368_v40 = vpop.permute.xlu1 %1367 }
 0x4bd   :  { %v1366_v41 = vpop.permute.xlu0 %1365  ;;  %1378 = vst.msk [vmem:[#allocation3 + $0x10] sm:$0xff] %vm16292_vm11, %v1368_v40  ;;  %v11543_v40 = vld [vmem:[%s16236_s1 + $0x84] ss:$8 sps:$4 sm:$0xff]   ;;  %vm13231_vm11 = vcmp.lt.s32.totalorder %v208_v11, 160 }
 0x4be   :  { %1377 = vst.msk [vmem:[#allocation3] sm:$0xff] %vm16293_vm2, %v1366_v41  ;;  %v11541_v41 = vld [vmem:[%s16236_s1 + $0x80] ss:$8 sps:$4 sm:$0xff]  }
 0x4c0   :  { %v1324_v42 = vpop.permute.xlu1 %1323 }
 0x4c1   :  { %v1322_v43 = vpop.permute.xlu0 %1321  ;;  %1332 = vst.msk [vmem:[#allocation3 + $0x30] sm:$0xf] %vm16294_vm3, %v1324_v42  ;;  %vm1137_vm3 = vcmask 80896   ;;  %v11546_v42 = vld [vmem:[%s16236_s1 + $0x94] ss:$8 sps:$4 sm:$0xff]  }
 0x4c2   :  { %1331 = vst.msk [vmem:[#allocation3 + $0x20] sm:$0xff] %vm108_vm4, %v1322_v43  ;;  %v11544_v43 = vld [vmem:[%s16236_s1 + $0x90] ss:$8 sps:$4 sm:$0xff]  }
 0x4c4   :  { %v1348_v44 = vpop.permute.xlu1 %1347 }
 0x4c5   :  { %v1346_v45 = vpop.permute.xlu0 %1345  ;;  %1356 = vst.msk [vmem:[#allocation3 + $0x30] sm:$0xf] %vm16295_vm1, %v1348_v44  ;;  %vm16298_vm1 = vcmask 1044480   ;;  %v1389_v44 = vld [vmem:[#allocation3] sm:$0xff] }
 0x4c6   :  { %1355 = vst.msk [vmem:[#allocation3 + $0x20] sm:$0xff] %vm134_vm5, %v1346_v45  ;;  %vm16299_vm2 = vmmov %vm16298_vm1  ;;  %v1391_v45 = vld [vmem:[#allocation3 + $0x10] sm:$0xff] }
 0x4c7   :  { %v1397_v48 = vpack.c.bf16 %v1391_v45, %v1389_v44 }
 0x4c8   :  { %v1372_v46 = vpop.permute.xlu1 %1371 }
 0x4c9   :  { %v1370_v47 = vpop.permute.xlu0 %1369  ;;  %1380 = vst.msk [vmem:[#allocation3 + $0x30] sm:$0xf] %vm16296_vm12, %v1372_v46  ;;  %v1394_v46 = vld [vmem:[#allocation3 + $0x28] sm:$0xff]  ;;  %vm16302_vm12 = vcmask 1045504  }
 0x4ca   :  { %1379 = vst.msk [vmem:[#allocation3 + $0x20] sm:$0xff] %vm16297_vm15, %v1370_v47  ;;  %v1396_v47 = vld [vmem:[#allocation3 + $0x38] sm:$0xf]  ;;  %vm16303_vm15 = vmmov %vm16302_vm12 }
 0x53c   :  { %v1109_v51 = vpop.f32.mrb[8].mxu0 }
 0x53d   :  { %v11319_v52 = vadd.f32 %v1109_v51, %v750_v49  ;;  %v1111_v53 = vpop.f32.mrb[9].mxu0  ;;  %v1393_v51 = vld [vmem:[#allocation3 + $0x20] sm:$0xff] }
 0x53e   :  { %v11320_v54 = vadd.f32 %v1111_v53, %v754_v50  ;;  %v1113_v55 = vpop.f32.mrb[10].mxu0  ;;  %v12640_v53 = vmov 1966171168  }
 0x53f   :  { %v1118_v56 = vmul.f32 0.5, %v11319_v52  ;;  %v11321_v57 = vadd.f32 %v1113_v55, %v750_v49  ;;  %v1115_v58 = vpop.f32.mrb[11].mxu0  ;;  %v1400_v49 = vpack.c.bf16 %v1396_v47, %v1394_v46 }
 0x540   :  { %v1119_v59 = vmul.f32 0.5, %v11320_v54  ;;  %v11322_v60 = vadd.f32 %v1115_v58, %v754_v50  ;;  %v1395_v50 = vld [vmem:[#allocation3 + $0x30] sm:$0xf]  ;;  %v1192_v54 = vunpack.c.l.s4 %v12640_v53 }
 0x541   :  { %12450 = vtanh.f32 %v1118_v56  ;;  %v1120_v61 = vmul.f32 0.5, %v11321_v57  ;;  %v1399_v52 = vpack.c.bf16 %v1395_v50, %v1393_v51 }
 0x542   :  { %12452 = vtanh.f32 %v1119_v59  ;;  %v1121_v62 = vmul.f32 0.5, %v11322_v60  ;;  %v1193_v55 = vunpack.c.0.s8 %v1192_v54 }
 0x543   :  { %12454 = vtanh.f32 %v1120_v61 }
 0x544   :  { %12456 = vtanh.f32 %v1121_v62  ;;  %v13224_v56 = vsub.s32 %v1193_v55, %v12841_v12 }
 0x54b   :  { %v12451_v63 = vpop.eup %12450 }
 0x54c   :  { %v12453_v0 = vpop.eup %12452  ;;  %v1126_v1 = vmul.f32 0.5, %v12451_v63 }
 0x54d   :  { %v12455_v3 = vpop.eup %12454  ;;  %v1127_v4 = vmul.f32 0.5, %v12453_v0 }
 0x54e   :  { %v12457_v5 = vpop.eup %12456  ;;  %v1128_v6 = vmul.f32 0.5, %v12455_v3  ;;  %v1130_v8 = vadd.f32 0.5, %v1126_v1 }
 0x54f   :  { %v1129_v7 = vmul.f32 0.5, %v12457_v5  ;;  %v1131_v14 = vadd.f32 0.5, %v1127_v4  ;;  %v1421_v4 = vld [vmem:[%s16239_s2] sm:$0x3] }
 0x550   :  { %v1132_v9 = vadd.f32 0.5, %v1128_v6  ;;  %v1426_v5 = vrot.slane %v1421_v4, %v12844_v13  ;;  %v1430_v6 = vrot.slane %v1421_v4, %v12850_v15 }
 0x551   :  { %v1133_v16 = vadd.f32 0.5, %v1129_v7 }
 0x552   :  { %v1135_v17 = vpack.c.bf16 %v1132_v9, %v1130_v8 }
 0x553   :  { %v1136_v18 = vpack.c.bf16 %v1133_v16, %v1131_v14 }
 0x554   :  { %v1142_v20 = vsel %vm16298_vm1, %v1135_v17, 0  ;;  %vm16304_vm1 = vcmask 228352  }
 0x555   :  { %10425 = vmatprep.subr.msk.bf16.mxu1 %vm16299_vm2, %v1136_v18  ;;  %vm16305_vm2 = vcmask 1043456  }
 0x556   :  { %1148 = vmatpush1.bf16.msra.mxu1 %v1142_v20 }
 0x557   :  { %1539 = vmatprep.subr.bf16.mxu1 %v11519_v19 }
 0x559   :  { %10426 = vmatmul.mubr.msk.bf16.vlgmr.msra.gmra.mrb[8].mxu1 %vm1137_vm3, %v1134_v23 }
 0x55a   :  { %1540 = vmatpush1.bf16.msra.mxu1 %v11517_v24  ;;  %10451 = vmatprep.mubr.msk.bf16.mxu1 %vm48_vm0, %v1398_v26 }
 0x55b   :  { %1541 = vmatprep.subr.bf16.mxu1 %v11522_v25 }
 0x55e   :  { %1542 = vmatpush1.bf16.msra.mxu1 %v11520_v27 }
 0x55f   :  { %1543 = vmatprep.subr.bf16.mxu1 %v11525_v28 }
 0x562   :  { %1544 = vmatpush1.bf16.msra.mxu1 %v11523_v29 }
 0x563   :  { %1545 = vmatprep.subr.bf16.mxu1 %v11528_v30 }
 0x566   :  { %1546 = vmatpush1.bf16.msra.mxu1 %v11526_v31 }
 0x567   :  { %1547 = vmatprep.subr.bf16.mxu1 %v11531_v32 }
 0x56a   :  { %1548 = vmatpush1.bf16.msra.mxu1 %v11529_v33 }
 0x56b   :  { %1549 = vmatprep.subr.bf16.mxu1 %v11534_v34 }
 0x56e   :  { %1550 = vmatpush1.bf16.msra.mxu1 %v11532_v35 }
 0x56f   :  { %1551 = vmatprep.subr.bf16.mxu1 %v11537_v36 }
 0x572   :  { %1552 = vmatpush1.bf16.msra.mxu1 %v11535_v37 }
 0x573   :  { %1553 = vmatprep.subr.bf16.mxu1 %v11540_v38 }
 0x576   :  { %1554 = vmatpush1.bf16.msra.mxu1 %v11538_v39 }
 0x577   :  { %1555 = vmatprep.subr.bf16.mxu1 %v11543_v40 }
 0x57a   :  { %1556 = vmatpush1.bf16.msra.mxu1 %v11541_v41 }
 0x57b   :  { %1557 = vmatprep.subr.bf16.mxu1 %v11546_v42 }
 0x57e   :  { %1558 = vmatpush1.bf16.msra.mxu1 %v11544_v43 }
 0x581   :  { %1572 = vmatmul.mubr.bf16.vlgmr.msra.gmra.mrb[12].mxu1 %v1397_v48 }
 0x582   :  { %10452 = vmatprep.mubr.msk.bf16.mxu1 %vm48_vm0, %v1400_v49 }
 0x589   :  { %1582 = vmatmul.mubr.bf16.gmra.mrb[16].mxu1 %v1399_v52 }
 0x58a   :  { %1676 = vmatprep.mubr.bf16.mxu1 %v12635_v10 }
 0x62c   :  { %v1181_v57 = vpop.f32.mrb[8].mxu1 }
 0x62d   :  { %v1183_v58 = vpop.f32.mrb[9].mxu1 }
 0x62e   :  { %v1190_v59 = vcombine.low %v1181_v57, %v1183_v58  ;;  %v1257_v60 = vcombine.high %v1181_v57, %v1183_v58  ;;  %v1185_v61 = vpop.f32.mrb[10].mxu1 }
 0x62f   :  { %v1186_v62 = vpop.f32.mrb[11].mxu1 }
 0x630   :  { %v13227_v63 = vrot.slane %v1190_v59, %v13224_v56  ;;  %v1264_v0 = vrot.slane %v1257_v60, %v13224_v56 }
 0x632   :  { %v13237_v12 = vrot.slane %v13227_v63, %v13224_v56  ;;  %v1271_v3 = vrot.slane %v1264_v0, %v13224_v56 }
 0x634   :  { %1274 = vst.msk [vmem:[#allocation5 + $0x28] ss:$8 sm:$0x3] %vm13231_vm11, %v1271_v3  ;;  %1210 = vst.msk [vmem:[#allocation5] ss:$8 sm:$0x3] %vm13231_vm11, %v13237_v12 }
 0x654   :  { %v1573_v7 = vpop.f32.mrb[12].mxu1 }
 0x655   :  { %v1574_v8 = vadd.f32 %v1573_v7, %v1426_v5  ;;  %v1575_v9 = vpop.f32.mrb[13].mxu1  ;;  %v11549_v7 = vld [vmem:[%s16238_s4 + $0x8] sm:$0xff]  }
 0x656   :  { %v1576_v14 = vadd.f32 %v1575_v9, %v1430_v6  ;;  %v1577_v16 = vpop.f32.mrb[14].mxu1  ;;  %v11551_v9 = vld [vmem:[%s16238_s4 + $0x18] sm:$0xff]  }
 0x657   :  { %v1592_v17 = vmul.f32 0.5, %v1574_v8  ;;  %v1578_v18 = vadd.f32 %v1577_v16, %v1426_v5  ;;  %v1579_v19 = vpop.f32.mrb[15].mxu1  ;;  %v11550_v8 = vld [vmem:[%s16238_s4 + $0x10] sm:$0xff]   ;;  %v11553_v16 = vld [vmem:[%s16238_s4 + $0x28] sm:$0xff]  }
 0x658   :  { %v1593_v20 = vmul.f32 0.5, %v1576_v14  ;;  %v1580_v21 = vadd.f32 %v1579_v19, %v1430_v6  ;;  %v11552_v14 = vld [vmem:[%s16238_s4 + $0x20] sm:$0xff]  }
 0x659   :  { %12458 = vtanh.f32 %v1592_v17  ;;  %v1594_v22 = vmul.f32 0.5, %v1578_v18  ;;  %v11554_v17 = vld [vmem:[%s16238_s4 + $0x30] sm:$0xff]   ;;  %v11555_v18 = vld [vmem:[%s16238_s4 + $0x38] sm:$0xff]   ;;  %v11556_v19 = vld [vmem:[%s16238_s4 + $0x40] sm:$0xff]  }
 0x65a   :  { %12460 = vtanh.f32 %v1593_v20  ;;  %v1595_v23 = vmul.f32 0.5, %v1580_v21  ;;  %v11557_v20 = vld [vmem:[%s16238_s4 + $0x48] sm:$0xff]   ;;  %v11558_v21 = vld [vmem:[%s16238_s4 + $0x50] ss:$0 sps:$4 sm:$0xff]  }
 0x65b   :  { %12462 = vtanh.f32 %v1594_v22  ;;  %v1777_v22 = vsel %vm16305_vm2, %v11558_v21, 0  ;;  %vm16309_vm2 = vcmask 1045504   ;;  %v11604_v21 = vld [vmem:[%s16240_s5 + $0xf0] ss:$8 sps:$4 sm:$0xff]  }
 0x65c   :  { %12464 = vtanh.f32 %v1595_v23  ;;  %v1583_v24 = vpop.f32.mrb[16].mxu1 }
 0x65d   :  { %v1584_v25 = vadd.f32 %v1583_v24, %v1426_v5  ;;  %v1585_v26 = vpop.f32.mrb[17].mxu1 }
 0x65e   :  { %v1586_v27 = vadd.f32 %v1585_v26, %v1430_v6  ;;  %v1587_v28 = vpop.f32.mrb[18].mxu1 }
 0x65f   :  { %v1596_v29 = vmul.f32 0.5, %v1584_v25  ;;  %v1588_v30 = vadd.f32 %v1587_v28, %v1426_v5  ;;  %v1589_v31 = vpop.f32.mrb[19].mxu1  ;;  %v11547_v5 = vld [vmem:[%s16237_s3] sm:$0x7f]  }
 0x660   :  { %v1597_v32 = vmul.f32 0.5, %v1586_v27  ;;  %v1590_v33 = vadd.f32 %v1589_v31, %v1430_v6  ;;  %v11548_v6 = vld [vmem:[%s16238_s4] sm:$0xff]   ;;  %v11564_v31 = vld [vmem:[%s16240_s5 + $0x14] ss:$8 sps:$4 sm:$0xff]  }
 0x661   :  { %12466 = vtanh.f32 %v1596_v29  ;;  %v1598_v34 = vmul.f32 0.5, %v1588_v30  ;;  %v11559_v29 = vld [vmem:[%s16240_s5] ss:$8 sps:$4 sm:$0xff]   ;;  %v11561_v30 = vld [vmem:[%s16240_s5 + $0x4] ss:$8 sps:$4 sm:$0xff]  }
 0x662   :  { %12468 = vtanh.f32 %v1597_v32  ;;  %v1599_v35 = vmul.f32 0.5, %v1590_v33  ;;  %2225 = vmatprep.subr.bf16.mxu0 %v11561_v30  ;;  %v11562_v32 = vld [vmem:[%s16240_s5 + $0x10] ss:$8 sps:$4 sm:$0xff]   ;;  %v11567_v33 = vld [vmem:[%s16240_s5 + $0x24] ss:$8 sps:$4 sm:$0xff]  }
 0x663   :  { %v12459_v36 = vpop.eup %12458  ;;  %12470 = vtanh.f32 %v1598_v34  ;;  %2226 = vmatpush1.bf16.msra.mxu0 %v11559_v29  ;;  %v11565_v34 = vld [vmem:[%s16240_s5 + $0x20] ss:$8 sps:$4 sm:$0xff]  }
 0x664   :  { %v12461_v37 = vpop.eup %12460  ;;  %v1608_v38 = vmul.f32 0.5, %v12459_v36  ;;  %12472 = vtanh.f32 %v1599_v35  ;;  %2227 = vmatprep.subr.bf16.mxu0 %v11564_v31  ;;  %v11570_v35 = vld [vmem:[%s16240_s5 + $0x34] ss:$8 sps:$4 sm:$0xff]   ;;  %v11568_v36 = vld [vmem:[%s16240_s5 + $0x30] ss:$8 sps:$4 sm:$0xff]  }
 0x665   :  { %v12463_v39 = vpop.eup %12462  ;;  %v1609_v40 = vmul.f32 0.5, %v12461_v37  ;;  %v11573_v37 = vld [vmem:[%s16240_s5 + $0x44] ss:$8 sps:$4 sm:$0xff]  }
 0x666   :  { %v12465_v41 = vpop.eup %12464  ;;  %v1610_v42 = vmul.f32 0.5, %v12463_v39  ;;  %v1616_v44 = vadd.f32 0.5, %v1608_v38  ;;  %v11571_v38 = vld [vmem:[%s16240_s5 + $0x40] ss:$8 sps:$4 sm:$0xff]   ;;  %v11576_v39 = vld [vmem:[%s16240_s5 + $0x54] ss:$8 sps:$4 sm:$0xff]  }
 0x667   :  { %v1611_v43 = vmul.f32 0.5, %v12465_v41  ;;  %v1617_v46 = vadd.f32 0.5, %v1609_v40  ;;  %2228 = vmatpush1.bf16.msra.mxu0 %v11562_v32  ;;  %v11574_v40 = vld [vmem:[%s16240_s5 + $0x50] ss:$8 sps:$4 sm:$0xff]   ;;  %v11579_v41 = vld [vmem:[%s16240_s5 + $0x64] ss:$8 sps:$4 sm:$0xff]  }
 0x668   :  { %v1618_v45 = vadd.f32 0.5, %v1610_v42  ;;  %2229 = vmatprep.subr.bf16.mxu0 %v11567_v33  ;;  %v11577_v42 = vld [vmem:[%s16240_s5 + $0x60] ss:$8 sps:$4 sm:$0xff]  }
 0x669   :  { %v1619_v47 = vadd.f32 0.5, %v1611_v43  ;;  %v11582_v43 = vld [vmem:[%s16240_s5 + $0x74] ss:$8 sps:$4 sm:$0xff]  }
 0x66a   :  { %v1626_v48 = vpack.c.bf16 %v1618_v45, %v1616_v44  ;;  %v11580_v44 = vld [vmem:[%s16240_s5 + $0x70] ss:$8 sps:$4 sm:$0xff]   ;;  %v11585_v45 = vld [vmem:[%s16240_s5 + $0x84] ss:$8 sps:$4 sm:$0xff]  }
 0x66b   :  { %v12467_v49 = vpop.eup %12466  ;;  %v1627_v50 = vpack.c.bf16 %v1619_v47, %v1617_v46  ;;  %2230 = vmatpush1.bf16.msra.mxu0 %v11565_v34  ;;  %v11583_v46 = vld [vmem:[%s16240_s5 + $0x80] ss:$8 sps:$4 sm:$0xff]   ;;  %v11588_v47 = vld [vmem:[%s16240_s5 + $0x94] ss:$8 sps:$4 sm:$0xff]  }
 0x66c   :  { %v12469_v51 = vpop.eup %12468  ;;  %v1612_v52 = vmul.f32 0.5, %v12467_v49  ;;  %2231 = vmatprep.subr.bf16.mxu0 %v11570_v35  ;;  %v11591_v49 = vld [vmem:[%s16240_s5 + $0xa4] ss:$8 sps:$4 sm:$0xff]  }
 0x66d   :  { %v12471_v53 = vpop.eup %12470  ;;  %v1613_v54 = vmul.f32 0.5, %v12469_v51  ;;  %1644 = vmatprep.subr.bf16.mxu1 %v1627_v50  ;;  %v11589_v50 = vld [vmem:[%s16240_s5 + $0xa0] ss:$8 sps:$4 sm:$0xff]   ;;  %v11594_v51 = vld [vmem:[%s16240_s5 + $0xb4] ss:$8 sps:$4 sm:$0xff]  }
 0x66e   :  { %v12473_v55 = vpop.eup %12472  ;;  %v1614_v57 = vmul.f32 0.5, %v12471_v53  ;;  %1645 = vmatpush1.bf16.msra.mxu1 %v1626_v48  ;;  %v1620_v59 = vadd.f32 0.5, %v1612_v52  ;;  %v11586_v48 = vld [vmem:[%s16240_s5 + $0x90] ss:$8 sps:$4 sm:$0xff]   ;;  %v11597_v53 = vld [vmem:[%s16240_s5 + $0xc4] ss:$8 sps:$4 sm:$0xff]  }
 0x66f   :  { %v1615_v58 = vmul.f32 0.5, %v12473_v55  ;;  %v1621_v61 = vadd.f32 0.5, %v1613_v54  ;;  %2232 = vmatpush1.bf16.msra.mxu0 %v11568_v36  ;;  %v11592_v52 = vld [vmem:[%s16240_s5 + $0xb0] ss:$8 sps:$4 sm:$0xff]   ;;  %v11595_v54 = vld [vmem:[%s16240_s5 + $0xc0] ss:$8 sps:$4 sm:$0xff]  }
 0x670   :  { %v1622_v60 = vadd.f32 0.5, %v1614_v57  ;;  %2233 = vmatprep.subr.bf16.mxu0 %v11573_v37  ;;  %v11598_v55 = vld [vmem:[%s16240_s5 + $0xd0] ss:$8 sps:$4 sm:$0xff]   ;;  %v11600_v57 = vld [vmem:[%s16240_s5 + $0xd4] ss:$8 sps:$4 sm:$0xff]  }
 0x671   :  { %v1623_v62 = vadd.f32 0.5, %v1615_v58 }
 0x672   :  { %v1628_v0 = vpack.c.bf16 %v1622_v60, %v1620_v59 }
 0x673   :  { %v1629_v3 = vpack.c.bf16 %v1623_v62, %v1621_v61  ;;  %2234 = vmatpush1.bf16.msra.mxu0 %v11571_v38 }
 0x674   :  { %v1639_v4 = vsel %vm16302_vm12, %v1628_v0, 0  ;;  %2235 = vmatprep.subr.bf16.mxu0 %v11576_v39  ;;  %vm16306_vm12 = vcmask 687104  }
 0x675   :  { %10454 = vmatprep.subr.msk.bf16.mxu1 %vm16303_vm15, %v1629_v3  ;;  %vm16307_vm15 = vcmask 680960  }
 0x676   :  { %1647 = vmatpush1.bf16.msra.mxu1 %v1639_v4 }
 0x677   :  { %1779 = vmatprep.subr.bf16.mxu1 %v12635_v10  ;;  %2236 = vmatpush1.bf16.msra.mxu0 %v11574_v40  ;;  %v11607_v40 = vld [vmem:[%s16240_s5 + $0x100] ss:$8 sps:$4 sm:$0xff]  }
 0x678   :  { %2237 = vmatprep.subr.bf16.mxu0 %v11579_v41 }
 0x679   :  { %10455 = vmatmul.mubr.msk.bf16.vlgmr.msra.gmra.mrb[20].mxu1 %vm16304_vm1, %v11547_v5  ;;  %vm16308_vm1 = vcmask 1046528  }
 0x67a   :  { %1780 = vmatpush1.bf16.msra.mxu1 %v11548_v6 }
 0x67b   :  { %1781 = vmatprep.subr.bf16.mxu1 %v12635_v10  ;;  %2238 = vmatpush1.bf16.msra.mxu0 %v11577_v42  ;;  %v11612_v42 = vld [vmem:[%s16240_s5 + $0x114] ss:$8 sps:$4 sm:$0xff]  }
 0x67c   :  { %2239 = vmatprep.subr.bf16.mxu0 %v11582_v43 }
 0x67e   :  { %1782 = vmatpush1.bf16.msra.mxu1 %v11549_v7 }
 0x67f   :  { %1783 = vmatprep.subr.bf16.mxu1 %v12635_v10  ;;  %2240 = vmatpush1.bf16.msra.mxu0 %v11580_v44 }
 0x680   :  { %2241 = vmatprep.subr.bf16.mxu0 %v11585_v45  ;;  %v11610_v45 = vld [vmem:[%s16240_s5 + $0x110] ss:$8 sps:$4 sm:$0xff]  }
 0x682   :  { %1784 = vmatpush1.bf16.msra.mxu1 %v11550_v8 }
 0x683   :  { %1785 = vmatprep.subr.bf16.mxu1 %v12635_v10  ;;  %2242 = vmatpush1.bf16.msra.mxu0 %v11583_v46 }
 0x684   :  { %2243 = vmatprep.subr.bf16.mxu0 %v11588_v47  ;;  %v11615_v47 = vld [vmem:[%s16240_s5 + $0x124] ss:$8 sps:$4 sm:$0xff]  }
 0x686   :  { %1786 = vmatpush1.bf16.msra.mxu1 %v11551_v9  ;;  %v11601_v9 = vld [vmem:[%s16240_s5 + $0xe0] ss:$8 sps:$4 sm:$0xff]  }
 0x687   :  { %1787 = vmatprep.subr.bf16.mxu1 %v12635_v10  ;;  %2244 = vmatpush1.bf16.msra.mxu0 %v11586_v48  ;;  %v11613_v48 = vld [vmem:[%s16240_s5 + $0x120] ss:$8 sps:$4 sm:$0xff]  }
 0x688   :  { %2245 = vmatprep.subr.bf16.mxu0 %v11591_v49  ;;  %v11618_v49 = vld [vmem:[%s16240_s5 + $0x134] ss:$8 sps:$4 sm:$0xff]  }
 0x68a   :  { %1788 = vmatpush1.bf16.msra.mxu1 %v11552_v14  ;;  %v11603_v14 = vld [vmem:[%s16240_s5 + $0xe4] ss:$8 sps:$4 sm:$0xff]  }
 0x68b   :  { %1789 = vmatprep.subr.bf16.mxu1 %v12635_v10  ;;  %2246 = vmatpush1.bf16.msra.mxu0 %v11589_v50  ;;  %v11616_v50 = vld [vmem:[%s16240_s5 + $0x130] ss:$8 sps:$4 sm:$0xff]  }
 0x68c   :  { %2247 = vmatprep.subr.bf16.mxu0 %v11594_v51  ;;  %v11621_v51 = vld [vmem:[%s16240_s5 + $0x144] ss:$8 sps:$4 sm:$0xff]  }
 0x68e   :  { %1790 = vmatpush1.bf16.msra.mxu1 %v11553_v16 }
 0x68f   :  { %1791 = vmatprep.subr.bf16.mxu1 %v12635_v10  ;;  %2248 = vmatpush1.bf16.msra.mxu0 %v11592_v52  ;;  %v11619_v52 = vld [vmem:[%s16240_s5 + $0x140] ss:$8 sps:$4 sm:$0xff]  }
 0x690   :  { %2249 = vmatprep.subr.bf16.mxu0 %v11597_v53  ;;  %v11624_v53 = vld [vmem:[%s16240_s5 + $0x154] ss:$8 sps:$4 sm:$0xff]  }
 0x692   :  { %1792 = vmatpush1.bf16.msra.mxu1 %v11554_v17 }
 0x693   :  { %1793 = vmatprep.subr.bf16.mxu1 %v12635_v10  ;;  %2250 = vmatpush1.bf16.msra.mxu0 %v11595_v54  ;;  %v11622_v54 = vld [vmem:[%s16240_s5 + $0x150] ss:$8 sps:$4 sm:$0xff]  }
 0x694   :  { %2251 = vmatprep.subr.bf16.mxu0 %v11600_v57  ;;  %v11625_v57 = vld [vmem:[%s16240_s5 + $0x160] ss:$8 sps:$4 sm:$0xff]  }
 0x696   :  { %1794 = vmatpush1.bf16.msra.mxu1 %v11555_v18 }
 0x697   :  { %1795 = vmatprep.subr.bf16.mxu1 %v12635_v10  ;;  %2252 = vmatpush1.bf16.msra.mxu0 %v11598_v55  ;;  %v11627_v55 = vld [vmem:[%s16240_s5 + $0x164] ss:$8 sps:$4 sm:$0xff]  }
 0x698   :  { %2253 = vmatprep.subr.bf16.mxu0 %v11603_v14 }
 0x69a   :  { %1796 = vmatpush1.bf16.msra.mxu1 %v11556_v19 }
 0x69b   :  { %1797 = vmatprep.subr.bf16.mxu1 %v12635_v10  ;;  %2254 = vmatpush1.bf16.msra.mxu0 %v11601_v9 }
 0x69e   :  { %1798 = vmatpush1.bf16.msra.mxu1 %v11557_v20  ;;  %v11606_v20 = vld [vmem:[%s16240_s5 + $0xf4] ss:$8 sps:$4 sm:$0xff]  }
 0x69f   :  { %1799 = vmatprep.subr.bf16.mxu1 %v12635_v10  ;;  %2255 = vmatprep.subr.bf16.mxu0 %v11606_v20 }
 0x6a0   :  { %2256 = vmatpush1.bf16.msra.mxu0 %v11604_v21 }
 0x6a2   :  { %1800 = vmatpush1.bf16.msra.mxu1 %v1777_v22  ;;  %v11609_v22 = vld [vmem:[%s16240_s5 + $0x104] ss:$8 sps:$4 sm:$0xff]  }
 0x6a3   :  { %2268 = vmatprep.subr.bf16.mxu0 %v11609_v22 }
 0x74c   :  { %v1678_v23 = vpop.f32.mrb[20].mxu1 }
 0x74d   :  { %v1680_v24 = vpop.f32.mrb[21].mxu1 }
 0x74e   :  { %v1682_v25 = vpop.f32.mrb[22].mxu1 }
 0x74f   :  { %v1687_v26 = vpack.c.bf16 %v1682_v25, %v1678_v23  ;;  %v1684_v27 = vpop.f32.mrb[23].mxu1  ;;  %v10527_v23 = vld [vmem:[%s16235_s0 + $0x48] sm:$0xff]  ;;  %v10528_v25 = vld [vmem:[%s16235_s0 + $0x50] sm:$0xff] }
 0x750   :  { %v1688_v28 = vpack.c.bf16 %v1684_v27, %v1680_v24  ;;  %v10526_v24 = vld [vmem:[%s16235_s0 + $0x40] sm:$0xff] }
 0x752   :  { %10467 = vmatprep.mubr.msk.bf16.mxu1 %vm560_vm13, %v1688_v28 }
 0x753   :  { %1812 = vmatmul.mubr.bf16.vlgmr.msra.gmra.mrb[24].mxu1 %v1687_v26  ;;  %v10529_v26 = vld [vmem:[%s16235_s0 + $0x58] sm:$0xf] }
 0x754   :  { %2371 = vmatprep.mubr.bf16.mxu1 %v12635_v10 }
 0x826   :  { %v1813_v58 = vpop.f32.mrb[24].mxu1 }
 0x827   :  { %1820 = vst.msk [vmem:[#allocation4] sm:$0xff] %vm16306_vm12, %v1813_v58  ;;  %v1815_v59 = vpop.f32.mrb[25].mxu1  ;;  %v1824_v61 = vrot.slane %v1813_v58, 1  ;;  %v1837_v62 = vrot.slane %v1813_v58, 2  ;;  %v1848_v0 = vrot.slane %v1813_v58, 3  ;;  %v1861_v3 = vrot.slane %v1813_v58, 4 }
 0x828   :  { %v1816_v60 = vpop.f32.mrb[26].mxu1  ;;  %vm16310_vm12 = vcmask 1044480   ;;  %v11630_v58 = vld [vmem:[%s16240_s5 + $0x174] ss:$8 sps:$4 sm:$0xff]   ;;  %v11628_v59 = vld [vmem:[%s16240_s5 + $0x170] ss:$8 sps:$4 sm:$0xff]  }
 0x829   :  { %1821 = vst.msk [vmem:[#allocation4 + $0x20] sm:$0x3] %vm16307_vm15, %v1816_v60  ;;  %v1818_v4 = vpop.f32.mrb[27].mxu1  ;;  %v1825_v5 = vrot.slane %v1816_v60, 1  ;;  %v1838_v6 = vrot.slane %v1816_v60, 2  ;;  %v1849_v7 = vrot.slane %v1816_v60, 3 }
 0x82a   :  { %v1862_v8 = vrot.slane %v1816_v60, 4  ;;  %vm16311_vm15 = vcmask 1043456   ;;  %v11633_v60 = vld [vmem:[%s16240_s5 + $0x184] ss:$8 sps:$4 sm:$0xff]  }
 0x82b   :  { %1829 = vrot.lane.b32.xlu1 %v1825_v5, %s16282_s20  ;;  %v1826_v16 = vsel %vm16308_vm1, %v1824_v61, %v1825_v5  ;;  %v1839_v17 = vsel %vm16309_vm2, %v1837_v62, %v1838_v6  ;;  %v1850_v18 = vsel %vm16310_vm12, %v1848_v0, %v1849_v7  ;;  %vm16314_vm1 = vcmask 1042080   ;;  %v11631_v61 = vld [vmem:[%s16240_s5 + $0x180] ss:$8 sps:$4 sm:$0xff]   ;;  %v11636_v62 = vld [vmem:[%s16240_s5 + $0x194] ss:$8 sps:$4 sm:$0xff]  }
 0x82c   :  { %v1863_v19 = vsel %vm16311_vm15, %v1861_v3, %v1862_v8  ;;  %1827 = vrot.lane.b32.xlu0 %v1826_v16, %s16282_s20  ;;  %vm16315_vm2 = vcmask 320512   ;;  %vm16316_vm12 = vcmask 1048224   ;;  %vm16317_vm15 = vcmask 1008960   ;;  %v1938_v0 = vld [vmem:[%s16240_s5 + $0x1a0] sm:$0x33] }
 0x82d   :  { %v11634_v5 = vld [vmem:[%s16240_s5 + $0x190] ss:$8 sps:$4 sm:$0xff]  }
 0x82f   :  { %1842 = vrot.lane.b32.xlu1 %v1838_v6, %s16278_s26  ;;  %v10521_v6 = vcombine.high %v1938_v0, %v1938_v0 }
 0x830   :  { %1840 = vrot.lane.b32.xlu0 %v1839_v17, %s16278_s26 }
 0x833   :  { %1853 = vrot.lane.b32.xlu1 %v1849_v7, %s16276_s18  ;;  %v10520_v7 = vcombine.low %v1938_v0, %v1938_v0 }
 0x834   :  { %1851 = vrot.lane.b32.xlu0 %v1850_v18, %s16276_s18  ;;  %s16347_s18 = smov 124  }
 0x837   :  { %1866 = vrot.lane.b32.xlu1 %v1862_v8, %s16312_s17 }
 0x838   :  { %1864 = vrot.lane.b32.xlu0 %v1863_v19, %s16312_s17 }
 0x83b   :  { %2465 = vrot.lane.b32.xlu1 %v10527_v23, %s16313_s25 }
 0x83c   :  { %2463 = vrot.lane.b32.xlu0 %v10526_v24, %s16313_s25 }
 0x83f   :  { %2469 = vrot.lane.b32.xlu1 %v10529_v26, %s16313_s25 }
 0x840   :  { %2467 = vrot.lane.b32.xlu0 %v10528_v25, %s16313_s25 }
 0x89d   :  { %v1830_v27 = vpop.permute.xlu1 %1829 }
 0x89e   :  { %1835 = vst.msk [vmem:[#allocation4 + $0x20] sm:$0x3] %vm16314_vm1, %v1830_v27  ;;  %v1828_v28 = vpop.permute.xlu0 %1827  ;;  %vm16318_vm1 = vcmask 287744  }
 0x89f   :  { %1836 = vst.msk [vmem:[#allocation4 + $0x28] sm:$0x3] %vm16315_vm2, %v1830_v27  ;;  %vm16319_vm2 = vcmask 1048192  }
 0x8a0   :  { %1833 = vst.msk [vmem:[#allocation4] sm:$0xff] %vm16316_vm12, %v1828_v28  ;;  %vm16320_vm12 = vcmask 293888  }
 0x8a1   :  { %1834 = vst.msk [vmem:[#allocation4 + $0x8] sm:$0xff] %vm560_vm13, %v1828_v28  ;;  %v1843_v29 = vpop.permute.xlu1 %1842 }
 0x8a2   :  { %1847 = vst.msk [vmem:[#allocation4 + $0x28] sm:$0x3] %vm16317_vm15, %v1843_v29  ;;  %v1841_v30 = vpop.permute.xlu0 %1840  ;;  %vm16321_vm15 = vmmov %vm16320_vm12 }
 0x8a3   :  { %1846 = vst.msk [vmem:[#allocation4 + $0x8] sm:$0xff] %vm641_vm10, %v1841_v30 }
 0x8a5   :  { %v1854_v31 = vpop.permute.xlu1 %1853  ;;  %v1878_v35 = vld [vmem:[#allocation4 + $0x20] sm:$0x3] }
 0x8a6   :  { %1859 = vst.msk [vmem:[#allocation4 + $0x28] sm:$0x3] %vm659_vm9, %v1854_v31  ;;  %v1852_v32 = vpop.permute.xlu0 %1851 }
 0x8a7   :  { %1860 = vst.msk [vmem:[#allocation4 + $0x30] sm:$0x3] %vm661_vm8, %v1854_v31  ;;  %v1874_v37 = vld [vmem:[#allocation4] sm:$0xff] }
 0x8a8   :  { %1857 = vst.msk [vmem:[#allocation4 + $0x8] sm:$0xff] %vm655_vm7, %v1852_v32  ;;  %v1882_v41 = vpack.c.bf16 %v1878_v35, %v1874_v37 }
 0x8a9   :  { %1858 = vst.msk [vmem:[#allocation4 + $0x10] sm:$0xff] %vm16281_vm6, %v1852_v32  ;;  %v1867_v33 = vpop.permute.xlu1 %1866 }
 0x8aa   :  { %1872 = vst.msk [vmem:[#allocation4 + $0x30] sm:$0x3] %vm16280_vm14, %v1867_v33  ;;  %v1865_v34 = vpop.permute.xlu0 %1864  ;;  %vm16326_vm14 = vcmask 1041408  }
 0x8ab   :  { %1873 = vst.msk [vmem:[#allocation4 + $0x38] sm:$0x3] %vm16318_vm1, %v1867_v33  ;;  %vm16322_vm1 = vcmask 244752  }
 0x8ac   :  { %1870 = vst.msk [vmem:[#allocation4 + $0x10] sm:$0xff] %vm16319_vm2, %v1865_v34  ;;  %vm16323_vm2 = vmmov %vm16322_vm1 }
 0x8ad   :  { %1871 = vst.msk [vmem:[#allocation4 + $0x18] sm:$0xff] %vm16320_vm12, %v1865_v34  ;;  %v1879_v36 = vld [vmem:[#allocation4 + $0x28] sm:$0x3]  ;;  %v2466_v3 = vpop.permute.xlu1 %2465  ;;  %vm16324_vm12 = vmmov %vm16322_vm1 }
 0x8ae   :  { %v2464_v4 = vpop.permute.xlu0 %2463  ;;  %2476 = vst.msk [vmem:[#allocation2 + $0xa] sm:$0xff] %vm16322_vm1, %v2466_v3  ;;  %vm16327_vm1 = vmmov %vm16326_vm14 }
 0x8af   :  { %v1875_v38 = vld [vmem:[#allocation4 + $0x8] sm:$0xff]  ;;  %2475 = vst.msk [vmem:[#allocation2 + $0x2] sm:$0xff] %vm16323_vm2, %v2464_v4  ;;  %v2220_v16 = vsel %vm16327_vm1, %v10520_v7, 0  ;;  %vm16332_vm1 = vcmask 519424  }
 0x8b0   :  { %v1883_v39 = vpack.c.bf16 %v1879_v36, %v1875_v38 }
 0x8b1   :  { %v2470_v9 = vpop.permute.xlu1 %2469  ;;  %v1880_v14 = vld [vmem:[#allocation4 + $0x30] sm:$0x3] }
 0x8b2   :  { %2257 = vmatprep.mubr.bf16.mxu0 %v1883_v39  ;;  %v1881_v43 = vld [vmem:[#allocation4 + $0x38] sm:$0x3]  ;;  %v2468_v8 = vpop.permute.xlu0 %2467 }
 0x8b3   :  { %2258 = vmatmul.mubr.bf16.vlgmr.msra.gmra.mrb[12].mxu0 %v1882_v41  ;;  %2477 = vst.msk [vmem:[#allocation2 + $0x12] sm:$0xff] %vm16324_vm12, %v2468_v8  ;;  %v1876_v17 = vld [vmem:[#allocation4 + $0x10] sm:$0xff]  ;;  %vm16330_vm12 = vcmask 1048320  }
 0x8b4   :  { %v1877_v44 = vld [vmem:[#allocation4 + $0x18] sm:$0xff]  ;;  %2269 = vmatpush1.bf16.msra.mxu0 %v11607_v40  ;;  %v1884_v21 = vpack.c.bf16 %v1880_v14, %v1876_v17  ;;  %vm16335_vm6 = vmmov %vm16330_vm12 }
 0x8b5   :  { %v1885_v46 = vpack.c.bf16 %v1881_v43, %v1877_v44  ;;  %2270 = vmatprep.subr.bf16.mxu0 %v11612_v42  ;;  %v2512_v20 = vld [vmem:[#allocation2 + $0xa] sm:$0xff] }
 0x8b6   :  { %v2488_v18 = vld [vmem:[#allocation2 + $0x9] sm:$0xff]  ;;  %v2487_v19 = vld [vmem:[#allocation2 + $0x1] sm:$0xff] }
 0x8b7   :  { %10523 = vmatprep.mubr.msk.bf16.mxu0 %vm16321_vm15, %v1885_v46  ;;  %vm16325_vm15 = vcmask 240656   ;;  %2497 = vrot.lane.b32.xlu1 %v2488_v18, %s16288_s24  ;;  %v2511_v22 = vld [vmem:[#allocation2 + $0x2] sm:$0xff] }
 0x8b8   :  { %2271 = vmatpush1.bf16.msra.mxu0 %v11610_v45  ;;  %2478 = vst.msk [vmem:[#allocation2 + $0x1a] sm:$0xf] %vm16325_vm15, %v2470_v9  ;;  %2495 = vrot.lane.b32.xlu0 %v2487_v19, %s16288_s24  ;;  %v2535_v24 = vld [vmem:[#allocation2 + $0x3] sm:$0xff]  ;;  %vm16331_vm15 = vmmov %vm16330_vm12 }
 0x8b9   :  { %2272 = vmatprep.subr.bf16.mxu0 %v11615_v47  ;;  %v2559_v31 = vld [vmem:[#allocation2 + $0x4] sm:$0xff] }
 0x8ba   :  { %v2536_v23 = vld [vmem:[#allocation2 + $0xb] sm:$0xff]  ;;  %2563 = vst.msk [vmem:[#allocation3 + $0x8] sm:$0xff] %vm48_vm0, %v2559_v31  ;;  %v2479_v34 = vld [vmem:[#allocation2] sm:$0xff]  ;;  %v11644_v31 = vld [vmem:[%s16236_s1 + $0x14] ss:$8 sps:$4 sm:$0xff]  }
 0x8bb   :  { %2521 = vrot.lane.b32.xlu1 %v2512_v20, %s16286_s29  ;;  %v2489_v26 = vld [vmem:[#allocation2 + $0x11] sm:$0xff]  ;;  %v2480_v33 = vld [vmem:[#allocation2 + $0x8] sm:$0xff]  ;;  %2483 = vst.msk [vmem:[#allocation3] sm:$0xff] %vm48_vm0, %v2479_v34 }
 0x8bc   :  { %2273 = vmatpush1.bf16.msra.mxu0 %v11613_v48  ;;  %2519 = vrot.lane.b32.xlu0 %v2511_v22, %s16286_s29  ;;  %v2513_v28 = vld [vmem:[#allocation2 + $0x12] sm:$0xff]  ;;  %2484 = vst.msk [vmem:[#allocation3 + $0x10] sm:$0xff] %vm48_vm0, %v2480_v33  ;;  %v11647_v34 = vld [vmem:[%s16236_s1 + $0x24] ss:$8 sps:$4 sm:$0xff]  }
 0x8bd   :  { %2274 = vmatprep.subr.bf16.mxu0 %v11618_v49  ;;  %v2560_v32 = vld [vmem:[#allocation2 + $0xc] sm:$0xff] }
 0x8be   :  { %2564 = vst.msk [vmem:[#allocation3 + $0x18] sm:$0xff] %vm48_vm0, %v2560_v32  ;;  %v2481_v35 = vld [vmem:[#allocation2 + $0x10] sm:$0xff] }
 0x8bf   :  { %2545 = vrot.lane.b32.xlu1 %v2536_v23, %s16284_s30  ;;  %v2490_v25 = vld [vmem:[#allocation2 + $0x19] sm:$0xf]  ;;  %2485 = vst.msk [vmem:[#allocation3 + $0x20] sm:$0xff] %vm48_vm0, %v2481_v35  ;;  %v11645_v35 = vld [vmem:[%s16236_s1 + $0x20] ss:$8 sps:$4 sm:$0xff]  }
 0x8c0   :  { %2275 = vmatpush1.bf16.msra.mxu0 %v11616_v50  ;;  %2543 = vrot.lane.b32.xlu0 %v2535_v24, %s16284_s30  ;;  %v2514_v27 = vld [vmem:[#allocation2 + $0x1a] sm:$0xf] }
 0x8c1   :  { %2276 = vmatprep.subr.bf16.mxu0 %v11621_v51  ;;  %v2538_v29 = vld [vmem:[#allocation2 + $0x1b] sm:$0xf]  ;;  %v2537_v30 = vld [vmem:[#allocation2 + $0x13] sm:$0xff]  ;;  %v1939_v51 = vld [vmem:[%s16241_s6] sm:$0x3] }
 0x8c2   :  { %v2482_v36 = vld [vmem:[#allocation2 + $0x18] sm:$0xf]  ;;  %v2562_v38 = vld [vmem:[#allocation2 + $0x1c] sm:$0xf] }
 0x8c3   :  { %2501 = vrot.lane.b32.xlu1 %v2490_v25, %s16288_s24  ;;  %v2561_v37 = vld [vmem:[#allocation2 + $0x14] sm:$0xff]  ;;  %v11641_v25 = vld [vmem:[%s16236_s1 + $0x4] ss:$8 sps:$4 sm:$0xff]  }
 0x8c4   :  { %2277 = vmatpush1.bf16.msra.mxu0 %v11619_v52  ;;  %2499 = vrot.lane.b32.xlu0 %v2489_v26, %s16288_s24  ;;  %2565 = vst.msk [vmem:[#allocation3 + $0x28] sm:$0xff] %vm48_vm0, %v2561_v37  ;;  %v1944_v52 = vrot.slane %v1939_v51, %v12844_v13  ;;  %v11642_v33 = vld [vmem:[%s16236_s1 + $0x10] ss:$8 sps:$4 sm:$0xff]  }
 0x8c5   :  { %2278 = vmatprep.subr.bf16.mxu0 %v11624_v53  ;;  %v1948_v53 = vrot.slane %v1939_v51, %v12850_v15  ;;  %v11648_v37 = vld [vmem:[%s16236_s1 + $0x30] ss:$8 sps:$4 sm:$0xff]  }
 0x8c7   :  { %2525 = vrot.lane.b32.xlu1 %v2514_v27, %s16286_s29  ;;  %v2568_v27 = vld [vmem:[#allocation3 + $0x8] sm:$0xff] }
 0x8c8   :  { %2279 = vmatpush1.bf16.msra.mxu0 %v11622_v54  ;;  %2523 = vrot.lane.b32.xlu0 %v2513_v28, %s16286_s29  ;;  %v2570_v28 = vld [vmem:[#allocation3 + $0x18] sm:$0xff] }
 0x8c9   :  { %2280 = vmatprep.subr.bf16.mxu0 %v11627_v55  ;;  %v2576_v32 = vpack.c.bf16 %v2570_v28, %v2568_v27 }
 0x8cb   :  { %2549 = vrot.lane.b32.xlu1 %v2538_v29, %s16284_s30  ;;  %v2327_v29 = vld [vmem:[%s16242_s7] sm:$0x7] }
 0x8cc   :  { %2281 = vmatpush1.bf16.msra.mxu0 %v11625_v57  ;;  %2547 = vrot.lane.b32.xlu0 %v2537_v30, %s16284_s30  ;;  %v11639_v30 = vld [vmem:[%s16236_s1] ss:$8 sps:$4 sm:$0xff]  }
 0x8cd   :  { %2282 = vmatprep.subr.bf16.mxu0 %v11630_v58 }
 0x8d0   :  { %2283 = vmatpush1.bf16.msra.mxu0 %v11628_v59 }
 0x8d1   :  { %2284 = vmatprep.subr.bf16.mxu0 %v11633_v60 }
 0x8d4   :  { %2285 = vmatpush1.bf16.msra.mxu0 %v11631_v61 }
 0x8d5   :  { %2286 = vmatprep.subr.bf16.mxu0 %v11636_v62 }
 0x8d8   :  { %2287 = vmatpush1.bf16.msra.mxu0 %v11634_v5 }
 0x8d9   :  { %10522 = vmatprep.subr.msk.bf16.mxu0 %vm16326_vm14, %v10521_v6  ;;  %vm16328_vm14 = vcmask 257024  }
 0x8da   :  { %2486 = vst.msk [vmem:[#allocation3 + $0x30] sm:$0xf] %vm16328_vm14, %v2482_v36  ;;  %vm16329_vm2 = vmmov %vm16328_vm14  ;;  %vm16333_vm14 = vcmask 781824   ;;  %v11650_v36 = vld [vmem:[%s16236_s1 + $0x34] ss:$8 sps:$4 sm:$0xff]  }
 0x8db   :  { %2566 = vst.msk [vmem:[#allocation3 + $0x38] sm:$0xf] %vm16329_vm2, %v2562_v38  ;;  %vm16334_vm2 = vcmask 1044224   ;;  %v11653_v38 = vld [vmem:[%s16236_s1 + $0x44] ss:$8 sps:$4 sm:$0xff]  }
 0x8dc   :  { %2289 = vmatpush1.bf16.msra.mxu0 %v2220_v16 }
 0x8df   :  { %2301 = vmatmul.mubr.bf16.vlgmr.msra.gmra.mrb[12].mxu0 %v1884_v21 }
 0x929   :  { %v2498_v39 = vpop.permute.xlu1 %2497 }
 0x92a   :  { %v2496_v40 = vpop.permute.xlu0 %2495  ;;  %2508 = vst.msk [vmem:[#allocation3 + $0x10] sm:$0xff] %vm108_vm4, %v2498_v39  ;;  %v11651_v39 = vld [vmem:[%s16236_s1 + $0x40] ss:$8 sps:$4 sm:$0xff]  }
 0x92b   :  { %2507 = vst.msk [vmem:[#allocation3] sm:$0xff] %vm108_vm4, %v2496_v40  ;;  %v11656_v40 = vld [vmem:[%s16236_s1 + $0x54] ss:$8 sps:$4 sm:$0xff]  }
 0x92d   :  { %v2522_v41 = vpop.permute.xlu1 %2521 }
 0x92e   :  { %v2520_v42 = vpop.permute.xlu0 %2519  ;;  %2532 = vst.msk [vmem:[#allocation3 + $0x10] sm:$0xff] %vm134_vm5, %v2522_v41  ;;  %v11654_v41 = vld [vmem:[%s16236_s1 + $0x50] ss:$8 sps:$4 sm:$0xff]  }
 0x92f   :  { %2531 = vst.msk [vmem:[#allocation3] sm:$0xff] %vm134_vm5, %v2520_v42  ;;  %v11659_v42 = vld [vmem:[%s16236_s1 + $0x64] ss:$8 sps:$4 sm:$0xff]  }
 0x931   :  { %v2546_v43 = vpop.permute.xlu1 %2545 }
 0x932   :  { %v2544_v44 = vpop.permute.xlu0 %2543  ;;  %2556 = vst.msk [vmem:[#allocation3 + $0x10] sm:$0xff] %vm16330_vm12, %v2546_v43  ;;  %v11657_v43 = vld [vmem:[%s16236_s1 + $0x60] ss:$8 sps:$4 sm:$0xff]  }
 0x933   :  { %2555 = vst.msk [vmem:[#allocation3] sm:$0xff] %vm16331_vm15, %v2544_v44  ;;  %v11662_v44 = vld [vmem:[%s16236_s1 + $0x74] ss:$8 sps:$4 sm:$0xff]   ;;  %vm16338_vm15 = vcmask 1045504  }
 0x935   :  { %v2502_v45 = vpop.permute.xlu1 %2501 }
 0x936   :  { %v2500_v46 = vpop.permute.xlu0 %2499  ;;  %2510 = vst.msk [vmem:[#allocation3 + $0x30] sm:$0xf] %vm16332_vm1, %v2502_v45  ;;  %v11660_v45 = vld [vmem:[%s16236_s1 + $0x70] ss:$8 sps:$4 sm:$0xff]   ;;  %vm16339_vm1 = vmmov %vm16338_vm15 }
 0x937   :  { %2509 = vst.msk [vmem:[#allocation3 + $0x20] sm:$0xff] %vm108_vm4, %v2500_v46  ;;  %v11665_v46 = vld [vmem:[%s16236_s1 + $0x84] ss:$8 sps:$4 sm:$0xff]  }
 0x939   :  { %v2526_v47 = vpop.permute.xlu1 %2525  ;;  %v2569_v51 = vld [vmem:[#allocation3 + $0x10] sm:$0xff] }
 0x93a   :  { %v2524_v48 = vpop.permute.xlu0 %2523  ;;  %2534 = vst.msk [vmem:[#allocation3 + $0x30] sm:$0xf] %vm16333_vm14, %v2526_v47  ;;  %v11663_v47 = vld [vmem:[%s16236_s1 + $0x80] ss:$8 sps:$4 sm:$0xff]   ;;  %vm16340_vm14 = vcmask 228352  }
 0x93b   :  { %2533 = vst.msk [vmem:[#allocation3 + $0x20] sm:$0xff] %vm134_vm5, %v2524_v48  ;;  %v11668_v48 = vld [vmem:[%s16236_s1 + $0x94] ss:$8 sps:$4 sm:$0xff]  }
 0x93d   :  { %v2550_v49 = vpop.permute.xlu1 %2549 }
 0x93e   :  { %v2548_v50 = vpop.permute.xlu0 %2547  ;;  %2558 = vst.msk [vmem:[#allocation3 + $0x30] sm:$0xf] %vm16334_vm2, %v2550_v49  ;;  %v11666_v49 = vld [vmem:[%s16236_s1 + $0x90] ss:$8 sps:$4 sm:$0xff]   ;;  %vm16341_vm2 = vcmask 1043456  }
 0x93f   :  { %2557 = vst.msk [vmem:[#allocation3 + $0x20] sm:$0xff] %vm16335_vm6, %v2548_v50  ;;  %vm16336_vm6 = vcmask 1044480   ;;  %v2567_v50 = vld [vmem:[#allocation3] sm:$0xff] }
 0x940   :  { %vm16337_vm12 = vmmov %vm16336_vm6 }
 0x9b2   :  { %v2302_v54 = vpop.f32.mrb[12].mxu0 }
 0x9b3   :  { %v11323_v55 = vadd.f32 %v2302_v54, %v1944_v52  ;;  %v2304_v57 = vpop.f32.mrb[13].mxu0  ;;  %v2575_v54 = vpack.c.bf16 %v2569_v51, %v2567_v50 }
 0x9b4   :  { %v11324_v58 = vadd.f32 %v2304_v57, %v1948_v53  ;;  %v2306_v59 = vpop.f32.mrb[14].mxu0  ;;  %v2573_v57 = vld [vmem:[#allocation3 + $0x30] sm:$0xf] }
 0x9b5   :  { %v2311_v60 = vmul.f32 0.5, %v11323_v55  ;;  %v11325_v61 = vadd.f32 %v2306_v59, %v1944_v52  ;;  %v2308_v62 = vpop.f32.mrb[15].mxu0  ;;  %v2572_v52 = vld [vmem:[#allocation3 + $0x28] sm:$0xff] }
 0x9b6   :  { %v2312_v0 = vmul.f32 0.5, %v11324_v58  ;;  %v11326_v3 = vadd.f32 %v2308_v62, %v1948_v53  ;;  %v2574_v53 = vld [vmem:[#allocation3 + $0x38] sm:$0xf]  ;;  %v2571_v58 = vld [vmem:[#allocation3 + $0x20] sm:$0xff] }
 0x9b7   :  { %12474 = vtanh.f32 %v2311_v60  ;;  %v2313_v4 = vmul.f32 0.5, %v11325_v61  ;;  %v2578_v55 = vpack.c.bf16 %v2574_v53, %v2572_v52  ;;  %v2577_v59 = vpack.c.bf16 %v2573_v57, %v2571_v58 }
 0x9b8   :  { %12476 = vtanh.f32 %v2312_v0  ;;  %v2314_v5 = vmul.f32 0.5, %v11326_v3 }
 0x9b9   :  { %12478 = vtanh.f32 %v2313_v4 }
 0x9ba   :  { %12480 = vtanh.f32 %v2314_v5 }
 0x9c1   :  { %v12475_v6 = vpop.eup %12474 }
 0x9c2   :  { %v12477_v7 = vpop.eup %12476  ;;  %v2319_v8 = vmul.f32 0.5, %v12475_v6 }
 0x9c3   :  { %v12479_v9 = vpop.eup %12478  ;;  %v2320_v14 = vmul.f32 0.5, %v12477_v7 }
 0x9c4   :  { %v12481_v16 = vpop.eup %12480  ;;  %v2321_v17 = vmul.f32 0.5, %v12479_v9  ;;  %v2323_v19 = vadd.f32 0.5, %v2319_v8  ;;  %v2599_v9 = vld [vmem:[%s16239_s2] sm:$0x3] }
 0x9c5   :  { %v2322_v18 = vmul.f32 0.5, %v12481_v16  ;;  %v2324_v21 = vadd.f32 0.5, %v2320_v14  ;;  %v2604_v14 = vrot.slane %v2599_v9, %v12844_v13  ;;  %v2608_v16 = vrot.slane %v2599_v9, %v12850_v15 }
 0x9c6   :  { %v2325_v20 = vadd.f32 0.5, %v2321_v17 }
 0x9c7   :  { %v2326_v22 = vadd.f32 0.5, %v2322_v18 }
 0x9c8   :  { %v2328_v23 = vpack.c.bf16 %v2325_v20, %v2323_v19 }
 0x9c9   :  { %v2329_v24 = vpack.c.bf16 %v2326_v22, %v2324_v21 }
 0x9ca   :  { %v2334_v26 = vsel %vm16336_vm6, %v2328_v23, 0  ;;  %vm16342_vm6 = vcmask 687104  }
 0x9cb   :  { %10524 = vmatprep.subr.msk.bf16.mxu1 %vm16337_vm12, %v2329_v24  ;;  %vm16343_vm12 = vcmask 680960  }
 0x9cc   :  { %2340 = vmatpush1.bf16.msra.mxu1 %v2334_v26 }
 0x9cd   :  { %2717 = vmatprep.subr.bf16.mxu1 %v11641_v25 }
 0x9cf   :  { %10525 = vmatmul.mubr.msk.bf16.vlgmr.msra.gmra.mrb[28].mxu1 %vm1137_vm3, %v2327_v29 }
 0x9d0   :  { %2718 = vmatpush1.bf16.msra.mxu1 %v11639_v30  ;;  %10550 = vmatprep.mubr.msk.bf16.mxu1 %vm48_vm0, %v2576_v32 }
 0x9d1   :  { %2719 = vmatprep.subr.bf16.mxu1 %v11644_v31 }
 0x9d4   :  { %2720 = vmatpush1.bf16.msra.mxu1 %v11642_v33 }
 0x9d5   :  { %2721 = vmatprep.subr.bf16.mxu1 %v11647_v34 }
 0x9d8   :  { %2722 = vmatpush1.bf16.msra.mxu1 %v11645_v35 }
 0x9d9   :  { %2723 = vmatprep.subr.bf16.mxu1 %v11650_v36 }
 0x9dc   :  { %2724 = vmatpush1.bf16.msra.mxu1 %v11648_v37 }
 0x9dd   :  { %2725 = vmatprep.subr.bf16.mxu1 %v11653_v38 }
 0x9e0   :  { %2726 = vmatpush1.bf16.msra.mxu1 %v11651_v39 }
 0x9e1   :  { %2727 = vmatprep.subr.bf16.mxu1 %v11656_v40 }
 0x9e4   :  { %2728 = vmatpush1.bf16.msra.mxu1 %v11654_v41 }
 0x9e5   :  { %2729 = vmatprep.subr.bf16.mxu1 %v11659_v42 }
 0x9e8   :  { %2730 = vmatpush1.bf16.msra.mxu1 %v11657_v43 }
 0x9e9   :  { %2731 = vmatprep.subr.bf16.mxu1 %v11662_v44 }
 0x9ec   :  { %2732 = vmatpush1.bf16.msra.mxu1 %v11660_v45 }
 0x9ed   :  { %2733 = vmatprep.subr.bf16.mxu1 %v11665_v46 }
 0x9f0   :  { %2734 = vmatpush1.bf16.msra.mxu1 %v11663_v47 }
 0x9f1   :  { %2735 = vmatprep.subr.bf16.mxu1 %v11668_v48 }
 0x9f4   :  { %2736 = vmatpush1.bf16.msra.mxu1 %v11666_v49 }
 0x9f7   :  { %2750 = vmatmul.mubr.bf16.vlgmr.msra.gmra.mrb[32].mxu1 %v2575_v54 }
 0x9f8   :  { %10551 = vmatprep.mubr.msk.bf16.mxu1 %vm48_vm0, %v2578_v55 }
 0x9ff   :  { %2760 = vmatmul.mubr.bf16.gmra.mrb[36].mxu1 %v2577_v59 }
 0xa00   :  { %2854 = vmatprep.mubr.bf16.mxu1 %v12635_v10 }
 0xaa2   :  { %v2373_v60 = vpop.f32.mrb[28].mxu1 }
 0xaa3   :  { %v2375_v61 = vpop.f32.mrb[29].mxu1 }
 0xaa4   :  { %v2382_v62 = vcombine.low %v2373_v60, %v2375_v61  ;;  %v2435_v0 = vcombine.high %v2373_v60, %v2375_v61  ;;  %v2377_v3 = vpop.f32.mrb[30].mxu1 }
 0xaa5   :  { %v2378_v4 = vpop.f32.mrb[31].mxu1 }
 0xaa6   :  { %v13620_v5 = vrot.slane %v2382_v62, %v13224_v56  ;;  %v2442_v6 = vrot.slane %v2435_v0, %v13224_v56 }
 0xaa8   :  { %v13625_v7 = vrot.slane %v13620_v5, %v13224_v56  ;;  %v2449_v8 = vrot.slane %v2442_v6, %v13224_v56 }
 0xaaa   :  { %2452 = vst.msk [vmem:[#allocation5 + $0x29] ss:$8 sm:$0x3] %vm13231_vm11, %v2449_v8  ;;  %2399 = vst.msk [vmem:[#allocation5 + $0x1] ss:$8 sm:$0x3] %vm13231_vm11, %v13625_v7 }
 0xaca   :  { %v2751_v17 = vpop.f32.mrb[32].mxu1 }
 0xacb   :  { %v2752_v18 = vadd.f32 %v2751_v17, %v2604_v14  ;;  %v2753_v19 = vpop.f32.mrb[33].mxu1  ;;  %v11669_v17 = vld [vmem:[%s16237_s3] sm:$0x7f]  }
 0xacc   :  { %v2754_v20 = vadd.f32 %v2753_v19, %v2608_v16  ;;  %v2755_v21 = vpop.f32.mrb[34].mxu1  ;;  %v11671_v19 = vld [vmem:[%s16238_s4 + $0x8] sm:$0xff]  }
 0xacd   :  { %v2770_v22 = vmul.f32 0.5, %v2752_v18  ;;  %v2756_v23 = vadd.f32 %v2755_v21, %v2604_v14  ;;  %v2757_v24 = vpop.f32.mrb[35].mxu1  ;;  %v11670_v18 = vld [vmem:[%s16238_s4] sm:$0xff]   ;;  %v11673_v21 = vld [vmem:[%s16238_s4 + $0x18] sm:$0xff]  }
 0xace   :  { %v2771_v25 = vmul.f32 0.5, %v2754_v20  ;;  %v2758_v26 = vadd.f32 %v2757_v24, %v2608_v16  ;;  %v11672_v20 = vld [vmem:[%s16238_s4 + $0x10] sm:$0xff]  }
 0xacf   :  { %12482 = vtanh.f32 %v2770_v22  ;;  %v2772_v27 = vmul.f32 0.5, %v2756_v23  ;;  %v11674_v22 = vld [vmem:[%s16238_s4 + $0x20] sm:$0xff]   ;;  %v11675_v23 = vld [vmem:[%s16238_s4 + $0x28] sm:$0xff]   ;;  %v11676_v24 = vld [vmem:[%s16238_s4 + $0x30] sm:$0xff]  }
 0xad0   :  { %12484 = vtanh.f32 %v2771_v25  ;;  %v2773_v28 = vmul.f32 0.5, %v2758_v26  ;;  %v11677_v25 = vld [vmem:[%s16238_s4 + $0x38] sm:$0xff]   ;;  %v11678_v26 = vld [vmem:[%s16238_s4 + $0x40] sm:$0xff]  }
 0xad1   :  { %12486 = vtanh.f32 %v2772_v27  ;;  %v11679_v27 = vld [vmem:[%s16238_s4 + $0x48] sm:$0xff]  }
 0xad2   :  { %12488 = vtanh.f32 %v2773_v28  ;;  %v2761_v29 = vpop.f32.mrb[36].mxu1  ;;  %v11680_v28 = vld [vmem:[%s16238_s4 + $0x50] ss:$0 sps:$4 sm:$0xff]  }
 0xad3   :  { %v2762_v30 = vadd.f32 %v2761_v29, %v2604_v14  ;;  %v2763_v31 = vpop.f32.mrb[37].mxu1  ;;  %v2955_v29 = vsel %vm16341_vm2, %v11680_v28, 0 }
 0xad4   :  { %v2764_v32 = vadd.f32 %v2763_v31, %v2608_v16  ;;  %v2765_v33 = vpop.f32.mrb[38].mxu1 }
 0xad5   :  { %v2774_v34 = vmul.f32 0.5, %v2762_v30  ;;  %v2766_v35 = vadd.f32 %v2765_v33, %v2604_v14  ;;  %v2767_v36 = vpop.f32.mrb[39].mxu1 }
 0xad6   :  { %v2775_v37 = vmul.f32 0.5, %v2764_v32  ;;  %v2768_v38 = vadd.f32 %v2767_v36, %v2608_v16  ;;  %v11681_v36 = vld [vmem:[%s16240_s5] ss:$8 sps:$4 sm:$0xff]  }
 0xad7   :  { %12490 = vtanh.f32 %v2774_v34  ;;  %v2776_v39 = vmul.f32 0.5, %v2766_v35 }
 0xad8   :  { %12492 = vtanh.f32 %v2775_v37  ;;  %v2777_v40 = vmul.f32 0.5, %v2768_v38  ;;  %v11683_v37 = vld [vmem:[%s16240_s5 + $0x4] ss:$8 sps:$4 sm:$0xff]   ;;  %v11686_v38 = vld [vmem:[%s16240_s5 + $0x14] ss:$8 sps:$4 sm:$0xff]  }
 0xad9   :  { %v12483_v41 = vpop.eup %12482  ;;  %12494 = vtanh.f32 %v2776_v39  ;;  %3403 = vmatprep.subr.bf16.mxu0 %v11683_v37  ;;  %v11684_v39 = vld [vmem:[%s16240_s5 + $0x10] ss:$8 sps:$4 sm:$0xff]  }
 0xada   :  { %v12485_v42 = vpop.eup %12484  ;;  %v2786_v43 = vmul.f32 0.5, %v12483_v41  ;;  %12496 = vtanh.f32 %v2777_v40  ;;  %3404 = vmatpush1.bf16.msra.mxu0 %v11681_v36  ;;  %v11689_v40 = vld [vmem:[%s16240_s5 + $0x24] ss:$8 sps:$4 sm:$0xff]   ;;  %v11687_v41 = vld [vmem:[%s16240_s5 + $0x20] ss:$8 sps:$4 sm:$0xff]  }
 0xadb   :  { %v12487_v44 = vpop.eup %12486  ;;  %v2787_v45 = vmul.f32 0.5, %v12485_v42  ;;  %3405 = vmatprep.subr.bf16.mxu0 %v11686_v38  ;;  %v11692_v42 = vld [vmem:[%s16240_s5 + $0x34] ss:$8 sps:$4 sm:$0xff]  }
 0xadc   :  { %v12489_v46 = vpop.eup %12488  ;;  %v2788_v47 = vmul.f32 0.5, %v12487_v44  ;;  %v2794_v49 = vadd.f32 0.5, %v2786_v43  ;;  %v11690_v43 = vld [vmem:[%s16240_s5 + $0x30] ss:$8 sps:$4 sm:$0xff]   ;;  %v11695_v44 = vld [vmem:[%s16240_s5 + $0x44] ss:$8 sps:$4 sm:$0xff]  }
 0xadd   :  { %v2789_v48 = vmul.f32 0.5, %v12489_v46  ;;  %v2795_v51 = vadd.f32 0.5, %v2787_v45  ;;  %v11693_v45 = vld [vmem:[%s16240_s5 + $0x40] ss:$8 sps:$4 sm:$0xff]   ;;  %v11698_v46 = vld [vmem:[%s16240_s5 + $0x54] ss:$8 sps:$4 sm:$0xff]  }
 0xade   :  { %v2796_v50 = vadd.f32 0.5, %v2788_v47  ;;  %3406 = vmatpush1.bf16.msra.mxu0 %v11684_v39  ;;  %v11696_v47 = vld [vmem:[%s16240_s5 + $0x50] ss:$8 sps:$4 sm:$0xff]  }
 0xadf   :  { %v2797_v52 = vadd.f32 0.5, %v2789_v48  ;;  %3407 = vmatprep.subr.bf16.mxu0 %v11689_v40  ;;  %v11701_v48 = vld [vmem:[%s16240_s5 + $0x64] ss:$8 sps:$4 sm:$0xff]  }
 0xae0   :  { %v2804_v53 = vpack.c.bf16 %v2796_v50, %v2794_v49  ;;  %v11699_v49 = vld [vmem:[%s16240_s5 + $0x60] ss:$8 sps:$4 sm:$0xff]   ;;  %v11704_v50 = vld [vmem:[%s16240_s5 + $0x74] ss:$8 sps:$4 sm:$0xff]  }
 0xae1   :  { %v12491_v54 = vpop.eup %12490  ;;  %v2805_v55 = vpack.c.bf16 %v2797_v52, %v2795_v51  ;;  %v11702_v51 = vld [vmem:[%s16240_s5 + $0x70] ss:$8 sps:$4 sm:$0xff]   ;;  %v11707_v52 = vld [vmem:[%s16240_s5 + $0x84] ss:$8 sps:$4 sm:$0xff]  }
 0xae2   :  { %v12493_v57 = vpop.eup %12492  ;;  %v2790_v58 = vmul.f32 0.5, %v12491_v54  ;;  %3408 = vmatpush1.bf16.msra.mxu0 %v11687_v41  ;;  %v11710_v54 = vld [vmem:[%s16240_s5 + $0x94] ss:$8 sps:$4 sm:$0xff]  }
 0xae3   :  { %v12495_v59 = vpop.eup %12494  ;;  %v2791_v60 = vmul.f32 0.5, %v12493_v57  ;;  %2822 = vmatprep.subr.bf16.mxu1 %v2805_v55  ;;  %3409 = vmatprep.subr.bf16.mxu0 %v11692_v42  ;;  %v11708_v55 = vld [vmem:[%s16240_s5 + $0x90] ss:$8 sps:$4 sm:$0xff]   ;;  %v11713_v57 = vld [vmem:[%s16240_s5 + $0xa4] ss:$8 sps:$4 sm:$0xff]  }
 0xae4   :  { %v12497_v61 = vpop.eup %12496  ;;  %v2792_v62 = vmul.f32 0.5, %v12495_v59  ;;  %2823 = vmatpush1.bf16.msra.mxu1 %v2804_v53  ;;  %v2798_v3 = vadd.f32 0.5, %v2790_v58  ;;  %v11705_v53 = vld [vmem:[%s16240_s5 + $0x80] ss:$8 sps:$4 sm:$0xff]   ;;  %v11716_v59 = vld [vmem:[%s16240_s5 + $0xb4] ss:$8 sps:$4 sm:$0xff]  }
 0xae5   :  { %v2793_v0 = vmul.f32 0.5, %v12497_v61  ;;  %v2799_v6 = vadd.f32 0.5, %v2791_v60  ;;  %v11711_v58 = vld [vmem:[%s16240_s5 + $0xa0] ss:$8 sps:$4 sm:$0xff]   ;;  %v11714_v60 = vld [vmem:[%s16240_s5 + $0xb0] ss:$8 sps:$4 sm:$0xff]  }
 0xae6   :  { %v2800_v4 = vadd.f32 0.5, %v2792_v62  ;;  %3410 = vmatpush1.bf16.msra.mxu0 %v11690_v43  ;;  %v11717_v61 = vld [vmem:[%s16240_s5 + $0xc0] ss:$8 sps:$4 sm:$0xff]   ;;  %v11719_v62 = vld [vmem:[%s16240_s5 + $0xc4] ss:$8 sps:$4 sm:$0xff]  }
 0xae7   :  { %v2801_v8 = vadd.f32 0.5, %v2793_v0  ;;  %3411 = vmatprep.subr.bf16.mxu0 %v11695_v44  ;;  %v11720_v0 = vld [vmem:[%s16240_s5 + $0xd0] ss:$8 sps:$4 sm:$0xff]  }
 0xae8   :  { %v2806_v9 = vpack.c.bf16 %v2800_v4, %v2798_v3  ;;  %v11722_v3 = vld [vmem:[%s16240_s5 + $0xd4] ss:$8 sps:$4 sm:$0xff]  }
 0xae9   :  { %v2807_v14 = vpack.c.bf16 %v2801_v8, %v2799_v6 }
 0xaea   :  { %v2817_v16 = vsel %vm16338_vm15, %v2806_v9, 0  ;;  %3412 = vmatpush1.bf16.msra.mxu0 %v11693_v45  ;;  %vm16344_vm15 = vcmask 1046528  }
 0xaeb   :  { %10553 = vmatprep.subr.msk.bf16.mxu1 %vm16339_vm1, %v2807_v14  ;;  %3413 = vmatprep.subr.bf16.mxu0 %v11698_v46 }
 0xaec   :  { %2825 = vmatpush1.bf16.msra.mxu1 %v2817_v16 }
 0xaed   :  { %2957 = vmatprep.subr.bf16.mxu1 %v12635_v10 }
 0xaee   :  { %3414 = vmatpush1.bf16.msra.mxu0 %v11696_v47 }
 0xaef   :  { %10554 = vmatmul.mubr.msk.bf16.vlgmr.msra.gmra.mrb[40].mxu1 %vm16340_vm14, %v11669_v17  ;;  %3415 = vmatprep.subr.bf16.mxu0 %v11701_v48  ;;  %vm16345_vm14 = vcmask 1044480  }
 0xaf0   :  { %2958 = vmatpush1.bf16.msra.mxu1 %v11670_v18  ;;  %v11725_v18 = vld [vmem:[%s16240_s5 + $0xe4] ss:$8 sps:$4 sm:$0xff]  }
 0xaf1   :  { %2959 = vmatprep.subr.bf16.mxu1 %v12635_v10 }
 0xaf2   :  { %3416 = vmatpush1.bf16.msra.mxu0 %v11699_v49  ;;  %v11729_v49 = vld [vmem:[%s16240_s5 + $0x100] ss:$8 sps:$4 sm:$0xff]  }
 0xaf3   :  { %3417 = vmatprep.subr.bf16.mxu0 %v11704_v50 }
 0xaf4   :  { %2960 = vmatpush1.bf16.msra.mxu1 %v11671_v19 }
 0xaf5   :  { %2961 = vmatprep.subr.bf16.mxu1 %v12635_v10 }
 0xaf6   :  { %3418 = vmatpush1.bf16.msra.mxu0 %v11702_v51  ;;  %v11734_v51 = vld [vmem:[%s16240_s5 + $0x114] ss:$8 sps:$4 sm:$0xff]  }
 0xaf7   :  { %3419 = vmatprep.subr.bf16.mxu0 %v11707_v52 }
 0xaf8   :  { %2962 = vmatpush1.bf16.msra.mxu1 %v11672_v20 }
 0xaf9   :  { %2963 = vmatprep.subr.bf16.mxu1 %v12635_v10 }
 0xafa   :  { %3420 = vmatpush1.bf16.msra.mxu0 %v11705_v53 }
 0xafb   :  { %3421 = vmatprep.subr.bf16.mxu0 %v11710_v54  ;;  %v11732_v54 = vld [vmem:[%s16240_s5 + $0x110] ss:$8 sps:$4 sm:$0xff]  }
 0xafc   :  { %2964 = vmatpush1.bf16.msra.mxu1 %v11673_v21 }
 0xafd   :  { %2965 = vmatprep.subr.bf16.mxu1 %v12635_v10 }
 0xafe   :  { %3422 = vmatpush1.bf16.msra.mxu0 %v11708_v55 }
 0xaff   :  { %3423 = vmatprep.subr.bf16.mxu0 %v11713_v57  ;;  %v11737_v57 = vld [vmem:[%s16240_s5 + $0x124] ss:$8 sps:$4 sm:$0xff]  }
 0xb00   :  { %2966 = vmatpush1.bf16.msra.mxu1 %v11674_v22 }
 0xb01   :  { %2967 = vmatprep.subr.bf16.mxu1 %v12635_v10 }
 0xb02   :  { %3424 = vmatpush1.bf16.msra.mxu0 %v11711_v58  ;;  %v11735_v58 = vld [vmem:[%s16240_s5 + $0x120] ss:$8 sps:$4 sm:$0xff]  }
 0xb03   :  { %3425 = vmatprep.subr.bf16.mxu0 %v11716_v59  ;;  %v11740_v59 = vld [vmem:[%s16240_s5 + $0x134] ss:$8 sps:$4 sm:$0xff]  }
 0xb04   :  { %2968 = vmatpush1.bf16.msra.mxu1 %v11675_v23 }
 0xb05   :  { %2969 = vmatprep.subr.bf16.mxu1 %v12635_v10 }
 0xb06   :  { %3426 = vmatpush1.bf16.msra.mxu0 %v11714_v60  ;;  %v11738_v60 = vld [vmem:[%s16240_s5 + $0x130] ss:$8 sps:$4 sm:$0xff]  }
 0xb07   :  { %3427 = vmatprep.subr.bf16.mxu0 %v11719_v62  ;;  %v11741_v62 = vld [vmem:[%s16240_s5 + $0x140] ss:$8 sps:$4 sm:$0xff]  }
 0xb08   :  { %2970 = vmatpush1.bf16.msra.mxu1 %v11676_v24  ;;  %v11723_v24 = vld [vmem:[%s16240_s5 + $0xe0] ss:$8 sps:$4 sm:$0xff]  }
 0xb09   :  { %2971 = vmatprep.subr.bf16.mxu1 %v12635_v10 }
 0xb0a   :  { %3428 = vmatpush1.bf16.msra.mxu0 %v11717_v61  ;;  %v11743_v61 = vld [vmem:[%s16240_s5 + $0x144] ss:$8 sps:$4 sm:$0xff]  }
 0xb0b   :  { %3429 = vmatprep.subr.bf16.mxu0 %v11722_v3  ;;  %v11744_v3 = vld [vmem:[%s16240_s5 + $0x150] ss:$8 sps:$4 sm:$0xff]  }
 0xb0c   :  { %2972 = vmatpush1.bf16.msra.mxu1 %v11677_v25 }
 0xb0d   :  { %2973 = vmatprep.subr.bf16.mxu1 %v12635_v10 }
 0xb0e   :  { %3430 = vmatpush1.bf16.msra.mxu0 %v11720_v0  ;;  %v11746_v0 = vld [vmem:[%s16240_s5 + $0x154] ss:$8 sps:$4 sm:$0xff]  }
 0xb0f   :  { %3431 = vmatprep.subr.bf16.mxu0 %v11725_v18  ;;  %v3116_v18 = vld [vmem:[%s16240_s5 + $0x1a0] sm:$0x33] }
 0xb10   :  { %2974 = vmatpush1.bf16.msra.mxu1 %v11678_v26 }
 0xb11   :  { %2975 = vmatprep.subr.bf16.mxu1 %v12635_v10 }
 0xb12   :  { %3432 = vmatpush1.bf16.msra.mxu0 %v11723_v24 }
 0xb14   :  { %2976 = vmatpush1.bf16.msra.mxu1 %v11679_v27 }
 0xb15   :  { %2977 = vmatprep.subr.bf16.mxu1 %v12635_v10 }
 0xb18   :  { %2978 = vmatpush1.bf16.msra.mxu1 %v2955_v29  ;;  %v11728_v29 = vld [vmem:[%s16240_s5 + $0xf4] ss:$8 sps:$4 sm:$0xff]  }
 0xb19   :  { %3433 = vmatprep.subr.bf16.mxu0 %v11728_v29 }
 0xbc2   :  { %v2856_v30 = vpop.f32.mrb[40].mxu1 }
 0xbc3   :  { %v2858_v31 = vpop.f32.mrb[41].mxu1 }
 0xbc4   :  { %v2860_v32 = vpop.f32.mrb[42].mxu1 }
 0xbc5   :  { %v2865_v33 = vpack.c.bf16 %v2860_v32, %v2856_v30  ;;  %v2862_v34 = vpop.f32.mrb[43].mxu1  ;;  %v11726_v30 = vld [vmem:[%s16240_s5 + $0xf0] ss:$8 sps:$4 sm:$0xff]   ;;  %v10626_v32 = vld [vmem:[%s16235_s0 + $0x68] sm:$0xff] }
 0xbc6   :  { %v2866_v35 = vpack.c.bf16 %v2862_v34, %v2858_v31  ;;  %3434 = vmatpush1.bf16.msra.mxu0 %v11726_v30  ;;  %v11731_v31 = vld [vmem:[%s16240_s5 + $0x104] ss:$8 sps:$4 sm:$0xff]   ;;  %v10627_v34 = vld [vmem:[%s16235_s0 + $0x70] sm:$0xff] }
 0xbc7   :  { %3446 = vmatprep.subr.bf16.mxu0 %v11731_v31 }
 0xbc8   :  { %10566 = vmatprep.mubr.msk.bf16.mxu1 %vm560_vm13, %v2866_v35  ;;  %v10628_v35 = vld [vmem:[%s16235_s0 + $0x78] sm:$0xf] }
 0xbc9   :  { %2990 = vmatmul.mubr.bf16.vlgmr.msra.gmra.mrb[44].mxu1 %v2865_v33  ;;  %v10625_v33 = vld [vmem:[%s16235_s0 + $0x60] sm:$0xff] }
 0xbca   :  { %3549 = vmatprep.mubr.bf16.mxu1 %v12635_v10 }
 0xc9c   :  { %v2991_v4 = vpop.f32.mrb[44].mxu1 }
 0xc9d   :  { %2998 = vst.msk [vmem:[#allocation4] sm:$0xff] %vm16342_vm6, %v2991_v4  ;;  %v2993_v6 = vpop.f32.mrb[45].mxu1  ;;  %v3002_v8 = vrot.slane %v2991_v4, 1  ;;  %v3015_v14 = vrot.slane %v2991_v4, 2  ;;  %v3026_v16 = vrot.slane %v2991_v4, 3  ;;  %v3039_v17 = vrot.slane %v2991_v4, 4 }
 0xc9e   :  { %v2994_v9 = vpop.f32.mrb[46].mxu1  ;;  %vm16348_vm6 = vcmask 1042080   ;;  %v11749_v4 = vld [vmem:[%s16240_s5 + $0x164] ss:$8 sps:$4 sm:$0xff]   ;;  %v11747_v6 = vld [vmem:[%s16240_s5 + $0x160] ss:$8 sps:$4 sm:$0xff]  }
 0xc9f   :  { %2999 = vst.msk [vmem:[#allocation4 + $0x20] sm:$0x3] %vm16343_vm12, %v2994_v9  ;;  %v2996_v19 = vpop.f32.mrb[47].mxu1  ;;  %v3003_v20 = vrot.slane %v2994_v9, 1  ;;  %v3016_v21 = vrot.slane %v2994_v9, 2  ;;  %v3027_v22 = vrot.slane %v2994_v9, 3 }
 0xca0   :  { %v3040_v23 = vrot.slane %v2994_v9, 4  ;;  %vm16349_vm12 = vcmask 320512   ;;  %v11750_v9 = vld [vmem:[%s16240_s5 + $0x170] ss:$8 sps:$4 sm:$0xff]  }
 0xca1   :  { %3007 = vrot.lane.b32.xlu1 %v3003_v20, %s16282_s20  ;;  %v3004_v25 = vsel %vm16344_vm15, %v3002_v8, %v3003_v20  ;;  %v3017_v26 = vsel %vm16339_vm1, %v3015_v14, %v3016_v21  ;;  %v3028_v27 = vsel %vm16345_vm14, %v3026_v16, %v3027_v22  ;;  %vm16350_vm15 = vcmask 1048224   ;;  %v11752_v8 = vld [vmem:[%s16240_s5 + $0x174] ss:$8 sps:$4 sm:$0xff]   ;;  %v11755_v14 = vld [vmem:[%s16240_s5 + $0x184] ss:$8 sps:$4 sm:$0xff]  }
 0xca2   :  { %v3041_v28 = vsel %vm16341_vm2, %v3039_v17, %v3040_v23  ;;  %3005 = vrot.lane.b32.xlu0 %v3004_v25, %s16282_s20  ;;  %vm16351_vm1 = vcmask 1008960   ;;  %vm16352_vm14 = vcmask 654336   ;;  %vm16353_vm2 = vcmask 1042048   ;;  %v11753_v16 = vld [vmem:[%s16240_s5 + $0x180] ss:$8 sps:$4 sm:$0xff]  }
 0xca3   :  { %v11758_v17 = vld [vmem:[%s16240_s5 + $0x194] ss:$8 sps:$4 sm:$0xff]  }
 0xca5   :  { %3020 = vrot.lane.b32.xlu1 %v3016_v21, %s16346_s15  ;;  %v11756_v21 = vld [vmem:[%s16240_s5 + $0x190] ss:$8 sps:$4 sm:$0xff]  }
 0xca6   :  { %3018 = vrot.lane.b32.xlu0 %v3017_v26, %s16346_s15 }
 0xca9   :  { %3031 = vrot.lane.b32.xlu1 %v3027_v22, %s16347_s18  ;;  %v10620_v22 = vcombine.high %v3116_v18, %v3116_v18 }
 0xcaa   :  { %3029 = vrot.lane.b32.xlu0 %v3028_v27, %s16347_s18 }
 0xcad   :  { %3044 = vrot.lane.b32.xlu1 %v3040_v23, %s16312_s17  ;;  %v10619_v23 = vcombine.low %v3116_v18, %v3116_v18 }
 0xcae   :  { %3042 = vrot.lane.b32.xlu0 %v3041_v28, %s16312_s17 }
 0xcb1   :  { %3643 = vrot.lane.b32.xlu1 %v10626_v32, %s16313_s25 }
 0xcb2   :  { %3641 = vrot.lane.b32.xlu0 %v10625_v33, %s16313_s25 }
 0xcb5   :  { %3647 = vrot.lane.b32.xlu1 %v10628_v35, %s16313_s25 }
 0xcb6   :  { %3645 = vrot.lane.b32.xlu0 %v10627_v34, %s16313_s25 }
 0xd13   :  { %v3008_v36 = vpop.permute.xlu1 %3007 }
 0xd14   :  { %3013 = vst.msk [vmem:[#allocation4 + $0x20] sm:$0x3] %vm16348_vm6, %v3008_v36  ;;  %v3006_v37 = vpop.permute.xlu0 %3005  ;;  %vm16354_vm6 = vcmask 287744  }
 0xd15   :  { %3014 = vst.msk [vmem:[#allocation4 + $0x28] sm:$0x3] %vm16349_vm12, %v3008_v36  ;;  %vm16355_vm12 = vcmask 1048192  }
 0xd16   :  { %3011 = vst.msk [vmem:[#allocation4] sm:$0xff] %vm16350_vm15, %v3006_v37  ;;  %vm16356_vm15 = vcmask 293888  }
 0xd17   :  { %3012 = vst.msk [vmem:[#allocation4 + $0x8] sm:$0xff] %vm560_vm13, %v3006_v37  ;;  %v3021_v38 = vpop.permute.xlu1 %3020 }
 0xd18   :  { %3025 = vst.msk [vmem:[#allocation4 + $0x28] sm:$0x3] %vm16351_vm1, %v3021_v38  ;;  %v3019_v39 = vpop.permute.xlu0 %3018  ;;  %vm16357_vm1 = vmmov %vm16356_vm15 }
 0xd19   :  { %3024 = vst.msk [vmem:[#allocation4 + $0x8] sm:$0xff] %vm641_vm10, %v3019_v39 }
 0xd1b   :  { %v3032_v40 = vpop.permute.xlu1 %3031  ;;  %v3056_v46 = vld [vmem:[#allocation4 + $0x20] sm:$0x3] }
 0xd1c   :  { %3037 = vst.msk [vmem:[#allocation4 + $0x28] sm:$0x3] %vm659_vm9, %v3032_v40  ;;  %v3030_v41 = vpop.permute.xlu0 %3029 }
 0xd1d   :  { %3038 = vst.msk [vmem:[#allocation4 + $0x30] sm:$0x3] %vm661_vm8, %v3032_v40  ;;  %v3052_v45 = vld [vmem:[#allocation4] sm:$0xff] }
 0xd1e   :  { %3035 = vst.msk [vmem:[#allocation4 + $0x8] sm:$0xff] %vm655_vm7, %v3030_v41  ;;  %v3060_v50 = vpack.c.bf16 %v3056_v46, %v3052_v45 }
 0xd1f   :  { %3036 = vst.msk [vmem:[#allocation4 + $0x10] sm:$0xff] %vm16352_vm14, %v3030_v41  ;;  %v3045_v42 = vpop.permute.xlu1 %3044  ;;  %vm16358_vm14 = vcmask 244752  }
 0xd20   :  { %3050 = vst.msk [vmem:[#allocation4 + $0x30] sm:$0x3] %vm16353_vm2, %v3045_v42  ;;  %v3043_v43 = vpop.permute.xlu0 %3042  ;;  %vm16359_vm2 = vmmov %vm16358_vm14 }
 0xd21   :  { %3051 = vst.msk [vmem:[#allocation4 + $0x38] sm:$0x3] %vm16354_vm6, %v3045_v42  ;;  %vm16360_vm6 = vmmov %vm16359_vm2 }
 0xd22   :  { %3048 = vst.msk [vmem:[#allocation4 + $0x10] sm:$0xff] %vm16355_vm12, %v3043_v43  ;;  %vm16361_vm12 = vcmask 240656  }
 0xd23   :  { %3049 = vst.msk [vmem:[#allocation4 + $0x18] sm:$0xff] %vm16356_vm15, %v3043_v43  ;;  %v3057_v44 = vld [vmem:[#allocation4 + $0x28] sm:$0x3]  ;;  %v3644_v19 = vpop.permute.xlu1 %3643  ;;  %vm16362_vm15 = vcmask 1041408  }
 0xd24   :  { %v3642_v20 = vpop.permute.xlu0 %3641  ;;  %3654 = vst.msk [vmem:[#allocation2 + $0xa] sm:$0xff] %vm16358_vm14, %v3644_v19  ;;  %vm16365_vm14 = vcmask 257024  }
 0xd25   :  { %v3053_v47 = vld [vmem:[#allocation4 + $0x8] sm:$0xff]  ;;  %3653 = vst.msk [vmem:[#allocation2 + $0x2] sm:$0xff] %vm16359_vm2, %v3642_v20  ;;  %vm16366_vm2 = vmmov %vm16365_vm14 }
 0xd26   :  { %v3061_v48 = vpack.c.bf16 %v3057_v44, %v3053_v47 }
 0xd27   :  { %v3648_v25 = vpop.permute.xlu1 %3647  ;;  %v3058_v27 = vld [vmem:[#allocation4 + $0x30] sm:$0x3] }
 0xd28   :  { %3435 = vmatprep.mubr.bf16.mxu0 %v3061_v48  ;;  %v3059_v52 = vld [vmem:[#allocation4 + $0x38] sm:$0x3]  ;;  %v3646_v24 = vpop.permute.xlu0 %3645  ;;  %3656 = vst.msk [vmem:[#allocation2 + $0x1a] sm:$0xf] %vm16361_vm12, %v3648_v25 }
 0xd29   :  { %3436 = vmatmul.mubr.bf16.vlgmr.msra.gmra.mrb[16].mxu0 %v3060_v50  ;;  %3655 = vst.msk [vmem:[#allocation2 + $0x12] sm:$0xff] %vm16360_vm6, %v3646_v24  ;;  %v3054_v28 = vld [vmem:[#allocation4 + $0x10] sm:$0xff]  ;;  %vm16367_vm6 = vcmask 1048320  }
 0xd2a   :  { %v3055_v53 = vld [vmem:[#allocation4 + $0x18] sm:$0xff]  ;;  %3447 = vmatpush1.bf16.msra.mxu0 %v11729_v49  ;;  %v3062_v32 = vpack.c.bf16 %v3058_v27, %v3054_v28  ;;  %vm16368_vm12 = vmmov %vm16367_vm6 }
 0xd2b   :  { %v3063_v55 = vpack.c.bf16 %v3059_v52, %v3055_v53  ;;  %3448 = vmatprep.subr.bf16.mxu0 %v11734_v51  ;;  %v3690_v31 = vld [vmem:[#allocation2 + $0xa] sm:$0xff] }
 0xd2c   :  { %v3666_v29 = vld [vmem:[#allocation2 + $0x9] sm:$0xff]  ;;  %v3665_v30 = vld [vmem:[#allocation2 + $0x1] sm:$0xff] }
 0xd2d   :  { %10622 = vmatprep.mubr.msk.bf16.mxu0 %vm16357_vm1, %v3063_v55  ;;  %vm16363_vm1 = vmmov %vm16362_vm15  ;;  %3675 = vrot.lane.b32.xlu1 %v3666_v29, %s16288_s24  ;;  %v3689_v33 = vld [vmem:[#allocation2 + $0x2] sm:$0xff] }
 0xd2e   :  { %3449 = vmatpush1.bf16.msra.mxu0 %v11732_v54  ;;  %v3398_v26 = vsel %vm16363_vm1, %v10619_v23, 0  ;;  %3673 = vrot.lane.b32.xlu0 %v3665_v30, %s16288_s24  ;;  %v3713_v35 = vld [vmem:[#allocation2 + $0x3] sm:$0xff]  ;;  %vm16370_vm1 = vcmask 781824  }
 0xd2f   :  { %3450 = vmatprep.subr.bf16.mxu0 %v11737_v57  ;;  %v3692_v38 = vld [vmem:[#allocation2 + $0x1a] sm:$0xf]  ;;  %v3737_v42 = vld [vmem:[#allocation2 + $0x4] sm:$0xff] }
 0xd30   :  { %v3714_v34 = vld [vmem:[#allocation2 + $0xb] sm:$0xff]  ;;  %v3668_v36 = vld [vmem:[#allocation2 + $0x19] sm:$0xf]  ;;  %3741 = vst.msk [vmem:[#allocation3 + $0x8] sm:$0xff] %vm48_vm0, %v3737_v42  ;;  %v3657_v45 = vld [vmem:[#allocation2] sm:$0xff] }
 0xd31   :  { %3699 = vrot.lane.b32.xlu1 %v3690_v31, %s16286_s29  ;;  %v3667_v37 = vld [vmem:[#allocation2 + $0x11] sm:$0xff]  ;;  %v3716_v40 = vld [vmem:[#allocation2 + $0x1b] sm:$0xf]  ;;  %v3658_v44 = vld [vmem:[#allocation2 + $0x8] sm:$0xff]  ;;  %3661 = vst.msk [vmem:[#allocation3] sm:$0xff] %vm48_vm0, %v3657_v45 }
 0xd32   :  { %3451 = vmatpush1.bf16.msra.mxu0 %v11735_v58  ;;  %3697 = vrot.lane.b32.xlu0 %v3689_v33, %s16286_s29  ;;  %v3691_v39 = vld [vmem:[#allocation2 + $0x12] sm:$0xff]  ;;  %3662 = vst.msk [vmem:[#allocation3 + $0x10] sm:$0xff] %vm48_vm0, %v3658_v44  ;;  %v3740_v49 = vld [vmem:[#allocation2 + $0x1c] sm:$0xf]  ;;  %v3505_v42 = vld [vmem:[%s16242_s7] sm:$0x7] }
 0xd33   :  { %3452 = vmatprep.subr.bf16.mxu0 %v11740_v59  ;;  %v3715_v41 = vld [vmem:[#allocation2 + $0x13] sm:$0xff]  ;;  %3744 = vst.msk [vmem:[#allocation3 + $0x38] sm:$0xf] %vm16366_vm2, %v3740_v49  ;;  %vm16372_vm2 = vmmov %vm16367_vm6 }
 0xd34   :  { %v3738_v43 = vld [vmem:[#allocation2 + $0xc] sm:$0xff]  ;;  %v3660_v47 = vld [vmem:[#allocation2 + $0x18] sm:$0xf]  ;;  %v11766_v44 = vld [vmem:[%s16236_s1 + $0x14] ss:$8 sps:$4 sm:$0xff]  }
 0xd35   :  { %3723 = vrot.lane.b32.xlu1 %v3714_v34, %s16364_s22  ;;  %3742 = vst.msk [vmem:[#allocation3 + $0x18] sm:$0xff] %vm48_vm0, %v3738_v43  ;;  %v3659_v46 = vld [vmem:[#allocation2 + $0x10] sm:$0xff]  ;;  %v11761_v43 = vld [vmem:[%s16236_s1] ss:$8 sps:$4 sm:$0xff]  }
 0xd36   :  { %3453 = vmatpush1.bf16.msra.mxu0 %v11738_v60  ;;  %3721 = vrot.lane.b32.xlu0 %v3713_v35, %s16364_s22  ;;  %3663 = vst.msk [vmem:[#allocation3 + $0x20] sm:$0xff] %vm48_vm0, %v3659_v46  ;;  %v3739_v48 = vld [vmem:[#allocation2 + $0x14] sm:$0xff] }
 0xd37   :  { %3454 = vmatprep.subr.bf16.mxu0 %v11743_v61  ;;  %3664 = vst.msk [vmem:[#allocation3 + $0x30] sm:$0xf] %vm16365_vm14, %v3660_v47  ;;  %vm16371_vm14 = vcmask 1044224   ;;  %v11764_v46 = vld [vmem:[%s16236_s1 + $0x10] ss:$8 sps:$4 sm:$0xff]  }
 0xd38   :  { %3743 = vst.msk [vmem:[#allocation3 + $0x28] sm:$0xff] %vm48_vm0, %v3739_v48  ;;  %v11769_v47 = vld [vmem:[%s16236_s1 + $0x24] ss:$8 sps:$4 sm:$0xff]   ;;  %v11767_v48 = vld [vmem:[%s16236_s1 + $0x20] ss:$8 sps:$4 sm:$0xff]  }
 0xd39   :  { %3679 = vrot.lane.b32.xlu1 %v3668_v36, %s16288_s24  ;;  %v11772_v49 = vld [vmem:[%s16236_s1 + $0x34] ss:$8 sps:$4 sm:$0xff]  }
 0xd3a   :  { %3455 = vmatpush1.bf16.msra.mxu0 %v11741_v62  ;;  %3677 = vrot.lane.b32.xlu0 %v3667_v37, %s16288_s24 }
 0xd3b   :  { %3456 = vmatprep.subr.bf16.mxu0 %v11746_v0  ;;  %v3117_v0 = vld [vmem:[%s16241_s6] sm:$0x3] }
 0xd3d   :  { %3703 = vrot.lane.b32.xlu1 %v3692_v38, %s16286_s29  ;;  %v11763_v38 = vld [vmem:[%s16236_s1 + $0x4] ss:$8 sps:$4 sm:$0xff]  }
 0xd3e   :  { %3457 = vmatpush1.bf16.msra.mxu0 %v11744_v3  ;;  %3701 = vrot.lane.b32.xlu0 %v3691_v39, %s16286_s29  ;;  %v3122_v3 = vrot.slane %v3117_v0, %v12844_v13  ;;  %s16401_s29 = smov 64  }
 0xd3f   :  { %3458 = vmatprep.subr.bf16.mxu0 %v11749_v4  ;;  %v3126_v4 = vrot.slane %v3117_v0, %v12850_v15  ;;  %v11788_v0 = vld [vmem:[%s16236_s1 + $0x90] ss:$8 sps:$4 sm:$0xff]  }
 0xd41   :  { %3727 = vrot.lane.b32.xlu1 %v3716_v40, %s16364_s22  ;;  %v3746_v40 = vld [vmem:[#allocation3 + $0x8] sm:$0xff] }
 0xd42   :  { %3459 = vmatpush1.bf16.msra.mxu0 %v11747_v6  ;;  %3725 = vrot.lane.b32.xlu0 %v3715_v41, %s16364_s22  ;;  %v3748_v41 = vld [vmem:[#allocation3 + $0x18] sm:$0xff] }
 0xd43   :  { %3460 = vmatprep.subr.bf16.mxu0 %v11752_v8  ;;  %v3754_v45 = vpack.c.bf16 %v3748_v41, %v3746_v40 }
 0xd46   :  { %3461 = vmatpush1.bf16.msra.mxu0 %v11750_v9 }
 0xd47   :  { %3462 = vmatprep.subr.bf16.mxu0 %v11755_v14 }
 0xd4a   :  { %3463 = vmatpush1.bf16.msra.mxu0 %v11753_v16 }
 0xd4b   :  { %3464 = vmatprep.subr.bf16.mxu0 %v11758_v17 }
 0xd4e   :  { %3465 = vmatpush1.bf16.msra.mxu0 %v11756_v21 }
 0xd4f   :  { %10621 = vmatprep.subr.msk.bf16.mxu0 %vm16362_vm15, %v10620_v22  ;;  %vm16369_vm15 = vcmask 519424  }
 0xd52   :  { %3467 = vmatpush1.bf16.msra.mxu0 %v3398_v26 }
 0xd55   :  { %3479 = vmatmul.mubr.bf16.vlgmr.msra.gmra.mrb[16].mxu0 %v3062_v32 }
 0xd9f   :  { %v3676_v50 = vpop.permute.xlu1 %3675 }
 0xda0   :  { %v3674_v51 = vpop.permute.xlu0 %3673  ;;  %3686 = vst.msk [vmem:[#allocation3 + $0x10] sm:$0xff] %vm108_vm4, %v3676_v50  ;;  %v11770_v50 = vld [vmem:[%s16236_s1 + $0x30] ss:$8 sps:$4 sm:$0xff]  }
 0xda1   :  { %3685 = vst.msk [vmem:[#allocation3] sm:$0xff] %vm108_vm4, %v3674_v51  ;;  %v11775_v51 = vld [vmem:[%s16236_s1 + $0x44] ss:$8 sps:$4 sm:$0xff]  }
 0xda3   :  { %v3700_v52 = vpop.permute.xlu1 %3699 }
 0xda4   :  { %v3698_v53 = vpop.permute.xlu0 %3697  ;;  %3710 = vst.msk [vmem:[#allocation3 + $0x10] sm:$0xff] %vm134_vm5, %v3700_v52  ;;  %v11773_v52 = vld [vmem:[%s16236_s1 + $0x40] ss:$8 sps:$4 sm:$0xff]  }
 0xda5   :  { %3709 = vst.msk [vmem:[#allocation3] sm:$0xff] %vm134_vm5, %v3698_v53  ;;  %v11778_v53 = vld [vmem:[%s16236_s1 + $0x54] ss:$8 sps:$4 sm:$0xff]  }
 0xda7   :  { %v3724_v54 = vpop.permute.xlu1 %3723 }
 0xda8   :  { %v3722_v55 = vpop.permute.xlu0 %3721  ;;  %3734 = vst.msk [vmem:[#allocation3 + $0x10] sm:$0xff] %vm16367_vm6, %v3724_v54  ;;  %vm16373_vm6 = vcmask 1044480   ;;  %v11776_v54 = vld [vmem:[%s16236_s1 + $0x50] ss:$8 sps:$4 sm:$0xff]  }
 0xda9   :  { %3733 = vst.msk [vmem:[#allocation3] sm:$0xff] %vm16368_vm12, %v3722_v55  ;;  %vm16374_vm12 = vmmov %vm16373_vm6  ;;  %v11781_v55 = vld [vmem:[%s16236_s1 + $0x64] ss:$8 sps:$4 sm:$0xff]  }
 0xdab   :  { %v3680_v57 = vpop.permute.xlu1 %3679 }
 0xdac   :  { %v3678_v58 = vpop.permute.xlu0 %3677  ;;  %3688 = vst.msk [vmem:[#allocation3 + $0x30] sm:$0xf] %vm16369_vm15, %v3680_v57  ;;  %v11779_v57 = vld [vmem:[%s16236_s1 + $0x60] ss:$8 sps:$4 sm:$0xff]   ;;  %vm16375_vm15 = vcmask 1045504  }
 0xdad   :  { %3687 = vst.msk [vmem:[#allocation3 + $0x20] sm:$0xff] %vm108_vm4, %v3678_v58  ;;  %v11784_v58 = vld [vmem:[%s16236_s1 + $0x74] ss:$8 sps:$4 sm:$0xff]  }
 0xdaf   :  { %v3704_v59 = vpop.permute.xlu1 %3703 }
 0xdb0   :  { %v3702_v60 = vpop.permute.xlu0 %3701  ;;  %3712 = vst.msk [vmem:[#allocation3 + $0x30] sm:$0xf] %vm16370_vm1, %v3704_v59  ;;  %v11782_v59 = vld [vmem:[%s16236_s1 + $0x70] ss:$8 sps:$4 sm:$0xff]   ;;  %vm16376_vm1 = vmmov %vm16375_vm15 }
 0xdb1   :  { %3711 = vst.msk [vmem:[#allocation3 + $0x20] sm:$0xff] %vm134_vm5, %v3702_v60  ;;  %v11787_v60 = vld [vmem:[%s16236_s1 + $0x84] ss:$8 sps:$4 sm:$0xff]  }
 0xdb3   :  { %v3728_v61 = vpop.permute.xlu1 %3727 }
 0xdb4   :  { %v3726_v62 = vpop.permute.xlu0 %3725  ;;  %3736 = vst.msk [vmem:[#allocation3 + $0x30] sm:$0xf] %vm16371_vm14, %v3728_v61  ;;  %v11785_v61 = vld [vmem:[%s16236_s1 + $0x80] ss:$8 sps:$4 sm:$0xff]   ;;  %vm16377_vm14 = vcmask 228352  }
 0xdb5   :  { %3735 = vst.msk [vmem:[#allocation3 + $0x20] sm:$0xff] %vm16372_vm2, %v3726_v62  ;;  %v11790_v62 = vld [vmem:[%s16236_s1 + $0x94] ss:$8 sps:$4 sm:$0xff]   ;;  %vm16378_vm2 = vcmask 1043456  }
 0xe28   :  { %v3480_v6 = vpop.f32.mrb[16].mxu0 }
 0xe29   :  { %v11327_v8 = vadd.f32 %v3480_v6, %v3122_v3  ;;  %v3482_v9 = vpop.f32.mrb[17].mxu0  ;;  %v3750_v6 = vld [vmem:[#allocation3 + $0x28] sm:$0xff] }
 0xe2a   :  { %v11328_v14 = vadd.f32 %v3482_v9, %v3126_v4  ;;  %v3484_v16 = vpop.f32.mrb[18].mxu0 }
 0xe2b   :  { %v3489_v17 = vmul.f32 0.5, %v11327_v8  ;;  %v11329_v18 = vadd.f32 %v3484_v16, %v3122_v3  ;;  %v3486_v19 = vpop.f32.mrb[19].mxu0  ;;  %v3745_v3 = vld [vmem:[#allocation3] sm:$0xff]  ;;  %v3752_v8 = vld [vmem:[#allocation3 + $0x38] sm:$0xf] }
 0xe2c   :  { %v3490_v20 = vmul.f32 0.5, %v11328_v14  ;;  %v11330_v21 = vadd.f32 %v3486_v19, %v3126_v4  ;;  %v3747_v4 = vld [vmem:[#allocation3 + $0x10] sm:$0xff]  ;;  %v3756_v14 = vpack.c.bf16 %v3752_v8, %v3750_v6 }
 0xe2d   :  { %12498 = vtanh.f32 %v3489_v17  ;;  %v3491_v22 = vmul.f32 0.5, %v11329_v18  ;;  %v3753_v9 = vpack.c.bf16 %v3747_v4, %v3745_v3  ;;  %v3751_v16 = vld [vmem:[#allocation3 + $0x30] sm:$0xf]  ;;  %v3749_v17 = vld [vmem:[#allocation3 + $0x20] sm:$0xff] }
 0xe2e   :  { %12500 = vtanh.f32 %v3490_v20  ;;  %v3492_v23 = vmul.f32 0.5, %v11330_v21  ;;  %v3755_v18 = vpack.c.bf16 %v3751_v16, %v3749_v17 }
 0xe2f   :  { %12502 = vtanh.f32 %v3491_v22 }
 0xe30   :  { %12504 = vtanh.f32 %v3492_v23 }
 0xe37   :  { %v12499_v24 = vpop.eup %12498 }
 0xe38   :  { %v12501_v25 = vpop.eup %12500  ;;  %v3497_v26 = vmul.f32 0.5, %v12499_v24 }
 0xe39   :  { %v12503_v27 = vpop.eup %12502  ;;  %v3498_v28 = vmul.f32 0.5, %v12501_v25 }
 0xe3a   :  { %v12505_v29 = vpop.eup %12504  ;;  %v3499_v30 = vmul.f32 0.5, %v12503_v27  ;;  %v3501_v32 = vadd.f32 0.5, %v3497_v26 }
 0xe3b   :  { %v3500_v31 = vmul.f32 0.5, %v12505_v29  ;;  %v3502_v34 = vadd.f32 0.5, %v3498_v28  ;;  %v3777_v29 = vld [vmem:[%s16239_s2] sm:$0x3] }
 0xe3c   :  { %v3503_v33 = vadd.f32 0.5, %v3499_v30  ;;  %v3782_v30 = vrot.slane %v3777_v29, %v12844_v13 }
 0xe3d   :  { %v3504_v35 = vadd.f32 0.5, %v3500_v31  ;;  %v3786_v31 = vrot.slane %v3777_v29, %v12850_v15 }
 0xe3e   :  { %v3506_v36 = vpack.c.bf16 %v3503_v33, %v3501_v32 }
 0xe3f   :  { %v3507_v37 = vpack.c.bf16 %v3504_v35, %v3502_v34 }
 0xe40   :  { %v3512_v39 = vsel %vm16373_vm6, %v3506_v36, 0  ;;  %vm16379_vm6 = vcmask 687104  }
 0xe41   :  { %10623 = vmatprep.subr.msk.bf16.mxu1 %vm16374_vm12, %v3507_v37  ;;  %vm16380_vm12 = vcmask 680960  }
 0xe42   :  { %3518 = vmatpush1.bf16.msra.mxu1 %v3512_v39 }
 0xe43   :  { %3895 = vmatprep.subr.bf16.mxu1 %v11763_v38 }
 0xe45   :  { %10624 = vmatmul.mubr.msk.bf16.vlgmr.msra.gmra.mrb[48].mxu1 %vm1137_vm3, %v3505_v42 }
 0xe46   :  { %3896 = vmatpush1.bf16.msra.mxu1 %v11761_v43  ;;  %10649 = vmatprep.mubr.msk.bf16.mxu1 %vm48_vm0, %v3754_v45 }
 0xe47   :  { %3897 = vmatprep.subr.bf16.mxu1 %v11766_v44 }
 0xe4a   :  { %3898 = vmatpush1.bf16.msra.mxu1 %v11764_v46 }
 0xe4b   :  { %3899 = vmatprep.subr.bf16.mxu1 %v11769_v47 }
 0xe4e   :  { %3900 = vmatpush1.bf16.msra.mxu1 %v11767_v48 }
 0xe4f   :  { %3901 = vmatprep.subr.bf16.mxu1 %v11772_v49 }
 0xe52   :  { %3902 = vmatpush1.bf16.msra.mxu1 %v11770_v50 }
 0xe53   :  { %3903 = vmatprep.subr.bf16.mxu1 %v11775_v51 }
 0xe56   :  { %3904 = vmatpush1.bf16.msra.mxu1 %v11773_v52 }
 0xe57   :  { %3905 = vmatprep.subr.bf16.mxu1 %v11778_v53 }
 0xe5a   :  { %3906 = vmatpush1.bf16.msra.mxu1 %v11776_v54 }
 0xe5b   :  { %3907 = vmatprep.subr.bf16.mxu1 %v11781_v55 }
 0xe5e   :  { %3908 = vmatpush1.bf16.msra.mxu1 %v11779_v57 }
 0xe5f   :  { %3909 = vmatprep.subr.bf16.mxu1 %v11784_v58 }
 0xe62   :  { %3910 = vmatpush1.bf16.msra.mxu1 %v11782_v59 }
 0xe63   :  { %3911 = vmatprep.subr.bf16.mxu1 %v11787_v60 }
 0xe66   :  { %3912 = vmatpush1.bf16.msra.mxu1 %v11785_v61 }
 0xe67   :  { %3913 = vmatprep.subr.bf16.mxu1 %v11790_v62 }
 0xe6a   :  { %3914 = vmatpush1.bf16.msra.mxu1 %v11788_v0 }
 0xe6d   :  { %3928 = vmatmul.mubr.bf16.vlgmr.msra.gmra.mrb[52].mxu1 %v3753_v9 }
 0xe6e   :  { %10650 = vmatprep.mubr.msk.bf16.mxu1 %vm48_vm0, %v3756_v14 }
 0xe75   :  { %3938 = vmatmul.mubr.bf16.gmra.mrb[56].mxu1 %v3755_v18 }
 0xe76   :  { %4032 = vmatprep.mubr.bf16.mxu1 %v12635_v10 }
 0xf18   :  { %v3551_v19 = vpop.f32.mrb[48].mxu1 }
 0xf19   :  { %v3553_v20 = vpop.f32.mrb[49].mxu1 }
 0xf1a   :  { %v3560_v21 = vcombine.low %v3551_v19, %v3553_v20  ;;  %v3613_v22 = vcombine.high %v3551_v19, %v3553_v20  ;;  %v3555_v23 = vpop.f32.mrb[50].mxu1 }
 0xf1b   :  { %v3556_v24 = vpop.f32.mrb[51].mxu1 }
 0xf1c   :  { %v14008_v25 = vrot.slane %v3560_v21, %v13224_v56  ;;  %v3620_v26 = vrot.slane %v3613_v22, %v13224_v56 }
 0xf1e   :  { %v14013_v27 = vrot.slane %v14008_v25, %v13224_v56  ;;  %v3627_v28 = vrot.slane %v3620_v26, %v13224_v56 }
 0xf20   :  { %3630 = vst.msk [vmem:[#allocation5 + $0x2a] ss:$8 sm:$0x3] %vm13231_vm11, %v3627_v28  ;;  %3577 = vst.msk [vmem:[#allocation5 + $0x2] ss:$8 sm:$0x3] %vm13231_vm11, %v14013_v27 }
 0xf40   :  { %v3929_v32 = vpop.f32.mrb[52].mxu1 }
 0xf41   :  { %v3930_v33 = vadd.f32 %v3929_v32, %v3782_v30  ;;  %v3931_v34 = vpop.f32.mrb[53].mxu1 }
 0xf42   :  { %v3932_v35 = vadd.f32 %v3931_v34, %v3786_v31  ;;  %v3933_v36 = vpop.f32.mrb[54].mxu1  ;;  %v11791_v34 = vld [vmem:[%s16237_s3] sm:$0x7f]  }
 0xf43   :  { %v3948_v37 = vmul.f32 0.5, %v3930_v33  ;;  %v3934_v38 = vadd.f32 %v3933_v36, %v3782_v30  ;;  %v3935_v39 = vpop.f32.mrb[55].mxu1  ;;  %v11793_v36 = vld [vmem:[%s16238_s4 + $0x8] sm:$0xff]  }
 0xf44   :  { %v3949_v40 = vmul.f32 0.5, %v3932_v35  ;;  %v3936_v41 = vadd.f32 %v3935_v39, %v3786_v31  ;;  %v11792_v35 = vld [vmem:[%s16238_s4] sm:$0xff]  }
 0xf45   :  { %12506 = vtanh.f32 %v3948_v37  ;;  %v3950_v42 = vmul.f32 0.5, %v3934_v38  ;;  %v11794_v37 = vld [vmem:[%s16238_s4 + $0x10] sm:$0xff]   ;;  %v11795_v38 = vld [vmem:[%s16238_s4 + $0x18] sm:$0xff]   ;;  %v11796_v39 = vld [vmem:[%s16238_s4 + $0x20] sm:$0xff]  }
 0xf46   :  { %12508 = vtanh.f32 %v3949_v40  ;;  %v3951_v43 = vmul.f32 0.5, %v3936_v41  ;;  %v11797_v40 = vld [vmem:[%s16238_s4 + $0x28] sm:$0xff]   ;;  %v11798_v41 = vld [vmem:[%s16238_s4 + $0x30] sm:$0xff]  }
 0xf47   :  { %12510 = vtanh.f32 %v3950_v42  ;;  %v11799_v42 = vld [vmem:[%s16238_s4 + $0x38] sm:$0xff]  }
 0xf48   :  { %12512 = vtanh.f32 %v3951_v43  ;;  %v3939_v44 = vpop.f32.mrb[56].mxu1  ;;  %v11800_v43 = vld [vmem:[%s16238_s4 + $0x40] sm:$0xff]  }
 0xf49   :  { %v3940_v45 = vadd.f32 %v3939_v44, %v3782_v30  ;;  %v3941_v46 = vpop.f32.mrb[57].mxu1  ;;  %v11801_v44 = vld [vmem:[%s16238_s4 + $0x48] sm:$0xff]  }
 0xf4a   :  { %v3942_v47 = vadd.f32 %v3941_v46, %v3786_v31  ;;  %v3943_v48 = vpop.f32.mrb[58].mxu1 }
 0xf4b   :  { %v3952_v49 = vmul.f32 0.5, %v3940_v45  ;;  %v3944_v50 = vadd.f32 %v3943_v48, %v3782_v30  ;;  %v3945_v51 = vpop.f32.mrb[59].mxu1  ;;  %v11802_v45 = vld [vmem:[%s16238_s4 + $0x50] ss:$0 sps:$4 sm:$0xff]  }
 0xf4c   :  { %v3953_v52 = vmul.f32 0.5, %v3942_v47  ;;  %v3946_v53 = vadd.f32 %v3945_v51, %v3786_v31  ;;  %v4133_v46 = vsel %vm16378_vm2, %v11802_v45, 0 }
 0xf4d   :  { %12514 = vtanh.f32 %v3952_v49  ;;  %v3954_v54 = vmul.f32 0.5, %v3944_v50 }
 0xf4e   :  { %12516 = vtanh.f32 %v3953_v52  ;;  %v3955_v55 = vmul.f32 0.5, %v3946_v53  ;;  %v11803_v53 = vld [vmem:[%s16240_s5] ss:$8 sps:$4 sm:$0xff]  }
 0xf4f   :  { %v12507_v57 = vpop.eup %12506  ;;  %12518 = vtanh.f32 %v3954_v54  ;;  %v11805_v54 = vld [vmem:[%s16240_s5 + $0x4] ss:$8 sps:$4 sm:$0xff]  }
 0xf50   :  { %v12509_v58 = vpop.eup %12508  ;;  %v3964_v59 = vmul.f32 0.5, %v12507_v57  ;;  %12520 = vtanh.f32 %v3955_v55  ;;  %v11808_v55 = vld [vmem:[%s16240_s5 + $0x14] ss:$8 sps:$4 sm:$0xff]   ;;  %4581 = vmatprep.subr.bf16.mxu0 %v11805_v54  ;;  %v11806_v57 = vld [vmem:[%s16240_s5 + $0x10] ss:$8 sps:$4 sm:$0xff]  }
 0xf51   :  { %v12511_v60 = vpop.eup %12510  ;;  %v3965_v61 = vmul.f32 0.5, %v12509_v58  ;;  %4582 = vmatpush1.bf16.msra.mxu0 %v11803_v53  ;;  %v11811_v58 = vld [vmem:[%s16240_s5 + $0x24] ss:$8 sps:$4 sm:$0xff]   ;;  %v10726_v53 = vld [vmem:[%s16235_s0 + $0x90] sm:$0xff]  ;;  %v10727_v54 = vld [vmem:[%s16235_s0 + $0x98] sm:$0xf] }
 0xf52   :  { %v12513_v62 = vpop.eup %12512  ;;  %v3966_v0 = vmul.f32 0.5, %v12511_v60  ;;  %v3972_v4 = vadd.f32 0.5, %v3964_v59  ;;  %4583 = vmatprep.subr.bf16.mxu0 %v11808_v55  ;;  %v11809_v59 = vld [vmem:[%s16240_s5 + $0x20] ss:$8 sps:$4 sm:$0xff]   ;;  %v11814_v60 = vld [vmem:[%s16240_s5 + $0x34] ss:$8 sps:$4 sm:$0xff]  }
 0xf53   :  { %v3967_v3 = vmul.f32 0.5, %v12513_v62  ;;  %v3973_v8 = vadd.f32 0.5, %v3965_v61  ;;  %v11812_v61 = vld [vmem:[%s16240_s5 + $0x30] ss:$8 sps:$4 sm:$0xff]   ;;  %v11817_v62 = vld [vmem:[%s16240_s5 + $0x44] ss:$8 sps:$4 sm:$0xff]  }
 0xf54   :  { %v3974_v6 = vadd.f32 0.5, %v3966_v0  ;;  %v11815_v0 = vld [vmem:[%s16240_s5 + $0x40] ss:$8 sps:$4 sm:$0xff]  }
 0xf55   :  { %v3975_v9 = vadd.f32 0.5, %v3967_v3  ;;  %4584 = vmatpush1.bf16.msra.mxu0 %v11806_v57  ;;  %v11820_v3 = vld [vmem:[%s16240_s5 + $0x54] ss:$8 sps:$4 sm:$0xff]  }
 0xf56   :  { %v3982_v14 = vpack.c.bf16 %v3974_v6, %v3972_v4  ;;  %4585 = vmatprep.subr.bf16.mxu0 %v11811_v58  ;;  %v11818_v4 = vld [vmem:[%s16240_s5 + $0x50] ss:$8 sps:$4 sm:$0xff]   ;;  %v11823_v6 = vld [vmem:[%s16240_s5 + $0x64] ss:$8 sps:$4 sm:$0xff]  }
 0xf57   :  { %v12515_v16 = vpop.eup %12514  ;;  %v3983_v17 = vpack.c.bf16 %v3975_v9, %v3973_v8  ;;  %v11821_v8 = vld [vmem:[%s16240_s5 + $0x60] ss:$8 sps:$4 sm:$0xff]   ;;  %v11826_v9 = vld [vmem:[%s16240_s5 + $0x74] ss:$8 sps:$4 sm:$0xff]  }
 0xf58   :  { %v12517_v18 = vpop.eup %12516  ;;  %v3968_v19 = vmul.f32 0.5, %v12515_v16  ;;  %v11829_v16 = vld [vmem:[%s16240_s5 + $0x84] ss:$8 sps:$4 sm:$0xff]  }
 0xf59   :  { %v12519_v20 = vpop.eup %12518  ;;  %v3969_v21 = vmul.f32 0.5, %v12517_v18  ;;  %4000 = vmatprep.subr.bf16.mxu1 %v3983_v17  ;;  %4586 = vmatpush1.bf16.msra.mxu0 %v11809_v59  ;;  %v11827_v17 = vld [vmem:[%s16240_s5 + $0x80] ss:$8 sps:$4 sm:$0xff]   ;;  %v11832_v18 = vld [vmem:[%s16240_s5 + $0x94] ss:$8 sps:$4 sm:$0xff]  }
 0xf5a   :  { %v12521_v22 = vpop.eup %12520  ;;  %v3970_v23 = vmul.f32 0.5, %v12519_v20  ;;  %4001 = vmatpush1.bf16.msra.mxu1 %v3982_v14  ;;  %v3976_v26 = vadd.f32 0.5, %v3968_v19  ;;  %4587 = vmatprep.subr.bf16.mxu0 %v11814_v60  ;;  %v11824_v14 = vld [vmem:[%s16240_s5 + $0x70] ss:$8 sps:$4 sm:$0xff]   ;;  %v11835_v20 = vld [vmem:[%s16240_s5 + $0xa4] ss:$8 sps:$4 sm:$0xff]  }
 0xf5b   :  { %v3971_v24 = vmul.f32 0.5, %v12521_v22  ;;  %v3977_v29 = vadd.f32 0.5, %v3969_v21  ;;  %v11830_v19 = vld [vmem:[%s16240_s5 + $0x90] ss:$8 sps:$4 sm:$0xff]   ;;  %v11833_v21 = vld [vmem:[%s16240_s5 + $0xa0] ss:$8 sps:$4 sm:$0xff]  }
 0xf5c   :  { %v3978_v28 = vadd.f32 0.5, %v3970_v23  ;;  %v11838_v22 = vld [vmem:[%s16240_s5 + $0xb4] ss:$8 sps:$4 sm:$0xff]   ;;  %v11836_v23 = vld [vmem:[%s16240_s5 + $0xb0] ss:$8 sps:$4 sm:$0xff]  }
 0xf5d   :  { %v3979_v30 = vadd.f32 0.5, %v3971_v24  ;;  %4588 = vmatpush1.bf16.msra.mxu0 %v11812_v61  ;;  %v11839_v24 = vld [vmem:[%s16240_s5 + $0xc0] ss:$8 sps:$4 sm:$0xff]  }
 0xf5e   :  { %v3984_v31 = vpack.c.bf16 %v3978_v28, %v3976_v26  ;;  %4589 = vmatprep.subr.bf16.mxu0 %v11817_v62  ;;  %v11841_v26 = vld [vmem:[%s16240_s5 + $0xc4] ss:$8 sps:$4 sm:$0xff]   ;;  %v11842_v28 = vld [vmem:[%s16240_s5 + $0xd0] ss:$8 sps:$4 sm:$0xff]  }
 0xf5f   :  { %v3985_v32 = vpack.c.bf16 %v3979_v30, %v3977_v29  ;;  %v11844_v29 = vld [vmem:[%s16240_s5 + $0xd4] ss:$8 sps:$4 sm:$0xff]  }
 0xf60   :  { %v3995_v33 = vsel %vm16375_vm15, %v3984_v31, 0  ;;  %vm16382_vm15 = vcmask 1046528  }
 0xf61   :  { %10652 = vmatprep.subr.msk.bf16.mxu1 %vm16376_vm1, %v3985_v32  ;;  %4590 = vmatpush1.bf16.msra.mxu0 %v11815_v0 }
 0xf62   :  { %4003 = vmatpush1.bf16.msra.mxu1 %v3995_v33  ;;  %4591 = vmatprep.subr.bf16.mxu0 %v11820_v3 }
 0xf63   :  { %4135 = vmatprep.subr.bf16.mxu1 %v12635_v10 }
 0xf65   :  { %10653 = vmatmul.mubr.msk.bf16.vlgmr.msra.gmra.mrb[60].mxu1 %vm16377_vm14, %v11791_v34  ;;  %4592 = vmatpush1.bf16.msra.mxu0 %v11818_v4  ;;  %vm16383_vm14 = vcmask 1044480  }
 0xf66   :  { %4136 = vmatpush1.bf16.msra.mxu1 %v11792_v35  ;;  %4593 = vmatprep.subr.bf16.mxu0 %v11823_v6 }
 0xf67   :  { %4137 = vmatprep.subr.bf16.mxu1 %v12635_v10 }
 0xf69   :  { %4594 = vmatpush1.bf16.msra.mxu0 %v11821_v8 }
 0xf6a   :  { %4138 = vmatpush1.bf16.msra.mxu1 %v11793_v36  ;;  %4595 = vmatprep.subr.bf16.mxu0 %v11826_v9 }
 0xf6b   :  { %4139 = vmatprep.subr.bf16.mxu1 %v12635_v10 }
 0xf6d   :  { %4596 = vmatpush1.bf16.msra.mxu0 %v11824_v14  ;;  %v11851_v14 = vld [vmem:[%s16240_s5 + $0x100] ss:$8 sps:$4 sm:$0xff]  }
 0xf6e   :  { %4140 = vmatpush1.bf16.msra.mxu1 %v11794_v37  ;;  %4597 = vmatprep.subr.bf16.mxu0 %v11829_v16  ;;  %v11845_v37 = vld [vmem:[%s16240_s5 + $0xe0] ss:$8 sps:$4 sm:$0xff]  }
 0xf6f   :  { %4141 = vmatprep.subr.bf16.mxu1 %v12635_v10 }
 0xf71   :  { %4598 = vmatpush1.bf16.msra.mxu0 %v11827_v17  ;;  %v11856_v17 = vld [vmem:[%s16240_s5 + $0x114] ss:$8 sps:$4 sm:$0xff]  }
 0xf72   :  { %4142 = vmatpush1.bf16.msra.mxu1 %v11795_v38  ;;  %4599 = vmatprep.subr.bf16.mxu0 %v11832_v18  ;;  %v11847_v38 = vld [vmem:[%s16240_s5 + $0xe4] ss:$8 sps:$4 sm:$0xff]  }
 0xf73   :  { %4143 = vmatprep.subr.bf16.mxu1 %v12635_v10 }
 0xf75   :  { %4600 = vmatpush1.bf16.msra.mxu0 %v11830_v19 }
 0xf76   :  { %4144 = vmatpush1.bf16.msra.mxu1 %v11796_v39  ;;  %4601 = vmatprep.subr.bf16.mxu0 %v11835_v20  ;;  %v11854_v20 = vld [vmem:[%s16240_s5 + $0x110] ss:$8 sps:$4 sm:$0xff]  }
 0xf77   :  { %4145 = vmatprep.subr.bf16.mxu1 %v12635_v10 }
 0xf79   :  { %4602 = vmatpush1.bf16.msra.mxu0 %v11833_v21 }
 0xf7a   :  { %4146 = vmatpush1.bf16.msra.mxu1 %v11797_v40  ;;  %4603 = vmatprep.subr.bf16.mxu0 %v11838_v22  ;;  %v11859_v22 = vld [vmem:[%s16240_s5 + $0x124] ss:$8 sps:$4 sm:$0xff]  }
 0xf7b   :  { %4147 = vmatprep.subr.bf16.mxu1 %v12635_v10 }
 0xf7d   :  { %4604 = vmatpush1.bf16.msra.mxu0 %v11836_v23  ;;  %v11857_v23 = vld [vmem:[%s16240_s5 + $0x120] ss:$8 sps:$4 sm:$0xff]  }
 0xf7e   :  { %4148 = vmatpush1.bf16.msra.mxu1 %v11798_v41  ;;  %4605 = vmatprep.subr.bf16.mxu0 %v11841_v26  ;;  %v11860_v26 = vld [vmem:[%s16240_s5 + $0x130] ss:$8 sps:$4 sm:$0xff]  }
 0xf7f   :  { %4149 = vmatprep.subr.bf16.mxu1 %v12635_v10 }
 0xf81   :  { %4606 = vmatpush1.bf16.msra.mxu0 %v11839_v24  ;;  %v11862_v24 = vld [vmem:[%s16240_s5 + $0x134] ss:$8 sps:$4 sm:$0xff]  }
 0xf82   :  { %4150 = vmatpush1.bf16.msra.mxu1 %v11799_v42  ;;  %4607 = vmatprep.subr.bf16.mxu0 %v11844_v29  ;;  %v11863_v29 = vld [vmem:[%s16240_s5 + $0x140] ss:$8 sps:$4 sm:$0xff]  }
 0xf83   :  { %4151 = vmatprep.subr.bf16.mxu1 %v12635_v10 }
 0xf85   :  { %4608 = vmatpush1.bf16.msra.mxu0 %v11842_v28  ;;  %v11865_v28 = vld [vmem:[%s16240_s5 + $0x144] ss:$8 sps:$4 sm:$0xff]  }
 0xf86   :  { %4152 = vmatpush1.bf16.msra.mxu1 %v11800_v43  ;;  %4609 = vmatprep.subr.bf16.mxu0 %v11847_v38  ;;  %v11880_v38 = vld [vmem:[%s16240_s5 + $0x194] ss:$8 sps:$4 sm:$0xff]  }
 0xf87   :  { %4153 = vmatprep.subr.bf16.mxu1 %v12635_v10 }
 0xf89   :  { %4610 = vmatpush1.bf16.msra.mxu0 %v11845_v37  ;;  %v11875_v37 = vld [vmem:[%s16240_s5 + $0x180] ss:$8 sps:$4 sm:$0xff]  }
 0xf8a   :  { %4154 = vmatpush1.bf16.msra.mxu1 %v11801_v44 }
 0xf8b   :  { %4155 = vmatprep.subr.bf16.mxu1 %v12635_v10 }
 0xf8e   :  { %4156 = vmatpush1.bf16.msra.mxu1 %v4133_v46 }
0x1038   :  { %v4034_v47 = vpop.f32.mrb[60].mxu1 }
0x1039   :  { %v4036_v48 = vpop.f32.mrb[61].mxu1 }
0x103a   :  { %v4038_v49 = vpop.f32.mrb[62].mxu1 }
0x103b   :  { %v4043_v50 = vpack.c.bf16 %v4038_v49, %v4034_v47  ;;  %v4040_v51 = vpop.f32.mrb[63].mxu1  ;;  %v11848_v49 = vld [vmem:[%s16240_s5 + $0xf0] ss:$8 sps:$4 sm:$0xff]  }
0x103c   :  { %v4044_v52 = vpack.c.bf16 %v4040_v51, %v4036_v48  ;;  %v11850_v48 = vld [vmem:[%s16240_s5 + $0xf4] ss:$8 sps:$4 sm:$0xff]   ;;  %v10725_v51 = vld [vmem:[%s16235_s0 + $0x88] sm:$0xff] }
0x103d   :  { %4611 = vmatprep.subr.bf16.mxu0 %v11850_v48 }
0x103e   :  { %10665 = vmatprep.mubr.msk.bf16.mxu1 %vm560_vm13, %v4044_v52  ;;  %4612 = vmatpush1.bf16.msra.mxu0 %v11848_v49  ;;  %v10724_v52 = vld [vmem:[%s16235_s0 + $0x80] sm:$0xff] }
0x103f   :  { %4168 = vmatmul.mubr.bf16.vlgmr.msra.gmra.mrb[64].mxu1 %v4043_v50  ;;  %v11853_v50 = vld [vmem:[%s16240_s5 + $0x104] ss:$8 sps:$4 sm:$0xff]  }
0x1040   :  { %4727 = vmatprep.mubr.bf16.mxu1 %v12635_v10  ;;  %4624 = vmatprep.subr.bf16.mxu0 %v11853_v50 }
0x1112   :  { %v4169_v30 = vpop.f32.mrb[64].mxu1 }
0x1113   :  { %4176 = vst.msk [vmem:[#allocation4] sm:$0xff] %vm16379_vm6, %v4169_v30  ;;  %v4171_v31 = vpop.f32.mrb[65].mxu1  ;;  %v4180_v32 = vrot.slane %v4169_v30, 1  ;;  %v4193_v33 = vrot.slane %v4169_v30, 2  ;;  %v4204_v34 = vrot.slane %v4169_v30, 3  ;;  %v4217_v36 = vrot.slane %v4169_v30, 4 }
0x1114   :  { %v4172_v35 = vpop.f32.mrb[66].mxu1  ;;  %vm16384_vm6 = vcmask 1042080   ;;  %v11868_v30 = vld [vmem:[%s16240_s5 + $0x154] ss:$8 sps:$4 sm:$0xff]   ;;  %v11866_v31 = vld [vmem:[%s16240_s5 + $0x150] ss:$8 sps:$4 sm:$0xff]  }
0x1115   :  { %4177 = vst.msk [vmem:[#allocation4 + $0x20] sm:$0x3] %vm16380_vm12, %v4172_v35  ;;  %v4174_v39 = vpop.f32.mrb[67].mxu1  ;;  %v4181_v40 = vrot.slane %v4172_v35, 1  ;;  %v4194_v41 = vrot.slane %v4172_v35, 2  ;;  %v4205_v42 = vrot.slane %v4172_v35, 3 }
0x1116   :  { %v4218_v43 = vrot.slane %v4172_v35, 4  ;;  %vm16385_vm12 = vcmask 320512   ;;  %v11872_v35 = vld [vmem:[%s16240_s5 + $0x170] ss:$8 sps:$4 sm:$0xff]   ;;  %v4294_v39 = vld [vmem:[%s16240_s5 + $0x1a0] sm:$0x33] }
0x1117   :  { %4185 = vrot.lane.b32.xlu1 %v4181_v40, %s16381_s27  ;;  %v4182_v44 = vsel %vm16382_vm15, %v4180_v32, %v4181_v40  ;;  %v4195_v45 = vsel %vm16376_vm1, %v4193_v33, %v4194_v41  ;;  %v4206_v46 = vsel %vm16383_vm14, %v4204_v34, %v4205_v42  ;;  %vm16386_vm15 = vcmask 1048224   ;;  %v11871_v32 = vld [vmem:[%s16240_s5 + $0x164] ss:$8 sps:$4 sm:$0xff]   ;;  %v11869_v33 = vld [vmem:[%s16240_s5 + $0x160] ss:$8 sps:$4 sm:$0xff]  }
0x1118   :  { %v4219_v47 = vsel %vm16378_vm2, %v4217_v36, %v4218_v43  ;;  %4183 = vrot.lane.b32.xlu0 %v4182_v44, %s16381_s27  ;;  %vm16387_vm1 = vcmask 1008960   ;;  %vm16388_vm14 = vcmask 654336   ;;  %vm16389_vm2 = vcmask 1042048   ;;  %v11874_v34 = vld [vmem:[%s16240_s5 + $0x174] ss:$8 sps:$4 sm:$0xff]  }
0x1119   :  { %v11877_v36 = vld [vmem:[%s16240_s5 + $0x184] ss:$8 sps:$4 sm:$0xff]   ;;  %v10718_v44 = vcombine.low %v4294_v39, %v4294_v39 }
0x111b   :  { %4198 = vrot.lane.b32.xlu1 %v4194_v41, %s16346_s15 }
0x111c   :  { %4196 = vrot.lane.b32.xlu0 %v4195_v45, %s16346_s15 }
0x111f   :  { %4209 = vrot.lane.b32.xlu1 %v4205_v42, %s16347_s18  ;;  %v11878_v42 = vld [vmem:[%s16240_s5 + $0x190] ss:$8 sps:$4 sm:$0xff]  }
0x1120   :  { %4207 = vrot.lane.b32.xlu0 %v4206_v46, %s16347_s18 }
0x1123   :  { %4222 = vrot.lane.b32.xlu1 %v4218_v43, %s16312_s17  ;;  %v10719_v43 = vcombine.high %v4294_v39, %v4294_v39 }
0x1124   :  { %4220 = vrot.lane.b32.xlu0 %v4219_v47, %s16312_s17 }
0x1127   :  { %4821 = vrot.lane.b32.xlu1 %v10725_v51, %s16313_s25 }
0x1128   :  { %4819 = vrot.lane.b32.xlu0 %v10724_v52, %s16313_s25 }
0x112b   :  { %4825 = vrot.lane.b32.xlu1 %v10727_v54, %s16313_s25 }
0x112c   :  { %4823 = vrot.lane.b32.xlu0 %v10726_v53, %s16313_s25 }
0x1189   :  { %v4186_v55 = vpop.permute.xlu1 %4185 }
0x118a   :  { %4191 = vst.msk [vmem:[#allocation4 + $0x20] sm:$0x3] %vm16384_vm6, %v4186_v55  ;;  %v4184_v57 = vpop.permute.xlu0 %4183  ;;  %vm16390_vm6 = vcmask 287744  }
0x118b   :  { %4192 = vst.msk [vmem:[#allocation4 + $0x28] sm:$0x3] %vm16385_vm12, %v4186_v55  ;;  %vm16391_vm12 = vcmask 1048192  }
0x118c   :  { %4189 = vst.msk [vmem:[#allocation4] sm:$0xff] %vm16386_vm15, %v4184_v57  ;;  %vm16392_vm15 = vcmask 293888  }
0x118d   :  { %4190 = vst.msk [vmem:[#allocation4 + $0x8] sm:$0xff] %vm560_vm13, %v4184_v57  ;;  %v4199_v58 = vpop.permute.xlu1 %4198 }
0x118e   :  { %4203 = vst.msk [vmem:[#allocation4 + $0x28] sm:$0x3] %vm16387_vm1, %v4199_v58  ;;  %v4197_v59 = vpop.permute.xlu0 %4196  ;;  %vm16393_vm1 = vmmov %vm16392_vm15 }
0x118f   :  { %4202 = vst.msk [vmem:[#allocation4 + $0x8] sm:$0xff] %vm641_vm10, %v4197_v59 }
0x1191   :  { %v4210_v60 = vpop.permute.xlu1 %4209  ;;  %v4234_v6 = vld [vmem:[#allocation4 + $0x20] sm:$0x3] }
0x1192   :  { %4215 = vst.msk [vmem:[#allocation4 + $0x28] sm:$0x3] %vm659_vm9, %v4210_v60  ;;  %v4208_v61 = vpop.permute.xlu0 %4207 }
0x1193   :  { %4216 = vst.msk [vmem:[#allocation4 + $0x30] sm:$0x3] %vm661_vm8, %v4210_v60  ;;  %v4230_v4 = vld [vmem:[#allocation4] sm:$0xff] }
0x1194   :  { %4213 = vst.msk [vmem:[#allocation4 + $0x8] sm:$0xff] %vm655_vm7, %v4208_v61  ;;  %v4238_v16 = vpack.c.bf16 %v4234_v6, %v4230_v4 }
0x1195   :  { %4214 = vst.msk [vmem:[#allocation4 + $0x10] sm:$0xff] %vm16388_vm14, %v4208_v61  ;;  %v4223_v62 = vpop.permute.xlu1 %4222  ;;  %vm16394_vm14 = vcmask 244752  }
0x1196   :  { %4228 = vst.msk [vmem:[#allocation4 + $0x30] sm:$0x3] %vm16389_vm2, %v4223_v62  ;;  %v4221_v0 = vpop.permute.xlu0 %4220  ;;  %vm16395_vm2 = vmmov %vm16394_vm14 }
0x1197   :  { %4229 = vst.msk [vmem:[#allocation4 + $0x38] sm:$0x3] %vm16390_vm6, %v4223_v62  ;;  %vm16396_vm6 = vmmov %vm16395_vm2 }
0x1198   :  { %4226 = vst.msk [vmem:[#allocation4 + $0x10] sm:$0xff] %vm16391_vm12, %v4221_v0  ;;  %vm16397_vm12 = vcmask 240656  }
0x1199   :  { %4227 = vst.msk [vmem:[#allocation4 + $0x18] sm:$0xff] %vm16392_vm15, %v4221_v0  ;;  %v4235_v3 = vld [vmem:[#allocation4 + $0x28] sm:$0x3]  ;;  %v4822_v40 = vpop.permute.xlu1 %4821  ;;  %vm16398_vm15 = vcmask 1041408  }
0x119a   :  { %v4820_v41 = vpop.permute.xlu0 %4819  ;;  %4832 = vst.msk [vmem:[#allocation2 + $0xa] sm:$0xff] %vm16394_vm14, %v4822_v40  ;;  %vm16402_vm14 = vcmask 257024  }
0x119b   :  { %v4231_v8 = vld [vmem:[#allocation4 + $0x8] sm:$0xff]  ;;  %4831 = vst.msk [vmem:[#allocation2 + $0x2] sm:$0xff] %vm16395_vm2, %v4820_v41  ;;  %vm16403_vm2 = vmmov %vm16402_vm14 }
0x119c   :  { %v4239_v9 = vpack.c.bf16 %v4235_v3, %v4231_v8 }
0x119d   :  { %v4826_v46 = vpop.permute.xlu1 %4825  ;;  %v4236_v48 = vld [vmem:[#allocation4 + $0x30] sm:$0x3] }
0x119e   :  { %4613 = vmatprep.mubr.bf16.mxu0 %v4239_v9  ;;  %v4237_v18 = vld [vmem:[#allocation4 + $0x38] sm:$0x3]  ;;  %v4824_v45 = vpop.permute.xlu0 %4823  ;;  %4834 = vst.msk [vmem:[#allocation2 + $0x1a] sm:$0xf] %vm16397_vm12, %v4826_v46 }
0x119f   :  { %4614 = vmatmul.mubr.bf16.vlgmr.msra.gmra.mrb[20].mxu0 %v4238_v16  ;;  %4833 = vst.msk [vmem:[#allocation2 + $0x12] sm:$0xff] %vm16396_vm6, %v4824_v45  ;;  %v4232_v49 = vld [vmem:[#allocation4 + $0x10] sm:$0xff]  ;;  %vm16404_vm6 = vcmask 1048320  }
0x11a0   :  { %v4233_v19 = vld [vmem:[#allocation4 + $0x18] sm:$0xff]  ;;  %4625 = vmatpush1.bf16.msra.mxu0 %v11851_v14  ;;  %v4240_v53 = vpack.c.bf16 %v4236_v48, %v4232_v49  ;;  %vm16405_vm12 = vmmov %vm16404_vm6 }
0x11a1   :  { %v4241_v21 = vpack.c.bf16 %v4237_v18, %v4233_v19  ;;  %4626 = vmatprep.subr.bf16.mxu0 %v11856_v17  ;;  %v4868_v52 = vld [vmem:[#allocation2 + $0xa] sm:$0xff] }
0x11a2   :  { %v4844_v50 = vld [vmem:[#allocation2 + $0x9] sm:$0xff]  ;;  %v4843_v51 = vld [vmem:[#allocation2 + $0x1] sm:$0xff] }
0x11a3   :  { %10721 = vmatprep.mubr.msk.bf16.mxu0 %vm16393_vm1, %v4241_v21  ;;  %vm16399_vm1 = vmmov %vm16398_vm15  ;;  %4853 = vrot.lane.b32.xlu1 %v4844_v50, %s16400_s21  ;;  %v4867_v54 = vld [vmem:[#allocation2 + $0x2] sm:$0xff] }
0x11a4   :  { %4627 = vmatpush1.bf16.msra.mxu0 %v11854_v20  ;;  %v4576_v47 = vsel %vm16399_vm1, %v10718_v44, 0  ;;  %4851 = vrot.lane.b32.xlu0 %v4843_v51, %s16400_s21  ;;  %v4891_v57 = vld [vmem:[#allocation2 + $0x3] sm:$0xff]  ;;  %vm16407_vm1 = vcmask 781824  }
0x11a5   :  { %4628 = vmatprep.subr.bf16.mxu0 %v11859_v22  ;;  %v4870_v60 = vld [vmem:[#allocation2 + $0x1a] sm:$0xf]  ;;  %v4915_v3 = vld [vmem:[#allocation2 + $0x4] sm:$0xff] }
0x11a6   :  { %v4892_v55 = vld [vmem:[#allocation2 + $0xb] sm:$0xff]  ;;  %v4846_v58 = vld [vmem:[#allocation2 + $0x19] sm:$0xf]  ;;  %4919 = vst.msk [vmem:[#allocation3 + $0x8] sm:$0xff] %vm48_vm0, %v4915_v3  ;;  %v4835_v8 = vld [vmem:[#allocation2] sm:$0xff] }
0x11a7   :  { %4877 = vrot.lane.b32.xlu1 %v4868_v52, %s16401_s29  ;;  %v4845_v59 = vld [vmem:[#allocation2 + $0x11] sm:$0xff]  ;;  %v4894_v62 = vld [vmem:[#allocation2 + $0x1b] sm:$0xf]  ;;  %v4836_v6 = vld [vmem:[#allocation2 + $0x8] sm:$0xff]  ;;  %4839 = vst.msk [vmem:[#allocation3] sm:$0xff] %vm48_vm0, %v4835_v8 }
0x11a8   :  { %4629 = vmatpush1.bf16.msra.mxu0 %v11857_v23  ;;  %4875 = vrot.lane.b32.xlu0 %v4867_v54, %s16401_s29  ;;  %v4869_v61 = vld [vmem:[#allocation2 + $0x12] sm:$0xff]  ;;  %4840 = vst.msk [vmem:[#allocation3 + $0x10] sm:$0xff] %vm48_vm0, %v4836_v6  ;;  %v4918_v17 = vld [vmem:[#allocation2 + $0x1c] sm:$0xf]  ;;  %v4683_v6 = vld [vmem:[%s16242_s7] sm:$0x7] }
0x11a9   :  { %4630 = vmatprep.subr.bf16.mxu0 %v11862_v24  ;;  %v4893_v0 = vld [vmem:[#allocation2 + $0x13] sm:$0xff]  ;;  %4922 = vst.msk [vmem:[#allocation3 + $0x38] sm:$0xf] %vm16403_vm2, %v4918_v17  ;;  %vm16409_vm2 = vmmov %vm16404_vm6  ;;  %v11883_v8 = vld [vmem:[%s16236_s1] ss:$8 sps:$4 sm:$0xff]  }
0x11aa   :  { %v4916_v4 = vld [vmem:[#allocation2 + $0xc] sm:$0xff]  ;;  %v4838_v14 = vld [vmem:[#allocation2 + $0x18] sm:$0xf] }
0x11ab   :  { %4901 = vrot.lane.b32.xlu1 %v4892_v55, %s16364_s22  ;;  %4920 = vst.msk [vmem:[#allocation3 + $0x18] sm:$0xff] %vm48_vm0, %v4916_v4  ;;  %v4837_v9 = vld [vmem:[#allocation2 + $0x10] sm:$0xff]  ;;  %v11891_v17 = vld [vmem:[%s16236_s1 + $0x24] ss:$8 sps:$4 sm:$0xff]  }
0x11ac   :  { %4631 = vmatpush1.bf16.msra.mxu0 %v11860_v26  ;;  %4899 = vrot.lane.b32.xlu0 %v4891_v57, %s16364_s22  ;;  %4841 = vst.msk [vmem:[#allocation3 + $0x20] sm:$0xff] %vm48_vm0, %v4837_v9  ;;  %v4917_v16 = vld [vmem:[#allocation2 + $0x14] sm:$0xff] }
0x11ad   :  { %4632 = vmatprep.subr.bf16.mxu0 %v11865_v28  ;;  %4842 = vst.msk [vmem:[#allocation3 + $0x30] sm:$0xf] %vm16402_vm14, %v4838_v14  ;;  %vm16408_vm14 = vcmask 1044224   ;;  %v4924_v3 = vld [vmem:[#allocation3 + $0x8] sm:$0xff]  ;;  %v11888_v9 = vld [vmem:[%s16236_s1 + $0x14] ss:$8 sps:$4 sm:$0xff]  }
0x11ae   :  { %4921 = vst.msk [vmem:[#allocation3 + $0x28] sm:$0xff] %vm48_vm0, %v4917_v16  ;;  %v11886_v16 = vld [vmem:[%s16236_s1 + $0x10] ss:$8 sps:$4 sm:$0xff]  }
0x11af   :  { %4857 = vrot.lane.b32.xlu1 %v4846_v58, %s16400_s21 }
0x11b0   :  { %4633 = vmatpush1.bf16.msra.mxu0 %v11863_v29  ;;  %4855 = vrot.lane.b32.xlu0 %v4845_v59, %s16400_s21 }
0x11b1   :  { %4634 = vmatprep.subr.bf16.mxu0 %v11868_v30 }
0x11b2   :  { %v4926_v4 = vld [vmem:[#allocation3 + $0x18] sm:$0xff] }
0x11b3   :  { %4881 = vrot.lane.b32.xlu1 %v4870_v60, %s16401_s29  ;;  %v4932_v14 = vpack.c.bf16 %v4926_v4, %v4924_v3 }
0x11b4   :  { %4635 = vmatpush1.bf16.msra.mxu0 %v11866_v31  ;;  %4879 = vrot.lane.b32.xlu0 %v4869_v61, %s16401_s29 }
0x11b5   :  { %4636 = vmatprep.subr.bf16.mxu0 %v11871_v32  ;;  %v4295_v32 = vld [vmem:[%s16241_s6] sm:$0x3] }
0x11b7   :  { %4905 = vrot.lane.b32.xlu1 %v4894_v62, %s16364_s22  ;;  %v11885_v62 = vld [vmem:[%s16236_s1 + $0x4] ss:$8 sps:$4 sm:$0xff]  }
0x11b8   :  { %4637 = vmatpush1.bf16.msra.mxu0 %v11869_v33  ;;  %4903 = vrot.lane.b32.xlu0 %v4893_v0, %s16364_s22  ;;  %v4300_v33 = vrot.slane %v4295_v32, %v12844_v13 }
0x11b9   :  { %4638 = vmatprep.subr.bf16.mxu0 %v11874_v34  ;;  %v4304_v34 = vrot.slane %v4295_v32, %v12850_v15  ;;  %v11907_v32 = vld [vmem:[%s16236_s1 + $0x80] ss:$8 sps:$4 sm:$0xff]  }
0x11bc   :  { %4639 = vmatpush1.bf16.msra.mxu0 %v11872_v35 }
0x11bd   :  { %4640 = vmatprep.subr.bf16.mxu0 %v11877_v36 }
0x11c0   :  { %4641 = vmatpush1.bf16.msra.mxu0 %v11875_v37 }
0x11c1   :  { %4642 = vmatprep.subr.bf16.mxu0 %v11880_v38 }
0x11c4   :  { %4643 = vmatpush1.bf16.msra.mxu0 %v11878_v42 }
0x11c5   :  { %10720 = vmatprep.subr.msk.bf16.mxu0 %vm16398_vm15, %v10719_v43  ;;  %vm16406_vm15 = vcmask 519424  }
0x11c8   :  { %4645 = vmatpush1.bf16.msra.mxu0 %v4576_v47 }
0x11cb   :  { %4657 = vmatmul.mubr.bf16.vlgmr.msra.gmra.mrb[20].mxu0 %v4240_v53 }
0x1215   :  { %v4854_v18 = vpop.permute.xlu1 %4853 }
0x1216   :  { %v4852_v19 = vpop.permute.xlu0 %4851  ;;  %4864 = vst.msk [vmem:[#allocation3 + $0x10] sm:$0xff] %vm108_vm4, %v4854_v18  ;;  %v11889_v18 = vld [vmem:[%s16236_s1 + $0x20] ss:$8 sps:$4 sm:$0xff]  }
0x1217   :  { %4863 = vst.msk [vmem:[#allocation3] sm:$0xff] %vm108_vm4, %v4852_v19  ;;  %v11894_v19 = vld [vmem:[%s16236_s1 + $0x34] ss:$8 sps:$4 sm:$0xff]  }
0x1219   :  { %v4878_v20 = vpop.permute.xlu1 %4877 }
0x121a   :  { %v4876_v21 = vpop.permute.xlu0 %4875  ;;  %4888 = vst.msk [vmem:[#allocation3 + $0x10] sm:$0xff] %vm134_vm5, %v4878_v20  ;;  %v11892_v20 = vld [vmem:[%s16236_s1 + $0x30] ss:$8 sps:$4 sm:$0xff]  }
0x121b   :  { %4887 = vst.msk [vmem:[#allocation3] sm:$0xff] %vm134_vm5, %v4876_v21  ;;  %v11897_v21 = vld [vmem:[%s16236_s1 + $0x44] ss:$8 sps:$4 sm:$0xff]  }
0x121d   :  { %v4902_v22 = vpop.permute.xlu1 %4901 }
0x121e   :  { %v4900_v23 = vpop.permute.xlu0 %4899  ;;  %4912 = vst.msk [vmem:[#allocation3 + $0x10] sm:$0xff] %vm16404_vm6, %v4902_v22  ;;  %vm16410_vm6 = vcmask 1044480   ;;  %v11895_v22 = vld [vmem:[%s16236_s1 + $0x40] ss:$8 sps:$4 sm:$0xff]  }
0x121f   :  { %4911 = vst.msk [vmem:[#allocation3] sm:$0xff] %vm16405_vm12, %v4900_v23  ;;  %vm16411_vm12 = vmmov %vm16410_vm6  ;;  %v11900_v23 = vld [vmem:[%s16236_s1 + $0x54] ss:$8 sps:$4 sm:$0xff]  }
0x1221   :  { %v4858_v24 = vpop.permute.xlu1 %4857 }
0x1222   :  { %v4856_v26 = vpop.permute.xlu0 %4855  ;;  %4866 = vst.msk [vmem:[#allocation3 + $0x30] sm:$0xf] %vm16406_vm15, %v4858_v24  ;;  %v11898_v24 = vld [vmem:[%s16236_s1 + $0x50] ss:$8 sps:$4 sm:$0xff]   ;;  %vm16412_vm15 = vcmask 1045504  }
0x1223   :  { %4865 = vst.msk [vmem:[#allocation3 + $0x20] sm:$0xff] %vm108_vm4, %v4856_v26  ;;  %v11903_v26 = vld [vmem:[%s16236_s1 + $0x64] ss:$8 sps:$4 sm:$0xff]  }
0x1225   :  { %v4882_v28 = vpop.permute.xlu1 %4881 }
0x1226   :  { %v4880_v29 = vpop.permute.xlu0 %4879  ;;  %4890 = vst.msk [vmem:[#allocation3 + $0x30] sm:$0xf] %vm16407_vm1, %v4882_v28  ;;  %v11901_v28 = vld [vmem:[%s16236_s1 + $0x60] ss:$8 sps:$4 sm:$0xff]   ;;  %vm16413_vm1 = vmmov %vm16412_vm15 }
0x1227   :  { %4889 = vst.msk [vmem:[#allocation3 + $0x20] sm:$0xff] %vm134_vm5, %v4880_v29  ;;  %v11906_v29 = vld [vmem:[%s16236_s1 + $0x74] ss:$8 sps:$4 sm:$0xff]  }
0x1229   :  { %v4906_v30 = vpop.permute.xlu1 %4905 }
0x122a   :  { %v4904_v31 = vpop.permute.xlu0 %4903  ;;  %4914 = vst.msk [vmem:[#allocation3 + $0x30] sm:$0xf] %vm16408_vm14, %v4906_v30  ;;  %v11904_v30 = vld [vmem:[%s16236_s1 + $0x70] ss:$8 sps:$4 sm:$0xff]   ;;  %vm16414_vm14 = vcmask 228352  }
0x122b   :  { %4913 = vst.msk [vmem:[#allocation3 + $0x20] sm:$0xff] %vm16409_vm2, %v4904_v31  ;;  %v11909_v31 = vld [vmem:[%s16236_s1 + $0x84] ss:$8 sps:$4 sm:$0xff]   ;;  %vm16415_vm2 = vcmask 1043456  }
0x129e   :  { %v4658_v35 = vpop.f32.mrb[20].mxu0 }
0x129f   :  { %v11331_v36 = vadd.f32 %v4658_v35, %v4300_v33  ;;  %v4660_v37 = vpop.f32.mrb[21].mxu0  ;;  %v4923_v35 = vld [vmem:[#allocation3] sm:$0xff] }
0x12a0   :  { %v11332_v38 = vadd.f32 %v4660_v37, %v4304_v34  ;;  %v4662_v39 = vpop.f32.mrb[22].mxu0  ;;  %v4928_v37 = vld [vmem:[#allocation3 + $0x28] sm:$0xff] }
0x12a1   :  { %v4667_v40 = vmul.f32 0.5, %v11331_v36  ;;  %v11333_v41 = vadd.f32 %v4662_v39, %v4300_v33  ;;  %v4664_v42 = vpop.f32.mrb[23].mxu0  ;;  %v11912_v33 = vld [vmem:[%s16236_s1 + $0x94] ss:$8 sps:$4 sm:$0xff]  }
0x12a2   :  { %v4668_v43 = vmul.f32 0.5, %v11332_v38  ;;  %v11334_v44 = vadd.f32 %v4664_v42, %v4304_v34  ;;  %v11910_v34 = vld [vmem:[%s16236_s1 + $0x90] ss:$8 sps:$4 sm:$0xff]   ;;  %v4927_v42 = vld [vmem:[#allocation3 + $0x20] sm:$0xff] }
0x12a3   :  { %12522 = vtanh.f32 %v4667_v40  ;;  %v4669_v45 = vmul.f32 0.5, %v11333_v41  ;;  %v4925_v36 = vld [vmem:[#allocation3 + $0x10] sm:$0xff]  ;;  %v4930_v38 = vld [vmem:[#allocation3 + $0x38] sm:$0xf] }
0x12a4   :  { %12524 = vtanh.f32 %v4668_v43  ;;  %v4670_v46 = vmul.f32 0.5, %v11334_v44  ;;  %v4931_v39 = vpack.c.bf16 %v4925_v36, %v4923_v35  ;;  %v4934_v40 = vpack.c.bf16 %v4930_v38, %v4928_v37  ;;  %v4929_v41 = vld [vmem:[#allocation3 + $0x30] sm:$0xf] }
0x12a5   :  { %12526 = vtanh.f32 %v4669_v45  ;;  %v4933_v43 = vpack.c.bf16 %v4929_v41, %v4927_v42 }
0x12a6   :  { %12528 = vtanh.f32 %v4670_v46 }
0x12ad   :  { %v12523_v47 = vpop.eup %12522 }
0x12ae   :  { %v12525_v48 = vpop.eup %12524  ;;  %v4675_v49 = vmul.f32 0.5, %v12523_v47 }
0x12af   :  { %v12527_v50 = vpop.eup %12526  ;;  %v4676_v51 = vmul.f32 0.5, %v12525_v48 }
0x12b0   :  { %v12529_v52 = vpop.eup %12528  ;;  %v4677_v53 = vmul.f32 0.5, %v12527_v50  ;;  %v4679_v55 = vadd.f32 0.5, %v4675_v49 }
0x12b1   :  { %v4678_v54 = vmul.f32 0.5, %v12529_v52  ;;  %v4680_v58 = vadd.f32 0.5, %v4676_v51 }
0x12b2   :  { %v4681_v57 = vadd.f32 0.5, %v4677_v53 }
0x12b3   :  { %v4682_v59 = vadd.f32 0.5, %v4678_v54  ;;  %v4955_v54 = vld [vmem:[%s16239_s2] sm:$0x3] }
0x12b4   :  { %v4684_v60 = vpack.c.bf16 %v4681_v57, %v4679_v55  ;;  %v4960_v55 = vrot.slane %v4955_v54, %v12844_v13  ;;  %v4964_v57 = vrot.slane %v4955_v54, %v12850_v15 }
0x12b5   :  { %v4685_v61 = vpack.c.bf16 %v4682_v59, %v4680_v58 }
0x12b6   :  { %v4690_v0 = vsel %vm16410_vm6, %v4684_v60, 0  ;;  %vm16416_vm6 = vcmask 687104  }
0x12b7   :  { %10722 = vmatprep.subr.msk.bf16.mxu1 %vm16411_vm12, %v4685_v61  ;;  %vm16417_vm12 = vcmask 680960  }
0x12b8   :  { %4696 = vmatpush1.bf16.msra.mxu1 %v4690_v0 }
0x12b9   :  { %5073 = vmatprep.subr.bf16.mxu1 %v11885_v62 }
0x12bb   :  { %10723 = vmatmul.mubr.msk.bf16.vlgmr.msra.gmra.mrb[68].mxu1 %vm1137_vm3, %v4683_v6 }
0x12bc   :  { %5074 = vmatpush1.bf16.msra.mxu1 %v11883_v8  ;;  %10748 = vmatprep.mubr.msk.bf16.mxu1 %vm48_vm0, %v4932_v14 }
0x12bd   :  { %5075 = vmatprep.subr.bf16.mxu1 %v11888_v9 }
0x12c0   :  { %5076 = vmatpush1.bf16.msra.mxu1 %v11886_v16 }
0x12c1   :  { %5077 = vmatprep.subr.bf16.mxu1 %v11891_v17 }
0x12c4   :  { %5078 = vmatpush1.bf16.msra.mxu1 %v11889_v18 }
0x12c5   :  { %5079 = vmatprep.subr.bf16.mxu1 %v11894_v19 }
0x12c8   :  { %5080 = vmatpush1.bf16.msra.mxu1 %v11892_v20 }
0x12c9   :  { %5081 = vmatprep.subr.bf16.mxu1 %v11897_v21 }
0x12cc   :  { %5082 = vmatpush1.bf16.msra.mxu1 %v11895_v22 }
0x12cd   :  { %5083 = vmatprep.subr.bf16.mxu1 %v11900_v23 }
0x12d0   :  { %5084 = vmatpush1.bf16.msra.mxu1 %v11898_v24 }
0x12d1   :  { %5085 = vmatprep.subr.bf16.mxu1 %v11903_v26 }
0x12d4   :  { %5086 = vmatpush1.bf16.msra.mxu1 %v11901_v28 }
0x12d5   :  { %5087 = vmatprep.subr.bf16.mxu1 %v11906_v29 }
0x12d8   :  { %5088 = vmatpush1.bf16.msra.mxu1 %v11904_v30 }
0x12d9   :  { %5089 = vmatprep.subr.bf16.mxu1 %v11909_v31 }
0x12dc   :  { %5090 = vmatpush1.bf16.msra.mxu1 %v11907_v32 }
0x12dd   :  { %5091 = vmatprep.subr.bf16.mxu1 %v11912_v33 }
0x12e0   :  { %5092 = vmatpush1.bf16.msra.mxu1 %v11910_v34 }
0x12e3   :  { %5106 = vmatmul.mubr.bf16.vlgmr.msra.gmra.mrb[72].mxu1 %v4931_v39 }
0x12e4   :  { %10749 = vmatprep.mubr.msk.bf16.mxu1 %vm48_vm0, %v4934_v40 }
0x12eb   :  { %5116 = vmatmul.mubr.bf16.gmra.mrb[76].mxu1 %v4933_v43 }
0x12ec   :  { %5210 = vmatprep.mubr.bf16.mxu1 %v12635_v10 }
0x138e   :  { %v4729_v44 = vpop.f32.mrb[68].mxu1 }
0x138f   :  { %v4731_v45 = vpop.f32.mrb[69].mxu1 }
0x1390   :  { %v4738_v46 = vcombine.low %v4729_v44, %v4731_v45  ;;  %v4791_v47 = vcombine.high %v4729_v44, %v4731_v45  ;;  %v4733_v48 = vpop.f32.mrb[70].mxu1 }
0x1391   :  { %v4734_v49 = vpop.f32.mrb[71].mxu1 }
0x1392   :  { %v14396_v50 = vrot.slane %v4738_v46, %v13224_v56  ;;  %v4798_v51 = vrot.slane %v4791_v47, %v13224_v56 }
0x1394   :  { %v14401_v52 = vrot.slane %v14396_v50, %v13224_v56  ;;  %v4805_v53 = vrot.slane %v4798_v51, %v13224_v56 }
0x1396   :  { %4808 = vst.msk [vmem:[#allocation5 + $0x2b] ss:$8 sm:$0x3] %vm13231_vm11, %v4805_v53  ;;  %4755 = vst.msk [vmem:[#allocation5 + $0x3] ss:$8 sm:$0x3] %vm13231_vm11, %v14401_v52  ;;  %v4773_v1 = vcombine.high %v14401_v52, %v14401_v52 }
0x13b6   :  { %v5107_v58 = vpop.f32.mrb[72].mxu1 }
0x13b7   :  { %v5108_v59 = vadd.f32 %v5107_v58, %v4960_v55  ;;  %v5109_v60 = vpop.f32.mrb[73].mxu1 }
0x13b8   :  { %v5110_v61 = vadd.f32 %v5109_v60, %v4964_v57  ;;  %v5111_v62 = vpop.f32.mrb[74].mxu1 }
0x13b9   :  { %v5126_v0 = vmul.f32 0.5, %v5108_v59  ;;  %v5112_v3 = vadd.f32 %v5111_v62, %v4960_v55  ;;  %v5113_v4 = vpop.f32.mrb[75].mxu1  ;;  %v11913_v62 = vld [vmem:[%s16237_s3] sm:$0x7f]  }
0x13ba   :  { %v5127_v6 = vmul.f32 0.5, %v5110_v61  ;;  %v5114_v8 = vadd.f32 %v5113_v4, %v4964_v57  ;;  %v11916_v4 = vld [vmem:[%s16238_s4 + $0x10] sm:$0xff]  }
0x13bb   :  { %12530 = vtanh.f32 %v5126_v0  ;;  %v5128_v9 = vmul.f32 0.5, %v5112_v3  ;;  %v11914_v0 = vld [vmem:[%s16238_s4] sm:$0xff]   ;;  %v11915_v3 = vld [vmem:[%s16238_s4 + $0x8] sm:$0xff]  }
0x13bc   :  { %12532 = vtanh.f32 %v5127_v6  ;;  %v5129_v14 = vmul.f32 0.5, %v5114_v8  ;;  %v11917_v6 = vld [vmem:[%s16238_s4 + $0x18] sm:$0xff]   ;;  %v11918_v8 = vld [vmem:[%s16238_s4 + $0x20] sm:$0xff]  }
0x13bd   :  { %12534 = vtanh.f32 %v5128_v9  ;;  %v11919_v9 = vld [vmem:[%s16238_s4 + $0x28] sm:$0xff]  }
0x13be   :  { %12536 = vtanh.f32 %v5129_v14  ;;  %v5117_v16 = vpop.f32.mrb[76].mxu1  ;;  %v11920_v14 = vld [vmem:[%s16238_s4 + $0x30] sm:$0xff]  }
0x13bf   :  { %v5118_v17 = vadd.f32 %v5117_v16, %v4960_v55  ;;  %v5119_v18 = vpop.f32.mrb[77].mxu1  ;;  %v11921_v16 = vld [vmem:[%s16238_s4 + $0x38] sm:$0xff]  }
0x13c0   :  { %v5120_v19 = vadd.f32 %v5119_v18, %v4964_v57  ;;  %v5121_v20 = vpop.f32.mrb[78].mxu1  ;;  %v11923_v18 = vld [vmem:[%s16238_s4 + $0x48] sm:$0xff]  }
0x13c1   :  { %v5130_v21 = vmul.f32 0.5, %v5118_v17  ;;  %v5122_v22 = vadd.f32 %v5121_v20, %v4960_v55  ;;  %v5123_v23 = vpop.f32.mrb[79].mxu1  ;;  %v11922_v17 = vld [vmem:[%s16238_s4 + $0x40] sm:$0xff]  }
0x13c2   :  { %v5131_v24 = vmul.f32 0.5, %v5120_v19  ;;  %v5124_v26 = vadd.f32 %v5123_v23, %v4964_v57  ;;  %v11924_v19 = vld [vmem:[%s16238_s4 + $0x50] ss:$0 sps:$4 sm:$0xff]  }
0x13c3   :  { %12538 = vtanh.f32 %v5130_v21  ;;  %v5132_v28 = vmul.f32 0.5, %v5122_v22  ;;  %v5311_v20 = vsel %vm16415_vm2, %v11924_v19, 0 }
0x13c4   :  { %12540 = vtanh.f32 %v5131_v24  ;;  %v5133_v29 = vmul.f32 0.5, %v5124_v26 }
0x13c5   :  { %v12531_v30 = vpop.eup %12530  ;;  %12542 = vtanh.f32 %v5132_v28 }
0x13c6   :  { %v12533_v31 = vpop.eup %12532  ;;  %v5142_v32 = vmul.f32 0.5, %v12531_v30  ;;  %12544 = vtanh.f32 %v5133_v29  ;;  %v11925_v29 = vld [vmem:[%s16240_s5] ss:$8 sps:$4 sm:$0xff]   ;;  %v11927_v30 = vld [vmem:[%s16240_s5 + $0x4] ss:$8 sps:$4 sm:$0xff]  }
0x13c7   :  { %v12535_v33 = vpop.eup %12534  ;;  %v5143_v34 = vmul.f32 0.5, %v12533_v31  ;;  %v11930_v31 = vld [vmem:[%s16240_s5 + $0x14] ss:$8 sps:$4 sm:$0xff]   ;;  %5759 = vmatprep.subr.bf16.mxu0 %v11927_v30  ;;  %v10823_v30 = vld [vmem:[%s16235_s0 + $0xa0] sm:$0xff] }
0x13c8   :  { %v12537_v35 = vpop.eup %12536  ;;  %v5144_v36 = vmul.f32 0.5, %v12535_v33  ;;  %v5150_v38 = vadd.f32 0.5, %v5142_v32  ;;  %5760 = vmatpush1.bf16.msra.mxu0 %v11925_v29  ;;  %v11928_v32 = vld [vmem:[%s16240_s5 + $0x10] ss:$8 sps:$4 sm:$0xff]   ;;  %v11933_v33 = vld [vmem:[%s16240_s5 + $0x24] ss:$8 sps:$4 sm:$0xff]  }
0x13c9   :  { %v5145_v37 = vmul.f32 0.5, %v12537_v35  ;;  %v5151_v40 = vadd.f32 0.5, %v5143_v34  ;;  %5761 = vmatprep.subr.bf16.mxu0 %v11930_v31  ;;  %v11931_v34 = vld [vmem:[%s16240_s5 + $0x20] ss:$8 sps:$4 sm:$0xff]   ;;  %v11936_v35 = vld [vmem:[%s16240_s5 + $0x34] ss:$8 sps:$4 sm:$0xff]  }
0x13ca   :  { %v5152_v39 = vadd.f32 0.5, %v5144_v36  ;;  %v11934_v36 = vld [vmem:[%s16240_s5 + $0x30] ss:$8 sps:$4 sm:$0xff]   ;;  %v10824_v29 = vld [vmem:[%s16235_s0 + $0xa8] sm:$0xff] }
0x13cb   :  { %v5153_v41 = vadd.f32 0.5, %v5145_v37  ;;  %v11939_v37 = vld [vmem:[%s16240_s5 + $0x44] ss:$8 sps:$4 sm:$0xff]   ;;  %v10825_v31 = vld [vmem:[%s16235_s0 + $0xb0] sm:$0xff] }
0x13cc   :  { %v5160_v42 = vpack.c.bf16 %v5152_v39, %v5150_v38  ;;  %5762 = vmatpush1.bf16.msra.mxu0 %v11928_v32  ;;  %v11937_v38 = vld [vmem:[%s16240_s5 + $0x40] ss:$8 sps:$4 sm:$0xff]   ;;  %v11942_v39 = vld [vmem:[%s16240_s5 + $0x54] ss:$8 sps:$4 sm:$0xff]   ;;  %v10826_v32 = vld [vmem:[%s16235_s0 + $0xb8] sm:$0xf] }
0x13cd   :  { %v12539_v43 = vpop.eup %12538  ;;  %v5161_v44 = vpack.c.bf16 %v5153_v41, %v5151_v40  ;;  %5763 = vmatprep.subr.bf16.mxu0 %v11933_v33  ;;  %v11940_v40 = vld [vmem:[%s16240_s5 + $0x50] ss:$8 sps:$4 sm:$0xff]   ;;  %v11945_v41 = vld [vmem:[%s16240_s5 + $0x64] ss:$8 sps:$4 sm:$0xff]  }
0x13ce   :  { %v12541_v45 = vpop.eup %12540  ;;  %v5146_v46 = vmul.f32 0.5, %v12539_v43  ;;  %v11948_v43 = vld [vmem:[%s16240_s5 + $0x74] ss:$8 sps:$4 sm:$0xff]  }
0x13cf   :  { %v12543_v47 = vpop.eup %12542  ;;  %v5147_v48 = vmul.f32 0.5, %v12541_v45  ;;  %5178 = vmatprep.subr.bf16.mxu1 %v5161_v44  ;;  %v11946_v44 = vld [vmem:[%s16240_s5 + $0x70] ss:$8 sps:$4 sm:$0xff]   ;;  %v11951_v45 = vld [vmem:[%s16240_s5 + $0x84] ss:$8 sps:$4 sm:$0xff]  }
0x13d0   :  { %v12545_v49 = vpop.eup %12544  ;;  %v5148_v51 = vmul.f32 0.5, %v12543_v47  ;;  %5179 = vmatpush1.bf16.msra.mxu1 %v5160_v42  ;;  %v5154_v54 = vadd.f32 0.5, %v5146_v46  ;;  %5764 = vmatpush1.bf16.msra.mxu0 %v11931_v34  ;;  %v11943_v42 = vld [vmem:[%s16240_s5 + $0x60] ss:$8 sps:$4 sm:$0xff]   ;;  %v11954_v47 = vld [vmem:[%s16240_s5 + $0x94] ss:$8 sps:$4 sm:$0xff]  }
0x13d1   :  { %v5149_v53 = vmul.f32 0.5, %v12545_v49  ;;  %v5155_v57 = vadd.f32 0.5, %v5147_v48  ;;  %5765 = vmatprep.subr.bf16.mxu0 %v11936_v35  ;;  %v11949_v46 = vld [vmem:[%s16240_s5 + $0x80] ss:$8 sps:$4 sm:$0xff]   ;;  %v11952_v48 = vld [vmem:[%s16240_s5 + $0x90] ss:$8 sps:$4 sm:$0xff]  }
0x13d2   :  { %v5156_v55 = vadd.f32 0.5, %v5148_v51  ;;  %v11957_v49 = vld [vmem:[%s16240_s5 + $0xa4] ss:$8 sps:$4 sm:$0xff]   ;;  %v11955_v51 = vld [vmem:[%s16240_s5 + $0xa0] ss:$8 sps:$4 sm:$0xff]  }
0x13d3   :  { %v5157_v58 = vadd.f32 0.5, %v5149_v53  ;;  %v11960_v53 = vld [vmem:[%s16240_s5 + $0xb4] ss:$8 sps:$4 sm:$0xff]  }
0x13d4   :  { %v5162_v59 = vpack.c.bf16 %v5156_v55, %v5154_v54  ;;  %5766 = vmatpush1.bf16.msra.mxu0 %v11934_v36  ;;  %v11958_v54 = vld [vmem:[%s16240_s5 + $0xb0] ss:$8 sps:$4 sm:$0xff]   ;;  %v11961_v55 = vld [vmem:[%s16240_s5 + $0xc0] ss:$8 sps:$4 sm:$0xff]  }
0x13d5   :  { %v5163_v60 = vpack.c.bf16 %v5157_v58, %v5155_v57  ;;  %5767 = vmatprep.subr.bf16.mxu0 %v11939_v37  ;;  %v11963_v57 = vld [vmem:[%s16240_s5 + $0xc4] ss:$8 sps:$4 sm:$0xff]   ;;  %v11964_v58 = vld [vmem:[%s16240_s5 + $0xd0] ss:$8 sps:$4 sm:$0xff]  }
0x13d6   :  { %v5173_v61 = vsel %vm16412_vm15, %v5162_v59, 0  ;;  %v11966_v59 = vld [vmem:[%s16240_s5 + $0xd4] ss:$8 sps:$4 sm:$0xff]   ;;  %vm16418_vm15 = vcmask 1046528  }
0x13d7   :  { %10751 = vmatprep.subr.msk.bf16.mxu1 %vm16413_vm1, %v5163_v60 }
0x13d8   :  { %5181 = vmatpush1.bf16.msra.mxu1 %v5173_v61  ;;  %5768 = vmatpush1.bf16.msra.mxu0 %v11937_v38 }
0x13d9   :  { %5313 = vmatprep.subr.bf16.mxu1 %v12635_v10  ;;  %5769 = vmatprep.subr.bf16.mxu0 %v11942_v39 }
0x13db   :  { %10752 = vmatmul.mubr.msk.bf16.vlgmr.msra.gmra.mrb[80].mxu1 %vm16414_vm14, %v11913_v62  ;;  %vm16419_vm14 = vcmask 1044480  }
0x13dc   :  { %5314 = vmatpush1.bf16.msra.mxu1 %v11914_v0  ;;  %5770 = vmatpush1.bf16.msra.mxu0 %v11940_v40 }
0x13dd   :  { %5315 = vmatprep.subr.bf16.mxu1 %v12635_v10  ;;  %5771 = vmatprep.subr.bf16.mxu0 %v11945_v41 }
0x13e0   :  { %5316 = vmatpush1.bf16.msra.mxu1 %v11915_v3  ;;  %5772 = vmatpush1.bf16.msra.mxu0 %v11943_v42 }
0x13e1   :  { %5317 = vmatprep.subr.bf16.mxu1 %v12635_v10  ;;  %5773 = vmatprep.subr.bf16.mxu0 %v11948_v43 }
0x13e4   :  { %5318 = vmatpush1.bf16.msra.mxu1 %v11916_v4  ;;  %5774 = vmatpush1.bf16.msra.mxu0 %v11946_v44 }
0x13e5   :  { %5319 = vmatprep.subr.bf16.mxu1 %v12635_v10  ;;  %5775 = vmatprep.subr.bf16.mxu0 %v11951_v45 }
0x13e8   :  { %5320 = vmatpush1.bf16.msra.mxu1 %v11917_v6  ;;  %5776 = vmatpush1.bf16.msra.mxu0 %v11949_v46  ;;  %v11973_v46 = vld [vmem:[%s16240_s5 + $0x100] ss:$8 sps:$4 sm:$0xff]  }
0x13e9   :  { %5321 = vmatprep.subr.bf16.mxu1 %v12635_v10  ;;  %5777 = vmatprep.subr.bf16.mxu0 %v11954_v47 }
0x13ec   :  { %5322 = vmatpush1.bf16.msra.mxu1 %v11918_v8  ;;  %5778 = vmatpush1.bf16.msra.mxu0 %v11952_v48  ;;  %v11967_v8 = vld [vmem:[%s16240_s5 + $0xe0] ss:$8 sps:$4 sm:$0xff]   ;;  %v11978_v48 = vld [vmem:[%s16240_s5 + $0x114] ss:$8 sps:$4 sm:$0xff]  }
0x13ed   :  { %5323 = vmatprep.subr.bf16.mxu1 %v12635_v10  ;;  %5779 = vmatprep.subr.bf16.mxu0 %v11957_v49 }
0x13f0   :  { %5324 = vmatpush1.bf16.msra.mxu1 %v11919_v9  ;;  %5780 = vmatpush1.bf16.msra.mxu0 %v11955_v51  ;;  %v11969_v9 = vld [vmem:[%s16240_s5 + $0xe4] ss:$8 sps:$4 sm:$0xff]  }
0x13f1   :  { %5325 = vmatprep.subr.bf16.mxu1 %v12635_v10  ;;  %5781 = vmatprep.subr.bf16.mxu0 %v11960_v53  ;;  %v11976_v53 = vld [vmem:[%s16240_s5 + $0x110] ss:$8 sps:$4 sm:$0xff]  }
0x13f4   :  { %5326 = vmatpush1.bf16.msra.mxu1 %v11920_v14  ;;  %5782 = vmatpush1.bf16.msra.mxu0 %v11958_v54 }
0x13f5   :  { %5327 = vmatprep.subr.bf16.mxu1 %v12635_v10  ;;  %5783 = vmatprep.subr.bf16.mxu0 %v11963_v57  ;;  %v11979_v57 = vld [vmem:[%s16240_s5 + $0x120] ss:$8 sps:$4 sm:$0xff]  }
0x13f8   :  { %5328 = vmatpush1.bf16.msra.mxu1 %v11921_v16  ;;  %5784 = vmatpush1.bf16.msra.mxu0 %v11961_v55  ;;  %v11981_v55 = vld [vmem:[%s16240_s5 + $0x124] ss:$8 sps:$4 sm:$0xff]  }
0x13f9   :  { %5329 = vmatprep.subr.bf16.mxu1 %v12635_v10  ;;  %5785 = vmatprep.subr.bf16.mxu0 %v11966_v59  ;;  %v11982_v59 = vld [vmem:[%s16240_s5 + $0x130] ss:$8 sps:$4 sm:$0xff]  }
0x13fc   :  { %5330 = vmatpush1.bf16.msra.mxu1 %v11922_v17  ;;  %5786 = vmatpush1.bf16.msra.mxu0 %v11964_v58  ;;  %v11984_v58 = vld [vmem:[%s16240_s5 + $0x134] ss:$8 sps:$4 sm:$0xff]  }
0x13fd   :  { %5331 = vmatprep.subr.bf16.mxu1 %v12635_v10  ;;  %5787 = vmatprep.subr.bf16.mxu0 %v11969_v9  ;;  %v11999_v9 = vld [vmem:[%s16240_s5 + $0x184] ss:$8 sps:$4 sm:$0xff]  }
0x1400   :  { %5332 = vmatpush1.bf16.msra.mxu1 %v11923_v18  ;;  %5788 = vmatpush1.bf16.msra.mxu0 %v11967_v8  ;;  %v11994_v8 = vld [vmem:[%s16240_s5 + $0x170] ss:$8 sps:$4 sm:$0xff]  }
0x1401   :  { %5333 = vmatprep.subr.bf16.mxu1 %v12635_v10 }
0x1404   :  { %5334 = vmatpush1.bf16.msra.mxu1 %v5311_v20 }
0x14ae   :  { %v5212_v21 = vpop.f32.mrb[80].mxu1 }
0x14af   :  { %v5214_v22 = vpop.f32.mrb[81].mxu1 }
0x14b0   :  { %v5216_v23 = vpop.f32.mrb[82].mxu1 }
0x14b1   :  { %v5221_v24 = vpack.c.bf16 %v5216_v23, %v5212_v21  ;;  %v5218_v26 = vpop.f32.mrb[83].mxu1 }
0x14b2   :  { %v5222_v28 = vpack.c.bf16 %v5218_v26, %v5214_v22  ;;  %v11970_v26 = vld [vmem:[%s16240_s5 + $0xf0] ss:$8 sps:$4 sm:$0xff]  }
0x14b4   :  { %10764 = vmatprep.mubr.msk.bf16.mxu1 %vm560_vm13, %v5222_v28  ;;  %v11975_v28 = vld [vmem:[%s16240_s5 + $0x104] ss:$8 sps:$4 sm:$0xff]  }
0x14b5   :  { %5346 = vmatmul.mubr.bf16.vlgmr.msra.gmra.mrb[84].mxu1 %v5221_v24  ;;  %v11972_v24 = vld [vmem:[%s16240_s5 + $0xf4] ss:$8 sps:$4 sm:$0xff]  }
0x14b6   :  { %5905 = vmatprep.mubr.bf16.mxu1 %v12635_v10  ;;  %5789 = vmatprep.subr.bf16.mxu0 %v11972_v24 }
0x14b7   :  { %5790 = vmatpush1.bf16.msra.mxu0 %v11970_v26 }
0x14b8   :  { %5802 = vmatprep.subr.bf16.mxu0 %v11975_v28 }
0x1588   :  { %v5347_v60 = vpop.f32.mrb[84].mxu1 }
0x1589   :  { %5354 = vst.msk [vmem:[#allocation4] sm:$0xff] %vm16416_vm6, %v5347_v60  ;;  %v5349_v61 = vpop.f32.mrb[85].mxu1  ;;  %v5358_v62 = vrot.slane %v5347_v60, 1  ;;  %v5371_v0 = vrot.slane %v5347_v60, 2  ;;  %v5382_v3 = vrot.slane %v5347_v60, 3  ;;  %v5395_v6 = vrot.slane %v5347_v60, 4 }
0x158a   :  { %v5350_v4 = vpop.f32.mrb[86].mxu1  ;;  %vm16420_vm6 = vcmask 1042080   ;;  %v11987_v60 = vld [vmem:[%s16240_s5 + $0x144] ss:$8 sps:$4 sm:$0xff]   ;;  %v11985_v61 = vld [vmem:[%s16240_s5 + $0x140] ss:$8 sps:$4 sm:$0xff]  }
0x158b   :  { %5355 = vst.msk [vmem:[#allocation4 + $0x20] sm:$0x3] %vm16417_vm12, %v5350_v4  ;;  %v5352_v14 = vpop.f32.mrb[87].mxu1  ;;  %v5359_v16 = vrot.slane %v5350_v4, 1  ;;  %v5372_v17 = vrot.slane %v5350_v4, 2  ;;  %v5383_v18 = vrot.slane %v5350_v4, 3 }
0x158c   :  { %v5396_v19 = vrot.slane %v5350_v4, 4  ;;  %vm16421_vm12 = vcmask 320512   ;;  %v11991_v4 = vld [vmem:[%s16240_s5 + $0x160] ss:$8 sps:$4 sm:$0xff]  }
0x158d   :  { %5363 = vrot.lane.b32.xlu1 %v5359_v16, %s16381_s27  ;;  %v5360_v20 = vsel %vm16418_vm15, %v5358_v62, %v5359_v16  ;;  %v5373_v21 = vsel %vm16413_vm1, %v5371_v0, %v5372_v17  ;;  %v5384_v22 = vsel %vm16419_vm14, %v5382_v3, %v5383_v18  ;;  %vm16422_vm15 = vcmask 1048224   ;;  %v11990_v62 = vld [vmem:[%s16240_s5 + $0x154] ss:$8 sps:$4 sm:$0xff]   ;;  %v11988_v0 = vld [vmem:[%s16240_s5 + $0x150] ss:$8 sps:$4 sm:$0xff]  }
0x158e   :  { %v5397_v23 = vsel %vm16415_vm2, %v5395_v6, %v5396_v19  ;;  %5361 = vrot.lane.b32.xlu0 %v5360_v20, %s16381_s27  ;;  %vm16423_vm1 = vcmask 1008960   ;;  %vm16424_vm14 = vcmask 654336   ;;  %vm16425_vm2 = vcmask 1042048   ;;  %v11993_v3 = vld [vmem:[%s16240_s5 + $0x164] ss:$8 sps:$4 sm:$0xff]  }
0x158f   :  { %v11996_v6 = vld [vmem:[%s16240_s5 + $0x174] ss:$8 sps:$4 sm:$0xff]   ;;  %v11997_v14 = vld [vmem:[%s16240_s5 + $0x180] ss:$8 sps:$4 sm:$0xff]   ;;  %v12000_v20 = vld [vmem:[%s16240_s5 + $0x190] ss:$8 sps:$4 sm:$0xff]  }
0x1590   :  { %v12002_v16 = vld [vmem:[%s16240_s5 + $0x194] ss:$8 sps:$4 sm:$0xff]  }
0x1591   :  { %5376 = vrot.lane.b32.xlu1 %v5372_v17, %s16346_s15  ;;  %v5472_v17 = vld [vmem:[%s16240_s5 + $0x1a0] sm:$0x33] }
0x1592   :  { %5374 = vrot.lane.b32.xlu0 %v5373_v21, %s16346_s15  ;;  %v10818_v21 = vcombine.high %v5472_v17, %v5472_v17 }
0x1595   :  { %5387 = vrot.lane.b32.xlu1 %v5383_v18, %s16347_s18 }
0x1596   :  { %5385 = vrot.lane.b32.xlu0 %v5384_v22, %s16347_s18  ;;  %v10817_v22 = vcombine.low %v5472_v17, %v5472_v17 }
0x1599   :  { %5400 = vrot.lane.b32.xlu1 %v5396_v19, %s16312_s17 }
0x159a   :  { %5398 = vrot.lane.b32.xlu0 %v5397_v23, %s16312_s17 }
0x159d   :  { %5999 = vrot.lane.b32.xlu1 %v10824_v29, %s16313_s25 }
0x159e   :  { %5997 = vrot.lane.b32.xlu0 %v10823_v30, %s16313_s25 }
0x15a1   :  { %6003 = vrot.lane.b32.xlu1 %v10826_v32, %s16313_s25 }
0x15a2   :  { %6001 = vrot.lane.b32.xlu0 %v10825_v31, %s16313_s25 }
0x15ff   :  { %v5364_v33 = vpop.permute.xlu1 %5363 }
0x1600   :  { %5369 = vst.msk [vmem:[#allocation4 + $0x20] sm:$0x3] %vm16420_vm6, %v5364_v33  ;;  %v5362_v34 = vpop.permute.xlu0 %5361  ;;  %vm16426_vm6 = vcmask 287744  }
0x1601   :  { %5370 = vst.msk [vmem:[#allocation4 + $0x28] sm:$0x3] %vm16421_vm12, %v5364_v33  ;;  %vm16427_vm12 = vcmask 1048192  }
0x1602   :  { %5367 = vst.msk [vmem:[#allocation4] sm:$0xff] %vm16422_vm15, %v5362_v34  ;;  %vm16428_vm15 = vcmask 293888  }
0x1603   :  { %5368 = vst.msk [vmem:[#allocation4 + $0x8] sm:$0xff] %vm560_vm13, %v5362_v34  ;;  %v5377_v35 = vpop.permute.xlu1 %5376 }
0x1604   :  { %5381 = vst.msk [vmem:[#allocation4 + $0x28] sm:$0x3] %vm16423_vm1, %v5377_v35  ;;  %v5375_v36 = vpop.permute.xlu0 %5374  ;;  %vm16429_vm1 = vmmov %vm16428_vm15 }
0x1605   :  { %5380 = vst.msk [vmem:[#allocation4 + $0x8] sm:$0xff] %vm641_vm10, %v5375_v36 }
0x1607   :  { %v5388_v37 = vpop.permute.xlu1 %5387  ;;  %v5412_v43 = vld [vmem:[#allocation4 + $0x20] sm:$0x3] }
0x1608   :  { %5393 = vst.msk [vmem:[#allocation4 + $0x28] sm:$0x3] %vm659_vm9, %v5388_v37  ;;  %v5386_v38 = vpop.permute.xlu0 %5385 }
0x1609   :  { %5394 = vst.msk [vmem:[#allocation4 + $0x30] sm:$0x3] %vm661_vm8, %v5388_v37  ;;  %v5408_v42 = vld [vmem:[#allocation4] sm:$0xff] }
0x160a   :  { %5391 = vst.msk [vmem:[#allocation4 + $0x8] sm:$0xff] %vm655_vm7, %v5386_v38  ;;  %v5416_v47 = vpack.c.bf16 %v5412_v43, %v5408_v42 }
0x160b   :  { %5392 = vst.msk [vmem:[#allocation4 + $0x10] sm:$0xff] %vm16424_vm14, %v5386_v38  ;;  %v5401_v39 = vpop.permute.xlu1 %5400  ;;  %vm16430_vm14 = vcmask 244752  }
0x160c   :  { %5406 = vst.msk [vmem:[#allocation4 + $0x30] sm:$0x3] %vm16425_vm2, %v5401_v39  ;;  %v5399_v40 = vpop.permute.xlu0 %5398  ;;  %vm16431_vm2 = vmmov %vm16430_vm14 }
0x160d   :  { %5407 = vst.msk [vmem:[#allocation4 + $0x38] sm:$0x3] %vm16426_vm6, %v5401_v39  ;;  %vm16432_vm6 = vmmov %vm16431_vm2 }
0x160e   :  { %5404 = vst.msk [vmem:[#allocation4 + $0x10] sm:$0xff] %vm16427_vm12, %v5399_v40  ;;  %vm16433_vm12 = vcmask 240656  }
0x160f   :  { %5405 = vst.msk [vmem:[#allocation4 + $0x18] sm:$0xff] %vm16428_vm15, %v5399_v40  ;;  %v5413_v41 = vld [vmem:[#allocation4 + $0x28] sm:$0x3]  ;;  %v6000_v18 = vpop.permute.xlu1 %5999  ;;  %vm16434_vm15 = vcmask 1041408  }
0x1610   :  { %v5998_v19 = vpop.permute.xlu0 %5997  ;;  %6010 = vst.msk [vmem:[#allocation2 + $0xa] sm:$0xff] %vm16430_vm14, %v6000_v18  ;;  %vm16436_vm14 = vcmask 257024  }
0x1611   :  { %v5409_v44 = vld [vmem:[#allocation4 + $0x8] sm:$0xff]  ;;  %6009 = vst.msk [vmem:[#allocation2 + $0x2] sm:$0xff] %vm16431_vm2, %v5998_v19  ;;  %vm16437_vm2 = vmmov %vm16436_vm14 }
0x1612   :  { %v5417_v45 = vpack.c.bf16 %v5413_v41, %v5409_v44 }
0x1613   :  { %v6004_v24 = vpop.permute.xlu1 %6003  ;;  %v5414_v28 = vld [vmem:[#allocation4 + $0x30] sm:$0x3] }
0x1614   :  { %5791 = vmatprep.mubr.bf16.mxu0 %v5417_v45  ;;  %v5415_v49 = vld [vmem:[#allocation4 + $0x38] sm:$0x3]  ;;  %v6002_v23 = vpop.permute.xlu0 %6001  ;;  %6012 = vst.msk [vmem:[#allocation2 + $0x1a] sm:$0xf] %vm16433_vm12, %v6004_v24 }
0x1615   :  { %5792 = vmatmul.mubr.bf16.vlgmr.msra.gmra.mrb[24].mxu0 %v5416_v47  ;;  %6011 = vst.msk [vmem:[#allocation2 + $0x12] sm:$0xff] %vm16432_vm6, %v6002_v23  ;;  %v5410_v29 = vld [vmem:[#allocation4 + $0x10] sm:$0xff]  ;;  %vm16438_vm6 = vcmask 1048320  }
0x1616   :  { %v5411_v51 = vld [vmem:[#allocation4 + $0x18] sm:$0xff]  ;;  %5803 = vmatpush1.bf16.msra.mxu0 %v11973_v46  ;;  %v5418_v33 = vpack.c.bf16 %v5414_v28, %v5410_v29  ;;  %vm16439_vm12 = vmmov %vm16438_vm6 }
0x1617   :  { %v5419_v54 = vpack.c.bf16 %v5415_v49, %v5411_v51  ;;  %5804 = vmatprep.subr.bf16.mxu0 %v11978_v48  ;;  %v6046_v32 = vld [vmem:[#allocation2 + $0xa] sm:$0xff] }
0x1618   :  { %v6022_v30 = vld [vmem:[#allocation2 + $0x9] sm:$0xff]  ;;  %v6021_v31 = vld [vmem:[#allocation2 + $0x1] sm:$0xff] }
0x1619   :  { %10820 = vmatprep.mubr.msk.bf16.mxu0 %vm16429_vm1, %v5419_v54  ;;  %vm16435_vm1 = vmmov %vm16434_vm15  ;;  %6031 = vrot.lane.b32.xlu1 %v6022_v30, %s16400_s21  ;;  %v6045_v34 = vld [vmem:[#allocation2 + $0x2] sm:$0xff] }
0x161a   :  { %5805 = vmatpush1.bf16.msra.mxu0 %v11976_v53  ;;  %v5754_v26 = vsel %vm16435_vm1, %v10817_v22, 0  ;;  %6029 = vrot.lane.b32.xlu0 %v6021_v31, %s16400_s21  ;;  %v6069_v36 = vld [vmem:[#allocation2 + $0x3] sm:$0xff]  ;;  %vm16441_vm1 = vcmask 781824  }
0x161b   :  { %5806 = vmatprep.subr.bf16.mxu0 %v11981_v55  ;;  %v6048_v39 = vld [vmem:[#allocation2 + $0x1a] sm:$0xf]  ;;  %v6093_v43 = vld [vmem:[#allocation2 + $0x4] sm:$0xff] }
0x161c   :  { %v6070_v35 = vld [vmem:[#allocation2 + $0xb] sm:$0xff]  ;;  %v6024_v37 = vld [vmem:[#allocation2 + $0x19] sm:$0xf]  ;;  %6097 = vst.msk [vmem:[#allocation3 + $0x8] sm:$0xff] %vm48_vm0, %v6093_v43  ;;  %v6013_v46 = vld [vmem:[#allocation2] sm:$0xff] }
0x161d   :  { %6055 = vrot.lane.b32.xlu1 %v6046_v32, %s16401_s29  ;;  %v6023_v38 = vld [vmem:[#allocation2 + $0x11] sm:$0xff]  ;;  %v6072_v41 = vld [vmem:[#allocation2 + $0x1b] sm:$0xf]  ;;  %v6014_v45 = vld [vmem:[#allocation2 + $0x8] sm:$0xff]  ;;  %6017 = vst.msk [vmem:[#allocation3] sm:$0xff] %vm48_vm0, %v6013_v46 }
0x161e   :  { %5807 = vmatpush1.bf16.msra.mxu0 %v11979_v57  ;;  %6053 = vrot.lane.b32.xlu0 %v6045_v34, %s16401_s29  ;;  %v6047_v40 = vld [vmem:[#allocation2 + $0x12] sm:$0xff]  ;;  %6018 = vst.msk [vmem:[#allocation3 + $0x10] sm:$0xff] %vm48_vm0, %v6014_v45  ;;  %v6096_v51 = vld [vmem:[#allocation2 + $0x1c] sm:$0xf]  ;;  %v12007_v43 = vld [vmem:[%s16236_s1 + $0x4] ss:$8 sps:$4 sm:$0xff]  }
0x161f   :  { %5808 = vmatprep.subr.bf16.mxu0 %v11984_v58  ;;  %v6071_v42 = vld [vmem:[#allocation2 + $0x13] sm:$0xff]  ;;  %6100 = vst.msk [vmem:[#allocation3 + $0x38] sm:$0xf] %vm16437_vm2, %v6096_v51  ;;  %vm16443_vm2 = vmmov %vm16438_vm6 }
0x1620   :  { %v6094_v44 = vld [vmem:[#allocation2 + $0xc] sm:$0xff]  ;;  %v6016_v48 = vld [vmem:[#allocation2 + $0x18] sm:$0xf] }
0x1621   :  { %6079 = vrot.lane.b32.xlu1 %v6070_v35, %s16364_s22  ;;  %6098 = vst.msk [vmem:[#allocation3 + $0x18] sm:$0xff] %vm48_vm0, %v6094_v44  ;;  %v6015_v47 = vld [vmem:[#allocation2 + $0x10] sm:$0xff] }
0x1622   :  { %5809 = vmatpush1.bf16.msra.mxu0 %v11982_v59  ;;  %6077 = vrot.lane.b32.xlu0 %v6069_v36, %s16364_s22  ;;  %6019 = vst.msk [vmem:[#allocation3 + $0x20] sm:$0xff] %vm48_vm0, %v6015_v47  ;;  %v6095_v49 = vld [vmem:[#allocation2 + $0x14] sm:$0xff]  ;;  %v5861_v47 = vld [vmem:[%s16242_s7] sm:$0x7] }
0x1623   :  { %5810 = vmatprep.subr.bf16.mxu0 %v11987_v60  ;;  %6020 = vst.msk [vmem:[#allocation3 + $0x30] sm:$0xf] %vm16436_vm14, %v6016_v48  ;;  %vm16442_vm14 = vcmask 1044224   ;;  %v6102_v45 = vld [vmem:[#allocation3 + $0x8] sm:$0xff] }
0x1624   :  { %6099 = vst.msk [vmem:[#allocation3 + $0x28] sm:$0xff] %vm48_vm0, %v6095_v49  ;;  %v12005_v48 = vld [vmem:[%s16236_s1] ss:$8 sps:$4 sm:$0xff]   ;;  %v12010_v49 = vld [vmem:[%s16236_s1 + $0x14] ss:$8 sps:$4 sm:$0xff]  }
0x1625   :  { %6035 = vrot.lane.b32.xlu1 %v6024_v37, %s16400_s21 }
0x1626   :  { %5811 = vmatpush1.bf16.msra.mxu0 %v11985_v61  ;;  %6033 = vrot.lane.b32.xlu0 %v6023_v38, %s16400_s21 }
0x1627   :  { %5812 = vmatprep.subr.bf16.mxu0 %v11990_v62 }
0x1628   :  { %v6104_v46 = vld [vmem:[#allocation3 + $0x18] sm:$0xff] }
0x1629   :  { %6059 = vrot.lane.b32.xlu1 %v6048_v39, %s16401_s29  ;;  %v6110_v51 = vpack.c.bf16 %v6104_v46, %v6102_v45 }
0x162a   :  { %5813 = vmatpush1.bf16.msra.mxu0 %v11988_v0  ;;  %6057 = vrot.lane.b32.xlu0 %v6047_v40, %s16401_s29 }
0x162b   :  { %5814 = vmatprep.subr.bf16.mxu0 %v11993_v3 }
0x162d   :  { %6083 = vrot.lane.b32.xlu1 %v6072_v41, %s16364_s22 }
0x162e   :  { %5815 = vmatpush1.bf16.msra.mxu0 %v11991_v4  ;;  %6081 = vrot.lane.b32.xlu0 %v6071_v42, %s16364_s22 }
0x162f   :  { %5816 = vmatprep.subr.bf16.mxu0 %v11996_v6  ;;  %v5473_v6 = vld [vmem:[%s16241_s6] sm:$0x3] }
0x1632   :  { %5817 = vmatpush1.bf16.msra.mxu0 %v11994_v8  ;;  %v5478_v8 = vrot.slane %v5473_v6, %v12844_v13 }
0x1633   :  { %5818 = vmatprep.subr.bf16.mxu0 %v11999_v9  ;;  %v5482_v9 = vrot.slane %v5473_v6, %v12850_v15  ;;  %v12026_v6 = vld [vmem:[%s16236_s1 + $0x70] ss:$8 sps:$4 sm:$0xff]  }
0x1636   :  { %5819 = vmatpush1.bf16.msra.mxu0 %v11997_v14 }
0x1637   :  { %5820 = vmatprep.subr.bf16.mxu0 %v12002_v16 }
0x163a   :  { %5821 = vmatpush1.bf16.msra.mxu0 %v12000_v20 }
0x163b   :  { %10819 = vmatprep.subr.msk.bf16.mxu0 %vm16434_vm15, %v10818_v21  ;;  %vm16440_vm15 = vcmask 519424  }
0x163e   :  { %5823 = vmatpush1.bf16.msra.mxu0 %v5754_v26 }
0x1641   :  { %5835 = vmatmul.mubr.bf16.vlgmr.msra.gmra.mrb[24].mxu0 %v5418_v33 }
0x168b   :  { %v6032_v53 = vpop.permute.xlu1 %6031 }
0x168c   :  { %v6030_v54 = vpop.permute.xlu0 %6029  ;;  %6042 = vst.msk [vmem:[#allocation3 + $0x10] sm:$0xff] %vm108_vm4, %v6032_v53  ;;  %v12008_v53 = vld [vmem:[%s16236_s1 + $0x10] ss:$8 sps:$4 sm:$0xff]  }
0x168d   :  { %6041 = vst.msk [vmem:[#allocation3] sm:$0xff] %vm108_vm4, %v6030_v54  ;;  %v12013_v54 = vld [vmem:[%s16236_s1 + $0x24] ss:$8 sps:$4 sm:$0xff]  }
0x168f   :  { %v6056_v55 = vpop.permute.xlu1 %6055 }
0x1690   :  { %v6054_v57 = vpop.permute.xlu0 %6053  ;;  %6066 = vst.msk [vmem:[#allocation3 + $0x10] sm:$0xff] %vm134_vm5, %v6056_v55  ;;  %v12011_v55 = vld [vmem:[%s16236_s1 + $0x20] ss:$8 sps:$4 sm:$0xff]  }
0x1691   :  { %6065 = vst.msk [vmem:[#allocation3] sm:$0xff] %vm134_vm5, %v6054_v57  ;;  %v12016_v57 = vld [vmem:[%s16236_s1 + $0x34] ss:$8 sps:$4 sm:$0xff]  }
0x1693   :  { %v6080_v58 = vpop.permute.xlu1 %6079 }
0x1694   :  { %v6078_v59 = vpop.permute.xlu0 %6077  ;;  %6090 = vst.msk [vmem:[#allocation3 + $0x10] sm:$0xff] %vm16438_vm6, %v6080_v58  ;;  %vm16444_vm6 = vcmask 1044480   ;;  %v12014_v58 = vld [vmem:[%s16236_s1 + $0x30] ss:$8 sps:$4 sm:$0xff]  }
0x1695   :  { %6089 = vst.msk [vmem:[#allocation3] sm:$0xff] %vm16439_vm12, %v6078_v59  ;;  %vm16445_vm12 = vmmov %vm16444_vm6  ;;  %v12019_v59 = vld [vmem:[%s16236_s1 + $0x44] ss:$8 sps:$4 sm:$0xff]  }
0x1697   :  { %v6036_v60 = vpop.permute.xlu1 %6035 }
0x1698   :  { %v6034_v61 = vpop.permute.xlu0 %6033  ;;  %6044 = vst.msk [vmem:[#allocation3 + $0x30] sm:$0xf] %vm16440_vm15, %v6036_v60  ;;  %v12017_v60 = vld [vmem:[%s16236_s1 + $0x40] ss:$8 sps:$4 sm:$0xff]   ;;  %vm16446_vm15 = vcmask 1045504  }
0x1699   :  { %6043 = vst.msk [vmem:[#allocation3 + $0x20] sm:$0xff] %vm108_vm4, %v6034_v61  ;;  %v12022_v61 = vld [vmem:[%s16236_s1 + $0x54] ss:$8 sps:$4 sm:$0xff]  }
0x169b   :  { %v6060_v62 = vpop.permute.xlu1 %6059 }
0x169c   :  { %v6058_v0 = vpop.permute.xlu0 %6057  ;;  %6068 = vst.msk [vmem:[#allocation3 + $0x30] sm:$0xf] %vm16441_vm1, %v6060_v62  ;;  %v12020_v62 = vld [vmem:[%s16236_s1 + $0x50] ss:$8 sps:$4 sm:$0xff]   ;;  %vm16447_vm1 = vmmov %vm16446_vm15 }
0x169d   :  { %6067 = vst.msk [vmem:[#allocation3 + $0x20] sm:$0xff] %vm134_vm5, %v6058_v0  ;;  %v12025_v0 = vld [vmem:[%s16236_s1 + $0x64] ss:$8 sps:$4 sm:$0xff]  }
0x169f   :  { %v6084_v3 = vpop.permute.xlu1 %6083 }
0x16a0   :  { %v6082_v4 = vpop.permute.xlu0 %6081  ;;  %6092 = vst.msk [vmem:[#allocation3 + $0x30] sm:$0xf] %vm16442_vm14, %v6084_v3  ;;  %v12023_v3 = vld [vmem:[%s16236_s1 + $0x60] ss:$8 sps:$4 sm:$0xff]   ;;  %vm16448_vm14 = vcmask 228352  }
0x16a1   :  { %6091 = vst.msk [vmem:[#allocation3 + $0x20] sm:$0xff] %vm16443_vm2, %v6082_v4  ;;  %v12028_v4 = vld [vmem:[%s16236_s1 + $0x74] ss:$8 sps:$4 sm:$0xff]   ;;  %vm16449_vm2 = vcmask 1043456  }
0x1714   :  { %v5836_v14 = vpop.f32.mrb[24].mxu0 }
0x1715   :  { %v11335_v16 = vadd.f32 %v5836_v14, %v5478_v8  ;;  %v5838_v17 = vpop.f32.mrb[25].mxu0  ;;  %v12034_v14 = vld [vmem:[%s16236_s1 + $0x94] ss:$8 sps:$4 sm:$0xff]  }
0x1716   :  { %v11336_v18 = vadd.f32 %v5838_v17, %v5482_v9  ;;  %v5840_v19 = vpop.f32.mrb[26].mxu0  ;;  %v6101_v17 = vld [vmem:[#allocation3] sm:$0xff] }
0x1717   :  { %v5845_v20 = vmul.f32 0.5, %v11335_v16  ;;  %v11337_v21 = vadd.f32 %v5840_v19, %v5478_v8  ;;  %v5842_v22 = vpop.f32.mrb[27].mxu0  ;;  %v12031_v8 = vld [vmem:[%s16236_s1 + $0x84] ss:$8 sps:$4 sm:$0xff]   ;;  %v12032_v16 = vld [vmem:[%s16236_s1 + $0x90] ss:$8 sps:$4 sm:$0xff]  }
0x1718   :  { %v5846_v23 = vmul.f32 0.5, %v11336_v18  ;;  %v11338_v24 = vadd.f32 %v5842_v22, %v5482_v9  ;;  %v12029_v9 = vld [vmem:[%s16236_s1 + $0x80] ss:$8 sps:$4 sm:$0xff]   ;;  %v6103_v18 = vld [vmem:[#allocation3 + $0x10] sm:$0xff] }
0x1719   :  { %12546 = vtanh.f32 %v5845_v20  ;;  %v5847_v26 = vmul.f32 0.5, %v11337_v21  ;;  %v6106_v19 = vld [vmem:[#allocation3 + $0x28] sm:$0xff]  ;;  %v6108_v20 = vld [vmem:[#allocation3 + $0x38] sm:$0xf]  ;;  %v6109_v21 = vpack.c.bf16 %v6103_v18, %v6101_v17 }
0x171a   :  { %12548 = vtanh.f32 %v5846_v23  ;;  %v5848_v28 = vmul.f32 0.5, %v11338_v24  ;;  %v6112_v22 = vpack.c.bf16 %v6108_v20, %v6106_v19  ;;  %v6105_v23 = vld [vmem:[#allocation3 + $0x20] sm:$0xff]  ;;  %v6107_v24 = vld [vmem:[#allocation3 + $0x30] sm:$0xf] }
0x171b   :  { %12550 = vtanh.f32 %v5847_v26  ;;  %v6111_v26 = vpack.c.bf16 %v6107_v24, %v6105_v23 }
0x171c   :  { %12552 = vtanh.f32 %v5848_v28 }
0x1723   :  { %v12547_v29 = vpop.eup %12546 }
0x1724   :  { %v12549_v30 = vpop.eup %12548  ;;  %v5853_v31 = vmul.f32 0.5, %v12547_v29 }
0x1725   :  { %v12551_v32 = vpop.eup %12550  ;;  %v5854_v33 = vmul.f32 0.5, %v12549_v30 }
0x1726   :  { %v12553_v34 = vpop.eup %12552  ;;  %v5855_v35 = vmul.f32 0.5, %v12551_v32  ;;  %v5857_v37 = vadd.f32 0.5, %v5853_v31 }
0x1727   :  { %v5856_v36 = vmul.f32 0.5, %v12553_v34  ;;  %v5858_v39 = vadd.f32 0.5, %v5854_v33 }
0x1728   :  { %v5859_v38 = vadd.f32 0.5, %v5855_v35 }
0x1729   :  { %v5860_v40 = vadd.f32 0.5, %v5856_v36 }
0x172a   :  { %v5862_v41 = vpack.c.bf16 %v5859_v38, %v5857_v37  ;;  %v6133_v38 = vld [vmem:[%s16239_s2] sm:$0x3] }
0x172b   :  { %v5863_v42 = vpack.c.bf16 %v5860_v40, %v5858_v39  ;;  %v6138_v39 = vrot.slane %v6133_v38, %v12844_v13  ;;  %v6142_v40 = vrot.slane %v6133_v38, %v12850_v15 }
0x172c   :  { %v5868_v44 = vsel %vm16444_vm6, %v5862_v41, 0  ;;  %vm16450_vm6 = vcmask 687104  }
0x172d   :  { %10821 = vmatprep.subr.msk.bf16.mxu1 %vm16445_vm12, %v5863_v42  ;;  %vm16451_vm12 = vcmask 680960  }
0x172e   :  { %5874 = vmatpush1.bf16.msra.mxu1 %v5868_v44 }
0x172f   :  { %6251 = vmatprep.subr.bf16.mxu1 %v12007_v43 }
0x1731   :  { %10822 = vmatmul.mubr.msk.bf16.vlgmr.msra.gmra.mrb[88].mxu1 %vm1137_vm3, %v5861_v47 }
0x1732   :  { %6252 = vmatpush1.bf16.msra.mxu1 %v12005_v48  ;;  %10847 = vmatprep.mubr.msk.bf16.mxu1 %vm48_vm0, %v6110_v51 }
0x1733   :  { %6253 = vmatprep.subr.bf16.mxu1 %v12010_v49 }
0x1736   :  { %6254 = vmatpush1.bf16.msra.mxu1 %v12008_v53 }
0x1737   :  { %6255 = vmatprep.subr.bf16.mxu1 %v12013_v54 }
0x173a   :  { %6256 = vmatpush1.bf16.msra.mxu1 %v12011_v55 }
0x173b   :  { %6257 = vmatprep.subr.bf16.mxu1 %v12016_v57 }
0x173e   :  { %6258 = vmatpush1.bf16.msra.mxu1 %v12014_v58 }
0x173f   :  { %6259 = vmatprep.subr.bf16.mxu1 %v12019_v59 }
0x1742   :  { %6260 = vmatpush1.bf16.msra.mxu1 %v12017_v60 }
0x1743   :  { %6261 = vmatprep.subr.bf16.mxu1 %v12022_v61 }
0x1746   :  { %6262 = vmatpush1.bf16.msra.mxu1 %v12020_v62 }
0x1747   :  { %6263 = vmatprep.subr.bf16.mxu1 %v12025_v0 }
0x174a   :  { %6264 = vmatpush1.bf16.msra.mxu1 %v12023_v3 }
0x174b   :  { %6265 = vmatprep.subr.bf16.mxu1 %v12028_v4 }
0x174e   :  { %6266 = vmatpush1.bf16.msra.mxu1 %v12026_v6 }
0x174f   :  { %6267 = vmatprep.subr.bf16.mxu1 %v12031_v8 }
0x1752   :  { %6268 = vmatpush1.bf16.msra.mxu1 %v12029_v9 }
0x1753   :  { %6269 = vmatprep.subr.bf16.mxu1 %v12034_v14 }
0x1756   :  { %6270 = vmatpush1.bf16.msra.mxu1 %v12032_v16 }
0x1759   :  { %6284 = vmatmul.mubr.bf16.vlgmr.msra.gmra.mrb[92].mxu1 %v6109_v21 }
0x175a   :  { %10848 = vmatprep.mubr.msk.bf16.mxu1 %vm48_vm0, %v6112_v22 }
0x1761   :  { %6294 = vmatmul.mubr.bf16.gmra.mrb[96].mxu1 %v6111_v26 }
0x1762   :  { %6388 = vmatprep.mubr.bf16.mxu1 %v12635_v10 }
0x1804   :  { %v5907_v28 = vpop.f32.mrb[88].mxu1 }
0x1805   :  { %v5909_v29 = vpop.f32.mrb[89].mxu1 }
0x1806   :  { %v5916_v30 = vcombine.low %v5907_v28, %v5909_v29  ;;  %v5969_v31 = vcombine.high %v5907_v28, %v5909_v29  ;;  %v5911_v32 = vpop.f32.mrb[90].mxu1 }
0x1807   :  { %v5912_v33 = vpop.f32.mrb[91].mxu1 }
0x1808   :  { %v14784_v34 = vrot.slane %v5916_v30, %v13224_v56  ;;  %v5976_v35 = vrot.slane %v5969_v31, %v13224_v56 }
0x180a   :  { %v14789_v36 = vrot.slane %v14784_v34, %v13224_v56  ;;  %v5983_v37 = vrot.slane %v5976_v35, %v13224_v56 }
0x180c   :  { %5986 = vst.msk [vmem:[#allocation5 + $0x2c] ss:$8 sm:$0x3] %vm13231_vm11, %v5983_v37  ;;  %5933 = vst.msk [vmem:[#allocation5 + $0x4] ss:$8 sm:$0x3] %vm13231_vm11, %v14789_v36 }
0x182c   :  { %v6285_v41 = vpop.f32.mrb[92].mxu1 }
0x182d   :  { %v6286_v42 = vadd.f32 %v6285_v41, %v6138_v39  ;;  %v6287_v43 = vpop.f32.mrb[93].mxu1 }
0x182e   :  { %v6288_v44 = vadd.f32 %v6287_v43, %v6142_v40  ;;  %v6289_v45 = vpop.f32.mrb[94].mxu1 }
0x182f   :  { %v6304_v46 = vmul.f32 0.5, %v6286_v42  ;;  %v6290_v47 = vadd.f32 %v6289_v45, %v6138_v39  ;;  %v6291_v48 = vpop.f32.mrb[95].mxu1 }
0x1830   :  { %v6305_v49 = vmul.f32 0.5, %v6288_v44  ;;  %v6292_v51 = vadd.f32 %v6291_v48, %v6142_v40  ;;  %v12036_v48 = vld [vmem:[%s16238_s4] sm:$0xff]  }
0x1831   :  { %12554 = vtanh.f32 %v6304_v46  ;;  %v6306_v53 = vmul.f32 0.5, %v6290_v47  ;;  %v12035_v47 = vld [vmem:[%s16237_s3] sm:$0x7f]  }
0x1832   :  { %12556 = vtanh.f32 %v6305_v49  ;;  %v6307_v54 = vmul.f32 0.5, %v6292_v51  ;;  %v12037_v49 = vld [vmem:[%s16238_s4 + $0x8] sm:$0xff]   ;;  %v12038_v51 = vld [vmem:[%s16238_s4 + $0x10] sm:$0xff]  }
0x1833   :  { %12558 = vtanh.f32 %v6306_v53  ;;  %v12039_v53 = vld [vmem:[%s16238_s4 + $0x18] sm:$0xff]  }
0x1834   :  { %12560 = vtanh.f32 %v6307_v54  ;;  %v6295_v55 = vpop.f32.mrb[96].mxu1  ;;  %v12040_v54 = vld [vmem:[%s16238_s4 + $0x20] sm:$0xff]  }
0x1835   :  { %v6296_v57 = vadd.f32 %v6295_v55, %v6138_v39  ;;  %v6297_v58 = vpop.f32.mrb[97].mxu1  ;;  %v12041_v55 = vld [vmem:[%s16238_s4 + $0x28] sm:$0xff]  }
0x1836   :  { %v6298_v59 = vadd.f32 %v6297_v58, %v6142_v40  ;;  %v6299_v60 = vpop.f32.mrb[98].mxu1  ;;  %v12043_v58 = vld [vmem:[%s16238_s4 + $0x38] sm:$0xff]  }
0x1837   :  { %v6308_v61 = vmul.f32 0.5, %v6296_v57  ;;  %v6300_v62 = vadd.f32 %v6299_v60, %v6138_v39  ;;  %v6301_v0 = vpop.f32.mrb[99].mxu1  ;;  %v12042_v57 = vld [vmem:[%s16238_s4 + $0x30] sm:$0xff]   ;;  %v12045_v60 = vld [vmem:[%s16238_s4 + $0x48] sm:$0xff]  }
0x1838   :  { %v6309_v3 = vmul.f32 0.5, %v6298_v59  ;;  %v6302_v4 = vadd.f32 %v6301_v0, %v6142_v40  ;;  %v12044_v59 = vld [vmem:[%s16238_s4 + $0x40] sm:$0xff]  }
0x1839   :  { %12562 = vtanh.f32 %v6308_v61  ;;  %v6310_v6 = vmul.f32 0.5, %v6300_v62  ;;  %v12046_v61 = vld [vmem:[%s16238_s4 + $0x50] ss:$0 sps:$4 sm:$0xff]  }
0x183a   :  { %12564 = vtanh.f32 %v6309_v3  ;;  %v6311_v8 = vmul.f32 0.5, %v6302_v4  ;;  %v6489_v62 = vsel %vm16449_vm2, %v12046_v61, 0 }
0x183b   :  { %v12555_v9 = vpop.eup %12554  ;;  %12566 = vtanh.f32 %v6310_v6 }
0x183c   :  { %v12557_v14 = vpop.eup %12556  ;;  %v6320_v16 = vmul.f32 0.5, %v12555_v9  ;;  %12568 = vtanh.f32 %v6311_v8 }
0x183d   :  { %v12559_v17 = vpop.eup %12558  ;;  %v6321_v18 = vmul.f32 0.5, %v12557_v14  ;;  %v12047_v14 = vld [vmem:[%s16240_s5] ss:$8 sps:$4 sm:$0xff]  }
0x183e   :  { %v12561_v19 = vpop.eup %12560  ;;  %v6322_v20 = vmul.f32 0.5, %v12559_v17  ;;  %v6328_v22 = vadd.f32 0.5, %v6320_v16  ;;  %v12049_v16 = vld [vmem:[%s16240_s5 + $0x4] ss:$8 sps:$4 sm:$0xff]   ;;  %v12052_v17 = vld [vmem:[%s16240_s5 + $0x14] ss:$8 sps:$4 sm:$0xff]  }
0x183f   :  { %v6323_v21 = vmul.f32 0.5, %v12561_v19  ;;  %v6329_v24 = vadd.f32 0.5, %v6321_v18  ;;  %6937 = vmatprep.subr.bf16.mxu0 %v12049_v16  ;;  %v12050_v18 = vld [vmem:[%s16240_s5 + $0x10] ss:$8 sps:$4 sm:$0xff]   ;;  %v12055_v19 = vld [vmem:[%s16240_s5 + $0x24] ss:$8 sps:$4 sm:$0xff]  }
0x1840   :  { %v6330_v23 = vadd.f32 0.5, %v6322_v20  ;;  %6938 = vmatpush1.bf16.msra.mxu0 %v12047_v14  ;;  %v12053_v20 = vld [vmem:[%s16240_s5 + $0x20] ss:$8 sps:$4 sm:$0xff]   ;;  %v12092_v14 = vld [vmem:[%s16240_s5 + $0xf0] ss:$8 sps:$4 sm:$0xff]  }
0x1841   :  { %v6331_v26 = vadd.f32 0.5, %v6323_v21  ;;  %6939 = vmatprep.subr.bf16.mxu0 %v12052_v17  ;;  %v12058_v21 = vld [vmem:[%s16240_s5 + $0x34] ss:$8 sps:$4 sm:$0xff]   ;;  %v12097_v16 = vld [vmem:[%s16240_s5 + $0x104] ss:$8 sps:$4 sm:$0xff]  }
0x1842   :  { %v6338_v28 = vpack.c.bf16 %v6330_v23, %v6328_v22  ;;  %v12056_v22 = vld [vmem:[%s16240_s5 + $0x30] ss:$8 sps:$4 sm:$0xff]   ;;  %v12061_v23 = vld [vmem:[%s16240_s5 + $0x44] ss:$8 sps:$4 sm:$0xff]  }
0x1843   :  { %v12563_v29 = vpop.eup %12562  ;;  %v6339_v30 = vpack.c.bf16 %v6331_v26, %v6329_v24  ;;  %v12059_v24 = vld [vmem:[%s16240_s5 + $0x40] ss:$8 sps:$4 sm:$0xff]   ;;  %v12064_v26 = vld [vmem:[%s16240_s5 + $0x54] ss:$8 sps:$4 sm:$0xff]  }
0x1844   :  { %v12565_v31 = vpop.eup %12564  ;;  %v6324_v32 = vmul.f32 0.5, %v12563_v29  ;;  %6940 = vmatpush1.bf16.msra.mxu0 %v12050_v18  ;;  %v12067_v29 = vld [vmem:[%s16240_s5 + $0x64] ss:$8 sps:$4 sm:$0xff]  }
0x1845   :  { %v12567_v33 = vpop.eup %12566  ;;  %v6325_v35 = vmul.f32 0.5, %v12565_v31  ;;  %6356 = vmatprep.subr.bf16.mxu1 %v6339_v30  ;;  %6941 = vmatprep.subr.bf16.mxu0 %v12055_v19  ;;  %v12065_v30 = vld [vmem:[%s16240_s5 + $0x60] ss:$8 sps:$4 sm:$0xff]   ;;  %v12070_v31 = vld [vmem:[%s16240_s5 + $0x74] ss:$8 sps:$4 sm:$0xff]  }
0x1846   :  { %v12569_v37 = vpop.eup %12568  ;;  %v6326_v38 = vmul.f32 0.5, %v12567_v33  ;;  %6357 = vmatpush1.bf16.msra.mxu1 %v6338_v28  ;;  %v6332_v40 = vadd.f32 0.5, %v6324_v32  ;;  %v12062_v28 = vld [vmem:[%s16240_s5 + $0x50] ss:$8 sps:$4 sm:$0xff]   ;;  %v12073_v33 = vld [vmem:[%s16240_s5 + $0x84] ss:$8 sps:$4 sm:$0xff]  }
0x1847   :  { %v6327_v39 = vmul.f32 0.5, %v12569_v37  ;;  %v6333_v42 = vadd.f32 0.5, %v6325_v35  ;;  %v12068_v32 = vld [vmem:[%s16240_s5 + $0x70] ss:$8 sps:$4 sm:$0xff]   ;;  %v12071_v35 = vld [vmem:[%s16240_s5 + $0x80] ss:$8 sps:$4 sm:$0xff]  }
0x1848   :  { %v6334_v41 = vadd.f32 0.5, %v6326_v38  ;;  %6942 = vmatpush1.bf16.msra.mxu0 %v12053_v20  ;;  %v12076_v37 = vld [vmem:[%s16240_s5 + $0x94] ss:$8 sps:$4 sm:$0xff]   ;;  %v12074_v38 = vld [vmem:[%s16240_s5 + $0x90] ss:$8 sps:$4 sm:$0xff]   ;;  %v10923_v17 = vld [vmem:[%s16235_s0 + $0xc8] sm:$0xff] }
0x1849   :  { %v6335_v43 = vadd.f32 0.5, %v6327_v39  ;;  %6943 = vmatprep.subr.bf16.mxu0 %v12058_v21  ;;  %v12079_v39 = vld [vmem:[%s16240_s5 + $0xa4] ss:$8 sps:$4 sm:$0xff]   ;;  %v10924_v19 = vld [vmem:[%s16235_s0 + $0xd0] sm:$0xff]  ;;  %v10925_v20 = vld [vmem:[%s16235_s0 + $0xd8] sm:$0xf] }
0x184a   :  { %v6340_v44 = vpack.c.bf16 %v6334_v41, %v6332_v40  ;;  %v12077_v40 = vld [vmem:[%s16240_s5 + $0xa0] ss:$8 sps:$4 sm:$0xff]   ;;  %v12082_v41 = vld [vmem:[%s16240_s5 + $0xb4] ss:$8 sps:$4 sm:$0xff]  }
0x184b   :  { %v6341_v45 = vpack.c.bf16 %v6335_v43, %v6333_v42  ;;  %v12080_v42 = vld [vmem:[%s16240_s5 + $0xb0] ss:$8 sps:$4 sm:$0xff]   ;;  %v12083_v43 = vld [vmem:[%s16240_s5 + $0xc0] ss:$8 sps:$4 sm:$0xff]  }
0x184c   :  { %v6351_v46 = vsel %vm16446_vm15, %v6340_v44, 0  ;;  %6944 = vmatpush1.bf16.msra.mxu0 %v12056_v22  ;;  %v12085_v44 = vld [vmem:[%s16240_s5 + $0xc4] ss:$8 sps:$4 sm:$0xff]   ;;  %vm16452_vm15 = vcmask 1046528  }
0x184d   :  { %10850 = vmatprep.subr.msk.bf16.mxu1 %vm16447_vm1, %v6341_v45  ;;  %6945 = vmatprep.subr.bf16.mxu0 %v12061_v23  ;;  %v12086_v45 = vld [vmem:[%s16240_s5 + $0xd0] ss:$8 sps:$4 sm:$0xff]   ;;  %v10922_v18 = vld [vmem:[%s16235_s0 + $0xc0] sm:$0xff] }
0x184e   :  { %6359 = vmatpush1.bf16.msra.mxu1 %v6351_v46  ;;  %v12088_v46 = vld [vmem:[%s16240_s5 + $0xd4] ss:$8 sps:$4 sm:$0xff]  }
0x184f   :  { %6491 = vmatprep.subr.bf16.mxu1 %v12635_v10 }
0x1850   :  { %6946 = vmatpush1.bf16.msra.mxu0 %v12059_v24 }
0x1851   :  { %10851 = vmatmul.mubr.msk.bf16.vlgmr.msra.gmra.mrb[100].mxu1 %vm16448_vm14, %v12035_v47  ;;  %6947 = vmatprep.subr.bf16.mxu0 %v12064_v26  ;;  %vm16453_vm14 = vcmask 1044480  }
0x1852   :  { %6492 = vmatpush1.bf16.msra.mxu1 %v12036_v48 }
0x1853   :  { %6493 = vmatprep.subr.bf16.mxu1 %v12635_v10 }
0x1854   :  { %6948 = vmatpush1.bf16.msra.mxu0 %v12062_v28 }
0x1855   :  { %6949 = vmatprep.subr.bf16.mxu0 %v12067_v29 }
0x1856   :  { %6494 = vmatpush1.bf16.msra.mxu1 %v12037_v49 }
0x1857   :  { %6495 = vmatprep.subr.bf16.mxu1 %v12635_v10 }
0x1858   :  { %6950 = vmatpush1.bf16.msra.mxu0 %v12065_v30 }
0x1859   :  { %6951 = vmatprep.subr.bf16.mxu0 %v12070_v31 }
0x185a   :  { %6496 = vmatpush1.bf16.msra.mxu1 %v12038_v51 }
0x185b   :  { %6497 = vmatprep.subr.bf16.mxu1 %v12635_v10 }
0x185c   :  { %6952 = vmatpush1.bf16.msra.mxu0 %v12068_v32 }
0x185d   :  { %6953 = vmatprep.subr.bf16.mxu0 %v12073_v33 }
0x185e   :  { %6498 = vmatpush1.bf16.msra.mxu1 %v12039_v53 }
0x185f   :  { %6499 = vmatprep.subr.bf16.mxu1 %v12635_v10 }
0x1860   :  { %6954 = vmatpush1.bf16.msra.mxu0 %v12071_v35 }
0x1861   :  { %6955 = vmatprep.subr.bf16.mxu0 %v12076_v37 }
0x1862   :  { %6500 = vmatpush1.bf16.msra.mxu1 %v12040_v54 }
0x1863   :  { %6501 = vmatprep.subr.bf16.mxu1 %v12635_v10 }
0x1864   :  { %6956 = vmatpush1.bf16.msra.mxu0 %v12074_v38  ;;  %v12095_v38 = vld [vmem:[%s16240_s5 + $0x100] ss:$8 sps:$4 sm:$0xff]  }
0x1865   :  { %6957 = vmatprep.subr.bf16.mxu0 %v12079_v39 }
0x1866   :  { %6502 = vmatpush1.bf16.msra.mxu1 %v12041_v55 }
0x1867   :  { %6503 = vmatprep.subr.bf16.mxu1 %v12635_v10 }
0x1868   :  { %6958 = vmatpush1.bf16.msra.mxu0 %v12077_v40  ;;  %v12100_v40 = vld [vmem:[%s16240_s5 + $0x114] ss:$8 sps:$4 sm:$0xff]  }
0x1869   :  { %6959 = vmatprep.subr.bf16.mxu0 %v12082_v41 }
0x186a   :  { %6504 = vmatpush1.bf16.msra.mxu1 %v12042_v57  ;;  %v12089_v57 = vld [vmem:[%s16240_s5 + $0xe0] ss:$8 sps:$4 sm:$0xff]  }
0x186b   :  { %6505 = vmatprep.subr.bf16.mxu1 %v12635_v10 }
0x186c   :  { %6960 = vmatpush1.bf16.msra.mxu0 %v12080_v42 }
0x186d   :  { %6961 = vmatprep.subr.bf16.mxu0 %v12085_v44 }
0x186e   :  { %6506 = vmatpush1.bf16.msra.mxu1 %v12043_v58  ;;  %v12091_v58 = vld [vmem:[%s16240_s5 + $0xe4] ss:$8 sps:$4 sm:$0xff]  }
0x186f   :  { %6507 = vmatprep.subr.bf16.mxu1 %v12635_v10 }
0x1870   :  { %6962 = vmatpush1.bf16.msra.mxu0 %v12083_v43  ;;  %v12098_v43 = vld [vmem:[%s16240_s5 + $0x110] ss:$8 sps:$4 sm:$0xff]  }
0x1871   :  { %6963 = vmatprep.subr.bf16.mxu0 %v12088_v46  ;;  %v12101_v46 = vld [vmem:[%s16240_s5 + $0x120] ss:$8 sps:$4 sm:$0xff]  }
0x1872   :  { %6508 = vmatpush1.bf16.msra.mxu1 %v12044_v59 }
0x1873   :  { %6509 = vmatprep.subr.bf16.mxu1 %v12635_v10 }
0x1874   :  { %6964 = vmatpush1.bf16.msra.mxu0 %v12086_v45  ;;  %v12103_v45 = vld [vmem:[%s16240_s5 + $0x124] ss:$8 sps:$4 sm:$0xff]  }
0x1875   :  { %6965 = vmatprep.subr.bf16.mxu0 %v12091_v58  ;;  %v12118_v58 = vld [vmem:[%s16240_s5 + $0x174] ss:$8 sps:$4 sm:$0xff]  }
0x1876   :  { %6510 = vmatpush1.bf16.msra.mxu1 %v12045_v60 }
0x1877   :  { %6511 = vmatprep.subr.bf16.mxu1 %v12635_v10 }
0x1878   :  { %6966 = vmatpush1.bf16.msra.mxu0 %v12089_v57  ;;  %v12113_v57 = vld [vmem:[%s16240_s5 + $0x160] ss:$8 sps:$4 sm:$0xff]  }
0x187a   :  { %6512 = vmatpush1.bf16.msra.mxu1 %v6489_v62 }
0x1924   :  { %v6390_v0 = vpop.f32.mrb[100].mxu1 }
0x1925   :  { %v6392_v3 = vpop.f32.mrb[101].mxu1 }
0x1926   :  { %v6394_v4 = vpop.f32.mrb[102].mxu1 }
0x1927   :  { %v6399_v6 = vpack.c.bf16 %v6394_v4, %v6390_v0  ;;  %v6396_v8 = vpop.f32.mrb[103].mxu1 }
0x1928   :  { %v6400_v9 = vpack.c.bf16 %v6396_v8, %v6392_v3 }
0x192a   :  { %10863 = vmatprep.mubr.msk.bf16.mxu1 %vm560_vm13, %v6400_v9  ;;  %v12094_v9 = vld [vmem:[%s16240_s5 + $0xf4] ss:$8 sps:$4 sm:$0xff]  }
0x192b   :  { %6524 = vmatmul.mubr.bf16.vlgmr.msra.gmra.mrb[104].mxu1 %v6399_v6  ;;  %6967 = vmatprep.subr.bf16.mxu0 %v12094_v9 }
0x192c   :  { %7083 = vmatprep.mubr.bf16.mxu1 %v12635_v10  ;;  %6968 = vmatpush1.bf16.msra.mxu0 %v12092_v14 }
0x192d   :  { %6980 = vmatprep.subr.bf16.mxu0 %v12097_v16 }
0x19fe   :  { %v6525_v47 = vpop.f32.mrb[104].mxu1 }
0x19ff   :  { %6532 = vst.msk [vmem:[#allocation4] sm:$0xff] %vm16450_vm6, %v6525_v47  ;;  %v6527_v48 = vpop.f32.mrb[105].mxu1  ;;  %v6536_v49 = vrot.slane %v6525_v47, 1  ;;  %v6549_v51 = vrot.slane %v6525_v47, 2  ;;  %v6560_v53 = vrot.slane %v6525_v47, 3  ;;  %v6573_v55 = vrot.slane %v6525_v47, 4 }
0x1a00   :  { %v6528_v54 = vpop.f32.mrb[106].mxu1  ;;  %vm16454_vm6 = vcmask 1042080   ;;  %v12106_v47 = vld [vmem:[%s16240_s5 + $0x134] ss:$8 sps:$4 sm:$0xff]   ;;  %v12104_v48 = vld [vmem:[%s16240_s5 + $0x130] ss:$8 sps:$4 sm:$0xff]  }
0x1a01   :  { %6533 = vst.msk [vmem:[#allocation4 + $0x20] sm:$0x3] %vm16451_vm12, %v6528_v54  ;;  %v6530_v59 = vpop.f32.mrb[107].mxu1  ;;  %v6537_v60 = vrot.slane %v6528_v54, 1  ;;  %v6550_v61 = vrot.slane %v6528_v54, 2  ;;  %v6561_v62 = vrot.slane %v6528_v54, 3 }
0x1a02   :  { %v6574_v0 = vrot.slane %v6528_v54, 4  ;;  %vm16455_vm12 = vcmask 320512   ;;  %v12110_v54 = vld [vmem:[%s16240_s5 + $0x150] ss:$8 sps:$4 sm:$0xff]  }
0x1a03   :  { %6541 = vrot.lane.b32.xlu1 %v6537_v60, %s16381_s27  ;;  %v6538_v3 = vsel %vm16452_vm15, %v6536_v49, %v6537_v60  ;;  %v6551_v4 = vsel %vm16447_vm1, %v6549_v51, %v6550_v61  ;;  %v6562_v6 = vsel %vm16453_vm14, %v6560_v53, %v6561_v62  ;;  %vm16456_vm15 = vcmask 1048224   ;;  %v12109_v49 = vld [vmem:[%s16240_s5 + $0x144] ss:$8 sps:$4 sm:$0xff]   ;;  %v12107_v51 = vld [vmem:[%s16240_s5 + $0x140] ss:$8 sps:$4 sm:$0xff]  }
0x1a04   :  { %v6575_v8 = vsel %vm16449_vm2, %v6573_v55, %v6574_v0  ;;  %6539 = vrot.lane.b32.xlu0 %v6538_v3, %s16381_s27  ;;  %vm16457_vm1 = vcmask 1008960   ;;  %vm16458_vm14 = vcmask 654336   ;;  %vm16459_vm2 = vcmask 1042048   ;;  %v12112_v53 = vld [vmem:[%s16240_s5 + $0x154] ss:$8 sps:$4 sm:$0xff]  }
0x1a05   :  { %v12115_v55 = vld [vmem:[%s16240_s5 + $0x164] ss:$8 sps:$4 sm:$0xff]   ;;  %v12116_v59 = vld [vmem:[%s16240_s5 + $0x170] ss:$8 sps:$4 sm:$0xff]  }
0x1a06   :  { %v12121_v60 = vld [vmem:[%s16240_s5 + $0x184] ss:$8 sps:$4 sm:$0xff]  }
0x1a07   :  { %6554 = vrot.lane.b32.xlu1 %v6550_v61, %s16346_s15  ;;  %v12119_v61 = vld [vmem:[%s16240_s5 + $0x180] ss:$8 sps:$4 sm:$0xff]  }
0x1a08   :  { %6552 = vrot.lane.b32.xlu0 %v6551_v4, %s16346_s15 }
0x1a0b   :  { %6565 = vrot.lane.b32.xlu1 %v6561_v62, %s16347_s18  ;;  %v12124_v62 = vld [vmem:[%s16240_s5 + $0x194] ss:$8 sps:$4 sm:$0xff]  }
0x1a0c   :  { %6563 = vrot.lane.b32.xlu0 %v6562_v6, %s16347_s18  ;;  %v12122_v6 = vld [vmem:[%s16240_s5 + $0x190] ss:$8 sps:$4 sm:$0xff]  }
0x1a0f   :  { %6578 = vrot.lane.b32.xlu1 %v6574_v0, %s16312_s17  ;;  %v6650_v0 = vld [vmem:[%s16240_s5 + $0x1a0] sm:$0x33] }
0x1a10   :  { %6576 = vrot.lane.b32.xlu0 %v6575_v8, %s16312_s17  ;;  %v10917_v8 = vcombine.high %v6650_v0, %v6650_v0  ;;  %v10916_v9 = vcombine.low %v6650_v0, %v6650_v0 }
0x1a13   :  { %7177 = vrot.lane.b32.xlu1 %v10923_v17, %s16313_s25 }
0x1a14   :  { %7175 = vrot.lane.b32.xlu0 %v10922_v18, %s16313_s25 }
0x1a17   :  { %7181 = vrot.lane.b32.xlu1 %v10925_v20, %s16313_s25 }
0x1a18   :  { %7179 = vrot.lane.b32.xlu0 %v10924_v19, %s16313_s25 }
0x1a75   :  { %v6542_v21 = vpop.permute.xlu1 %6541 }
0x1a76   :  { %6547 = vst.msk [vmem:[#allocation4 + $0x20] sm:$0x3] %vm16454_vm6, %v6542_v21  ;;  %v6540_v22 = vpop.permute.xlu0 %6539  ;;  %vm16460_vm6 = vcmask 287744  }
0x1a77   :  { %6548 = vst.msk [vmem:[#allocation4 + $0x28] sm:$0x3] %vm16455_vm12, %v6542_v21  ;;  %vm16461_vm12 = vcmask 1048192  }
0x1a78   :  { %6545 = vst.msk [vmem:[#allocation4] sm:$0xff] %vm16456_vm15, %v6540_v22  ;;  %vm16462_vm15 = vcmask 293888  }
0x1a79   :  { %6546 = vst.msk [vmem:[#allocation4 + $0x8] sm:$0xff] %vm560_vm13, %v6540_v22  ;;  %v6555_v23 = vpop.permute.xlu1 %6554 }
0x1a7a   :  { %6559 = vst.msk [vmem:[#allocation4 + $0x28] sm:$0x3] %vm16457_vm1, %v6555_v23  ;;  %v6553_v24 = vpop.permute.xlu0 %6552  ;;  %vm16463_vm1 = vmmov %vm16462_vm15 }
0x1a7b   :  { %6558 = vst.msk [vmem:[#allocation4 + $0x8] sm:$0xff] %vm641_vm10, %v6553_v24 }
0x1a7d   :  { %v6566_v26 = vpop.permute.xlu1 %6565  ;;  %v6590_v33 = vld [vmem:[#allocation4 + $0x20] sm:$0x3] }
0x1a7e   :  { %6571 = vst.msk [vmem:[#allocation4 + $0x28] sm:$0x3] %vm659_vm9, %v6566_v26  ;;  %v6564_v28 = vpop.permute.xlu0 %6563 }
0x1a7f   :  { %6572 = vst.msk [vmem:[#allocation4 + $0x30] sm:$0x3] %vm661_vm8, %v6566_v26  ;;  %v6586_v32 = vld [vmem:[#allocation4] sm:$0xff] }
0x1a80   :  { %6569 = vst.msk [vmem:[#allocation4 + $0x8] sm:$0xff] %vm655_vm7, %v6564_v28  ;;  %v6594_v39 = vpack.c.bf16 %v6590_v33, %v6586_v32 }
0x1a81   :  { %6570 = vst.msk [vmem:[#allocation4 + $0x10] sm:$0xff] %vm16458_vm14, %v6564_v28  ;;  %v6579_v29 = vpop.permute.xlu1 %6578  ;;  %vm16464_vm14 = vcmask 244752  }
0x1a82   :  { %6584 = vst.msk [vmem:[#allocation4 + $0x30] sm:$0x3] %vm16459_vm2, %v6579_v29  ;;  %v6577_v30 = vpop.permute.xlu0 %6576  ;;  %vm16465_vm2 = vmmov %vm16464_vm14 }
0x1a83   :  { %6585 = vst.msk [vmem:[#allocation4 + $0x38] sm:$0x3] %vm16460_vm6, %v6579_v29  ;;  %vm16466_vm6 = vmmov %vm16465_vm2 }
0x1a84   :  { %6582 = vst.msk [vmem:[#allocation4 + $0x10] sm:$0xff] %vm16461_vm12, %v6577_v30  ;;  %vm16467_vm12 = vcmask 240656  }
0x1a85   :  { %6583 = vst.msk [vmem:[#allocation4 + $0x18] sm:$0xff] %vm16462_vm15, %v6577_v30  ;;  %v6591_v31 = vld [vmem:[#allocation4 + $0x28] sm:$0x3]  ;;  %v7178_v3 = vpop.permute.xlu1 %7177  ;;  %vm16468_vm15 = vcmask 1041408  }
0x1a86   :  { %v7176_v4 = vpop.permute.xlu0 %7175  ;;  %7188 = vst.msk [vmem:[#allocation2 + $0xa] sm:$0xff] %vm16464_vm14, %v7178_v3  ;;  %vm16470_vm14 = vcmask 257024  }
0x1a87   :  { %v6587_v35 = vld [vmem:[#allocation4 + $0x8] sm:$0xff]  ;;  %7187 = vst.msk [vmem:[#allocation2 + $0x2] sm:$0xff] %vm16465_vm2, %v7176_v4  ;;  %vm16471_vm2 = vmmov %vm16470_vm14 }
0x1a88   :  { %v6595_v37 = vpack.c.bf16 %v6591_v31, %v6587_v35 }
0x1a89   :  { %v7182_v16 = vpop.permute.xlu1 %7181  ;;  %v6592_v18 = vld [vmem:[#allocation4 + $0x30] sm:$0x3] }
0x1a8a   :  { %6969 = vmatprep.mubr.bf16.mxu0 %v6595_v37  ;;  %v6593_v41 = vld [vmem:[#allocation4 + $0x38] sm:$0x3]  ;;  %v7180_v14 = vpop.permute.xlu0 %7179  ;;  %7190 = vst.msk [vmem:[#allocation2 + $0x1a] sm:$0xf] %vm16467_vm12, %v7182_v16 }
0x1a8b   :  { %6970 = vmatmul.mubr.bf16.vlgmr.msra.gmra.mrb[28].mxu0 %v6594_v39  ;;  %7189 = vst.msk [vmem:[#allocation2 + $0x12] sm:$0xff] %vm16466_vm6, %v7180_v14  ;;  %v6588_v19 = vld [vmem:[#allocation4 + $0x10] sm:$0xff]  ;;  %vm16472_vm6 = vcmask 1048320  }
0x1a8c   :  { %v6589_v42 = vld [vmem:[#allocation4 + $0x18] sm:$0xff]  ;;  %6981 = vmatpush1.bf16.msra.mxu0 %v12095_v38  ;;  %v6596_v23 = vpack.c.bf16 %v6592_v18, %v6588_v19  ;;  %vm16473_vm12 = vmmov %vm16472_vm6 }
0x1a8d   :  { %v6597_v44 = vpack.c.bf16 %v6593_v41, %v6589_v42  ;;  %6982 = vmatprep.subr.bf16.mxu0 %v12100_v40  ;;  %v7224_v22 = vld [vmem:[#allocation2 + $0xa] sm:$0xff] }
0x1a8e   :  { %v7200_v20 = vld [vmem:[#allocation2 + $0x9] sm:$0xff]  ;;  %v7199_v21 = vld [vmem:[#allocation2 + $0x1] sm:$0xff] }
0x1a8f   :  { %10919 = vmatprep.mubr.msk.bf16.mxu0 %vm16463_vm1, %v6597_v44  ;;  %vm16469_vm1 = vmmov %vm16468_vm15  ;;  %7209 = vrot.lane.b32.xlu1 %v7200_v20, %s16400_s21  ;;  %v7223_v24 = vld [vmem:[#allocation2 + $0x2] sm:$0xff] }
0x1a90   :  { %6983 = vmatpush1.bf16.msra.mxu0 %v12098_v43  ;;  %v6932_v17 = vsel %vm16469_vm1, %v10916_v9, 0  ;;  %7207 = vrot.lane.b32.xlu0 %v7199_v21, %s16400_s21  ;;  %v7247_v28 = vld [vmem:[#allocation2 + $0x3] sm:$0xff]  ;;  %vm16475_vm1 = vcmask 781824  }
0x1a91   :  { %6984 = vmatprep.subr.bf16.mxu0 %v12103_v45  ;;  %v7226_v31 = vld [vmem:[#allocation2 + $0x1a] sm:$0xf]  ;;  %v7271_v37 = vld [vmem:[#allocation2 + $0x4] sm:$0xff] }
0x1a92   :  { %v7248_v26 = vld [vmem:[#allocation2 + $0xb] sm:$0xff]  ;;  %v7202_v29 = vld [vmem:[#allocation2 + $0x19] sm:$0xf]  ;;  %7275 = vst.msk [vmem:[#allocation3 + $0x8] sm:$0xff] %vm48_vm0, %v7271_v37  ;;  %v7191_v40 = vld [vmem:[#allocation2] sm:$0xff] }
0x1a93   :  { %7233 = vrot.lane.b32.xlu1 %v7224_v22, %s16401_s29  ;;  %v7201_v30 = vld [vmem:[#allocation2 + $0x11] sm:$0xff]  ;;  %v7250_v33 = vld [vmem:[#allocation2 + $0x1b] sm:$0xf]  ;;  %v7192_v39 = vld [vmem:[#allocation2 + $0x8] sm:$0xff]  ;;  %7195 = vst.msk [vmem:[#allocation3] sm:$0xff] %vm48_vm0, %v7191_v40 }
0x1a94   :  { %6985 = vmatpush1.bf16.msra.mxu0 %v12101_v46  ;;  %7231 = vrot.lane.b32.xlu0 %v7223_v24, %s16401_s29  ;;  %v7225_v32 = vld [vmem:[#allocation2 + $0x12] sm:$0xff]  ;;  %7196 = vst.msk [vmem:[#allocation3 + $0x10] sm:$0xff] %vm48_vm0, %v7192_v39  ;;  %v7274_v44 = vld [vmem:[#allocation2 + $0x1c] sm:$0xf]  ;;  %v12129_v39 = vld [vmem:[%s16236_s1 + $0x4] ss:$8 sps:$4 sm:$0xff]  }
0x1a95   :  { %6986 = vmatprep.subr.bf16.mxu0 %v12106_v47  ;;  %v7249_v35 = vld [vmem:[#allocation2 + $0x13] sm:$0xff]  ;;  %7278 = vst.msk [vmem:[#allocation3 + $0x38] sm:$0xf] %vm16471_vm2, %v7274_v44  ;;  %vm16477_vm2 = vmmov %vm16472_vm6  ;;  %v12127_v44 = vld [vmem:[%s16236_s1] ss:$8 sps:$4 sm:$0xff]  }
0x1a96   :  { %v7272_v38 = vld [vmem:[#allocation2 + $0xc] sm:$0xff]  ;;  %v7194_v42 = vld [vmem:[#allocation2 + $0x18] sm:$0xf] }
0x1a97   :  { %7257 = vrot.lane.b32.xlu1 %v7248_v26, %s16364_s22  ;;  %7276 = vst.msk [vmem:[#allocation3 + $0x18] sm:$0xff] %vm48_vm0, %v7272_v38  ;;  %v7193_v41 = vld [vmem:[#allocation2 + $0x10] sm:$0xff] }
0x1a98   :  { %6987 = vmatpush1.bf16.msra.mxu0 %v12104_v48  ;;  %7255 = vrot.lane.b32.xlu0 %v7247_v28, %s16364_s22  ;;  %7197 = vst.msk [vmem:[#allocation3 + $0x20] sm:$0xff] %vm48_vm0, %v7193_v41  ;;  %v7273_v43 = vld [vmem:[#allocation2 + $0x14] sm:$0xff] }
0x1a99   :  { %6988 = vmatprep.subr.bf16.mxu0 %v12109_v49  ;;  %7198 = vst.msk [vmem:[#allocation3 + $0x30] sm:$0xf] %vm16470_vm14, %v7194_v42  ;;  %vm16476_vm14 = vcmask 1044224   ;;  %v7280_v41 = vld [vmem:[#allocation3 + $0x8] sm:$0xff] }
0x1a9a   :  { %7277 = vst.msk [vmem:[#allocation3 + $0x28] sm:$0xff] %vm48_vm0, %v7273_v43  ;;  %v7039_v43 = vld [vmem:[%s16242_s7] sm:$0x7] }
0x1a9b   :  { %7213 = vrot.lane.b32.xlu1 %v7202_v29, %s16400_s21 }
0x1a9c   :  { %6989 = vmatpush1.bf16.msra.mxu0 %v12107_v51  ;;  %7211 = vrot.lane.b32.xlu0 %v7201_v30, %s16400_s21 }
0x1a9d   :  { %6990 = vmatprep.subr.bf16.mxu0 %v12112_v53 }
0x1a9e   :  { %v7282_v42 = vld [vmem:[#allocation3 + $0x18] sm:$0xff] }
0x1a9f   :  { %7237 = vrot.lane.b32.xlu1 %v7226_v31, %s16401_s29 }
0x1aa0   :  { %6991 = vmatpush1.bf16.msra.mxu0 %v12110_v54  ;;  %7235 = vrot.lane.b32.xlu0 %v7225_v32, %s16401_s29 }
0x1aa1   :  { %6992 = vmatprep.subr.bf16.mxu0 %v12115_v55 }
0x1aa3   :  { %7261 = vrot.lane.b32.xlu1 %v7250_v33, %s16364_s22 }
0x1aa4   :  { %6993 = vmatpush1.bf16.msra.mxu0 %v12113_v57  ;;  %7259 = vrot.lane.b32.xlu0 %v7249_v35, %s16364_s22 }
0x1aa5   :  { %6994 = vmatprep.subr.bf16.mxu0 %v12118_v58 }
0x1aa8   :  { %6995 = vmatpush1.bf16.msra.mxu0 %v12116_v59 }
0x1aa9   :  { %6996 = vmatprep.subr.bf16.mxu0 %v12121_v60  ;;  %v6651_v60 = vld [vmem:[%s16241_s6] sm:$0x3] }
0x1aac   :  { %6997 = vmatpush1.bf16.msra.mxu0 %v12119_v61  ;;  %v6656_v61 = vrot.slane %v6651_v60, %v12844_v13 }
0x1aad   :  { %6998 = vmatprep.subr.bf16.mxu0 %v12124_v62  ;;  %v6660_v62 = vrot.slane %v6651_v60, %v12850_v15  ;;  %v12145_v60 = vld [vmem:[%s16236_s1 + $0x60] ss:$8 sps:$4 sm:$0xff]  }
0x1ab0   :  { %6999 = vmatpush1.bf16.msra.mxu0 %v12122_v6 }
0x1ab1   :  { %10918 = vmatprep.subr.msk.bf16.mxu0 %vm16468_vm15, %v10917_v8  ;;  %vm16474_vm15 = vcmask 519424  }
0x1ab4   :  { %7001 = vmatpush1.bf16.msra.mxu0 %v6932_v17 }
0x1ab7   :  { %7013 = vmatmul.mubr.bf16.vlgmr.msra.gmra.mrb[28].mxu0 %v6596_v23 }
0x1b01   :  { %v7210_v45 = vpop.permute.xlu1 %7209 }
0x1b02   :  { %v7208_v46 = vpop.permute.xlu0 %7207  ;;  %7220 = vst.msk [vmem:[#allocation3 + $0x10] sm:$0xff] %vm108_vm4, %v7210_v45  ;;  %v12132_v45 = vld [vmem:[%s16236_s1 + $0x14] ss:$8 sps:$4 sm:$0xff]  }
0x1b03   :  { %7219 = vst.msk [vmem:[#allocation3] sm:$0xff] %vm108_vm4, %v7208_v46  ;;  %v7288_v46 = vpack.c.bf16 %v7282_v42, %v7280_v41 }
0x1b05   :  { %v7234_v47 = vpop.permute.xlu1 %7233 }
0x1b06   :  { %v7232_v48 = vpop.permute.xlu0 %7231  ;;  %7244 = vst.msk [vmem:[#allocation3 + $0x10] sm:$0xff] %vm134_vm5, %v7234_v47  ;;  %v12130_v47 = vld [vmem:[%s16236_s1 + $0x10] ss:$8 sps:$4 sm:$0xff]  }
0x1b07   :  { %7243 = vst.msk [vmem:[#allocation3] sm:$0xff] %vm134_vm5, %v7232_v48  ;;  %v12135_v48 = vld [vmem:[%s16236_s1 + $0x24] ss:$8 sps:$4 sm:$0xff]  }
0x1b09   :  { %v7258_v49 = vpop.permute.xlu1 %7257 }
0x1b0a   :  { %v7256_v51 = vpop.permute.xlu0 %7255  ;;  %7268 = vst.msk [vmem:[#allocation3 + $0x10] sm:$0xff] %vm16472_vm6, %v7258_v49  ;;  %vm16478_vm6 = vcmask 1044480   ;;  %v12133_v49 = vld [vmem:[%s16236_s1 + $0x20] ss:$8 sps:$4 sm:$0xff]  }
0x1b0b   :  { %7267 = vst.msk [vmem:[#allocation3] sm:$0xff] %vm16473_vm12, %v7256_v51  ;;  %vm16479_vm12 = vmmov %vm16478_vm6  ;;  %v12138_v51 = vld [vmem:[%s16236_s1 + $0x34] ss:$8 sps:$4 sm:$0xff]  }
0x1b0d   :  { %v7214_v53 = vpop.permute.xlu1 %7213 }
0x1b0e   :  { %v7212_v54 = vpop.permute.xlu0 %7211  ;;  %7222 = vst.msk [vmem:[#allocation3 + $0x30] sm:$0xf] %vm16474_vm15, %v7214_v53  ;;  %v12136_v53 = vld [vmem:[%s16236_s1 + $0x30] ss:$8 sps:$4 sm:$0xff]   ;;  %vm16480_vm15 = vcmask 1045504  }
0x1b0f   :  { %7221 = vst.msk [vmem:[#allocation3 + $0x20] sm:$0xff] %vm108_vm4, %v7212_v54  ;;  %v12141_v54 = vld [vmem:[%s16236_s1 + $0x44] ss:$8 sps:$4 sm:$0xff]  }
0x1b11   :  { %v7238_v55 = vpop.permute.xlu1 %7237 }
0x1b12   :  { %v7236_v57 = vpop.permute.xlu0 %7235  ;;  %7246 = vst.msk [vmem:[#allocation3 + $0x30] sm:$0xf] %vm16475_vm1, %v7238_v55  ;;  %v12139_v55 = vld [vmem:[%s16236_s1 + $0x40] ss:$8 sps:$4 sm:$0xff]   ;;  %vm16481_vm1 = vmmov %vm16480_vm15 }
0x1b13   :  { %7245 = vst.msk [vmem:[#allocation3 + $0x20] sm:$0xff] %vm134_vm5, %v7236_v57  ;;  %v12144_v57 = vld [vmem:[%s16236_s1 + $0x54] ss:$8 sps:$4 sm:$0xff]  }
0x1b15   :  { %v7262_v58 = vpop.permute.xlu1 %7261 }
0x1b16   :  { %v7260_v59 = vpop.permute.xlu0 %7259  ;;  %7270 = vst.msk [vmem:[#allocation3 + $0x30] sm:$0xf] %vm16476_vm14, %v7262_v58  ;;  %v12142_v58 = vld [vmem:[%s16236_s1 + $0x50] ss:$8 sps:$4 sm:$0xff]   ;;  %vm16482_vm14 = vcmask 228352  }
0x1b17   :  { %7269 = vst.msk [vmem:[#allocation3 + $0x20] sm:$0xff] %vm16477_vm2, %v7260_v59  ;;  %v12147_v59 = vld [vmem:[%s16236_s1 + $0x64] ss:$8 sps:$4 sm:$0xff]   ;;  %vm16483_vm2 = vcmask 1043456  }
0x1b8a   :  { %v7014_v0 = vpop.f32.mrb[28].mxu0 }
0x1b8b   :  { %v11339_v3 = vadd.f32 %v7014_v0, %v6656_v61  ;;  %v7016_v4 = vpop.f32.mrb[29].mxu0  ;;  %v12153_v0 = vld [vmem:[%s16236_s1 + $0x84] ss:$8 sps:$4 sm:$0xff]  }
0x1b8c   :  { %v11340_v6 = vadd.f32 %v7016_v4, %v6660_v62  ;;  %v7018_v8 = vpop.f32.mrb[30].mxu0  ;;  %v12156_v4 = vld [vmem:[%s16236_s1 + $0x94] ss:$8 sps:$4 sm:$0xff]  }
0x1b8d   :  { %v7023_v9 = vmul.f32 0.5, %v11339_v3  ;;  %v11341_v14 = vadd.f32 %v7018_v8, %v6656_v61  ;;  %v7020_v16 = vpop.f32.mrb[31].mxu0  ;;  %v12150_v61 = vld [vmem:[%s16236_s1 + $0x74] ss:$8 sps:$4 sm:$0xff]   ;;  %v12151_v3 = vld [vmem:[%s16236_s1 + $0x80] ss:$8 sps:$4 sm:$0xff]  }
0x1b8e   :  { %v7024_v17 = vmul.f32 0.5, %v11340_v6  ;;  %v11342_v18 = vadd.f32 %v7020_v16, %v6660_v62  ;;  %v12148_v62 = vld [vmem:[%s16236_s1 + $0x70] ss:$8 sps:$4 sm:$0xff]   ;;  %v7279_v8 = vld [vmem:[#allocation3] sm:$0xff] }
0x1b8f   :  { %12570 = vtanh.f32 %v7023_v9  ;;  %v7025_v19 = vmul.f32 0.5, %v11341_v14  ;;  %v12154_v6 = vld [vmem:[%s16236_s1 + $0x90] ss:$8 sps:$4 sm:$0xff]   ;;  %v7284_v14 = vld [vmem:[#allocation3 + $0x28] sm:$0xff] }
0x1b90   :  { %12572 = vtanh.f32 %v7024_v17  ;;  %v7026_v20 = vmul.f32 0.5, %v11342_v18  ;;  %v7281_v9 = vld [vmem:[#allocation3 + $0x10] sm:$0xff]  ;;  %v7286_v16 = vld [vmem:[#allocation3 + $0x38] sm:$0xf] }
0x1b91   :  { %12574 = vtanh.f32 %v7025_v19  ;;  %v7287_v17 = vpack.c.bf16 %v7281_v9, %v7279_v8  ;;  %v7290_v18 = vpack.c.bf16 %v7286_v16, %v7284_v14  ;;  %v7283_v19 = vld [vmem:[#allocation3 + $0x20] sm:$0xff] }
0x1b92   :  { %12576 = vtanh.f32 %v7026_v20  ;;  %v7285_v20 = vld [vmem:[#allocation3 + $0x30] sm:$0xf] }
0x1b99   :  { %v12571_v21 = vpop.eup %12570 }
0x1b9a   :  { %v12573_v22 = vpop.eup %12572  ;;  %v7031_v23 = vmul.f32 0.5, %v12571_v21  ;;  %v7289_v21 = vpack.c.bf16 %v7285_v20, %v7283_v19 }
0x1b9b   :  { %v12575_v24 = vpop.eup %12574  ;;  %v7032_v26 = vmul.f32 0.5, %v12573_v22 }
0x1b9c   :  { %v12577_v28 = vpop.eup %12576  ;;  %v7033_v29 = vmul.f32 0.5, %v12575_v24  ;;  %v7035_v31 = vadd.f32 0.5, %v7031_v23 }
0x1b9d   :  { %v7034_v30 = vmul.f32 0.5, %v12577_v28  ;;  %v7036_v33 = vadd.f32 0.5, %v7032_v26 }
0x1b9e   :  { %v7037_v32 = vadd.f32 0.5, %v7033_v29 }
0x1b9f   :  { %v7038_v35 = vadd.f32 0.5, %v7034_v30 }
0x1ba0   :  { %v7040_v37 = vpack.c.bf16 %v7037_v32, %v7035_v31 }
0x1ba1   :  { %v7041_v38 = vpack.c.bf16 %v7038_v35, %v7036_v33  ;;  %v7311_v35 = vld [vmem:[%s16239_s2] sm:$0x3] }
0x1ba2   :  { %v7046_v40 = vsel %vm16478_vm6, %v7040_v37, 0  ;;  %v7316_v37 = vrot.slane %v7311_v35, %v12844_v13  ;;  %vm16484_vm6 = vcmask 687104  }
0x1ba3   :  { %10920 = vmatprep.subr.msk.bf16.mxu1 %vm16479_vm12, %v7041_v38  ;;  %v7320_v38 = vrot.slane %v7311_v35, %v12850_v15  ;;  %vm16485_vm12 = vcmask 680960  }
0x1ba4   :  { %7052 = vmatpush1.bf16.msra.mxu1 %v7046_v40 }
0x1ba5   :  { %7429 = vmatprep.subr.bf16.mxu1 %v12129_v39 }
0x1ba7   :  { %10921 = vmatmul.mubr.msk.bf16.vlgmr.msra.gmra.mrb[108].mxu1 %vm1137_vm3, %v7039_v43 }
0x1ba8   :  { %7430 = vmatpush1.bf16.msra.mxu1 %v12127_v44  ;;  %10946 = vmatprep.mubr.msk.bf16.mxu1 %vm48_vm0, %v7288_v46 }
0x1ba9   :  { %7431 = vmatprep.subr.bf16.mxu1 %v12132_v45 }
0x1bac   :  { %7432 = vmatpush1.bf16.msra.mxu1 %v12130_v47 }
0x1bad   :  { %7433 = vmatprep.subr.bf16.mxu1 %v12135_v48 }
0x1bb0   :  { %7434 = vmatpush1.bf16.msra.mxu1 %v12133_v49 }
0x1bb1   :  { %7435 = vmatprep.subr.bf16.mxu1 %v12138_v51 }
0x1bb4   :  { %7436 = vmatpush1.bf16.msra.mxu1 %v12136_v53 }
0x1bb5   :  { %7437 = vmatprep.subr.bf16.mxu1 %v12141_v54 }
0x1bb8   :  { %7438 = vmatpush1.bf16.msra.mxu1 %v12139_v55 }
0x1bb9   :  { %7439 = vmatprep.subr.bf16.mxu1 %v12144_v57 }
0x1bbc   :  { %7440 = vmatpush1.bf16.msra.mxu1 %v12142_v58 }
0x1bbd   :  { %7441 = vmatprep.subr.bf16.mxu1 %v12147_v59 }
0x1bc0   :  { %7442 = vmatpush1.bf16.msra.mxu1 %v12145_v60 }
0x1bc1   :  { %7443 = vmatprep.subr.bf16.mxu1 %v12150_v61 }
0x1bc4   :  { %7444 = vmatpush1.bf16.msra.mxu1 %v12148_v62 }
0x1bc5   :  { %7445 = vmatprep.subr.bf16.mxu1 %v12153_v0 }
0x1bc8   :  { %7446 = vmatpush1.bf16.msra.mxu1 %v12151_v3 }
0x1bc9   :  { %7447 = vmatprep.subr.bf16.mxu1 %v12156_v4 }
0x1bcc   :  { %7448 = vmatpush1.bf16.msra.mxu1 %v12154_v6 }
0x1bcf   :  { %7462 = vmatmul.mubr.bf16.vlgmr.msra.gmra.mrb[112].mxu1 %v7287_v17 }
0x1bd0   :  { %10947 = vmatprep.mubr.msk.bf16.mxu1 %vm48_vm0, %v7290_v18 }
0x1bd7   :  { %7472 = vmatmul.mubr.bf16.gmra.mrb[116].mxu1 %v7289_v21 }
0x1bd8   :  { %7566 = vmatprep.mubr.bf16.mxu1 %v12635_v10 }
0x1c7a   :  { %v7085_v22 = vpop.f32.mrb[108].mxu1 }
0x1c7b   :  { %v7087_v23 = vpop.f32.mrb[109].mxu1 }
0x1c7c   :  { %v7094_v24 = vcombine.low %v7085_v22, %v7087_v23  ;;  %v7147_v26 = vcombine.high %v7085_v22, %v7087_v23  ;;  %v7089_v28 = vpop.f32.mrb[110].mxu1 }
0x1c7d   :  { %v7090_v29 = vpop.f32.mrb[111].mxu1 }
0x1c7e   :  { %v15172_v30 = vrot.slane %v7094_v24, %v13224_v56  ;;  %v7154_v31 = vrot.slane %v7147_v26, %v13224_v56 }
0x1c80   :  { %v15177_v32 = vrot.slane %v15172_v30, %v13224_v56  ;;  %v7161_v33 = vrot.slane %v7154_v31, %v13224_v56 }
0x1c82   :  { %7164 = vst.msk [vmem:[#allocation5 + $0x2d] ss:$8 sm:$0x3] %vm13231_vm11, %v7161_v33  ;;  %7111 = vst.msk [vmem:[#allocation5 + $0x5] ss:$8 sm:$0x3] %vm13231_vm11, %v15177_v32 }
0x1ca2   :  { %v7463_v39 = vpop.f32.mrb[112].mxu1 }
0x1ca3   :  { %v7464_v40 = vadd.f32 %v7463_v39, %v7316_v37  ;;  %v7465_v41 = vpop.f32.mrb[113].mxu1 }
0x1ca4   :  { %v7466_v42 = vadd.f32 %v7465_v41, %v7320_v38  ;;  %v7467_v43 = vpop.f32.mrb[114].mxu1 }
0x1ca5   :  { %v7482_v44 = vmul.f32 0.5, %v7464_v40  ;;  %v7468_v45 = vadd.f32 %v7467_v43, %v7316_v37  ;;  %v7469_v46 = vpop.f32.mrb[115].mxu1 }
0x1ca6   :  { %v7483_v47 = vmul.f32 0.5, %v7466_v42  ;;  %v7470_v48 = vadd.f32 %v7469_v46, %v7320_v38 }
0x1ca7   :  { %12578 = vtanh.f32 %v7482_v44  ;;  %v7484_v49 = vmul.f32 0.5, %v7468_v45 }
0x1ca8   :  { %12580 = vtanh.f32 %v7483_v47  ;;  %v7485_v51 = vmul.f32 0.5, %v7470_v48  ;;  %v12157_v47 = vld [vmem:[%s16237_s3] sm:$0x7f]  }
0x1ca9   :  { %12582 = vtanh.f32 %v7484_v49  ;;  %v12158_v48 = vld [vmem:[%s16238_s4] sm:$0xff]   ;;  %v12159_v49 = vld [vmem:[%s16238_s4 + $0x8] sm:$0xff]  }
0x1caa   :  { %12584 = vtanh.f32 %v7485_v51  ;;  %v7473_v53 = vpop.f32.mrb[116].mxu1  ;;  %v12160_v51 = vld [vmem:[%s16238_s4 + $0x10] sm:$0xff]  }
0x1cab   :  { %v7474_v54 = vadd.f32 %v7473_v53, %v7316_v37  ;;  %v7475_v55 = vpop.f32.mrb[117].mxu1  ;;  %v12161_v53 = vld [vmem:[%s16238_s4 + $0x18] sm:$0xff]  }
0x1cac   :  { %v7476_v57 = vadd.f32 %v7475_v55, %v7320_v38  ;;  %v7477_v58 = vpop.f32.mrb[118].mxu1  ;;  %v12163_v55 = vld [vmem:[%s16238_s4 + $0x28] sm:$0xff]  }
0x1cad   :  { %v7486_v59 = vmul.f32 0.5, %v7474_v54  ;;  %v7478_v60 = vadd.f32 %v7477_v58, %v7316_v37  ;;  %v7479_v61 = vpop.f32.mrb[119].mxu1  ;;  %v12162_v54 = vld [vmem:[%s16238_s4 + $0x20] sm:$0xff]   ;;  %v12165_v58 = vld [vmem:[%s16238_s4 + $0x38] sm:$0xff]  }
0x1cae   :  { %v7487_v62 = vmul.f32 0.5, %v7476_v57  ;;  %v7480_v0 = vadd.f32 %v7479_v61, %v7320_v38  ;;  %v12164_v57 = vld [vmem:[%s16238_s4 + $0x30] sm:$0xff]  }
0x1caf   :  { %12586 = vtanh.f32 %v7486_v59  ;;  %v7488_v3 = vmul.f32 0.5, %v7478_v60  ;;  %v12166_v59 = vld [vmem:[%s16238_s4 + $0x40] sm:$0xff]   ;;  %v12167_v60 = vld [vmem:[%s16238_s4 + $0x48] sm:$0xff]   ;;  %v12168_v61 = vld [vmem:[%s16238_s4 + $0x50] ss:$0 sps:$4 sm:$0xff]  }
0x1cb0   :  { %12588 = vtanh.f32 %v7487_v62  ;;  %v7489_v4 = vmul.f32 0.5, %v7480_v0  ;;  %v7667_v62 = vsel %vm16483_vm2, %v12168_v61, 0 }
0x1cb1   :  { %v12579_v6 = vpop.eup %12578  ;;  %12590 = vtanh.f32 %v7488_v3 }
0x1cb2   :  { %v12581_v8 = vpop.eup %12580  ;;  %v7498_v9 = vmul.f32 0.5, %v12579_v6  ;;  %12592 = vtanh.f32 %v7489_v4 }
0x1cb3   :  { %v12583_v14 = vpop.eup %12582  ;;  %v7499_v16 = vmul.f32 0.5, %v12581_v8 }
0x1cb4   :  { %v12585_v17 = vpop.eup %12584  ;;  %v7500_v18 = vmul.f32 0.5, %v12583_v14  ;;  %v7506_v20 = vadd.f32 0.5, %v7498_v9  ;;  %v12169_v14 = vld [vmem:[%s16240_s5] ss:$8 sps:$4 sm:$0xff]  }
0x1cb5   :  { %v7501_v19 = vmul.f32 0.5, %v12585_v17  ;;  %v7507_v22 = vadd.f32 0.5, %v7499_v16  ;;  %v12171_v16 = vld [vmem:[%s16240_s5 + $0x4] ss:$8 sps:$4 sm:$0xff]   ;;  %v12174_v17 = vld [vmem:[%s16240_s5 + $0x14] ss:$8 sps:$4 sm:$0xff]  }
0x1cb6   :  { %v7508_v21 = vadd.f32 0.5, %v7500_v18  ;;  %8115 = vmatprep.subr.bf16.mxu0 %v12171_v16  ;;  %v12172_v18 = vld [vmem:[%s16240_s5 + $0x10] ss:$8 sps:$4 sm:$0xff]   ;;  %v12216_v16 = vld [vmem:[%s16240_s5 + $0xf4] ss:$8 sps:$4 sm:$0xff]  }
0x1cb7   :  { %v7509_v23 = vadd.f32 0.5, %v7501_v19  ;;  %8116 = vmatpush1.bf16.msra.mxu0 %v12169_v14  ;;  %v12177_v19 = vld [vmem:[%s16240_s5 + $0x24] ss:$8 sps:$4 sm:$0xff]  }
0x1cb8   :  { %v7516_v24 = vpack.c.bf16 %v7508_v21, %v7506_v20  ;;  %8117 = vmatprep.subr.bf16.mxu0 %v12174_v17  ;;  %v12175_v20 = vld [vmem:[%s16240_s5 + $0x20] ss:$8 sps:$4 sm:$0xff]   ;;  %v12180_v21 = vld [vmem:[%s16240_s5 + $0x34] ss:$8 sps:$4 sm:$0xff]   ;;  %v12214_v17 = vld [vmem:[%s16240_s5 + $0xf0] ss:$8 sps:$4 sm:$0xff]  }
0x1cb9   :  { %v12587_v26 = vpop.eup %12586  ;;  %v7517_v28 = vpack.c.bf16 %v7509_v23, %v7507_v22  ;;  %v12178_v22 = vld [vmem:[%s16240_s5 + $0x30] ss:$8 sps:$4 sm:$0xff]   ;;  %v12183_v23 = vld [vmem:[%s16240_s5 + $0x44] ss:$8 sps:$4 sm:$0xff]  }
0x1cba   :  { %v12589_v29 = vpop.eup %12588  ;;  %v7502_v31 = vmul.f32 0.5, %v12587_v26  ;;  %v12186_v26 = vld [vmem:[%s16240_s5 + $0x54] ss:$8 sps:$4 sm:$0xff]  }
0x1cbb   :  { %v12591_v33 = vpop.eup %12590  ;;  %v7503_v35 = vmul.f32 0.5, %v12589_v29  ;;  %7534 = vmatprep.subr.bf16.mxu1 %v7517_v28  ;;  %8118 = vmatpush1.bf16.msra.mxu0 %v12172_v18  ;;  %v12184_v28 = vld [vmem:[%s16240_s5 + $0x50] ss:$8 sps:$4 sm:$0xff]   ;;  %v12189_v29 = vld [vmem:[%s16240_s5 + $0x64] ss:$8 sps:$4 sm:$0xff]  }
0x1cbc   :  { %v12593_v37 = vpop.eup %12592  ;;  %v7504_v38 = vmul.f32 0.5, %v12591_v33  ;;  %7535 = vmatpush1.bf16.msra.mxu1 %v7516_v24  ;;  %v7510_v40 = vadd.f32 0.5, %v7502_v31  ;;  %8119 = vmatprep.subr.bf16.mxu0 %v12177_v19  ;;  %v12181_v24 = vld [vmem:[%s16240_s5 + $0x40] ss:$8 sps:$4 sm:$0xff]   ;;  %v12192_v33 = vld [vmem:[%s16240_s5 + $0x74] ss:$8 sps:$4 sm:$0xff]  }
0x1cbd   :  { %v7505_v39 = vmul.f32 0.5, %v12593_v37  ;;  %v7511_v42 = vadd.f32 0.5, %v7503_v35  ;;  %v12187_v31 = vld [vmem:[%s16240_s5 + $0x60] ss:$8 sps:$4 sm:$0xff]   ;;  %v12190_v35 = vld [vmem:[%s16240_s5 + $0x70] ss:$8 sps:$4 sm:$0xff]  }
0x1cbe   :  { %v7512_v41 = vadd.f32 0.5, %v7504_v38  ;;  %v12195_v37 = vld [vmem:[%s16240_s5 + $0x84] ss:$8 sps:$4 sm:$0xff]   ;;  %v12193_v38 = vld [vmem:[%s16240_s5 + $0x80] ss:$8 sps:$4 sm:$0xff]  }
0x1cbf   :  { %v7513_v43 = vadd.f32 0.5, %v7505_v39  ;;  %8120 = vmatpush1.bf16.msra.mxu0 %v12175_v20  ;;  %v12198_v39 = vld [vmem:[%s16240_s5 + $0x94] ss:$8 sps:$4 sm:$0xff]   ;;  %v12219_v18 = vld [vmem:[%s16240_s5 + $0x104] ss:$8 sps:$4 sm:$0xff]  }
0x1cc0   :  { %v7518_v44 = vpack.c.bf16 %v7512_v41, %v7510_v40  ;;  %8121 = vmatprep.subr.bf16.mxu0 %v12180_v21  ;;  %v12196_v40 = vld [vmem:[%s16240_s5 + $0x90] ss:$8 sps:$4 sm:$0xff]   ;;  %v12201_v41 = vld [vmem:[%s16240_s5 + $0xa4] ss:$8 sps:$4 sm:$0xff]  }
0x1cc1   :  { %v7519_v45 = vpack.c.bf16 %v7513_v43, %v7511_v42  ;;  %v12199_v42 = vld [vmem:[%s16240_s5 + $0xa0] ss:$8 sps:$4 sm:$0xff]   ;;  %v12204_v43 = vld [vmem:[%s16240_s5 + $0xb4] ss:$8 sps:$4 sm:$0xff]  }
0x1cc2   :  { %v7529_v46 = vsel %vm16480_vm15, %v7518_v44, 0  ;;  %v12202_v44 = vld [vmem:[%s16240_s5 + $0xb0] ss:$8 sps:$4 sm:$0xff]   ;;  %vm16486_vm15 = vcmask 1046528   ;;  %v11022_v19 = vld [vmem:[%s16235_s0 + $0xe8] sm:$0xff]  ;;  %v11021_v20 = vld [vmem:[%s16235_s0 + $0xe0] sm:$0xff] }
0x1cc3   :  { %10949 = vmatprep.subr.msk.bf16.mxu1 %vm16481_vm1, %v7519_v45  ;;  %8122 = vmatpush1.bf16.msra.mxu0 %v12178_v22  ;;  %v12205_v45 = vld [vmem:[%s16240_s5 + $0xc0] ss:$8 sps:$4 sm:$0xff]   ;;  %v11023_v21 = vld [vmem:[%s16235_s0 + $0xf0] sm:$0xff]  ;;  %v11024_v22 = vld [vmem:[%s16235_s0 + $0xf8] sm:$0xf] }
0x1cc4   :  { %7537 = vmatpush1.bf16.msra.mxu1 %v7529_v46  ;;  %8123 = vmatprep.subr.bf16.mxu0 %v12183_v23  ;;  %v12207_v46 = vld [vmem:[%s16240_s5 + $0xc4] ss:$8 sps:$4 sm:$0xff]  }
0x1cc5   :  { %7669 = vmatprep.subr.bf16.mxu1 %v12635_v10 }
0x1cc7   :  { %10950 = vmatmul.mubr.msk.bf16.vlgmr.msra.gmra.mrb[120].mxu1 %vm16482_vm14, %v12157_v47  ;;  %8124 = vmatpush1.bf16.msra.mxu0 %v12181_v24  ;;  %v12208_v47 = vld [vmem:[%s16240_s5 + $0xd0] ss:$8 sps:$4 sm:$0xff]   ;;  %vm16487_vm14 = vcmask 1044480  }
0x1cc8   :  { %7670 = vmatpush1.bf16.msra.mxu1 %v12158_v48  ;;  %8125 = vmatprep.subr.bf16.mxu0 %v12186_v26  ;;  %v12210_v48 = vld [vmem:[%s16240_s5 + $0xd4] ss:$8 sps:$4 sm:$0xff]  }
0x1cc9   :  { %7671 = vmatprep.subr.bf16.mxu1 %v12635_v10 }
0x1ccb   :  { %8126 = vmatpush1.bf16.msra.mxu0 %v12184_v28 }
0x1ccc   :  { %7672 = vmatpush1.bf16.msra.mxu1 %v12159_v49  ;;  %8127 = vmatprep.subr.bf16.mxu0 %v12189_v29 }
0x1ccd   :  { %7673 = vmatprep.subr.bf16.mxu1 %v12635_v10 }
0x1ccf   :  { %8128 = vmatpush1.bf16.msra.mxu0 %v12187_v31 }
0x1cd0   :  { %7674 = vmatpush1.bf16.msra.mxu1 %v12160_v51  ;;  %8129 = vmatprep.subr.bf16.mxu0 %v12192_v33 }
0x1cd1   :  { %7675 = vmatprep.subr.bf16.mxu1 %v12635_v10 }
0x1cd3   :  { %8130 = vmatpush1.bf16.msra.mxu0 %v12190_v35 }
0x1cd4   :  { %7676 = vmatpush1.bf16.msra.mxu1 %v12161_v53  ;;  %8131 = vmatprep.subr.bf16.mxu0 %v12195_v37 }
0x1cd5   :  { %7677 = vmatprep.subr.bf16.mxu1 %v12635_v10 }
0x1cd7   :  { %8132 = vmatpush1.bf16.msra.mxu0 %v12193_v38 }
0x1cd8   :  { %7678 = vmatpush1.bf16.msra.mxu1 %v12162_v54  ;;  %8133 = vmatprep.subr.bf16.mxu0 %v12198_v39 }
0x1cd9   :  { %7679 = vmatprep.subr.bf16.mxu1 %v12635_v10 }
0x1cdb   :  { %8134 = vmatpush1.bf16.msra.mxu0 %v12196_v40 }
0x1cdc   :  { %7680 = vmatpush1.bf16.msra.mxu1 %v12163_v55  ;;  %8135 = vmatprep.subr.bf16.mxu0 %v12201_v41 }
0x1cdd   :  { %7681 = vmatprep.subr.bf16.mxu1 %v12635_v10 }
0x1cdf   :  { %8136 = vmatpush1.bf16.msra.mxu0 %v12199_v42  ;;  %v12217_v42 = vld [vmem:[%s16240_s5 + $0x100] ss:$8 sps:$4 sm:$0xff]  }
0x1ce0   :  { %7682 = vmatpush1.bf16.msra.mxu1 %v12164_v57  ;;  %8137 = vmatprep.subr.bf16.mxu0 %v12204_v43 }
0x1ce1   :  { %7683 = vmatprep.subr.bf16.mxu1 %v12635_v10 }
0x1ce3   :  { %8138 = vmatpush1.bf16.msra.mxu0 %v12202_v44  ;;  %v12222_v44 = vld [vmem:[%s16240_s5 + $0x114] ss:$8 sps:$4 sm:$0xff]  }
0x1ce4   :  { %7684 = vmatpush1.bf16.msra.mxu1 %v12165_v58  ;;  %8139 = vmatprep.subr.bf16.mxu0 %v12207_v46 }
0x1ce5   :  { %7685 = vmatprep.subr.bf16.mxu1 %v12635_v10 }
0x1ce7   :  { %8140 = vmatpush1.bf16.msra.mxu0 %v12205_v45 }
0x1ce8   :  { %7686 = vmatpush1.bf16.msra.mxu1 %v12166_v59  ;;  %8141 = vmatprep.subr.bf16.mxu0 %v12210_v48  ;;  %v12211_v59 = vld [vmem:[%s16240_s5 + $0xe0] ss:$8 sps:$4 sm:$0xff]  }
0x1ce9   :  { %7687 = vmatprep.subr.bf16.mxu1 %v12635_v10 }
0x1ceb   :  { %8142 = vmatpush1.bf16.msra.mxu0 %v12208_v47  ;;  %v12220_v47 = vld [vmem:[%s16240_s5 + $0x110] ss:$8 sps:$4 sm:$0xff]  }
0x1cec   :  { %7688 = vmatpush1.bf16.msra.mxu1 %v12167_v60  ;;  %v12213_v60 = vld [vmem:[%s16240_s5 + $0xe4] ss:$8 sps:$4 sm:$0xff]  }
0x1ced   :  { %7689 = vmatprep.subr.bf16.mxu1 %v12635_v10  ;;  %8143 = vmatprep.subr.bf16.mxu0 %v12213_v60  ;;  %v12237_v60 = vld [vmem:[%s16240_s5 + $0x164] ss:$8 sps:$4 sm:$0xff]  }
0x1cef   :  { %8144 = vmatpush1.bf16.msra.mxu0 %v12211_v59  ;;  %v12232_v59 = vld [vmem:[%s16240_s5 + $0x150] ss:$8 sps:$4 sm:$0xff]  }
0x1cf0   :  { %7690 = vmatpush1.bf16.msra.mxu1 %v7667_v62  ;;  %8145 = vmatprep.subr.bf16.mxu0 %v12216_v16  ;;  %v12244_v16 = vld [vmem:[%s16240_s5 + $0x190] ss:$8 sps:$4 sm:$0xff]  }
0x1cf3   :  { %8146 = vmatpush1.bf16.msra.mxu0 %v12214_v17 }
0x1cf4   :  { %8158 = vmatprep.subr.bf16.mxu0 %v12219_v18 }
0x1d9a   :  { %v7568_v0 = vpop.f32.mrb[120].mxu1 }
0x1d9b   :  { %v7570_v3 = vpop.f32.mrb[121].mxu1 }
0x1d9c   :  { %v7572_v4 = vpop.f32.mrb[122].mxu1 }
0x1d9d   :  { %v7577_v6 = vpack.c.bf16 %v7572_v4, %v7568_v0  ;;  %v7574_v8 = vpop.f32.mrb[123].mxu1 }
0x1d9e   :  { %v7578_v9 = vpack.c.bf16 %v7574_v8, %v7570_v3 }
0x1da0   :  { %10962 = vmatprep.mubr.msk.bf16.mxu1 %vm560_vm13, %v7578_v9 }
0x1da1   :  { %7702 = vmatmul.mubr.bf16.vlgmr.msra.gmra.mrb[124].mxu1 %v7577_v6 }
0x1da2   :  { %8261 = vmatprep.mubr.bf16.mxu1 %v12635_v10 }
0x1e74   :  { %v7703_v49 = vpop.f32.mrb[124].mxu1 }
0x1e75   :  { %7710 = vst.msk [vmem:[#allocation4] sm:$0xff] %vm16484_vm6, %v7703_v49  ;;  %v7705_v51 = vpop.f32.mrb[125].mxu1  ;;  %v7714_v53 = vrot.slane %v7703_v49, 1  ;;  %v7727_v54 = vrot.slane %v7703_v49, 2  ;;  %v7738_v55 = vrot.slane %v7703_v49, 3  ;;  %v7751_v58 = vrot.slane %v7703_v49, 4 }
0x1e76   :  { %v7706_v57 = vpop.f32.mrb[126].mxu1  ;;  %vm16488_vm6 = vcmask 1042080   ;;  %v12225_v49 = vld [vmem:[%s16240_s5 + $0x124] ss:$8 sps:$4 sm:$0xff]   ;;  %v12223_v51 = vld [vmem:[%s16240_s5 + $0x120] ss:$8 sps:$4 sm:$0xff]  }
0x1e77   :  { %7711 = vst.msk [vmem:[#allocation4 + $0x20] sm:$0x3] %vm16485_vm12, %v7706_v57  ;;  %v7708_v61 = vpop.f32.mrb[127].mxu1  ;;  %v7715_v62 = vrot.slane %v7706_v57, 1  ;;  %v7728_v0 = vrot.slane %v7706_v57, 2  ;;  %v7739_v3 = vrot.slane %v7706_v57, 3 }
0x1e78   :  { %v7752_v4 = vrot.slane %v7706_v57, 4  ;;  %vm16489_vm12 = vcmask 320512   ;;  %v12229_v57 = vld [vmem:[%s16240_s5 + $0x140] ss:$8 sps:$4 sm:$0xff]  }
0x1e79   :  { %7719 = vrot.lane.b32.xlu1 %v7715_v62, %s16381_s27  ;;  %v7716_v6 = vsel %vm16486_vm15, %v7714_v53, %v7715_v62  ;;  %v7729_v8 = vsel %vm16481_vm1, %v7727_v54, %v7728_v0  ;;  %v7740_v9 = vsel %vm16487_vm14, %v7738_v55, %v7739_v3  ;;  %vm16490_vm15 = vcmask 1048224   ;;  %v12228_v53 = vld [vmem:[%s16240_s5 + $0x134] ss:$8 sps:$4 sm:$0xff]   ;;  %v12226_v54 = vld [vmem:[%s16240_s5 + $0x130] ss:$8 sps:$4 sm:$0xff]  }
0x1e7a   :  { %v7753_v14 = vsel %vm16483_vm2, %v7751_v58, %v7752_v4  ;;  %7717 = vrot.lane.b32.xlu0 %v7716_v6, %s16381_s27  ;;  %vm16491_vm1 = vcmask 1008960   ;;  %vm16492_vm14 = vcmask 654336   ;;  %vm16493_vm2 = vcmask 1042048   ;;  %v12231_v55 = vld [vmem:[%s16240_s5 + $0x144] ss:$8 sps:$4 sm:$0xff]  }
0x1e7b   :  { %v12234_v58 = vld [vmem:[%s16240_s5 + $0x154] ss:$8 sps:$4 sm:$0xff]   ;;  %v12235_v61 = vld [vmem:[%s16240_s5 + $0x160] ss:$8 sps:$4 sm:$0xff]  }
0x1e7c   :  { %v12240_v62 = vld [vmem:[%s16240_s5 + $0x174] ss:$8 sps:$4 sm:$0xff]  }
0x1e7d   :  { %7732 = vrot.lane.b32.xlu1 %v7728_v0, %s16346_s15  ;;  %v12238_v0 = vld [vmem:[%s16240_s5 + $0x170] ss:$8 sps:$4 sm:$0xff]   ;;  %v12246_v6 = vld [vmem:[%s16240_s5 + $0x194] ss:$8 sps:$4 sm:$0xff]  }
0x1e7e   :  { %7730 = vrot.lane.b32.xlu0 %v7729_v8, %s16346_s15  ;;  %v7828_v8 = vld [vmem:[%s16240_s5 + $0x1a0] sm:$0x33] }
0x1e7f   :  { %v11016_v17 = vcombine.high %v7828_v8, %v7828_v8  ;;  %v11015_v18 = vcombine.low %v7828_v8, %v7828_v8 }
0x1e81   :  { %7743 = vrot.lane.b32.xlu1 %v7739_v3, %s16347_s18  ;;  %v12243_v3 = vld [vmem:[%s16240_s5 + $0x184] ss:$8 sps:$4 sm:$0xff]  }
0x1e82   :  { %7741 = vrot.lane.b32.xlu0 %v7740_v9, %s16347_s18 }
0x1e85   :  { %7756 = vrot.lane.b32.xlu1 %v7752_v4, %s16312_s17  ;;  %v12241_v4 = vld [vmem:[%s16240_s5 + $0x180] ss:$8 sps:$4 sm:$0xff]  }
0x1e86   :  { %7754 = vrot.lane.b32.xlu0 %v7753_v14, %s16312_s17 }
0x1e89   :  { %8355 = vrot.lane.b32.xlu1 %v11022_v19, %s16313_s25 }
0x1e8a   :  { %8353 = vrot.lane.b32.xlu0 %v11021_v20, %s16313_s25 }
0x1e8d   :  { %8359 = vrot.lane.b32.xlu1 %v11024_v22, %s16313_s25 }
0x1e8e   :  { %8357 = vrot.lane.b32.xlu0 %v11023_v21, %s16313_s25 }
0x1eeb   :  { %v7720_v23 = vpop.permute.xlu1 %7719 }
0x1eec   :  { %7725 = vst.msk [vmem:[#allocation4 + $0x20] sm:$0x3] %vm16488_vm6, %v7720_v23  ;;  %v7718_v24 = vpop.permute.xlu0 %7717  ;;  %vm16494_vm6 = vcmask 287744  }
0x1eed   :  { %7726 = vst.msk [vmem:[#allocation4 + $0x28] sm:$0x3] %vm16489_vm12, %v7720_v23  ;;  %vm16495_vm12 = vcmask 1048192  }
0x1eee   :  { %7723 = vst.msk [vmem:[#allocation4] sm:$0xff] %vm16490_vm15, %v7718_v24  ;;  %vm16496_vm15 = vcmask 293888  }
0x1eef   :  { %7724 = vst.msk [vmem:[#allocation4 + $0x8] sm:$0xff] %vm560_vm13, %v7718_v24  ;;  %v7733_v26 = vpop.permute.xlu1 %7732 }
0x1ef0   :  { %7737 = vst.msk [vmem:[#allocation4 + $0x28] sm:$0x3] %vm16491_vm1, %v7733_v26  ;;  %v7731_v28 = vpop.permute.xlu0 %7730  ;;  %vm16497_vm1 = vmmov %vm16496_vm15 }
0x1ef1   :  { %7736 = vst.msk [vmem:[#allocation4 + $0x8] sm:$0xff] %vm641_vm10, %v7731_v28 }
0x1ef3   :  { %v7744_v29 = vpop.permute.xlu1 %7743  ;;  %v7768_v39 = vld [vmem:[#allocation4 + $0x20] sm:$0x3] }
0x1ef4   :  { %7749 = vst.msk [vmem:[#allocation4 + $0x28] sm:$0x3] %vm659_vm9, %v7744_v29  ;;  %v7742_v31 = vpop.permute.xlu0 %7741 }
0x1ef5   :  { %7750 = vst.msk [vmem:[#allocation4 + $0x30] sm:$0x3] %vm661_vm8, %v7744_v29  ;;  %v7764_v38 = vld [vmem:[#allocation4] sm:$0xff] }
0x1ef6   :  { %7747 = vst.msk [vmem:[#allocation4 + $0x8] sm:$0xff] %vm655_vm7, %v7742_v31  ;;  %v7772_v43 = vpack.c.bf16 %v7768_v39, %v7764_v38 }
0x1ef7   :  { %7748 = vst.msk [vmem:[#allocation4 + $0x10] sm:$0xff] %vm16492_vm14, %v7742_v31  ;;  %v7757_v33 = vpop.permute.xlu1 %7756  ;;  %vm16498_vm14 = vcmask 244752  }
0x1ef8   :  { %7762 = vst.msk [vmem:[#allocation4 + $0x30] sm:$0x3] %vm16493_vm2, %v7757_v33  ;;  %v7755_v35 = vpop.permute.xlu0 %7754  ;;  %vm16499_vm2 = vmmov %vm16498_vm14 }
0x1ef9   :  { %7763 = vst.msk [vmem:[#allocation4 + $0x38] sm:$0x3] %vm16494_vm6, %v7757_v33  ;;  %vm16500_vm6 = vmmov %vm16499_vm2 }
0x1efa   :  { %7760 = vst.msk [vmem:[#allocation4 + $0x10] sm:$0xff] %vm16495_vm12, %v7755_v35  ;;  %vm16501_vm12 = vcmask 240656  }
0x1efb   :  { %7761 = vst.msk [vmem:[#allocation4 + $0x18] sm:$0xff] %vm16496_vm15, %v7755_v35  ;;  %v7769_v37 = vld [vmem:[#allocation4 + $0x28] sm:$0x3]  ;;  %v8356_v9 = vpop.permute.xlu1 %8355  ;;  %vm16502_vm15 = vcmask 1041408  }
0x1efc   :  { %v8354_v14 = vpop.permute.xlu0 %8353  ;;  %8366 = vst.msk [vmem:[#allocation2 + $0xa] sm:$0xff] %vm16498_vm14, %v8356_v9  ;;  %vm16504_vm14 = vcmask 257024  }
0x1efd   :  { %v7765_v40 = vld [vmem:[#allocation4 + $0x8] sm:$0xff]  ;;  %8365 = vst.msk [vmem:[#allocation2 + $0x2] sm:$0xff] %vm16499_vm2, %v8354_v14  ;;  %vm16505_vm2 = vmmov %vm16504_vm14 }
0x1efe   :  { %v7773_v41 = vpack.c.bf16 %v7769_v37, %v7765_v40 }
0x1eff   :  { %v8360_v20 = vpop.permute.xlu1 %8359  ;;  %v7770_v22 = vld [vmem:[#allocation4 + $0x30] sm:$0x3] }
0x1f00   :  { %8147 = vmatprep.mubr.bf16.mxu0 %v7773_v41  ;;  %v7771_v45 = vld [vmem:[#allocation4 + $0x38] sm:$0x3]  ;;  %v8358_v19 = vpop.permute.xlu0 %8357  ;;  %8368 = vst.msk [vmem:[#allocation2 + $0x1a] sm:$0xf] %vm16501_vm12, %v8360_v20 }
0x1f01   :  { %8148 = vmatmul.mubr.bf16.vlgmr.msra.gmra.mrb[32].mxu0 %v7772_v43  ;;  %8367 = vst.msk [vmem:[#allocation2 + $0x12] sm:$0xff] %vm16500_vm6, %v8358_v19  ;;  %v7766_v23 = vld [vmem:[#allocation4 + $0x10] sm:$0xff]  ;;  %vm16506_vm6 = vcmask 1048320  }
0x1f02   :  { %v7767_v46 = vld [vmem:[#allocation4 + $0x18] sm:$0xff]  ;;  %8159 = vmatpush1.bf16.msra.mxu0 %v12217_v42  ;;  %v7774_v29 = vpack.c.bf16 %v7770_v22, %v7766_v23  ;;  %vm16507_vm12 = vmmov %vm16506_vm6 }
0x1f03   :  { %v7775_v48 = vpack.c.bf16 %v7771_v45, %v7767_v46  ;;  %8160 = vmatprep.subr.bf16.mxu0 %v12222_v44  ;;  %v8402_v28 = vld [vmem:[#allocation2 + $0xa] sm:$0xff] }
0x1f04   :  { %v8378_v24 = vld [vmem:[#allocation2 + $0x9] sm:$0xff]  ;;  %v8377_v26 = vld [vmem:[#allocation2 + $0x1] sm:$0xff] }
0x1f05   :  { %11018 = vmatprep.mubr.msk.bf16.mxu0 %vm16497_vm1, %v7775_v48  ;;  %vm16503_vm1 = vmmov %vm16502_vm15  ;;  %8387 = vrot.lane.b32.xlu1 %v8378_v24, %s16400_s21  ;;  %v8401_v31 = vld [vmem:[#allocation2 + $0x2] sm:$0xff] }
0x1f06   :  { %8161 = vmatpush1.bf16.msra.mxu0 %v12220_v47  ;;  %v8110_v21 = vsel %vm16503_vm1, %v11015_v18, 0  ;;  %8385 = vrot.lane.b32.xlu0 %v8377_v26, %s16400_s21  ;;  %v8425_v35 = vld [vmem:[#allocation2 + $0x3] sm:$0xff]  ;;  %vm16509_vm1 = vcmask 781824  }
0x1f07   :  { %8162 = vmatprep.subr.bf16.mxu0 %v12225_v49  ;;  %v8404_v39 = vld [vmem:[#allocation2 + $0x1a] sm:$0xf]  ;;  %v8449_v43 = vld [vmem:[#allocation2 + $0x4] sm:$0xff] }
0x1f08   :  { %v8426_v33 = vld [vmem:[#allocation2 + $0xb] sm:$0xff]  ;;  %v8380_v37 = vld [vmem:[#allocation2 + $0x19] sm:$0xf]  ;;  %8453 = vst.msk [vmem:[#allocation3 + $0x8] sm:$0xff] %vm48_vm0, %v8449_v43  ;;  %v8369_v46 = vld [vmem:[#allocation2] sm:$0xff] }
0x1f09   :  { %8411 = vrot.lane.b32.xlu1 %v8402_v28, %s16401_s29  ;;  %v8379_v38 = vld [vmem:[#allocation2 + $0x11] sm:$0xff]  ;;  %v8428_v41 = vld [vmem:[#allocation2 + $0x1b] sm:$0xf]  ;;  %v8370_v45 = vld [vmem:[#allocation2 + $0x8] sm:$0xff]  ;;  %8373 = vst.msk [vmem:[#allocation3] sm:$0xff] %vm48_vm0, %v8369_v46 }
0x1f0a   :  { %8163 = vmatpush1.bf16.msra.mxu0 %v12223_v51  ;;  %8409 = vrot.lane.b32.xlu0 %v8401_v31, %s16401_s29  ;;  %v8403_v40 = vld [vmem:[#allocation2 + $0x12] sm:$0xff]  ;;  %8374 = vst.msk [vmem:[#allocation3 + $0x10] sm:$0xff] %vm48_vm0, %v8370_v45  ;;  %v8452_v51 = vld [vmem:[#allocation2 + $0x1c] sm:$0xf] }
0x1f0b   :  { %8164 = vmatprep.subr.bf16.mxu0 %v12228_v53  ;;  %v8427_v42 = vld [vmem:[#allocation2 + $0x13] sm:$0xff]  ;;  %8456 = vst.msk [vmem:[#allocation3 + $0x38] sm:$0xf] %vm16505_vm2, %v8452_v51  ;;  %vm16511_vm2 = vmmov %vm16506_vm6 }
0x1f0c   :  { %v8450_v44 = vld [vmem:[#allocation2 + $0xc] sm:$0xff]  ;;  %v8372_v48 = vld [vmem:[#allocation2 + $0x18] sm:$0xf] }
0x1f0d   :  { %8435 = vrot.lane.b32.xlu1 %v8426_v33, %s16364_s22  ;;  %8454 = vst.msk [vmem:[#allocation3 + $0x18] sm:$0xff] %vm48_vm0, %v8450_v44  ;;  %v8371_v47 = vld [vmem:[#allocation2 + $0x10] sm:$0xff] }
0x1f0e   :  { %8165 = vmatpush1.bf16.msra.mxu0 %v12226_v54  ;;  %8433 = vrot.lane.b32.xlu0 %v8425_v35, %s16364_s22  ;;  %8375 = vst.msk [vmem:[#allocation3 + $0x20] sm:$0xff] %vm48_vm0, %v8371_v47  ;;  %v8451_v49 = vld [vmem:[#allocation2 + $0x14] sm:$0xff]  ;;  %v12251_v47 = vld [vmem:[%s16236_s1 + $0x4] ss:$8 sps:$4 sm:$0xff]  }
0x1f0f   :  { %8166 = vmatprep.subr.bf16.mxu0 %v12231_v55  ;;  %8376 = vst.msk [vmem:[#allocation3 + $0x30] sm:$0xf] %vm16504_vm14, %v8372_v48  ;;  %vm16510_vm14 = vcmask 1044224  }
0x1f10   :  { %8455 = vst.msk [vmem:[#allocation3 + $0x28] sm:$0xff] %vm48_vm0, %v8451_v49  ;;  %v8458_v49 = vld [vmem:[#allocation3 + $0x8] sm:$0xff] }
0x1f11   :  { %8391 = vrot.lane.b32.xlu1 %v8380_v37, %s16400_s21 }
0x1f12   :  { %8167 = vmatpush1.bf16.msra.mxu0 %v12229_v57  ;;  %8389 = vrot.lane.b32.xlu0 %v8379_v38, %s16400_s21 }
0x1f13   :  { %8168 = vmatprep.subr.bf16.mxu0 %v12234_v58 }
0x1f14   :  { %v8460_v51 = vld [vmem:[#allocation3 + $0x18] sm:$0xff] }
0x1f15   :  { %8415 = vrot.lane.b32.xlu1 %v8404_v39, %s16401_s29 }
0x1f16   :  { %8169 = vmatpush1.bf16.msra.mxu0 %v12232_v59  ;;  %8413 = vrot.lane.b32.xlu0 %v8403_v40, %s16401_s29 }
0x1f17   :  { %8170 = vmatprep.subr.bf16.mxu0 %v12237_v60 }
0x1f19   :  { %8439 = vrot.lane.b32.xlu1 %v8428_v41, %s16364_s22 }
0x1f1a   :  { %8171 = vmatpush1.bf16.msra.mxu0 %v12235_v61  ;;  %8437 = vrot.lane.b32.xlu0 %v8427_v42, %s16364_s22 }
0x1f1b   :  { %8172 = vmatprep.subr.bf16.mxu0 %v12240_v62 }
0x1f1e   :  { %8173 = vmatpush1.bf16.msra.mxu0 %v12238_v0 }
0x1f1f   :  { %8174 = vmatprep.subr.bf16.mxu0 %v12243_v3 }
0x1f22   :  { %8175 = vmatpush1.bf16.msra.mxu0 %v12241_v4 }
0x1f23   :  { %8176 = vmatprep.subr.bf16.mxu0 %v12246_v6  ;;  %v7829_v6 = vld [vmem:[%s16241_s6] sm:$0x3] }
0x1f24   :  { %v7834_v8 = vrot.slane %v7829_v6, %v12844_v13  ;;  %v7838_v9 = vrot.slane %v7829_v6, %v12850_v15  ;;  %v12264_v6 = vld [vmem:[%s16236_s1 + $0x50] ss:$8 sps:$4 sm:$0xff]  }
0x1f26   :  { %8177 = vmatpush1.bf16.msra.mxu0 %v12244_v16 }
0x1f27   :  { %11017 = vmatprep.subr.msk.bf16.mxu0 %vm16502_vm15, %v11016_v17  ;;  %vm16508_vm15 = vcmask 519424  }
0x1f2a   :  { %8179 = vmatpush1.bf16.msra.mxu0 %v8110_v21 }
0x1f2d   :  { %8191 = vmatmul.mubr.bf16.vlgmr.msra.gmra.mrb[32].mxu0 %v7774_v29 }
0x1f77   :  { %v8388_v53 = vpop.permute.xlu1 %8387 }
0x1f78   :  { %v8386_v54 = vpop.permute.xlu0 %8385  ;;  %8398 = vst.msk [vmem:[#allocation3 + $0x10] sm:$0xff] %vm108_vm4, %v8388_v53  ;;  %v8217_v53 = vld [vmem:[%s16242_s7] sm:$0x7] }
0x1f79   :  { %8397 = vst.msk [vmem:[#allocation3] sm:$0xff] %vm108_vm4, %v8386_v54  ;;  %v12249_v54 = vld [vmem:[%s16236_s1] ss:$8 sps:$4 sm:$0xff]  }
0x1f7b   :  { %v8412_v55 = vpop.permute.xlu1 %8411 }
0x1f7c   :  { %v8410_v57 = vpop.permute.xlu0 %8409  ;;  %8422 = vst.msk [vmem:[#allocation3 + $0x10] sm:$0xff] %vm134_vm5, %v8412_v55  ;;  %v12254_v55 = vld [vmem:[%s16236_s1 + $0x14] ss:$8 sps:$4 sm:$0xff]  }
0x1f7d   :  { %8421 = vst.msk [vmem:[#allocation3] sm:$0xff] %vm134_vm5, %v8410_v57  ;;  %v8466_v57 = vpack.c.bf16 %v8460_v51, %v8458_v49 }
0x1f7f   :  { %v8436_v58 = vpop.permute.xlu1 %8435 }
0x1f80   :  { %v8434_v59 = vpop.permute.xlu0 %8433  ;;  %8446 = vst.msk [vmem:[#allocation3 + $0x10] sm:$0xff] %vm16506_vm6, %v8436_v58  ;;  %v12252_v58 = vld [vmem:[%s16236_s1 + $0x10] ss:$8 sps:$4 sm:$0xff]   ;;  %vm16514_vm6 = vcmask 1045504  }
0x1f81   :  { %8445 = vst.msk [vmem:[#allocation3] sm:$0xff] %vm16507_vm12, %v8434_v59  ;;  %v12257_v59 = vld [vmem:[%s16236_s1 + $0x24] ss:$8 sps:$4 sm:$0xff]   ;;  %vm16515_vm12 = vmmov %vm16514_vm6 }
0x1f83   :  { %v8392_v60 = vpop.permute.xlu1 %8391 }
0x1f84   :  { %v8390_v61 = vpop.permute.xlu0 %8389  ;;  %8400 = vst.msk [vmem:[#allocation3 + $0x30] sm:$0xf] %vm16508_vm15, %v8392_v60  ;;  %v12255_v60 = vld [vmem:[%s16236_s1 + $0x20] ss:$8 sps:$4 sm:$0xff]   ;;  %vm16516_vm15 = vcmask 228352  }
0x1f85   :  { %8399 = vst.msk [vmem:[#allocation3 + $0x20] sm:$0xff] %vm108_vm4, %v8390_v61  ;;  %vm16512_vm4 = vcmask 1044480   ;;  %v12260_v61 = vld [vmem:[%s16236_s1 + $0x34] ss:$8 sps:$4 sm:$0xff]  }
0x1f87   :  { %v8416_v62 = vpop.permute.xlu1 %8415 }
0x1f88   :  { %v8414_v0 = vpop.permute.xlu0 %8413  ;;  %8424 = vst.msk [vmem:[#allocation3 + $0x30] sm:$0xf] %vm16509_vm1, %v8416_v62  ;;  %v12258_v62 = vld [vmem:[%s16236_s1 + $0x30] ss:$8 sps:$4 sm:$0xff]   ;;  %vm16517_vm1 = vcmask 1043456  }
0x1f89   :  { %8423 = vst.msk [vmem:[#allocation3 + $0x20] sm:$0xff] %vm134_vm5, %v8414_v0  ;;  %vm16513_vm5 = vmmov %vm16512_vm4  ;;  %v12263_v0 = vld [vmem:[%s16236_s1 + $0x44] ss:$8 sps:$4 sm:$0xff]  }
0x1f8b   :  { %v8440_v3 = vpop.permute.xlu1 %8439 }
0x1f8c   :  { %v8438_v4 = vpop.permute.xlu0 %8437  ;;  %8448 = vst.msk [vmem:[#allocation3 + $0x30] sm:$0xf] %vm16510_vm14, %v8440_v3  ;;  %v12261_v3 = vld [vmem:[%s16236_s1 + $0x40] ss:$8 sps:$4 sm:$0xff]   ;;  %vm16518_vm14 = vcmask 687104  }
0x1f8d   :  { %8447 = vst.msk [vmem:[#allocation3 + $0x20] sm:$0xff] %vm16511_vm2, %v8438_v4  ;;  %v12266_v4 = vld [vmem:[%s16236_s1 + $0x54] ss:$8 sps:$4 sm:$0xff]   ;;  %vm16519_vm2 = vcmask 680960  }
0x2000   :  { %v8192_v14 = vpop.f32.mrb[32].mxu0 }
0x2001   :  { %v11343_v16 = vadd.f32 %v8192_v14, %v7834_v8  ;;  %v8194_v17 = vpop.f32.mrb[33].mxu0  ;;  %v12272_v14 = vld [vmem:[%s16236_s1 + $0x74] ss:$8 sps:$4 sm:$0xff]  }
0x2002   :  { %v11344_v18 = vadd.f32 %v8194_v17, %v7838_v9  ;;  %v8196_v19 = vpop.f32.mrb[34].mxu0  ;;  %v12275_v17 = vld [vmem:[%s16236_s1 + $0x84] ss:$8 sps:$4 sm:$0xff]  }
0x2003   :  { %v8201_v20 = vmul.f32 0.5, %v11343_v16  ;;  %v11345_v21 = vadd.f32 %v8196_v19, %v7834_v8  ;;  %v8198_v22 = vpop.f32.mrb[35].mxu0  ;;  %v12269_v8 = vld [vmem:[%s16236_s1 + $0x64] ss:$8 sps:$4 sm:$0xff]   ;;  %v12270_v16 = vld [vmem:[%s16236_s1 + $0x70] ss:$8 sps:$4 sm:$0xff]  }
0x2004   :  { %v8202_v23 = vmul.f32 0.5, %v11344_v18  ;;  %v11346_v24 = vadd.f32 %v8198_v22, %v7838_v9  ;;  %v12267_v9 = vld [vmem:[%s16236_s1 + $0x60] ss:$8 sps:$4 sm:$0xff]   ;;  %v12278_v19 = vld [vmem:[%s16236_s1 + $0x94] ss:$8 sps:$4 sm:$0xff]  }
0x2005   :  { %12594 = vtanh.f32 %v8201_v20  ;;  %v8203_v26 = vmul.f32 0.5, %v11345_v21  ;;  %v12273_v18 = vld [vmem:[%s16236_s1 + $0x80] ss:$8 sps:$4 sm:$0xff]   ;;  %v12276_v20 = vld [vmem:[%s16236_s1 + $0x90] ss:$8 sps:$4 sm:$0xff]  }
0x2006   :  { %12596 = vtanh.f32 %v8202_v23  ;;  %v8204_v28 = vmul.f32 0.5, %v11346_v24  ;;  %v8457_v21 = vld [vmem:[#allocation3] sm:$0xff]  ;;  %v8459_v22 = vld [vmem:[#allocation3 + $0x10] sm:$0xff]  ;;  %v8462_v23 = vld [vmem:[#allocation3 + $0x28] sm:$0xff] }
0x2007   :  { %12598 = vtanh.f32 %v8203_v26  ;;  %v8464_v24 = vld [vmem:[#allocation3 + $0x38] sm:$0xf]  ;;  %v8465_v26 = vpack.c.bf16 %v8459_v22, %v8457_v21 }
0x2008   :  { %12600 = vtanh.f32 %v8204_v28  ;;  %v8468_v28 = vpack.c.bf16 %v8464_v24, %v8462_v23 }
0x200f   :  { %v12595_v29 = vpop.eup %12594 }
0x2010   :  { %v12597_v31 = vpop.eup %12596  ;;  %v8209_v33 = vmul.f32 0.5, %v12595_v29  ;;  %v8461_v29 = vld [vmem:[#allocation3 + $0x20] sm:$0xff] }
0x2011   :  { %v12599_v35 = vpop.eup %12598  ;;  %v8210_v37 = vmul.f32 0.5, %v12597_v31  ;;  %v8463_v31 = vld [vmem:[#allocation3 + $0x30] sm:$0xf] }
0x2012   :  { %v12601_v38 = vpop.eup %12600  ;;  %v8211_v39 = vmul.f32 0.5, %v12599_v35  ;;  %v8213_v41 = vadd.f32 0.5, %v8209_v33  ;;  %v8467_v33 = vpack.c.bf16 %v8463_v31, %v8461_v29 }
0x2013   :  { %v8212_v40 = vmul.f32 0.5, %v12601_v38  ;;  %v8214_v43 = vadd.f32 0.5, %v8210_v37 }
0x2014   :  { %v8215_v42 = vadd.f32 0.5, %v8211_v39 }
0x2015   :  { %v8216_v44 = vadd.f32 0.5, %v8212_v40 }
0x2016   :  { %v8218_v45 = vpack.c.bf16 %v8215_v42, %v8213_v41 }
0x2017   :  { %v8219_v46 = vpack.c.bf16 %v8216_v44, %v8214_v43 }
0x2018   :  { %v8224_v48 = vsel %vm16512_vm4, %v8218_v45, 0  ;;  %vm16520_vm4 = vcmask 1046528  }
0x2019   :  { %11019 = vmatprep.subr.msk.bf16.mxu1 %vm16513_vm5, %v8219_v46  ;;  %v8489_v46 = vld [vmem:[%s16239_s2] sm:$0x3]  ;;  %vm16521_vm5 = vmmov %vm16514_vm6 }
0x201a   :  { %8230 = vmatpush1.bf16.msra.mxu1 %v8224_v48  ;;  %v8498_v48 = vrot.slane %v8489_v46, %v12850_v15 }
0x201b   :  { %8607 = vmatprep.subr.bf16.mxu1 %v12251_v47  ;;  %v8494_v47 = vrot.slane %v8489_v46, %v12844_v13 }
0x201d   :  { %11020 = vmatmul.mubr.msk.bf16.vlgmr.msra.gmra.mrb[128].mxu1 %vm1137_vm3, %v8217_v53 }
0x201e   :  { %8608 = vmatpush1.bf16.msra.mxu1 %v12249_v54  ;;  %11045 = vmatprep.mubr.msk.bf16.mxu1 %vm48_vm0, %v8466_v57 }
0x201f   :  { %8609 = vmatprep.subr.bf16.mxu1 %v12254_v55 }
0x2022   :  { %8610 = vmatpush1.bf16.msra.mxu1 %v12252_v58 }
0x2023   :  { %8611 = vmatprep.subr.bf16.mxu1 %v12257_v59 }
0x2026   :  { %8612 = vmatpush1.bf16.msra.mxu1 %v12255_v60 }
0x2027   :  { %8613 = vmatprep.subr.bf16.mxu1 %v12260_v61 }
0x202a   :  { %8614 = vmatpush1.bf16.msra.mxu1 %v12258_v62 }
0x202b   :  { %8615 = vmatprep.subr.bf16.mxu1 %v12263_v0 }
0x202e   :  { %8616 = vmatpush1.bf16.msra.mxu1 %v12261_v3 }
0x202f   :  { %8617 = vmatprep.subr.bf16.mxu1 %v12266_v4 }
0x2032   :  { %8618 = vmatpush1.bf16.msra.mxu1 %v12264_v6 }
0x2033   :  { %8619 = vmatprep.subr.bf16.mxu1 %v12269_v8 }
0x2036   :  { %8620 = vmatpush1.bf16.msra.mxu1 %v12267_v9 }
0x2037   :  { %8621 = vmatprep.subr.bf16.mxu1 %v12272_v14 }
0x203a   :  { %8622 = vmatpush1.bf16.msra.mxu1 %v12270_v16 }
0x203b   :  { %8623 = vmatprep.subr.bf16.mxu1 %v12275_v17 }
0x203e   :  { %8624 = vmatpush1.bf16.msra.mxu1 %v12273_v18 }
0x203f   :  { %8625 = vmatprep.subr.bf16.mxu1 %v12278_v19 }
0x2042   :  { %8626 = vmatpush1.bf16.msra.mxu1 %v12276_v20 }
0x2045   :  { %8640 = vmatmul.mubr.bf16.vlgmr.msra.gmra.mrb[132].mxu1 %v8465_v26 }
0x2046   :  { %11046 = vmatprep.mubr.msk.bf16.mxu1 %vm48_vm0, %v8468_v28 }
0x204d   :  { %8650 = vmatmul.mubr.bf16.gmra.mrb[136].mxu1 %v8467_v33 }
0x204e   :  { %8744 = vmatprep.mubr.bf16.mxu1 %v12635_v10 }
0x20f0   :  { %v8263_v35 = vpop.f32.mrb[128].mxu1 }
0x20f1   :  { %v8265_v37 = vpop.f32.mrb[129].mxu1 }
0x20f2   :  { %v8272_v38 = vcombine.low %v8263_v35, %v8265_v37  ;;  %v8325_v39 = vcombine.high %v8263_v35, %v8265_v37  ;;  %v8267_v40 = vpop.f32.mrb[130].mxu1 }
0x20f3   :  { %v8268_v41 = vpop.f32.mrb[131].mxu1 }
0x20f4   :  { %v15560_v42 = vrot.slane %v8272_v38, %v13224_v56  ;;  %v8332_v43 = vrot.slane %v8325_v39, %v13224_v56 }
0x20f6   :  { %v15565_v44 = vrot.slane %v15560_v42, %v13224_v56  ;;  %v8339_v45 = vrot.slane %v8332_v43, %v13224_v56 }
0x20f8   :  { %8342 = vst.msk [vmem:[#allocation5 + $0x2e] ss:$8 sm:$0x3] %vm13231_vm11, %v8339_v45  ;;  %8289 = vst.msk [vmem:[#allocation5 + $0x6] ss:$8 sm:$0x3] %vm13231_vm11, %v15565_v44 }
0x2118   :  { %v8641_v49 = vpop.f32.mrb[132].mxu1 }
0x2119   :  { %v8642_v51 = vadd.f32 %v8641_v49, %v8494_v47  ;;  %v8643_v53 = vpop.f32.mrb[133].mxu1 }
0x211a   :  { %v8644_v54 = vadd.f32 %v8643_v53, %v8498_v48  ;;  %v8645_v55 = vpop.f32.mrb[134].mxu1 }
0x211b   :  { %v8660_v57 = vmul.f32 0.5, %v8642_v51  ;;  %v8646_v58 = vadd.f32 %v8645_v55, %v8494_v47  ;;  %v8647_v59 = vpop.f32.mrb[135].mxu1 }
0x211c   :  { %v8661_v60 = vmul.f32 0.5, %v8644_v54  ;;  %v8648_v61 = vadd.f32 %v8647_v59, %v8498_v48 }
0x211d   :  { %12602 = vtanh.f32 %v8660_v57  ;;  %v8662_v62 = vmul.f32 0.5, %v8646_v58 }
0x211e   :  { %12604 = vtanh.f32 %v8661_v60  ;;  %v8663_v0 = vmul.f32 0.5, %v8648_v61 }
0x211f   :  { %12606 = vtanh.f32 %v8662_v62  ;;  %v12279_v62 = vld [vmem:[%s16237_s3] sm:$0x7f]  }
0x2120   :  { %12608 = vtanh.f32 %v8663_v0  ;;  %v8651_v3 = vpop.f32.mrb[136].mxu1  ;;  %v12280_v0 = vld [vmem:[%s16238_s4] sm:$0xff]  }
0x2121   :  { %v8652_v4 = vadd.f32 %v8651_v3, %v8494_v47  ;;  %v8653_v6 = vpop.f32.mrb[137].mxu1  ;;  %v12281_v3 = vld [vmem:[%s16238_s4 + $0x8] sm:$0xff]  }
0x2122   :  { %v8654_v8 = vadd.f32 %v8653_v6, %v8498_v48  ;;  %v8655_v9 = vpop.f32.mrb[138].mxu1  ;;  %v12283_v6 = vld [vmem:[%s16238_s4 + $0x18] sm:$0xff]  }
0x2123   :  { %v8664_v14 = vmul.f32 0.5, %v8652_v4  ;;  %v8656_v16 = vadd.f32 %v8655_v9, %v8494_v47  ;;  %v8657_v17 = vpop.f32.mrb[139].mxu1  ;;  %v12282_v4 = vld [vmem:[%s16238_s4 + $0x10] sm:$0xff]   ;;  %v12285_v9 = vld [vmem:[%s16238_s4 + $0x28] sm:$0xff]  }
0x2124   :  { %v8665_v18 = vmul.f32 0.5, %v8654_v8  ;;  %v8658_v19 = vadd.f32 %v8657_v17, %v8498_v48  ;;  %v12284_v8 = vld [vmem:[%s16238_s4 + $0x20] sm:$0xff]  }
0x2125   :  { %12610 = vtanh.f32 %v8664_v14  ;;  %v8666_v20 = vmul.f32 0.5, %v8656_v16  ;;  %v12286_v14 = vld [vmem:[%s16238_s4 + $0x30] sm:$0xff]   ;;  %v12287_v16 = vld [vmem:[%s16238_s4 + $0x38] sm:$0xff]   ;;  %v12288_v17 = vld [vmem:[%s16238_s4 + $0x40] sm:$0xff]  }
0x2126   :  { %12612 = vtanh.f32 %v8665_v18  ;;  %v8667_v21 = vmul.f32 0.5, %v8658_v19  ;;  %v12289_v18 = vld [vmem:[%s16238_s4 + $0x48] sm:$0xff]   ;;  %v12290_v19 = vld [vmem:[%s16238_s4 + $0x50] ss:$0 sps:$4 sm:$0xff]  }
0x2127   :  { %v12603_v22 = vpop.eup %12602  ;;  %12614 = vtanh.f32 %v8666_v20  ;;  %v8845_v20 = vsel %vm16517_vm1, %v12290_v19, 0  ;;  %v12335_v19 = vld [vmem:[%s16240_s5 + $0xe4] ss:$8 sps:$4 sm:$0xff]  }
0x2128   :  { %v12605_v23 = vpop.eup %12604  ;;  %v8676_v24 = vmul.f32 0.5, %v12603_v22  ;;  %12616 = vtanh.f32 %v8667_v21 }
0x2129   :  { %v12607_v26 = vpop.eup %12606  ;;  %v8677_v28 = vmul.f32 0.5, %v12605_v23 }
0x212a   :  { %v12609_v29 = vpop.eup %12608  ;;  %v8678_v31 = vmul.f32 0.5, %v12607_v26  ;;  %v8684_v35 = vadd.f32 0.5, %v8676_v24 }
0x212b   :  { %v8679_v33 = vmul.f32 0.5, %v12609_v29  ;;  %v8685_v38 = vadd.f32 0.5, %v8677_v28  ;;  %v12291_v29 = vld [vmem:[%s16240_s5] ss:$8 sps:$4 sm:$0xff]  }
0x212c   :  { %v8686_v37 = vadd.f32 0.5, %v8678_v31  ;;  %v12293_v31 = vld [vmem:[%s16240_s5 + $0x4] ss:$8 sps:$4 sm:$0xff]  }
0x212d   :  { %v8687_v39 = vadd.f32 0.5, %v8679_v33  ;;  %v12296_v33 = vld [vmem:[%s16240_s5 + $0x14] ss:$8 sps:$4 sm:$0xff]   ;;  %9293 = vmatprep.subr.bf16.mxu0 %v12293_v31 }
0x212e   :  { %v8694_v40 = vpack.c.bf16 %v8686_v37, %v8684_v35  ;;  %9294 = vmatpush1.bf16.msra.mxu0 %v12291_v29  ;;  %v12294_v35 = vld [vmem:[%s16240_s5 + $0x10] ss:$8 sps:$4 sm:$0xff]   ;;  %v12297_v37 = vld [vmem:[%s16240_s5 + $0x20] ss:$8 sps:$4 sm:$0xff]  }
0x212f   :  { %v12611_v41 = vpop.eup %12610  ;;  %v8695_v43 = vpack.c.bf16 %v8687_v39, %v8685_v38  ;;  %9295 = vmatprep.subr.bf16.mxu0 %v12296_v33  ;;  %v12302_v38 = vld [vmem:[%s16240_s5 + $0x34] ss:$8 sps:$4 sm:$0xff]   ;;  %v12300_v39 = vld [vmem:[%s16240_s5 + $0x30] ss:$8 sps:$4 sm:$0xff]  }
0x2130   :  { %v12613_v45 = vpop.eup %12612  ;;  %v8680_v46 = vmul.f32 0.5, %v12611_v41  ;;  %v12303_v41 = vld [vmem:[%s16240_s5 + $0x40] ss:$8 sps:$4 sm:$0xff]   ;;  %v12338_v33 = vld [vmem:[%s16240_s5 + $0xf4] ss:$8 sps:$4 sm:$0xff]  }
0x2131   :  { %v12615_v47 = vpop.eup %12614  ;;  %v8681_v48 = vmul.f32 0.5, %v12613_v45  ;;  %8712 = vmatprep.subr.bf16.mxu1 %v8695_v43  ;;  %v12308_v43 = vld [vmem:[%s16240_s5 + $0x54] ss:$8 sps:$4 sm:$0xff]   ;;  %v12306_v45 = vld [vmem:[%s16240_s5 + $0x50] ss:$8 sps:$4 sm:$0xff]  }
0x2132   :  { %v12617_v49 = vpop.eup %12616  ;;  %v8682_v51 = vmul.f32 0.5, %v12615_v47  ;;  %8713 = vmatpush1.bf16.msra.mxu1 %v8694_v40  ;;  %v8688_v54 = vadd.f32 0.5, %v8680_v46  ;;  %9296 = vmatpush1.bf16.msra.mxu0 %v12294_v35  ;;  %v12305_v40 = vld [vmem:[%s16240_s5 + $0x44] ss:$8 sps:$4 sm:$0xff]   ;;  %v12309_v47 = vld [vmem:[%s16240_s5 + $0x60] ss:$8 sps:$4 sm:$0xff]  }
0x2133   :  { %v8683_v53 = vmul.f32 0.5, %v12617_v49  ;;  %v8689_v57 = vadd.f32 0.5, %v8681_v48  ;;  %v12311_v46 = vld [vmem:[%s16240_s5 + $0x64] ss:$8 sps:$4 sm:$0xff]   ;;  %v12314_v48 = vld [vmem:[%s16240_s5 + $0x74] ss:$8 sps:$4 sm:$0xff]  }
0x2134   :  { %v8690_v55 = vadd.f32 0.5, %v8682_v51  ;;  %v12312_v49 = vld [vmem:[%s16240_s5 + $0x70] ss:$8 sps:$4 sm:$0xff]   ;;  %v12317_v51 = vld [vmem:[%s16240_s5 + $0x84] ss:$8 sps:$4 sm:$0xff]  }
0x2135   :  { %v8691_v58 = vadd.f32 0.5, %v8683_v53  ;;  %v12315_v53 = vld [vmem:[%s16240_s5 + $0x80] ss:$8 sps:$4 sm:$0xff]   ;;  %v12336_v35 = vld [vmem:[%s16240_s5 + $0xf0] ss:$8 sps:$4 sm:$0xff]  }
0x2136   :  { %v8696_v59 = vpack.c.bf16 %v8690_v55, %v8688_v54  ;;  %v12320_v54 = vld [vmem:[%s16240_s5 + $0x94] ss:$8 sps:$4 sm:$0xff]   ;;  %v12318_v55 = vld [vmem:[%s16240_s5 + $0x90] ss:$8 sps:$4 sm:$0xff]  }
0x2137   :  { %v8697_v60 = vpack.c.bf16 %v8691_v58, %v8689_v57  ;;  %v12323_v57 = vld [vmem:[%s16240_s5 + $0xa4] ss:$8 sps:$4 sm:$0xff]   ;;  %v12321_v58 = vld [vmem:[%s16240_s5 + $0xa0] ss:$8 sps:$4 sm:$0xff]  }
0x2138   :  { %v8707_v61 = vsel %vm16514_vm6, %v8696_v59, 0  ;;  %v12326_v59 = vld [vmem:[%s16240_s5 + $0xb4] ss:$8 sps:$4 sm:$0xff]   ;;  %vm16522_vm6 = vcmask 1044480  }
0x2139   :  { %11048 = vmatprep.subr.msk.bf16.mxu1 %vm16515_vm12, %v8697_v60  ;;  %v12324_v60 = vld [vmem:[%s16240_s5 + $0xb0] ss:$8 sps:$4 sm:$0xff]   ;;  %vm16523_vm12 = vmmov %vm16517_vm1  ;;  %vm16525_vm1 = vcmask 320512  }
0x213a   :  { %8715 = vmatpush1.bf16.msra.mxu1 %v8707_v61  ;;  %v12327_v61 = vld [vmem:[%s16240_s5 + $0xc0] ss:$8 sps:$4 sm:$0xff]  }
0x213b   :  { %8847 = vmatprep.subr.bf16.mxu1 %v12635_v10 }
0x213d   :  { %11049 = vmatmul.mubr.msk.bf16.vlgmr.msra.gmra.mrb[140].mxu1 %vm16516_vm15, %v12279_v62  ;;  %v12329_v62 = vld [vmem:[%s16240_s5 + $0xc4] ss:$8 sps:$4 sm:$0xff]   ;;  %vm16524_vm15 = vcmask 1042080  }
0x213e   :  { %8848 = vmatpush1.bf16.msra.mxu1 %v12280_v0  ;;  %v12330_v0 = vld [vmem:[%s16240_s5 + $0xd0] ss:$8 sps:$4 sm:$0xff]  }
0x213f   :  { %8849 = vmatprep.subr.bf16.mxu1 %v12635_v10 }
0x2142   :  { %8850 = vmatpush1.bf16.msra.mxu1 %v12281_v3  ;;  %v12332_v3 = vld [vmem:[%s16240_s5 + $0xd4] ss:$8 sps:$4 sm:$0xff]  }
0x2143   :  { %8851 = vmatprep.subr.bf16.mxu1 %v12635_v10 }
0x2146   :  { %8852 = vmatpush1.bf16.msra.mxu1 %v12282_v4 }
0x2147   :  { %8853 = vmatprep.subr.bf16.mxu1 %v12635_v10 }
0x214a   :  { %8854 = vmatpush1.bf16.msra.mxu1 %v12283_v6 }
0x214b   :  { %8855 = vmatprep.subr.bf16.mxu1 %v12635_v10 }
0x214e   :  { %8856 = vmatpush1.bf16.msra.mxu1 %v12284_v8 }
0x214f   :  { %8857 = vmatprep.subr.bf16.mxu1 %v12635_v10 }
0x2152   :  { %8858 = vmatpush1.bf16.msra.mxu1 %v12285_v9 }
0x2153   :  { %8859 = vmatprep.subr.bf16.mxu1 %v12635_v10 }
0x2156   :  { %8860 = vmatpush1.bf16.msra.mxu1 %v12286_v14 }
0x2157   :  { %8861 = vmatprep.subr.bf16.mxu1 %v12635_v10 }
0x215a   :  { %8862 = vmatpush1.bf16.msra.mxu1 %v12287_v16 }
0x215b   :  { %8863 = vmatprep.subr.bf16.mxu1 %v12635_v10 }
0x215e   :  { %8864 = vmatpush1.bf16.msra.mxu1 %v12288_v17 }
0x215f   :  { %8865 = vmatprep.subr.bf16.mxu1 %v12635_v10 }
0x2162   :  { %8866 = vmatpush1.bf16.msra.mxu1 %v12289_v18  ;;  %v12333_v18 = vld [vmem:[%s16240_s5 + $0xe0] ss:$8 sps:$4 sm:$0xff]  }
0x2163   :  { %8867 = vmatprep.subr.bf16.mxu1 %v12635_v10 }
0x2166   :  { %8868 = vmatpush1.bf16.msra.mxu1 %v8845_v20 }
0x2210   :  { %v8746_v21 = vpop.f32.mrb[140].mxu1 }
0x2211   :  { %v8748_v22 = vpop.f32.mrb[141].mxu1 }
0x2212   :  { %v8750_v23 = vpop.f32.mrb[142].mxu1 }
0x2213   :  { %v8755_v24 = vpack.c.bf16 %v8750_v23, %v8746_v21  ;;  %v8752_v26 = vpop.f32.mrb[143].mxu1 }
0x2214   :  { %v8756_v28 = vpack.c.bf16 %v8752_v26, %v8748_v22 }
0x2216   :  { %11061 = vmatprep.mubr.msk.bf16.mxu1 %vm560_vm13, %v8756_v28 }
0x2217   :  { %8880 = vmatmul.mubr.bf16.vlgmr.msra.gmra.mrb[144].mxu1 %v8755_v24 }
0x2218   :  { %9439 = vmatprep.mubr.bf16.mxu1 %v12635_v10  ;;  %v12299_v10 = vld [vmem:[%s16240_s5 + $0x24] ss:$8 sps:$4 sm:$0xff]  }
0x2219   :  { %9297 = vmatprep.subr.bf16.mxu0 %v12299_v10  ;;  %v12341_v10 = vld [vmem:[%s16240_s5 + $0x104] ss:$8 sps:$4 sm:$0xff]  }
0x221a   :  { %9298 = vmatpush1.bf16.msra.mxu0 %v12297_v37  ;;  %v2401_v37 = vcombine.high %v13620_v5, %v13620_v5 }
0x221b   :  { %9299 = vmatprep.subr.bf16.mxu0 %v12302_v38  ;;  %v1212_v38 = vcombine.high %v13227_v63, %v13227_v63  ;;  %v7113_v63 = vcombine.high %v15172_v30, %v15172_v30 }
0x221e   :  { %9300 = vmatpush1.bf16.msra.mxu0 %v12300_v39  ;;  %v4757_v39 = vcombine.high %v14396_v50, %v14396_v50  ;;  %v5935_v50 = vcombine.high %v14784_v34, %v14784_v34 }
0x221f   :  { %9301 = vmatprep.subr.bf16.mxu0 %v12305_v40  ;;  %v15751_v40 = vrot.slane %v2401_v37, %v13224_v56 }
0x2220   :  { %v15762_v5 = vrot.slane %v4757_v39, %v13224_v56  ;;  %v5942_v30 = vrot.slane %v5935_v50, %v13224_v56 }
0x2222   :  { %9302 = vmatpush1.bf16.msra.mxu0 %v12303_v41  ;;  %v3579_v41 = vcombine.high %v14008_v25, %v14008_v25  ;;  %v15771_v25 = vrot.slane %v7113_v63, %v13224_v56  ;;  %v12345_v63 = vld [vmem:[%s16240_s5 + $0x120] ss:$8 sps:$4 sm:$0xff]   ;;  %v4782_v52 = vcombine.high %v15762_v5, %v15762_v5 }
0x2223   :  { %9303 = vmatprep.subr.bf16.mxu0 %v12308_v43  ;;  %v1219_v43 = vrot.slane %v1212_v38, %v13224_v56 }
0x2226   :  { %9304 = vmatpush1.bf16.msra.mxu0 %v12306_v45  ;;  %v3586_v45 = vrot.slane %v3579_v41, %v13224_v56 }
0x2227   :  { %9305 = vmatprep.subr.bf16.mxu0 %v12311_v46  ;;  %v8291_v46 = vcombine.high %v15560_v42, %v15560_v42  ;;  %v5951_v42 = vcombine.high %v14789_v36, %v14789_v36 }
0x2229   :  { %v8298_v34 = vrot.slane %v8291_v46, %v13224_v56 }
0x222a   :  { %9306 = vmatpush1.bf16.msra.mxu0 %v12309_v47  ;;  %v1231_v47 = vcombine.high %v13237_v12, %v13237_v12  ;;  %v3604_v12 = vcombine.high %v3586_v45, %v3586_v45 }
0x222b   :  { %9307 = vmatprep.subr.bf16.mxu0 %v12314_v48  ;;  %v3595_v48 = vcombine.high %v14013_v27, %v14013_v27  ;;  %v8316_v27 = vcombine.high %v8298_v34, %v8298_v34 }
0x222e   :  { %9308 = vmatpush1.bf16.msra.mxu0 %v12312_v49  ;;  %v8307_v49 = vcombine.high %v15565_v44, %v15565_v44 }
0x222f   :  { %9309 = vmatprep.subr.bf16.mxu0 %v12317_v51  ;;  %v1244_v51 = vcombine.high %v1219_v43, %v1219_v43 }
0x2232   :  { %9310 = vmatpush1.bf16.msra.mxu0 %v12315_v53  ;;  %v5960_v53 = vcombine.high %v5942_v30, %v5942_v30 }
0x2233   :  { %9311 = vmatprep.subr.bf16.mxu0 %v12320_v54 }
0x2236   :  { %9312 = vmatpush1.bf16.msra.mxu0 %v12318_v55 }
0x2237   :  { %9313 = vmatprep.subr.bf16.mxu0 %v12323_v57 }
0x223a   :  { %9314 = vmatpush1.bf16.msra.mxu0 %v12321_v58 }
0x223b   :  { %9315 = vmatprep.subr.bf16.mxu0 %v12326_v59 }
0x223e   :  { %9316 = vmatpush1.bf16.msra.mxu0 %v12324_v60 }
0x223f   :  { %9317 = vmatprep.subr.bf16.mxu0 %v12329_v62 }
0x2242   :  { %9318 = vmatpush1.bf16.msra.mxu0 %v12327_v61 }
0x2243   :  { %9319 = vmatprep.subr.bf16.mxu0 %v12332_v3 }
0x2246   :  { %9320 = vmatpush1.bf16.msra.mxu0 %v12330_v0 }
0x2247   :  { %9321 = vmatprep.subr.bf16.mxu0 %v12335_v19 }
0x224a   :  { %9322 = vmatpush1.bf16.msra.mxu0 %v12333_v18 }
0x224b   :  { %9323 = vmatprep.subr.bf16.mxu0 %v12338_v33 }
0x224e   :  { %9324 = vmatpush1.bf16.msra.mxu0 %v12336_v35 }
0x224f   :  { %9336 = vmatprep.subr.bf16.mxu0 %v12341_v10  ;;  %v12347_v10 = vld [vmem:[%s16240_s5 + $0x124] ss:$8 sps:$4 sm:$0xff]  }
0x22ea   :  { %v8881_v4 = vpop.f32.mrb[144].mxu1 }
0x22eb   :  { %8888 = vst.msk [vmem:[#allocation4] sm:$0xff] %vm16518_vm14, %v8881_v4  ;;  %v8883_v6 = vpop.f32.mrb[145].mxu1  ;;  %v8892_v8 = vrot.slane %v8881_v4, 1  ;;  %v8905_v9 = vrot.slane %v8881_v4, 2  ;;  %v8916_v14 = vrot.slane %v8881_v4, 3  ;;  %v8929_v17 = vrot.slane %v8881_v4, 4 }
0x22ec   :  { %v8884_v16 = vpop.f32.mrb[146].mxu1  ;;  %vm16526_vm14 = vcmask 1048224   ;;  %v12389_v4 = vld [vmem:[%s16243_s8 + $0x80] sm:$0xff]  }
0x22ed   :  { %8889 = vst.msk [vmem:[#allocation4 + $0x20] sm:$0x3] %vm16519_vm2, %v8884_v16  ;;  %v8886_v20 = vpop.f32.mrb[147].mxu1  ;;  %v8893_v21 = vrot.slane %v8884_v16, 1  ;;  %v8906_v22 = vrot.slane %v8884_v16, 2  ;;  %v8917_v23 = vrot.slane %v8884_v16, 3 }
0x22ee   :  { %v8930_v24 = vrot.slane %v8884_v16, 4  ;;  %vm16527_vm2 = vcmask 1008960   ;;  %v12339_v16 = vld [vmem:[%s16240_s5 + $0x100] ss:$8 sps:$4 sm:$0xff]   ;;  %v12344_v20 = vld [vmem:[%s16240_s5 + $0x114] ss:$8 sps:$4 sm:$0xff]  }
0x22ef   :  { %8897 = vrot.lane.b32.xlu1 %v8893_v21, %s16381_s27  ;;  %v8894_v26 = vsel %vm16520_vm4, %v8892_v8, %v8893_v21  ;;  %v8907_v28 = vsel %vm16521_vm5, %v8905_v9, %v8906_v22  ;;  %v8918_v29 = vsel %vm16522_vm6, %v8916_v14, %v8917_v23  ;;  %vm16528_vm4 = vcmask 654336  }
0x22f0   :  { %v8931_v31 = vsel %vm16523_vm12, %v8929_v17, %v8930_v24  ;;  %8895 = vrot.lane.b32.xlu0 %v8894_v26, %s16381_s27  ;;  %vm16529_vm5 = vcmask 1042048   ;;  %vm16531_vm6 = vcmask 1048192   ;;  %vm16532_vm12 = vcmask 293888  }
0x22f3   :  { %8910 = vrot.lane.b32.xlu1 %v8906_v22, %s16346_s15 }
0x22f4   :  { %8908 = vrot.lane.b32.xlu0 %v8907_v28, %s16346_s15 }
0x22f7   :  { %8921 = vrot.lane.b32.xlu1 %v8917_v23, %s16347_s18 }
0x22f8   :  { %8919 = vrot.lane.b32.xlu0 %v8918_v29, %s16347_s18 }
0x22fb   :  { %8934 = vrot.lane.b32.xlu1 %v8930_v24, %s16312_s17 }
0x22fc   :  { %8932 = vrot.lane.b32.xlu0 %v8931_v31, %s16312_s17  ;;  %v12342_v31 = vld [vmem:[%s16240_s5 + $0x110] ss:$8 sps:$4 sm:$0xff]  }
0x22ff   :  { %2409 = vrot.lane.b32.xlu1 %v15751_v40, %s16400_s21 }
0x2300   :  { %1220 = vrot.lane.b32.xlu0 %v1219_v43, %s16400_s21 }
0x2303   :  { %4765 = vrot.lane.b32.xlu1 %v15762_v5, %s16400_s21 }
0x2304   :  { %3587 = vrot.lane.b32.xlu0 %v3586_v45, %s16400_s21  ;;  %v12350_v45 = vld [vmem:[%s16240_s5 + $0x134] ss:$8 sps:$4 sm:$0xff]  }
0x2307   :  { %7121 = vrot.lane.b32.xlu1 %v15771_v25, %s16400_s21 }
0x2308   :  { %5943 = vrot.lane.b32.xlu0 %v5942_v30, %s16400_s21 }
0x230c   :  { %8299 = vrot.lane.b32.xlu0 %v8298_v34, %s16400_s21 }
0x2310   :  { %1232 = vrot.lane.b32.xlu0 %v1231_v47, %s16401_s29  ;;  %v12348_v47 = vld [vmem:[%s16240_s5 + $0x130] ss:$8 sps:$4 sm:$0xff]  }
0x2314   :  { %3596 = vrot.lane.b32.xlu0 %v3595_v48, %s16401_s29  ;;  %v12353_v48 = vld [vmem:[%s16240_s5 + $0x144] ss:$8 sps:$4 sm:$0xff]  }
0x2318   :  { %5952 = vrot.lane.b32.xlu0 %v5951_v42, %s16401_s29 }
0x231c   :  { %8308 = vrot.lane.b32.xlu0 %v8307_v49, %s16401_s29 }
0x2320   :  { %1245 = vrot.lane.b32.xlu0 %v1244_v51, %s16364_s22  ;;  %v12401_v51 = vld [vmem:[%s16243_s8 + $0xb0] sm:$0xff]  }
0x2324   :  { %3605 = vrot.lane.b32.xlu0 %v3604_v12, %s16364_s22 }
0x2328   :  { %5961 = vrot.lane.b32.xlu0 %v5960_v53, %s16364_s22  ;;  %v12351_v53 = vld [vmem:[%s16240_s5 + $0x140] ss:$8 sps:$4 sm:$0xff]  }
0x232c   :  { %8317 = vrot.lane.b32.xlu0 %v8316_v27, %s16364_s22  ;;  %v12356_v27 = vld [vmem:[%s16240_s5 + $0x154] ss:$8 sps:$4 sm:$0xff]  }
0x2361   :  { %v8898_v36 = vpop.permute.xlu1 %8897 }
0x2362   :  { %8903 = vst.msk [vmem:[#allocation4 + $0x20] sm:$0x3] %vm16524_vm15, %v8898_v36  ;;  %v8896_v44 = vpop.permute.xlu0 %8895  ;;  %vm1238_vm15 = vcmp.ge.s32.totalorder %v208_v11, 64 }
0x2363   :  { %8904 = vst.msk [vmem:[#allocation4 + $0x28] sm:$0x3] %vm16525_vm1, %v8898_v36  ;;  %vm1239_vm1 = vcmp.lt.s32.totalorder %v208_v11, 224 }
0x2364   :  { %8901 = vst.msk [vmem:[#allocation4] sm:$0xff] %vm16526_vm14, %v8896_v44  ;;  %vm1235_vm14 = vcmask 523264  }
0x2365   :  { %8902 = vst.msk [vmem:[#allocation4 + $0x8] sm:$0xff] %vm560_vm13, %v8896_v44  ;;  %v8911_v54 = vpop.permute.xlu1 %8910  ;;  %vm16530_vm13 = vcmask 287744  }
0x2366   :  { %8915 = vst.msk [vmem:[#allocation4 + $0x28] sm:$0x3] %vm16527_vm2, %v8911_v54  ;;  %v8909_v55 = vpop.permute.xlu0 %8908  ;;  %vm15865_vm2 = vmand %vm1238_vm15, %vm1239_vm1  ;;  %vm12641_vm15 = vmmov 0  }
0x2367   :  { %8914 = vst.msk [vmem:[#allocation4 + $0x8] sm:$0xff] %vm641_vm10, %v8909_v55  ;;  %vm1225_vm10 = vcmp.ge.s32.totalorder %v208_v11, 32  ;;  %v12354_v55 = vld [vmem:[%s16240_s5 + $0x150] ss:$8 sps:$4 sm:$0xff]  }
0x2369   :  { %v8922_v57 = vpop.permute.xlu1 %8921  ;;  %v8946_v3 = vld [vmem:[#allocation4 + $0x20] sm:$0x3] }
0x236a   :  { %8927 = vst.msk [vmem:[#allocation4 + $0x28] sm:$0x3] %vm659_vm9, %v8922_v57  ;;  %v8920_v58 = vpop.permute.xlu0 %8919  ;;  %vm1226_vm9 = vcmp.lt.s32.totalorder %v208_v11, 192 }
0x236b   :  { %8928 = vst.msk [vmem:[#allocation4 + $0x30] sm:$0x3] %vm661_vm8, %v8922_v57  ;;  %v8942_v0 = vld [vmem:[#allocation4] sm:$0xff]  ;;  %vm16535_vm8 = vmmov %vm16532_vm12 }
0x236c   :  { %8925 = vst.msk [vmem:[#allocation4 + $0x8] sm:$0xff] %vm655_vm7, %v8920_v58  ;;  %vm15813_vm7 = vmand %vm1225_vm10, %vm1226_vm9  ;;  %v8950_v19 = vpack.c.bf16 %v8946_v3, %v8942_v0  ;;  %v12359_v57 = vld [vmem:[%s16240_s5 + $0x164] ss:$8 sps:$4 sm:$0xff]   ;;  %vm16542_vm9 = vcmask 1044480  }
0x236d   :  { %8926 = vst.msk [vmem:[#allocation4 + $0x10] sm:$0xff] %vm16528_vm4, %v8920_v58  ;;  %v8935_v59 = vpop.permute.xlu1 %8934  ;;  %vm1251_vm4 = vcmp.ge.s32.totalorder %v208_v11, 96 }
0x236e   :  { %8940 = vst.msk [vmem:[#allocation4 + $0x30] sm:$0x3] %vm16529_vm5, %v8935_v59  ;;  %v8933_v60 = vpop.permute.xlu0 %8932  ;;  %vm1252_vm5 = vcmp.lt.s32.totalorder %v208_v11, 256  ;;  %v12363_v11 = vld [vmem:[%s16240_s5 + $0x180] ss:$8 sps:$4 sm:$0xff]  }
0x236f   :  { %8941 = vst.msk [vmem:[#allocation4 + $0x38] sm:$0x3] %vm16530_vm13, %v8935_v59  ;;  %vm1248_vm13 = vcmask 785408  }
0x2370   :  { %8938 = vst.msk [vmem:[#allocation4 + $0x10] sm:$0xff] %vm16531_vm6, %v8933_v60  ;;  %vm15907_vm6 = vmand %vm1251_vm4, %vm1252_vm5 }
0x2371   :  { %8939 = vst.msk [vmem:[#allocation4 + $0x18] sm:$0xff] %vm16532_vm12, %v8933_v60  ;;  %v2410_v61 = vpop.permute.xlu1 %2409  ;;  %v8947_v62 = vld [vmem:[#allocation4 + $0x28] sm:$0x3]  ;;  %vm16540_vm12 = vcmask 1041408  }
0x2372   :  { %v2411_v6 = vrot.slane %v2410_v61, 7  ;;  %v1221_v8 = vpop.permute.xlu0 %1220  ;;  %vm16541_vm10 = vmmov %vm16540_vm12 }
0x2373   :  { %v8943_v9 = vld [vmem:[#allocation4 + $0x8] sm:$0xff]  ;;  %v1222_v14 = vrot.slane %v1221_v8, 7 }
0x2374   :  { %v8951_v17 = vpack.c.bf16 %v8947_v62, %v8943_v9  ;;  %v2412_v18 = vsel %vm48_vm0, %v2411_v6, %v2410_v61  ;;  %v12357_v61 = vld [vmem:[%s16240_s5 + $0x160] ss:$8 sps:$4 sm:$0xff]   ;;  %v12362_v62 = vld [vmem:[%s16240_s5 + $0x174] ss:$8 sps:$4 sm:$0xff]   ;;  %v12365_v9 = vld [vmem:[%s16240_s5 + $0x184] ss:$8 sps:$4 sm:$0xff]  }
0x2375   :  { %2415 = vst.msk [vmem:[#allocation5 + $0x9] ss:$8 sm:$0x3] %vm15813_vm7, %v2412_v18  ;;  %v1223_v21 = vsel %vm48_vm0, %v1222_v14, %v1221_v8  ;;  %v4766_v22 = vpop.permute.xlu1 %4765  ;;  %v12360_v8 = vld [vmem:[%s16240_s5 + $0x170] ss:$8 sps:$4 sm:$0xff]  }
0x2376   :  { %9325 = vmatprep.mubr.bf16.mxu0 %v8951_v17  ;;  %v8949_v23 = vld [vmem:[#allocation4 + $0x38] sm:$0x3]  ;;  %1229 = vst.msk [vmem:[#allocation5 + $0x8] ss:$8 sm:$0x3] %vm15813_vm7, %v1223_v21  ;;  %v4767_v24 = vrot.slane %v4766_v22, 7  ;;  %v3588_v26 = vpop.permute.xlu0 %3587 }
0x2377   :  { %9326 = vmatmul.mubr.bf16.vlgmr.msra.gmra.mrb[36].mxu0 %v8950_v19  ;;  %v3589_v29 = vrot.slane %v3588_v26, 7  ;;  %v12368_v19 = vld [vmem:[%s16240_s5 + $0x194] ss:$8 sps:$4 sm:$0xff]   ;;  %v9006_v21 = vld [vmem:[%s16240_s5 + $0x1a0] sm:$0x33] }
0x2378   :  { %v8945_v28 = vld [vmem:[#allocation4 + $0x18] sm:$0xff]  ;;  %9337 = vmatpush1.bf16.msra.mxu0 %v12339_v16  ;;  %v4768_v35 = vsel %vm48_vm0, %v4767_v24, %v4766_v22  ;;  %v12404_v17 = vld [vmem:[%s16243_s8 + $0x140] sm:$0xff]  }
0x2379   :  { %v8953_v33 = vpack.c.bf16 %v8949_v23, %v8945_v28  ;;  %9338 = vmatprep.subr.bf16.mxu0 %v12344_v20  ;;  %4771 = vst.msk [vmem:[#allocation5 + $0xb] ss:$8 sm:$0x3] %vm15813_vm7, %v4768_v35  ;;  %v3590_v37 = vsel %vm48_vm0, %v3589_v29, %v3588_v26  ;;  %v7122_v38 = vpop.permute.xlu1 %7121  ;;  %v12366_v24 = vld [vmem:[%s16240_s5 + $0x190] ss:$8 sps:$4 sm:$0xff]   ;;  %v11115_v26 = vcombine.high %v9006_v21, %v9006_v21 }
0x237a   :  { %3593 = vst.msk [vmem:[#allocation5 + $0xa] ss:$8 sm:$0x3] %vm15813_vm7, %v3590_v37  ;;  %v7123_v39 = vrot.slane %v7122_v38, 7  ;;  %v5944_v41 = vpop.permute.xlu0 %5943  ;;  %v11114_v28 = vcombine.low %v9006_v21, %v9006_v21  ;;  %v8944_v37 = vld [vmem:[#allocation4 + $0x10] sm:$0xff]  ;;  %v12374_v21 = vld [vmem:[%s16243_s8 + $0x48] sm:$0xff]  }
0x237b   :  { %11117 = vmatprep.mubr.msk.bf16.mxu0 %vm16535_vm8, %v8953_v33  ;;  %v5945_v43 = vrot.slane %v5944_v41, 7  ;;  %vm16543_vm8 = vmmov %vm16542_vm9 }
0x237c   :  { %9339 = vmatpush1.bf16.msra.mxu0 %v12342_v31  ;;  %v7124_v50 = vsel %vm48_vm0, %v7123_v39, %v7122_v38  ;;  %v9288_v35 = vsel %vm16541_vm10, %v11114_v28, 0  ;;  %v8948_v38 = vld [vmem:[#allocation4 + $0x30] sm:$0x3]  ;;  %v12379_v28 = vld [vmem:[%s16243_s8 + $0x18] sm:$0xff]  }
0x237d   :  { %9340 = vmatprep.subr.bf16.mxu0 %v12347_v10  ;;  %7127 = vst.msk [vmem:[#allocation5 + $0xd] ss:$8 sm:$0x3] %vm15813_vm7, %v7124_v50  ;;  %v5946_v46 = vsel %vm48_vm0, %v5945_v43, %v5944_v41  ;;  %v8952_v43 = vpack.c.bf16 %v8948_v38, %v8944_v37  ;;  %v9007_v50 = vld [vmem:[%s16241_s6] sm:$0x3]  ;;  %v12384_v37 = vld [vmem:[%s16243_s8 + $0x70] sm:$0xff]  }
0x237e   :  { %5949 = vst.msk [vmem:[#allocation5 + $0xc] ss:$8 sm:$0x3] %vm15813_vm7, %v5946_v46  ;;  %v8300_v30 = vpop.permute.xlu0 %8299  ;;  %v9016_v46 = vrot.slane %v9007_v50, %v12850_v15 }
0x237f   :  { %v8301_v34 = vrot.slane %v8300_v30, 7 }
0x2380   :  { %9341 = vmatpush1.bf16.msra.mxu0 %v12345_v63 }
0x2381   :  { %9342 = vmatprep.subr.bf16.mxu0 %v12350_v45  ;;  %v8302_v42 = vsel %vm48_vm0, %v8301_v34, %v8300_v30  ;;  %v9012_v45 = vrot.slane %v9007_v50, %v12844_v13 }
0x2382   :  { %8305 = vst.msk [vmem:[#allocation5 + $0xe] ss:$8 sm:$0x3] %vm15813_vm7, %v8302_v42  ;;  %v1233_v49 = vpop.permute.xlu0 %1232 }
0x2383   :  { %v1234_v12 = vrot.slane %v1233_v49, 7 }
0x2384   :  { %9343 = vmatpush1.bf16.msra.mxu0 %v12348_v47 }
0x2385   :  { %9344 = vmatprep.subr.bf16.mxu0 %v12353_v48  ;;  %v1236_v36 = vsel %vm1235_vm14, %v1234_v12, %v1233_v49 }
0x2386   :  { %1242 = vst.msk [vmem:[#allocation5 + $0x10] ss:$8 sm:$0x3] %vm15865_vm2, %v1236_v36  ;;  %v3597_v44 = vpop.permute.xlu0 %3596 }
0x2387   :  { %v3598_v54 = vrot.slane %v3597_v44, 7 }
0x2388   :  { %9345 = vmatpush1.bf16.msra.mxu0 %v12351_v53 }
0x2389   :  { %9346 = vmatprep.subr.bf16.mxu0 %v12356_v27  ;;  %v3599_v58 = vsel %vm1235_vm14, %v3598_v54, %v3597_v44 }
0x238a   :  { %3602 = vst.msk [vmem:[#allocation5 + $0x12] ss:$8 sm:$0x3] %vm15865_vm2, %v3599_v58  ;;  %v5953_v59 = vpop.permute.xlu0 %5952 }
0x238b   :  { %v5954_v60 = vrot.slane %v5953_v59, 7 }
0x238c   :  { %9347 = vmatpush1.bf16.msra.mxu0 %v12354_v55 }
0x238d   :  { %9348 = vmatprep.subr.bf16.mxu0 %v12359_v57  ;;  %v5955_v0 = vsel %vm1235_vm14, %v5954_v60, %v5953_v59 }
0x238e   :  { %5958 = vst.msk [vmem:[#allocation5 + $0x14] ss:$8 sm:$0x3] %vm15865_vm2, %v5955_v0  ;;  %v8309_v3 = vpop.permute.xlu0 %8308 }
0x238f   :  { %v8310_v6 = vrot.slane %v8309_v3, 7 }
0x2390   :  { %9349 = vmatpush1.bf16.msra.mxu0 %v12357_v61 }
0x2391   :  { %9350 = vmatprep.subr.bf16.mxu0 %v12362_v62  ;;  %v8311_v14 = vsel %vm1235_vm14, %v8310_v6, %v8309_v3 }
0x2392   :  { %8314 = vst.msk [vmem:[#allocation5 + $0x16] ss:$8 sm:$0x3] %vm15865_vm2, %v8311_v14  ;;  %v1246_v16 = vpop.permute.xlu0 %1245 }
0x2393   :  { %v1247_v18 = vrot.slane %v1246_v16, 7 }
0x2394   :  { %9351 = vmatpush1.bf16.msra.mxu0 %v12360_v8 }
0x2395   :  { %9352 = vmatprep.subr.bf16.mxu0 %v12365_v9  ;;  %v1249_v20 = vsel %vm1248_vm13, %v1247_v18, %v1246_v16  ;;  %v9395_v16 = vld [vmem:[%s16242_s7] sm:$0x7]  ;;  %s16548_s7 = sld [smem:[#allocation7_spill]] }
0x2396   :  { %1255 = vst.msk [vmem:[#allocation5 + $0x18] ss:$8 sm:$0x3] %vm15907_vm6, %v1249_v20  ;;  %v3606_v22 = vpop.permute.xlu0 %3605  ;;  %v12370_v18 = vld [vmem:[%s16243_s8 + $0x180] sm:$0xff]  }
0x2397   :  { %v3607_v23 = vrot.slane %v3606_v22, 7  ;;  %v12373_v20 = vld [vmem:[%s16243_s8] sm:$0xff]  }
0x2398   :  { %9353 = vmatpush1.bf16.msra.mxu0 %v12363_v11  ;;  %v12371_v11 = vld [vmem:[%s16243_s8 + $0x188] sm:$0xff]  }
0x2399   :  { %9354 = vmatprep.subr.bf16.mxu0 %v12368_v19  ;;  %v3608_v29 = vsel %vm1248_vm13, %v3607_v23, %v3606_v22  ;;  %v12372_v19 = vld [vmem:[%s16243_s8 + $0x40] sm:$0xff]   ;;  %v12375_v22 = vld [vmem:[%s16243_s8 + $0x8] sm:$0xff]   ;;  %v12376_v23 = vld [vmem:[%s16243_s8 + $0x50] sm:$0xff]  }
0x239a   :  { %3611 = vst.msk [vmem:[#allocation5 + $0x1a] ss:$8 sm:$0x3] %vm15907_vm6, %v3608_v29  ;;  %v5962_v31 = vpop.permute.xlu0 %5961  ;;  %v12380_v29 = vld [vmem:[%s16243_s8 + $0x60] sm:$0xff]  }
0x239b   :  { %v5963_v33 = vrot.slane %v5962_v31, 7 }
0x239c   :  { %9355 = vmatpush1.bf16.msra.mxu0 %v12366_v24  ;;  %v12377_v24 = vld [vmem:[%s16243_s8 + $0x10] sm:$0xff]  }
0x239d   :  { %11116 = vmatprep.subr.msk.bf16.mxu0 %vm16540_vm12, %v11115_v26  ;;  %v5964_v10 = vsel %vm1248_vm13, %v5963_v33, %v5962_v31  ;;  %v12378_v26 = vld [vmem:[%s16243_s8 + $0x58] sm:$0xff]   ;;  %v12381_v31 = vld [vmem:[%s16243_s8 + $0x20] sm:$0xff]   ;;  %v12382_v33 = vld [vmem:[%s16243_s8 + $0x68] sm:$0xff]  }
0x239e   :  { %5967 = vst.msk [vmem:[#allocation5 + $0x1c] ss:$8 sm:$0x3] %vm15907_vm6, %v5964_v10  ;;  %v8318_v39 = vpop.permute.xlu0 %8317 }
0x239f   :  { %v8319_v41 = vrot.slane %v8318_v39, 7 }
0x23a0   :  { %9357 = vmatpush1.bf16.msra.mxu0 %v9288_v35  ;;  %v12383_v35 = vld [vmem:[%s16243_s8 + $0x28] sm:$0xff]  }
0x23a1   :  { %11275 = vmatprep.subr.bf16.mxu0 %v12630_v2  ;;  %v8320_v63 = vsel %vm1248_vm13, %v8319_v41, %v8318_v39  ;;  %v12385_v39 = vld [vmem:[%s16243_s8 + $0x30] sm:$0xff]  }
0x23a2   :  { %8323 = vst.msk [vmem:[#allocation5 + $0x1e] ss:$8 sm:$0x3] %vm15907_vm6, %v8320_v63 }
0x23a3   :  { %9369 = vmatmul.mubr.bf16.vlgmr.msra.gmra.mrb[36].mxu0 %v8952_v43 }
0x23a4   :  { %11276 = vmatpush3.bf16.msra.mxu0 %v12370_v18  ;;  %11279 = vmatprep.mubr.msk.bf16.mxu0 %vm12641_vm15, %v12630_v2 }
0x23a5   :  { %11277 = vmatprep.subr.bf16.mxu0 %v12630_v2 }
0x23a8   :  { %11278 = vmatpush3.bf16.msra.mxu0 %v12371_v11  ;;  %v12392_v11 = vld [vmem:[%s16243_s8 + $0xd0] sm:$0xff]  }
0x23a9   :  { %11283 = vmatprep.subr.bf16.mxu0 %v12630_v2 }
0x2476   :  { %v9370_v30 = vpop.f32.mrb[36].mxu0 }
0x2477   :  { %v11347_v34 = vadd.f32 %v9370_v30, %v9012_v45  ;;  %v9372_v47 = vpop.f32.mrb[37].mxu0  ;;  %v12386_v30 = vld [vmem:[%s16243_s8 + $0x78] sm:$0xff]  }
0x2478   :  { %v11348_v48 = vadd.f32 %v9372_v47, %v9016_v46  ;;  %v9374_v42 = vpop.f32.mrb[38].mxu0 }
0x2479   :  { %v9379_v49 = vmul.f32 0.5, %v11347_v34  ;;  %v11349_v12 = vadd.f32 %v9374_v42, %v9012_v45  ;;  %v9376_v53 = vpop.f32.mrb[39].mxu0  ;;  %v12387_v34 = vld [vmem:[%s16243_s8 + $0x38] sm:$0xff]  }
0x247a   :  { %v9380_v27 = vmul.f32 0.5, %v11348_v48  ;;  %v11350_v36 = vadd.f32 %v9376_v53, %v9016_v46  ;;  %v2417_v53 = vcombine.high %v13625_v7, %v13625_v7  ;;  %v2426_v7 = vcombine.high %v15751_v40, %v15751_v40 }
0x247b   :  { %12618 = vtanh.f32 %v9379_v49  ;;  %v9381_v44 = vmul.f32 0.5, %v11349_v12  ;;  %v12388_v12 = vld [vmem:[%s16243_s8 + $0xc0] sm:$0xff]  }
0x247c   :  { %12620 = vtanh.f32 %v9380_v27  ;;  %v9382_v54 = vmul.f32 0.5, %v11350_v36 }
0x247d   :  { %12622 = vtanh.f32 %v9381_v44  ;;  %v7138_v44 = vcombine.high %v15771_v25, %v15771_v25 }
0x247e   :  { %12624 = vtanh.f32 %v9382_v54 }
0x2485   :  { %v12619_v55 = vpop.eup %12618 }
0x2486   :  { %v12621_v13 = vpop.eup %12620  ;;  %v9387_v57 = vmul.f32 0.5, %v12619_v55 }
0x2487   :  { %v12623_v15 = vpop.eup %12622  ;;  %v9388_v58 = vmul.f32 0.5, %v12621_v13 }
0x2488   :  { %v12625_v59 = vpop.eup %12624  ;;  %v9389_v60 = vmul.f32 0.5, %v12623_v15  ;;  %v9391_v62 = vadd.f32 0.5, %v9387_v57 }
0x2489   :  { %v9390_v61 = vmul.f32 0.5, %v12625_v59  ;;  %v9392_v3 = vadd.f32 0.5, %v9388_v58 }
0x248a   :  { %v9393_v0 = vadd.f32 0.5, %v9389_v60 }
0x248b   :  { %v9394_v6 = vadd.f32 0.5, %v9390_v61 }
0x248c   :  { %v9396_v8 = vpack.c.bf16 %v9393_v0, %v9391_v62 }
0x248d   :  { %v9397_v9 = vpack.c.bf16 %v9394_v6, %v9392_v3 }
0x248e   :  { %v9402_v14 = vsel %vm16542_vm9, %v9396_v8, 0  ;;  %v12390_v8 = vld [vmem:[%s16243_s8 + $0xc8] sm:$0xff]  }
0x248f   :  { %11118 = vmatprep.subr.msk.bf16.mxu1 %vm16543_vm8, %v9397_v9 }
0x2490   :  { %9408 = vmatpush1.bf16.msra.mxu1 %v9402_v14 }
0x2491   :  { %11190 = vmatprep.subr.bf16.mxu1 %v12372_v19 }
0x2493   :  { %11119 = vmatmul.mubr.msk.bf16.vlgmr.msra.gmra.mrb[148].mxu1 %vm1137_vm3, %v9395_v16  ;;  %v12391_v16 = vld [vmem:[%s16243_s8 + $0x88] sm:$0xff]   ;;  %vm10178_vm3 = vcmask 982016  }
0x2494   :  { %11191 = vmatpush3.bf16.msra.mxu1 %v12373_v20 }
0x2495   :  { %11192 = vmatprep.subr.bf16.mxu1 %v12374_v21  ;;  %v12393_v21 = vld [vmem:[%s16243_s8 + $0x90] sm:$0xff]  }
0x2498   :  { %11193 = vmatpush3.bf16.msra.mxu1 %v12375_v22 }
0x2499   :  { %11194 = vmatprep.subr.bf16.mxu1 %v12376_v23  ;;  %v12394_v23 = vld [vmem:[%s16243_s8 + $0xd8] sm:$0xff]  }
0x249c   :  { %11195 = vmatpush3.bf16.msra.mxu1 %v12377_v24 }
0x249d   :  { %11196 = vmatprep.subr.bf16.mxu1 %v12378_v26 }
0x24a0   :  { %11197 = vmatpush3.bf16.msra.mxu1 %v12379_v28  ;;  %v12395_v28 = vld [vmem:[%s16243_s8 + $0x98] sm:$0xff]  }
0x24a1   :  { %11198 = vmatprep.subr.bf16.mxu1 %v12380_v29 }
0x24a4   :  { %11199 = vmatpush3.bf16.msra.mxu1 %v12381_v31  ;;  %v12396_v31 = vld [vmem:[%s16243_s8 + $0xe0] sm:$0xff]  }
0x24a5   :  { %11200 = vmatprep.subr.bf16.mxu1 %v12382_v33 }
0x24a8   :  { %11201 = vmatpush3.bf16.msra.mxu1 %v12383_v35 }
0x24a9   :  { %11202 = vmatprep.subr.bf16.mxu1 %v12384_v37 }
0x24ac   :  { %11203 = vmatpush3.bf16.msra.mxu1 %v12385_v39 }
0x24ad   :  { %11204 = vmatprep.subr.bf16.mxu1 %v12386_v30  ;;  %v12403_v30 = vld [vmem:[%s16243_s8 + $0xb8] sm:$0xff]  }
0x24b0   :  { %11205 = vmatpush3.bf16.msra.mxu1 %v12387_v34 }
0x24b1   :  { %11212 = vmatprep.subr.bf16.mxu1 %v12388_v12 }
0x2566   :  { %v9441_v10 = vpop.f32.mrb[148].mxu1 }
0x2567   :  { %v9443_v38 = vpop.f32.mrb[149].mxu1 }
0x2568   :  { %v9450_v41 = vcombine.low %v9441_v10, %v9443_v38  ;;  %v9503_v43 = vcombine.high %v9441_v10, %v9443_v38  ;;  %v9445_v63 = vpop.f32.mrb[150].mxu1  ;;  %v12397_v10 = vld [vmem:[%s16243_s8 + $0xa0] sm:$0xff]   ;;  %v12398_v38 = vld [vmem:[%s16243_s8 + $0xe8] sm:$0xff]  }
0x2569   :  { %v9446_v50 = vpop.f32.mrb[151].mxu1 }
0x256a   :  { %v9457_v45 = vrot.slane %v9450_v41, %v13224_v56  ;;  %v9510_v46 = vrot.slane %v9503_v43, %v13224_v56  ;;  %v12399_v43 = vld [vmem:[%s16243_s8 + $0xa8] sm:$0xff]   ;;  %v12400_v50 = vld [vmem:[%s16243_s8 + $0xf0] sm:$0xff]  }
0x256c   :  { %v9464_v47 = vrot.slane %v9457_v45, %v13224_v56  ;;  %v9469_v48 = vcombine.high %v9457_v45, %v9457_v45  ;;  %v9517_v42 = vrot.slane %v9510_v46, %v13224_v56  ;;  %v12402_v46 = vld [vmem:[%s16243_s8 + $0xf8] sm:$0xff]  }
0x256e   :  { %9520 = vst.msk [vmem:[#allocation5 + $0x2f] ss:$8 sm:$0x3] %vm13231_vm11, %v9517_v42  ;;  %9467 = vst.msk [vmem:[#allocation5 + $0x7] ss:$8 sm:$0x3] %vm13231_vm11, %v9464_v47  ;;  %v9476_v49 = vrot.slane %v9469_v48, %v13224_v56  ;;  %v7129_v56 = vcombine.high %v15177_v32, %v15177_v32  ;;  %v9485_v54 = vcombine.high %v9464_v47, %v9464_v47 }
0x256f   :  { %vm16545_vm11 = vmmov %vm16541_vm10 }
0x2570   :  { %9477 = vrot.lane.b32.xlu1 %v9476_v49, %s16400_s21  ;;  %v9494_v32 = vcombine.high %v9476_v49, %v9476_v49  ;;  %v12405_v49 = vld [vmem:[%s16243_s8 + $0x100] sm:$0xff]  }
0x2574   :  { %2418 = vrot.lane.b32.xlu1 %v2417_v53, %s16401_s29  ;;  %v12406_v53 = vld [vmem:[%s16243_s8 + $0x148] sm:$0xff]  }
0x2575   :  { %v9528_v27 = vld [vmem:[#allocation5 + $0x30] sm:$0xff]  ;;  %v9522_v59 = vld [vmem:[#allocation5] sm:$0xff]  ;;  %v9527_v48 = vld [vmem:[#allocation5 + $0x28] sm:$0xff] }
0x2576   :  { %v9535_v36 = vpack.c.bf16 %v9528_v27, %v9528_v27  ;;  %v9529_v6 = vpack.c.bf16 %v9522_v59, %v9522_v59  ;;  %v9534_v27 = vpack.c.bf16 %v9527_v48, %v9527_v48  ;;  %v12432_v48 = vld [vmem:[%s16245_s12 + $0x20] sm:$0xff]  }
0x2578   :  { %11280 = vmatmul.mubr.msk.bf16.vlgmr.msra.gmra.mrb[40].mxu0 %vm48_vm0, %v9535_v36  ;;  %4774 = vrot.lane.b32.xlu1 %v4773_v1, %s16401_s29  ;;  %v12407_v36 = vld [vmem:[%s16243_s8 + $0x108] sm:$0xff]   ;;  %v12408_v1 = vld [vmem:[%s16243_s8 + $0x150] sm:$0xff]  }
0x2579   :  { %11299 = vmatprep.mubr.msk.bf16.mxu0 %vm12641_vm15, %v12630_v2 }
0x257c   :  { %7130 = vrot.lane.b32.xlu1 %v7129_v56, %s16401_s29  ;;  %v12409_v56 = vld [vmem:[%s16243_s8 + $0x110] sm:$0xff]  }
0x2580   :  { %2427 = vrot.lane.b32.xlu1 %v2426_v7, %s16364_s22  ;;  %v12410_v7 = vld [vmem:[%s16243_s8 + $0x158] sm:$0xff]  }
0x2584   :  { %4783 = vrot.lane.b32.xlu1 %v4782_v52, %s16364_s22  ;;  %v12411_v52 = vld [vmem:[%s16243_s8 + $0x118] sm:$0xff]  }
0x2588   :  { %7139 = vrot.lane.b32.xlu1 %v7138_v44, %s16364_s22  ;;  %v12412_v44 = vld [vmem:[%s16243_s8 + $0x160] sm:$0xff]  }
0x258c   :  { %9486 = vrot.lane.b32.xlu1 %v9485_v54, %s16401_s29  ;;  %v12413_v54 = vld [vmem:[%s16243_s8 + $0x120] sm:$0xff]  }
0x2590   :  { %9495 = vrot.lane.b32.xlu1 %v9494_v32, %s16364_s22  ;;  %v12414_v32 = vld [vmem:[%s16243_s8 + $0x168] sm:$0xff]  }
0x25e2   :  { %v9478_v55 = vpop.permute.xlu1 %9477 }
0x25e3   :  { %v9479_v40 = vrot.slane %v9478_v55, 7 }
0x25e5   :  { %v9480_v13 = vsel %vm48_vm0, %v9479_v40, %v9478_v55  ;;  %v12415_v55 = vld [vmem:[%s16243_s8 + $0x128] sm:$0xff]   ;;  %v12416_v40 = vld [vmem:[%s16243_s8 + $0x170] sm:$0xff]   ;;  %vm16544_vm0 = vcmask 1043456  }
0x25e6   :  { %9483 = vst.msk [vmem:[#allocation5 + $0xf] ss:$8 sm:$0x3] %vm15813_vm7, %v9480_v13  ;;  %v2419_v5 = vpop.permute.xlu1 %2418  ;;  %v12417_v13 = vld [vmem:[%s16243_s8 + $0x130] sm:$0xff]   ;;  %vm16546_vm7 = vcmask 687104  }
0x25e7   :  { %v2420_v57 = vrot.slane %v2419_v5, 7 }
0x25e9   :  { %v2421_v15 = vsel %vm1235_vm14, %v2420_v57, %v2419_v5  ;;  %v12418_v5 = vld [vmem:[%s16243_s8 + $0x178] sm:$0xff]  }
0x25ea   :  { %2424 = vst.msk [vmem:[#allocation5 + $0x11] ss:$8 sm:$0x3] %vm15865_vm2, %v2421_v15  ;;  %v4775_v25 = vpop.permute.xlu1 %4774  ;;  %v12419_v57 = vld [vmem:[%s16243_s8 + $0x138] sm:$0xff]  }
0x25eb   :  { %v4776_v58 = vrot.slane %v4775_v25, 7 }
0x25ed   :  { %v4777_v60 = vsel %vm1235_vm14, %v4776_v58, %v4775_v25  ;;  %v9523_v61 = vld [vmem:[#allocation5 + $0x8] sm:$0xff] }
0x25ee   :  { %4780 = vst.msk [vmem:[#allocation5 + $0x13] ss:$8 sm:$0x3] %vm15865_vm2, %v4777_v60  ;;  %v7131_v62 = vpop.permute.xlu1 %7130  ;;  %v9530_v0 = vpack.c.bf16 %v9523_v61, %v9523_v61 }
0x25ef   :  { %v7132_v3 = vrot.slane %v7131_v62, 7 }
0x25f0   :  { %9978 = vmatprep.mubr.bf16.mxu1 %v9530_v0  ;;  %v12421_v0 = vld [vmem:[%s16244_s10 + $0x8] sm:$0xff]  }
0x25f1   :  { %v7133_v9 = vsel %vm1235_vm14, %v7132_v3, %v7131_v62  ;;  %9979 = vmatmul.mubr.bf16.vlgmr.msra.gmra.mrb[152].mxu1 %v9529_v6  ;;  %v12420_v62 = vld [vmem:[%s16244_s10] sm:$0xff]   ;;  %v12423_v3 = vld [vmem:[%s16244_s10 + $0x18] sm:$0xff]  }
0x25f2   :  { %7136 = vst.msk [vmem:[#allocation5 + $0x15] ss:$8 sm:$0x3] %vm15865_vm2, %v7133_v9  ;;  %11213 = vmatpush3.bf16.msra.mxu1 %v12389_v4  ;;  %v2428_v14 = vpop.permute.xlu1 %2427  ;;  %11284 = vmatpush3.bf16.msra.mxu0 %v12420_v62  ;;  %v12422_v4 = vld [vmem:[%s16244_s10 + $0x10] sm:$0xff]   ;;  %v12424_v6 = vld [vmem:[%s16244_s10 + $0x20] sm:$0xff]  }
0x25f3   :  { %v2429_v18 = vrot.slane %v2428_v14, 7  ;;  %11214 = vmatprep.subr.bf16.mxu1 %v12390_v8  ;;  %11285 = vmatprep.subr.bf16.mxu0 %v12630_v2  ;;  %v12425_v8 = vld [vmem:[%s16244_s10 + $0x28] sm:$0xff]   ;;  %v12426_v9 = vld [vmem:[%s16244_s10 + $0x30] sm:$0xff]  }
0x25f5   :  { %v2430_v19 = vsel %vm1248_vm13, %v2429_v18, %v2428_v14  ;;  %v12427_v14 = vld [vmem:[%s16244_s10 + $0x38] ss:$0 sps:$4 sm:$0xff]   ;;  %v12428_v18 = vld [vmem:[%s16245_s12] sm:$0xff]  }
0x25f6   :  { %2433 = vst.msk [vmem:[#allocation5 + $0x19] ss:$8 sm:$0x3] %vm15907_vm6, %v2430_v19  ;;  %11215 = vmatpush3.bf16.msra.mxu1 %v12391_v16  ;;  %v4784_v20 = vpop.permute.xlu1 %4783  ;;  %11286 = vmatpush3.bf16.msra.mxu0 %v12421_v0  ;;  %v10183_v16 = vsel %vm16544_vm0, %v12427_v14, 0 }
0x25f7   :  { %v4785_v22 = vrot.slane %v4784_v20, 7  ;;  %11216 = vmatprep.subr.bf16.mxu1 %v12392_v11  ;;  %11287 = vmatprep.subr.bf16.mxu0 %v12630_v2 }
0x25f9   :  { %v4786_v24 = vsel %vm1248_vm13, %v4785_v22, %v4784_v20 }
0x25fa   :  { %4789 = vst.msk [vmem:[#allocation5 + $0x1b] ss:$8 sm:$0x3] %vm15907_vm6, %v4786_v24  ;;  %11217 = vmatpush3.bf16.msra.mxu1 %v12393_v21  ;;  %v7140_v26 = vpop.permute.xlu1 %7139  ;;  %11288 = vmatpush3.bf16.msra.mxu0 %v12422_v4 }
0x25fb   :  { %v7141_v29 = vrot.slane %v7140_v26, 7  ;;  %11218 = vmatprep.subr.bf16.mxu1 %v12394_v23  ;;  %11289 = vmatprep.subr.bf16.mxu0 %v12630_v2  ;;  %v11120_v23 = vld [vmem:[%s16246_s9] ss:$0 sm:$0xff] }
0x25fd   :  { %v7142_v33 = vsel %vm1248_vm13, %v7141_v29, %v7140_v26 }
0x25fe   :  { %7145 = vst.msk [vmem:[#allocation5 + $0x1d] ss:$8 sm:$0x3] %vm15907_vm6, %v7142_v33  ;;  %11219 = vmatpush3.bf16.msra.mxu1 %v12395_v28  ;;  %v9487_v35 = vpop.permute.xlu1 %9486  ;;  %11290 = vmatpush3.bf16.msra.mxu0 %v12423_v3 }
0x25ff   :  { %v9488_v37 = vrot.slane %v9487_v35, 7  ;;  %11220 = vmatprep.subr.bf16.mxu1 %v12396_v31  ;;  %11291 = vmatprep.subr.bf16.mxu0 %v12630_v2 }
0x2601   :  { %v9489_v39 = vsel %vm1235_vm14, %v9488_v37, %v9487_v35 }
0x2602   :  { %9492 = vst.msk [vmem:[#allocation5 + $0x17] ss:$8 sm:$0x3] %vm15865_vm2, %v9489_v39  ;;  %11221 = vmatpush3.bf16.msra.mxu1 %v12397_v10  ;;  %v9496_v41 = vpop.permute.xlu1 %9495  ;;  %11292 = vmatpush3.bf16.msra.mxu0 %v12424_v6 }
0x2603   :  { %v9497_v63 = vrot.slane %v9496_v41, 7  ;;  %11222 = vmatprep.subr.bf16.mxu1 %v12398_v38  ;;  %11293 = vmatprep.subr.bf16.mxu0 %v12630_v2 }
0x2605   :  { %v9498_v45 = vsel %vm1248_vm13, %v9497_v63, %v9496_v41 }
0x2606   :  { %9501 = vst.msk [vmem:[#allocation5 + $0x1f] ss:$8 sm:$0x3] %vm15907_vm6, %v9498_v45  ;;  %11223 = vmatpush3.bf16.msra.mxu1 %v12399_v43  ;;  %11294 = vmatpush3.bf16.msra.mxu0 %v12425_v8 }
0x2607   :  { %11224 = vmatprep.subr.bf16.mxu1 %v12400_v50  ;;  %11295 = vmatprep.subr.bf16.mxu0 %v12630_v2 }
0x2609   :  { %v9524_v34 = vld [vmem:[#allocation5 + $0x10] sm:$0xff] }
0x260a   :  { %11225 = vmatpush3.bf16.msra.mxu1 %v12401_v51  ;;  %v9531_v12 = vpack.c.bf16 %v9524_v34, %v9524_v34  ;;  %11296 = vmatpush3.bf16.msra.mxu0 %v12426_v9  ;;  %v12430_v34 = vld [vmem:[%s16245_s12 + $0x10] sm:$0xff]  }
0x260b   :  { %11226 = vmatprep.subr.bf16.mxu1 %v12402_v46  ;;  %11297 = vmatprep.subr.bf16.mxu0 %v12630_v2 }
0x260d   :  { %v9525_v47 = vld [vmem:[#allocation5 + $0x18] sm:$0xff]  ;;  %v9526_v15 = vld [vmem:[#allocation5 + $0x20] sm:$0xff] }
0x260e   :  { %11227 = vmatpush3.bf16.msra.mxu1 %v12403_v30  ;;  %v9532_v42 = vpack.c.bf16 %v9525_v47, %v9525_v47  ;;  %v9533_v25 = vpack.c.bf16 %v9526_v15, %v9526_v15  ;;  %11298 = vmatpush3.bf16.msra.mxu0 %v10183_v16  ;;  %v12431_v47 = vld [vmem:[%s16245_s12 + $0x18] sm:$0xff]  }
0x260f   :  { %11234 = vmatprep.subr.bf16.mxu1 %v12404_v17  ;;  %v12429_v17 = vld [vmem:[%s16245_s12 + $0x8] sm:$0xff]  }
0x2610   :  { %10018 = vmatprep.mubr.bf16.mxu1 %v9532_v42  ;;  %v12433_v42 = vld [vmem:[%s16245_s12 + $0x28] ss:$0 sps:$4 sm:$0x33]  }
0x2611   :  { %10019 = vmatmul.mubr.bf16.vlgmr.msra.gmra.mrb[156].mxu1 %v9531_v12  ;;  %v11172_v12 = vld [vmem:[%s16247_s11] ss:$0 sm:$0xff] }
0x2612   :  { %11235 = vmatpush3.bf16.msra.mxu1 %v12405_v49  ;;  %10058 = vmatprep.mubr.bf16.mxu1 %v9534_v27  ;;  %v10285_v49 = vsel %vm16545_vm11, %v12433_v42, 0 }
0x2613   :  { %11236 = vmatprep.subr.bf16.mxu1 %v12406_v53 }
0x2616   :  { %11237 = vmatpush3.bf16.msra.mxu1 %v12407_v36 }
0x2617   :  { %11238 = vmatprep.subr.bf16.mxu1 %v12408_v1 }
0x261a   :  { %11239 = vmatpush3.bf16.msra.mxu1 %v12409_v56 }
0x261b   :  { %11240 = vmatprep.subr.bf16.mxu1 %v12410_v7 }
0x261e   :  { %11241 = vmatpush3.bf16.msra.mxu1 %v12411_v52 }
0x261f   :  { %11242 = vmatprep.subr.bf16.mxu1 %v12412_v44 }
0x2622   :  { %11243 = vmatpush3.bf16.msra.mxu1 %v12413_v54 }
0x2623   :  { %11244 = vmatprep.subr.bf16.mxu1 %v12414_v32  ;;  %v11182_v32 = vld [vmem:[%s16547_s16] ss:$0 sm:$0xff] }
0x2626   :  { %11245 = vmatpush3.bf16.msra.mxu1 %v12415_v55 }
0x2627   :  { %11246 = vmatprep.subr.bf16.mxu1 %v12416_v40 }
0x262a   :  { %11247 = vmatpush3.bf16.msra.mxu1 %v12417_v13 }
0x262b   :  { %11248 = vmatprep.subr.bf16.mxu1 %v12418_v5 }
0x262e   :  { %11249 = vmatpush3.bf16.msra.mxu1 %v12419_v57 }
0x262f   :  { %11303 = vmatprep.subr.bf16.mxu1 %v12630_v2 }
0x2631   :  { %10059 = vmatmul.mubr.bf16.vlgmr.msra.gmra.mrb[160].mxu1 %v9533_v25 }
0x2632   :  { %11315 = vmatprep.mubr.msk.bf16.mxu1 %vm12641_vm15, %v12630_v2  ;;  %11304 = vmatpush3.bf16.msra.mxu1 %v12428_v18 }
0x2633   :  { %11305 = vmatprep.subr.bf16.mxu1 %v12630_v2 }
0x2636   :  { %11306 = vmatpush3.bf16.msra.mxu1 %v12429_v17 }
0x2637   :  { %11307 = vmatprep.subr.bf16.mxu1 %v12630_v2 }
0x263a   :  { %11308 = vmatpush3.bf16.msra.mxu1 %v12430_v34 }
0x263b   :  { %11309 = vmatprep.subr.bf16.mxu1 %v12630_v2 }
0x263e   :  { %11310 = vmatpush3.bf16.msra.mxu1 %v12431_v47 }
0x263f   :  { %11311 = vmatprep.subr.bf16.mxu1 %v12630_v2 }
0x2642   :  { %11312 = vmatpush3.bf16.msra.mxu1 %v12432_v48 }
0x2643   :  { %11313 = vmatprep.subr.bf16.mxu1 %v12630_v2 }
0x2646   :  { %11314 = vmatpush3.bf16.msra.mxu1 %v10285_v49 }
0x264b   :  { %v10100_v58 = vpop.f32.mrb[40].mxu0 }
0x264c   :  { %v11281_v59 = vpop.f32.mrb[41].mxu0 }
0x264d   :  { %v10103_v60 = vpop.f32.mrb[42].mxu0 }
0x264e   :  { %v11282_v61 = vpop.f32.mrb[43].mxu0 }
0x26c4   :  { %v11206_v11 = vpop.f32.mrb[152].mxu1 }
0x26c5   :  { %v11207_v19 = vpop.f32.mrb[153].mxu1 }
0x26c6   :  { %v11208_v20 = vadd.f32 %v11207_v19, %v11206_v11  ;;  %v11209_v21 = vpop.f32.mrb[154].mxu1 }
0x26c7   :  { %v11210_v22 = vpop.f32.mrb[155].mxu1 }
0x26c8   :  { %v9981_v28 = vadd.f32 %v11208_v20, %v11120_v23 }
0x26e4   :  { %v11228_v24 = vpop.f32.mrb[156].mxu1 }
0x26e5   :  { %v11229_v26 = vpop.f32.mrb[157].mxu1 }
0x26e6   :  { %v11230_v29 = vadd.f32 %v11229_v26, %v11228_v24  ;;  %v11231_v31 = vpop.f32.mrb[158].mxu1 }
0x26e7   :  { %v11232_v33 = vpop.f32.mrb[159].mxu1 }
0x26e8   :  { %v10021_v35 = vadd.f32 %v11230_v29, %v9981_v28 }
0x2704   :  { %v11250_v10 = vpop.f32.mrb[160].mxu1 }
0x2705   :  { %v11251_v37 = vpop.f32.mrb[161].mxu1 }
0x2706   :  { %v11252_v38 = vadd.f32 %v11251_v37, %v11250_v10  ;;  %v11253_v39 = vpop.f32.mrb[162].mxu1 }
0x2707   :  { %v11254_v41 = vpop.f32.mrb[163].mxu1 }
0x2708   :  { %v10061_v43 = vadd.f32 %v11252_v38, %v10021_v35 }
0x270a   :  { %v10101_v63 = vadd.f32 %v10100_v58, %v10061_v43 }
0x270c   :  { %v10106_v50 = vmul.f32 0.5, %v10101_v63 }
0x270e   :  { %12626 = vtanh.f32 %v10106_v50 }
0x2718   :  { %v12627_v45 = vpop.eup %12626 }
0x2719   :  { %v10108_v51 = vmul.f32 0.5, %v12627_v45 }
0x271b   :  { %v10109_v46 = vadd.f32 0.5, %v10108_v51 }
0x271d   :  { %v10110_v30 = vpack.c.bf16 %v10109_v46, %v10109_v46 }
0x271f   :  { %11300 = vmatmul.mubr.msk.bf16.vlgmr.msra.gmra.mrb[44].mxu0 %vm10178_vm3, %v10110_v30 }
0x27f2   :  { %v10219_v53 = vpop.f32.mrb[44].mxu0 }
0x27f3   :  { %v10220_v27 = vadd.f32 %v11172_v12, %v10219_v53  ;;  %v11301_v36 = vpop.f32.mrb[45].mxu0 }
0x27f4   :  { %v10222_v1 = vpop.f32.mrb[46].mxu0 }
0x27f5   :  { %v10225_v56 = vmul.f32 0.5, %v10220_v27  ;;  %v11302_v7 = vpop.f32.mrb[47].mxu0 }
0x27f7   :  { %12628 = vtanh.f32 %v10225_v56 }
0x2801   :  { %v12629_v52 = vpop.eup %12628 }
0x2802   :  { %v10227_v2 = vmul.f32 0.5, %v12629_v52 }
0x2804   :  { %v10228_v44 = vadd.f32 0.5, %v10227_v2 }
0x2806   :  { %v10229_v54 = vpack.c.bf16 %v10228_v44, %v10228_v44 }
0x2808   :  { %11316 = vmatmul.mubr.msk.bf16.vlgmr.msra.gmra.mrb[164].mxu1 %vm16546_vm7, %v10229_v54 }
0x28db   :  { %v10321_v55 = vpop.f32.mrb[164].mxu1 }
0x28dc   :  { %v10322_v40 = vadd.f32 %v11182_v32, %v10321_v55  ;;  %v11317_v13 = vpop.f32.mrb[165].mxu1 }
0x28dd   :  { %v10324_v5 = vpop.f32.mrb[166].mxu1 }
0x28de   :  { %10327 = vst [vmem:[%s16548_s7] sm:$0xff] %v10322_v40  ;;  %v11318_v57 = vpop.f32.mrb[167].mxu1 }

</bundles_post_ra>
